<compile_context>
chip_gen: v6e
topology: v6e:2x2x1
jax: 0.10.0
libtpu: 0.0.40
codegen_flags: <defaults>
</compile_context>

<pallas_src>
import math

import jax
import jax.numpy as jnp
from jax.experimental import pallas as pl
from jax.experimental.pallas import tpu as pltpu  # noqa: F401  (TPU backend; defaults place operands in VMEM)

# Use full-f32 matmul passes everywhere (kernel and pure-JAX reference) so the
# two paths are numerically comparable; v5e has no bf16 VPU path anyway.
jax.config.update("jax_default_matmul_precision", "highest")

# ----------------------------- model hyper-params ---------------------------
EMB = 32       # emb_size
QK = 16        # q_k_size
VS = 16        # v_size
FF = 64        # f_size
HEAD = 4       # head
B = 2          # batch
S_DEC = 8      # decoder (emb_result) sequence length
S_ENC = 8      # encoder sequence length
EPS = 1e-5     # nn.LayerNorm default eps
NEG_INF = -1e9
VEC_W = 64     # lane width of the packed bias/LN slab (= FF)

# rows inside the packed bias/LN slab -----------------------------------------
R_BQ1, R_BK1, R_BV1 = 0, 4, 8          # per-head rows (4 each)
R_BQ2, R_BK2, R_BV2 = 12, 16, 20       # per-head rows (4 each)
R_BZ1, R_BZ2, R_BF1, R_BF2 = 24, 25, 26, 27
R_G1, R_BE1, R_G2, R_BE2, R_G3, R_BE3 = 28, 29, 30, 31, 32, 33
N_VEC_ROWS = 34

# slabs inside the per-head projection-weight array (24, EMB, 16) -------------
W_ATTN1, W_ATTN2 = 0, 12               # base index; +0 q-heads, +4 k-heads, +8 v-heads


# ------------------------------- kernel helpers -----------------------------
def _layernorm(x, gamma, beta):
    mu = jnp.mean(x, axis=-1, keepdims=True)
    var = jnp.mean((x - mu) ** 2, axis=-1, keepdims=True)
    return (x - mu) * jax.lax.rsqrt(var + EPS) * gamma + beta


# ---------------------------------- kernel ----------------------------------
def decoder_block_kernel(acts_ref, mask_ref, w_heads_ref, w_out_ref, vec_ref, out_ref):
    ND = B * S_DEC
    NE = B * S_ENC

    acts = acts_ref[...]                       # (ND + NE, EMB)
    emb = acts[0:ND]                           # (16, 32)  decoder rows
    enc = acts[ND:ND + NE]                     # (16, 32)  encoder rows

    # additive attention bias for BOTH masks in one shot (1.0 == masked)
    bias_all = mask_ref[...] * NEG_INF         # (2*B*S_DEC, 8)

    V = vec_ref[...]                           # (34, 64) biases / LN params

    def vrow(r, w):
        return V[r:r + 1, :w]                  # (1, w) -> broadcasts over rows

    def attention(x_q, x_kv, bias, w_base, b_base, wz, sq, sk):
        """Multi-head attention + accumulated output projection.

        - per-head projection weights (lane offset 0 for every head, no lane
          rotates); 1/sqrt(QK) already folded into the q weights/biases.
        - q.k^T via dot_general contracting last dims (no transpose).
        - softmax batched over all (batch, head) blocks along sublanes.
        - wz output projection accumulated per head (sublane-aligned slices).
        """
        qh = [jnp.dot(x_q, w_heads_ref[w_base + h],
                      preferred_element_type=jnp.float32) + vrow(b_base + h, QK)
              for h in range(HEAD)]
        kh = [jnp.dot(x_kv, w_heads_ref[w_base + HEAD + h],
                      preferred_element_type=jnp.float32) + vrow(b_base + HEAD + h, QK)
              for h in range(HEAD)]
        vh = [jnp.dot(x_kv, w_heads_ref[w_base + 2 * HEAD + h],
                      preferred_element_type=jnp.float32) + vrow(b_base + 2 * HEAD + h, VS)
              for h in range(HEAD)]

        # ---- scores for every (batch, head), stacked along sublanes ----
        blocks = []
        for b in range(B):                               # static, B == 2
            bias_b = bias[b * sq:(b + 1) * sq, :sk]       # (sq, sk)
            for h in range(HEAD):                         # static, HEAD == 4
                s = jax.lax.dot_general(
                    qh[h][b * sq:(b + 1) * sq],
                    kh[h][b * sk:(b + 1) * sk],
                    (((1,), (1,)), ((), ())),             # q . k^T, no transpose
                    preferred_element_type=jnp.float32) + bias_b
                blocks.append(s)
        s_all = jnp.concatenate(blocks, axis=0)           # (B*HEAD*sq, sk)

        # ---- one batched softmax for all (batch, head) blocks ----
        s_all = s_all - jnp.max(s_all, axis=-1, keepdims=True)
        p_all = jnp.exp(s_all)
        p_all = p_all / jnp.sum(p_all, axis=-1, keepdims=True)   # exact normalization

        # ---- P@V and accumulated wz projection ----
        outs = []
        for b in range(B):
            acc = None
            for h in range(HEAD):
                idx = b * HEAD + h
                o = jnp.dot(p_all[idx * sq:(idx + 1) * sq],
                            vh[h][b * sk:(b + 1) * sk],
                            preferred_element_type=jnp.float32)          # (sq, VS)
                c = jnp.dot(o, wz[h * VS:(h + 1) * VS, :],               # sublane slice
                            preferred_element_type=jnp.float32)          # (sq, EMB)
                acc = c if acc is None else acc + c
            outs.append(acc)
        return jnp.concatenate(outs, axis=0)                             # (B*sq, EMB)

    # ---- masked self-attention -> z_linear1 -> addnorm1 ----
    z = attention(emb, emb, bias_all[0:ND], W_ATTN1, R_BQ1,
                  w_out_ref[0], S_DEC, S_DEC) + vrow(R_BZ1, EMB)
    z = _layernorm(emb + z, vrow(R_G1, EMB), vrow(R_BE1, EMB))

    # ---- cross-attention (query = emb_result, as in the torch forward) ----
    a = attention(emb, enc, bias_all[ND:2 * ND], W_ATTN2, R_BQ2,
                  w_out_ref[1], S_DEC, S_ENC) + vrow(R_BZ2, EMB)
    z = _layernorm(z + a, vrow(R_G2, EMB), vrow(R_BE2, EMB))

    # ---- feed-forward -> addnorm3 (wf1 stored transposed: last-dim contraction) ----
    h = jax.lax.dot_general(z, w_out_ref[3], (((1,), (1,)), ((), ())),
                            preferred_element_type=jnp.float32) + vrow(R_BF1, FF)
    h = jnp.maximum(h, 0.0)
    f = jnp.dot(h, w_out_ref[2], preferred_element_type=jnp.float32) + vrow(R_BF2, EMB)
    z = _layernorm(z + f, vrow(R_G3, EMB), vrow(R_BE3, EMB))

    out_ref[...] = z


# ------------------------- one-time parameter packing ------------------------
def pack_params(params):
    """Pack the 26 nn.Module parameters into 3 slabs (call ONCE, not per step)."""
    (wq1, bq1, wk1, bk1, wv1, bv1, wz1, bz1,
     wq2, bq2, wk2, bk2, wv2, bv2, wz2, bz2,
     wf1, bf1, wf2, bf2, g1, be1, g2, be2, g3, be3) = params
    scale = 1.0 / math.sqrt(QK)

    def split_heads(w, d):                    # (EMB, HEAD*d) -> (HEAD, EMB, d)
        return jnp.stack([w[:, h * d:(h + 1) * d] for h in range(HEAD)])

    # per-head q/k/v projection weights for both attentions: (24, EMB, 16)
    w_heads = jnp.concatenate([
        split_heads(wq1 * scale, QK), split_heads(wk1, QK), split_heads(wv1, VS),
        split_heads(wq2 * scale, QK), split_heads(wk2, QK), split_heads(wv2, VS),
    ], axis=0)

    # output-side weights: wz1, wz2, wf2, wf1^T — all (64, EMB): (4, 64, EMB)
    w_out = jnp.stack([wz1, wz2, wf2, wf1.T])

    def row(v):
        v = jnp.reshape(v, (-1,))
        return jnp.pad(v, (0, VEC_W - v.shape[0]))

    rows = []

    def head_bias_rows(bvec, d, s=1.0):
        for h in range(HEAD):
            rows.append(row(bvec[0, h * d:(h + 1) * d] * s))

    head_bias_rows(bq1, QK, scale)
    head_bias_rows(bk1, QK)
    head_bias_rows(bv1, VS)
    head_bias_rows(bq2, QK, scale)
    head_bias_rows(bk2, QK)
    head_bias_rows(bv2, VS)
    rows += [row(bz1), row(bz2), row(bf1), row(bf2),
             row(g1), row(be1), row(g2), row(be2), row(g3), row(be3)]
    vecs = jnp.stack(rows)                    # (34, 64)
    assert vecs.shape == (N_VEC_ROWS, VEC_W)
    return w_heads, w_out, vecs


# --------------------------------- wrapper ----------------------------------
@jax.jit
def decoder_block(encoder_result, emb_result, first_attn_mask, second_attn_mask, packed):
    w_heads, w_out, vecs = packed
    b, sd, e = emb_result.shape
    se = encoder_result.shape[1]
    # merge small inputs -> fewer un-pipelined DMAs in the grid=() kernel
    acts = jnp.concatenate([emb_result.reshape(b * sd, e),
                            encoder_result.reshape(b * se, e)], axis=0)
    masks = jnp.concatenate([first_attn_mask.reshape(b * sd, sd),
                             second_attn_mask.reshape(b * sd, se)], axis=0)
    out = pl.pallas_call(
        decoder_block_kernel,
        out_shape=jax.ShapeDtypeStruct((b * sd, e), jnp.float32),
    )(acts, masks, w_heads, w_out, vecs)
    return out.reshape(b, sd, e)


# ----------------------------- pure-JAX reference ---------------------------
def decoder_block_ref(enc, emb, m1, m2, params):
    (wq1, bq1, wk1, bk1, wv1, bv1, wz1, bz1,
     wq2, bq2, wk2, bk2, wv2, bv2, wz2, bz2,
     wf1, bf1, wf2, bf2, g1, be1, g2, be2, g3, be3) = params

    def mha(q_in, kv_in, mask, wq, bq, wk, bk, wv, bv):
        q = q_in @ wq + bq
        k = kv_in @ wk + bk
        v = kv_in @ wv + bv
        Bq, Sq, _ = q.shape
        Sk = k.shape[1]
        q = q.reshape(Bq, Sq, HEAD, QK).transpose(0, 2, 1, 3)
        k = k.reshape(Bq, Sk, HEAD, QK).transpose(0, 2, 1, 3)
        v = v.reshape(Bq, Sk, HEAD, VS).transpose(0, 2, 1, 3)
        s = jnp.einsum("bhqd,bhkd->bhqk", q, k) / math.sqrt(QK)
        s = jnp.where(mask[:, None, :, :] > 0.5, -1e9, s)
        p = jax.nn.softmax(s, axis=-1)
        o = jnp.einsum("bhqk,bhkd->bhqd", p, v)
        return o.transpose(0, 2, 1, 3).reshape(Bq, Sq, HEAD * VS)

    def ln(x, g, b_):
        mu = jnp.mean(x, axis=-1, keepdims=True)
        var = jnp.mean((x - mu) ** 2, axis=-1, keepdims=True)
        return (x - mu) * jax.lax.rsqrt(var + EPS) * g + b_

    z = mha(emb, emb, m1, wq1, bq1, wk1, bk1, wv1, bv1) @ wz1 + bz1
    z = ln(emb + z, g1, be1)
    a = mha(emb, enc, m2, wq2, bq2, wk2, bk2, wv2, bv2) @ wz2 + bz2
    z = ln(z + a, g2, be2)
    f = jnp.maximum(z @ wf1 + bf1, 0.0) @ wf2 + bf2
    return ln(z + f, g3, be3)


# ----------------------------------- main ------------------------------------
def _init_params(key):
    ks = jax.random.split(key, 16)

    def w(k, shape, scale=0.05):
        return jax.random.normal(k, shape, jnp.float32) * scale

    params = (
        # masked self-attention
        w(ks[0], (EMB, HEAD * QK)), jnp.zeros((1, HEAD * QK), jnp.float32),
        w(ks[1], (EMB, HEAD * QK)), jnp.zeros((1, HEAD * QK), jnp.float32),
        w(ks[2], (EMB, HEAD * VS)), jnp.zeros((1, HEAD * VS), jnp.float32),
        w(ks[3], (HEAD * VS, EMB)), jnp.zeros((1, EMB), jnp.float32),
        # cross attention
        w(ks[4], (EMB, HEAD * QK)), jnp.zeros((1, HEAD * QK), jnp.float32),
        w(ks[5], (EMB, HEAD * QK)), jnp.zeros((1, HEAD * QK), jnp.float32),
        w(ks[6], (EMB, HEAD * VS)), jnp.zeros((1, HEAD * VS), jnp.float32),
        w(ks[7], (HEAD * VS, EMB)), jnp.zeros((1, EMB), jnp.float32),
        # feed-forward
        w(ks[8], (EMB, FF)), jnp.zeros((1, FF), jnp.float32),
        w(ks[9], (FF, EMB)), jnp.zeros((1, EMB), jnp.float32),
        # layernorms (gamma=1, beta=0, like fresh nn.LayerNorm)
        jnp.ones((1, EMB), jnp.float32), jnp.zeros((1, EMB), jnp.float32),
        jnp.ones((1, EMB), jnp.float32), jnp.zeros((1, EMB), jnp.float32),
        jnp.ones((1, EMB), jnp.float32), jnp.zeros((1, EMB), jnp.float32),
    )
    return params


if __name__ == "__main__":
    key = jax.random.PRNGKey(0)
    k_enc, k_emb, k_par = jax.random.split(key, 3)

    encoder_result = jax.random.normal(k_enc, (B, S_ENC, EMB), jnp.float32)
    emb_result = jax.random.normal(k_emb, (B, S_DEC, EMB), jnp.float32)

    # first_attn_mask: causal mask (1.0 above the diagonal == masked)
    causal = (jnp.arange(S_DEC)[:, None] < jnp.arange(S_DEC)[None, :]).astype(jnp.float32)
    first_attn_mask = jnp.broadcast_to(causal, (B, S_DEC, S_DEC))
    # second_attn_mask: no masking (all zeros)
    second_attn_mask = jnp.zeros((B, S_DEC, S_ENC), jnp.float32)

    params = _init_params(k_par)
    packed = jax.block_until_ready(pack_params(params))   # one-time packing

    out = decoder_block(encoder_result, emb_result, first_attn_mask,
                        second_attn_mask, packed)
    out = jax.block_until_ready(out)

    ref = decoder_block_ref(encoder_result, emb_result, first_attn_mask,
                            second_attn_mask, params)
    assert out.shape == (B, S_DEC, EMB)
    # exact softmax normalization now -> tighter tolerance than before
    assert jnp.allclose(out, ref, atol=1e-3, rtol=1e-3), float(jnp.max(jnp.abs(out - ref)))

    print("KERNEL_OK")
</pallas_src>

<mosaic_0001>
module attributes {stable_mosaic.version = 11 : i64} {
  func.func @decoder_block_kernel(%arg0: memref<32x32xf32, #tpu.memory_space<vmem>>, %arg1: memref<32x8xf32, #tpu.memory_space<vmem>>, %arg2: memref<24x32x16xf32, #tpu.memory_space<vmem>>, %arg3: memref<4x64x32xf32, #tpu.memory_space<vmem>>, %arg4: memref<34x64xf32, #tpu.memory_space<vmem>>, %arg5: memref<16x32xf32, #tpu.memory_space<vmem>>) attributes {dimension_semantics = [], scalar_prefetch = 0 : i64, scratch_operands = 0 : i64, tpu.core_type = #tpu.core_type<tc>} {
    %c0 = arith.constant 0 : index
    %c0_0 = arith.constant 0 : index
    %0 = vector.load %arg0[%c0, %c0_0] : memref<32x32xf32, #tpu.memory_space<vmem>>, vector<32x32xf32>
    %1 = vector.extract_strided_slice %0 {offsets = [0, 0], sizes = [16, 32], strides = [1, 1]} : vector<32x32xf32> to vector<16x32xf32>
    %2 = vector.extract_strided_slice %0 {offsets = [16, 0], sizes = [16, 32], strides = [1, 1]} : vector<32x32xf32> to vector<16x32xf32>
    %c0_1 = arith.constant 0 : index
    %c0_2 = arith.constant 0 : index
    %3 = vector.load %arg1[%c0_1, %c0_2] : memref<32x8xf32, #tpu.memory_space<vmem>>, vector<32x8xf32>
    %cst = arith.constant -1.000000e+09 : f32
    %4 = vector.broadcast %cst : f32 to vector<32x8xf32>
    %5 = arith.mulf %3, %4 : vector<32x8xf32>
    %c0_3 = arith.constant 0 : index
    %c0_4 = arith.constant 0 : index
    %6 = vector.load %arg4[%c0_3, %c0_4] : memref<34x64xf32, #tpu.memory_space<vmem>>, vector<34x64xf32>
    %7 = vector.extract_strided_slice %5 {offsets = [0, 0], sizes = [16, 8], strides = [1, 1]} : vector<32x8xf32> to vector<16x8xf32>
    %c0_5 = arith.constant 0 : index
    %c0_6 = arith.constant 0 : index
    %c0_7 = arith.constant 0 : index
    %8 = vector.load %arg3[%c0_5, %c0_6, %c0_7] : memref<4x64x32xf32, #tpu.memory_space<vmem>>, vector<1x64x32xf32>
    %9 = vector.shape_cast %8 : vector<1x64x32xf32> to vector<64x32xf32>
    %c0_8 = arith.constant 0 : index
    %c0_9 = arith.constant 0 : index
    %c0_10 = arith.constant 0 : index
    %10 = vector.load %arg2[%c0_8, %c0_9, %c0_10] : memref<24x32x16xf32, #tpu.memory_space<vmem>>, vector<1x32x16xf32>
    %11 = vector.shape_cast %10 : vector<1x32x16xf32> to vector<32x16xf32>
    %cst_11 = arith.constant dense<0.000000e+00> : vector<16x16xf32>
    %12 = tpu.matmul %1, %11, %cst_11 {dimension_numbers = #tpu.dot_dimension_numbers<[1], [0], [0], [1], [0, 0, 1, 1], [], []>, precision = #tpu.contract_precision<fp32>} : vector<16x32xf32>, vector<32x16xf32>, vector<16x16xf32> -> vector<16x16xf32>
    %13 = vector.extract_strided_slice %6 {offsets = [0, 0], sizes = [1, 16], strides = [1, 1]} : vector<34x64xf32> to vector<1x16xf32>
    %14 = vector.broadcast %13 : vector<1x16xf32> to vector<16x16xf32>
    %15 = arith.addf %12, %14 : vector<16x16xf32>
    %c1 = arith.constant 1 : index
    %c0_12 = arith.constant 0 : index
    %c0_13 = arith.constant 0 : index
    %16 = vector.load %arg2[%c1, %c0_12, %c0_13] : memref<24x32x16xf32, #tpu.memory_space<vmem>>, vector<1x32x16xf32>
    %17 = vector.shape_cast %16 : vector<1x32x16xf32> to vector<32x16xf32>
    %cst_14 = arith.constant dense<0.000000e+00> : vector<16x16xf32>
    %18 = tpu.matmul %1, %17, %cst_14 {dimension_numbers = #tpu.dot_dimension_numbers<[1], [0], [0], [1], [0, 0, 1, 1], [], []>, precision = #tpu.contract_precision<fp32>} : vector<16x32xf32>, vector<32x16xf32>, vector<16x16xf32> -> vector<16x16xf32>
    %19 = vector.extract_strided_slice %6 {offsets = [1, 0], sizes = [1, 16], strides = [1, 1]} : vector<34x64xf32> to vector<1x16xf32>
    %20 = vector.broadcast %19 : vector<1x16xf32> to vector<16x16xf32>
    %21 = arith.addf %18, %20 : vector<16x16xf32>
    %c2 = arith.constant 2 : index
    %c0_15 = arith.constant 0 : index
    %c0_16 = arith.constant 0 : index
    %22 = vector.load %arg2[%c2, %c0_15, %c0_16] : memref<24x32x16xf32, #tpu.memory_space<vmem>>, vector<1x32x16xf32>
    %23 = vector.shape_cast %22 : vector<1x32x16xf32> to vector<32x16xf32>
    %cst_17 = arith.constant dense<0.000000e+00> : vector<16x16xf32>
    %24 = tpu.matmul %1, %23, %cst_17 {dimension_numbers = #tpu.dot_dimension_numbers<[1], [0], [0], [1], [0, 0, 1, 1], [], []>, precision = #tpu.contract_precision<fp32>} : vector<16x32xf32>, vector<32x16xf32>, vector<16x16xf32> -> vector<16x16xf32>
    %25 = vector.extract_strided_slice %6 {offsets = [2, 0], sizes = [1, 16], strides = [1, 1]} : vector<34x64xf32> to vector<1x16xf32>
    %26 = vector.broadcast %25 : vector<1x16xf32> to vector<16x16xf32>
    %27 = arith.addf %24, %26 : vector<16x16xf32>
    %c3 = arith.constant 3 : index
    %c0_18 = arith.constant 0 : index
    %c0_19 = arith.constant 0 : index
    %28 = vector.load %arg2[%c3, %c0_18, %c0_19] : memref<24x32x16xf32, #tpu.memory_space<vmem>>, vector<1x32x16xf32>
    %29 = vector.shape_cast %28 : vector<1x32x16xf32> to vector<32x16xf32>
    %cst_20 = arith.constant dense<0.000000e+00> : vector<16x16xf32>
    %30 = tpu.matmul %1, %29, %cst_20 {dimension_numbers = #tpu.dot_dimension_numbers<[1], [0], [0], [1], [0, 0, 1, 1], [], []>, precision = #tpu.contract_precision<fp32>} : vector<16x32xf32>, vector<32x16xf32>, vector<16x16xf32> -> vector<16x16xf32>
    %31 = vector.extract_strided_slice %6 {offsets = [3, 0], sizes = [1, 16], strides = [1, 1]} : vector<34x64xf32> to vector<1x16xf32>
    %32 = vector.broadcast %31 : vector<1x16xf32> to vector<16x16xf32>
    %33 = arith.addf %30, %32 : vector<16x16xf32>
    %c4 = arith.constant 4 : index
    %c0_21 = arith.constant 0 : index
    %c0_22 = arith.constant 0 : index
    %34 = vector.load %arg2[%c4, %c0_21, %c0_22] : memref<24x32x16xf32, #tpu.memory_space<vmem>>, vector<1x32x16xf32>
    %35 = vector.shape_cast %34 : vector<1x32x16xf32> to vector<32x16xf32>
    %cst_23 = arith.constant dense<0.000000e+00> : vector<16x16xf32>
    %36 = tpu.matmul %1, %35, %cst_23 {dimension_numbers = #tpu.dot_dimension_numbers<[1], [0], [0], [1], [0, 0, 1, 1], [], []>, precision = #tpu.contract_precision<fp32>} : vector<16x32xf32>, vector<32x16xf32>, vector<16x16xf32> -> vector<16x16xf32>
    %37 = vector.extract_strided_slice %6 {offsets = [4, 0], sizes = [1, 16], strides = [1, 1]} : vector<34x64xf32> to vector<1x16xf32>
    %38 = vector.broadcast %37 : vector<1x16xf32> to vector<16x16xf32>
    %39 = arith.addf %36, %38 : vector<16x16xf32>
    %c5 = arith.constant 5 : index
    %c0_24 = arith.constant 0 : index
    %c0_25 = arith.constant 0 : index
    %40 = vector.load %arg2[%c5, %c0_24, %c0_25] : memref<24x32x16xf32, #tpu.memory_space<vmem>>, vector<1x32x16xf32>
    %41 = vector.shape_cast %40 : vector<1x32x16xf32> to vector<32x16xf32>
    %cst_26 = arith.constant dense<0.000000e+00> : vector<16x16xf32>
    %42 = tpu.matmul %1, %41, %cst_26 {dimension_numbers = #tpu.dot_dimension_numbers<[1], [0], [0], [1], [0, 0, 1, 1], [], []>, precision = #tpu.contract_precision<fp32>} : vector<16x32xf32>, vector<32x16xf32>, vector<16x16xf32> -> vector<16x16xf32>
    %43 = vector.extract_strided_slice %6 {offsets = [5, 0], sizes = [1, 16], strides = [1, 1]} : vector<34x64xf32> to vector<1x16xf32>
    %44 = vector.broadcast %43 : vector<1x16xf32> to vector<16x16xf32>
    %45 = arith.addf %42, %44 : vector<16x16xf32>
    %c6 = arith.constant 6 : index
    %c0_27 = arith.constant 0 : index
    %c0_28 = arith.constant 0 : index
    %46 = vector.load %arg2[%c6, %c0_27, %c0_28] : memref<24x32x16xf32, #tpu.memory_space<vmem>>, vector<1x32x16xf32>
    %47 = vector.shape_cast %46 : vector<1x32x16xf32> to vector<32x16xf32>
    %cst_29 = arith.constant dense<0.000000e+00> : vector<16x16xf32>
    %48 = tpu.matmul %1, %47, %cst_29 {dimension_numbers = #tpu.dot_dimension_numbers<[1], [0], [0], [1], [0, 0, 1, 1], [], []>, precision = #tpu.contract_precision<fp32>} : vector<16x32xf32>, vector<32x16xf32>, vector<16x16xf32> -> vector<16x16xf32>
    %49 = vector.extract_strided_slice %6 {offsets = [6, 0], sizes = [1, 16], strides = [1, 1]} : vector<34x64xf32> to vector<1x16xf32>
    %50 = vector.broadcast %49 : vector<1x16xf32> to vector<16x16xf32>
    %51 = arith.addf %48, %50 : vector<16x16xf32>
    %c7 = arith.constant 7 : index
    %c0_30 = arith.constant 0 : index
    %c0_31 = arith.constant 0 : index
    %52 = vector.load %arg2[%c7, %c0_30, %c0_31] : memref<24x32x16xf32, #tpu.memory_space<vmem>>, vector<1x32x16xf32>
    %53 = vector.shape_cast %52 : vector<1x32x16xf32> to vector<32x16xf32>
    %cst_32 = arith.constant dense<0.000000e+00> : vector<16x16xf32>
    %54 = tpu.matmul %1, %53, %cst_32 {dimension_numbers = #tpu.dot_dimension_numbers<[1], [0], [0], [1], [0, 0, 1, 1], [], []>, precision = #tpu.contract_precision<fp32>} : vector<16x32xf32>, vector<32x16xf32>, vector<16x16xf32> -> vector<16x16xf32>
    %55 = vector.extract_strided_slice %6 {offsets = [7, 0], sizes = [1, 16], strides = [1, 1]} : vector<34x64xf32> to vector<1x16xf32>
    %56 = vector.broadcast %55 : vector<1x16xf32> to vector<16x16xf32>
    %57 = arith.addf %54, %56 : vector<16x16xf32>
    %c8 = arith.constant 8 : index
    %c0_33 = arith.constant 0 : index
    %c0_34 = arith.constant 0 : index
    %58 = vector.load %arg2[%c8, %c0_33, %c0_34] : memref<24x32x16xf32, #tpu.memory_space<vmem>>, vector<1x32x16xf32>
    %59 = vector.shape_cast %58 : vector<1x32x16xf32> to vector<32x16xf32>
    %cst_35 = arith.constant dense<0.000000e+00> : vector<16x16xf32>
    %60 = tpu.matmul %1, %59, %cst_35 {dimension_numbers = #tpu.dot_dimension_numbers<[1], [0], [0], [1], [0, 0, 1, 1], [], []>, precision = #tpu.contract_precision<fp32>} : vector<16x32xf32>, vector<32x16xf32>, vector<16x16xf32> -> vector<16x16xf32>
    %61 = vector.extract_strided_slice %6 {offsets = [8, 0], sizes = [1, 16], strides = [1, 1]} : vector<34x64xf32> to vector<1x16xf32>
    %62 = vector.broadcast %61 : vector<1x16xf32> to vector<16x16xf32>
    %63 = arith.addf %60, %62 : vector<16x16xf32>
    %c9 = arith.constant 9 : index
    %c0_36 = arith.constant 0 : index
    %c0_37 = arith.constant 0 : index
    %64 = vector.load %arg2[%c9, %c0_36, %c0_37] : memref<24x32x16xf32, #tpu.memory_space<vmem>>, vector<1x32x16xf32>
    %65 = vector.shape_cast %64 : vector<1x32x16xf32> to vector<32x16xf32>
    %cst_38 = arith.constant dense<0.000000e+00> : vector<16x16xf32>
    %66 = tpu.matmul %1, %65, %cst_38 {dimension_numbers = #tpu.dot_dimension_numbers<[1], [0], [0], [1], [0, 0, 1, 1], [], []>, precision = #tpu.contract_precision<fp32>} : vector<16x32xf32>, vector<32x16xf32>, vector<16x16xf32> -> vector<16x16xf32>
    %67 = vector.extract_strided_slice %6 {offsets = [9, 0], sizes = [1, 16], strides = [1, 1]} : vector<34x64xf32> to vector<1x16xf32>
    %68 = vector.broadcast %67 : vector<1x16xf32> to vector<16x16xf32>
    %69 = arith.addf %66, %68 : vector<16x16xf32>
    %c10 = arith.constant 10 : index
    %c0_39 = arith.constant 0 : index
    %c0_40 = arith.constant 0 : index
    %70 = vector.load %arg2[%c10, %c0_39, %c0_40] : memref<24x32x16xf32, #tpu.memory_space<vmem>>, vector<1x32x16xf32>
    %71 = vector.shape_cast %70 : vector<1x32x16xf32> to vector<32x16xf32>
    %cst_41 = arith.constant dense<0.000000e+00> : vector<16x16xf32>
    %72 = tpu.matmul %1, %71, %cst_41 {dimension_numbers = #tpu.dot_dimension_numbers<[1], [0], [0], [1], [0, 0, 1, 1], [], []>, precision = #tpu.contract_precision<fp32>} : vector<16x32xf32>, vector<32x16xf32>, vector<16x16xf32> -> vector<16x16xf32>
    %73 = vector.extract_strided_slice %6 {offsets = [10, 0], sizes = [1, 16], strides = [1, 1]} : vector<34x64xf32> to vector<1x16xf32>
    %74 = vector.broadcast %73 : vector<1x16xf32> to vector<16x16xf32>
    %75 = arith.addf %72, %74 : vector<16x16xf32>
    %c11 = arith.constant 11 : index
    %c0_42 = arith.constant 0 : index
    %c0_43 = arith.constant 0 : index
    %76 = vector.load %arg2[%c11, %c0_42, %c0_43] : memref<24x32x16xf32, #tpu.memory_space<vmem>>, vector<1x32x16xf32>
    %77 = vector.shape_cast %76 : vector<1x32x16xf32> to vector<32x16xf32>
    %cst_44 = arith.constant dense<0.000000e+00> : vector<16x16xf32>
    %78 = tpu.matmul %1, %77, %cst_44 {dimension_numbers = #tpu.dot_dimension_numbers<[1], [0], [0], [1], [0, 0, 1, 1], [], []>, precision = #tpu.contract_precision<fp32>} : vector<16x32xf32>, vector<32x16xf32>, vector<16x16xf32> -> vector<16x16xf32>
    %79 = vector.extract_strided_slice %6 {offsets = [11, 0], sizes = [1, 16], strides = [1, 1]} : vector<34x64xf32> to vector<1x16xf32>
    %80 = vector.broadcast %79 : vector<1x16xf32> to vector<16x16xf32>
    %81 = arith.addf %78, %80 : vector<16x16xf32>
    %82 = vector.extract_strided_slice %7 {offsets = [0, 0], sizes = [8, 8], strides = [1, 1]} : vector<16x8xf32> to vector<8x8xf32>
    %83 = vector.extract_strided_slice %15 {offsets = [0, 0], sizes = [8, 16], strides = [1, 1]} : vector<16x16xf32> to vector<8x16xf32>
    %84 = vector.extract_strided_slice %39 {offsets = [0, 0], sizes = [8, 16], strides = [1, 1]} : vector<16x16xf32> to vector<8x16xf32>
    %cst_45 = arith.constant dense<0.000000e+00> : vector<8x8xf32>
    %85 = tpu.matmul %83, %84, %cst_45 {dimension_numbers = #tpu.dot_dimension_numbers<[1], [1], [0], [0], [0, 0, 1, 0], [], []>, precision = #tpu.contract_precision<fp32>} : vector<8x16xf32>, vector<8x16xf32>, vector<8x8xf32> -> vector<8x8xf32>
    %86 = arith.addf %85, %82 : vector<8x8xf32>
    %87 = vector.extract_strided_slice %21 {offsets = [0, 0], sizes = [8, 16], strides = [1, 1]} : vector<16x16xf32> to vector<8x16xf32>
    %88 = vector.extract_strided_slice %45 {offsets = [0, 0], sizes = [8, 16], strides = [1, 1]} : vector<16x16xf32> to vector<8x16xf32>
    %cst_46 = arith.constant dense<0.000000e+00> : vector<8x8xf32>
    %89 = tpu.matmul %87, %88, %cst_46 {dimension_numbers = #tpu.dot_dimension_numbers<[1], [1], [0], [0], [0, 0, 1, 0], [], []>, precision = #tpu.contract_precision<fp32>} : vector<8x16xf32>, vector<8x16xf32>, vector<8x8xf32> -> vector<8x8xf32>
    %90 = arith.addf %89, %82 : vector<8x8xf32>
    %91 = vector.extract_strided_slice %27 {offsets = [0, 0], sizes = [8, 16], strides = [1, 1]} : vector<16x16xf32> to vector<8x16xf32>
    %92 = vector.extract_strided_slice %51 {offsets = [0, 0], sizes = [8, 16], strides = [1, 1]} : vector<16x16xf32> to vector<8x16xf32>
    %cst_47 = arith.constant dense<0.000000e+00> : vector<8x8xf32>
    %93 = tpu.matmul %91, %92, %cst_47 {dimension_numbers = #tpu.dot_dimension_numbers<[1], [1], [0], [0], [0, 0, 1, 0], [], []>, precision = #tpu.contract_precision<fp32>} : vector<8x16xf32>, vector<8x16xf32>, vector<8x8xf32> -> vector<8x8xf32>
    %94 = arith.addf %93, %82 : vector<8x8xf32>
    %95 = vector.extract_strided_slice %33 {offsets = [0, 0], sizes = [8, 16], strides = [1, 1]} : vector<16x16xf32> to vector<8x16xf32>
    %96 = vector.extract_strided_slice %57 {offsets = [0, 0], sizes = [8, 16], strides = [1, 1]} : vector<16x16xf32> to vector<8x16xf32>
    %cst_48 = arith.constant dense<0.000000e+00> : vector<8x8xf32>
    %97 = tpu.matmul %95, %96, %cst_48 {dimension_numbers = #tpu.dot_dimension_numbers<[1], [1], [0], [0], [0, 0, 1, 0], [], []>, precision = #tpu.contract_precision<fp32>} : vector<8x16xf32>, vector<8x16xf32>, vector<8x8xf32> -> vector<8x8xf32>
    %98 = arith.addf %97, %82 : vector<8x8xf32>
    %99 = vector.extract_strided_slice %7 {offsets = [8, 0], sizes = [8, 8], strides = [1, 1]} : vector<16x8xf32> to vector<8x8xf32>
    %100 = vector.extract_strided_slice %15 {offsets = [8, 0], sizes = [8, 16], strides = [1, 1]} : vector<16x16xf32> to vector<8x16xf32>
    %101 = vector.extract_strided_slice %39 {offsets = [8, 0], sizes = [8, 16], strides = [1, 1]} : vector<16x16xf32> to vector<8x16xf32>
    %cst_49 = arith.constant dense<0.000000e+00> : vector<8x8xf32>
    %102 = tpu.matmul %100, %101, %cst_49 {dimension_numbers = #tpu.dot_dimension_numbers<[1], [1], [0], [0], [0, 0, 1, 0], [], []>, precision = #tpu.contract_precision<fp32>} : vector<8x16xf32>, vector<8x16xf32>, vector<8x8xf32> -> vector<8x8xf32>
    %103 = arith.addf %102, %99 : vector<8x8xf32>
    %104 = vector.extract_strided_slice %21 {offsets = [8, 0], sizes = [8, 16], strides = [1, 1]} : vector<16x16xf32> to vector<8x16xf32>
    %105 = vector.extract_strided_slice %45 {offsets = [8, 0], sizes = [8, 16], strides = [1, 1]} : vector<16x16xf32> to vector<8x16xf32>
    %cst_50 = arith.constant dense<0.000000e+00> : vector<8x8xf32>
    %106 = tpu.matmul %104, %105, %cst_50 {dimension_numbers = #tpu.dot_dimension_numbers<[1], [1], [0], [0], [0, 0, 1, 0], [], []>, precision = #tpu.contract_precision<fp32>} : vector<8x16xf32>, vector<8x16xf32>, vector<8x8xf32> -> vector<8x8xf32>
    %107 = arith.addf %106, %99 : vector<8x8xf32>
    %108 = vector.extract_strided_slice %27 {offsets = [8, 0], sizes = [8, 16], strides = [1, 1]} : vector<16x16xf32> to vector<8x16xf32>
    %109 = vector.extract_strided_slice %51 {offsets = [8, 0], sizes = [8, 16], strides = [1, 1]} : vector<16x16xf32> to vector<8x16xf32>
    %cst_51 = arith.constant dense<0.000000e+00> : vector<8x8xf32>
    %110 = tpu.matmul %108, %109, %cst_51 {dimension_numbers = #tpu.dot_dimension_numbers<[1], [1], [0], [0], [0, 0, 1, 0], [], []>, precision = #tpu.contract_precision<fp32>} : vector<8x16xf32>, vector<8x16xf32>, vector<8x8xf32> -> vector<8x8xf32>
    %111 = arith.addf %110, %99 : vector<8x8xf32>
    %112 = vector.extract_strided_slice %33 {offsets = [8, 0], sizes = [8, 16], strides = [1, 1]} : vector<16x16xf32> to vector<8x16xf32>
    %113 = vector.extract_strided_slice %57 {offsets = [8, 0], sizes = [8, 16], strides = [1, 1]} : vector<16x16xf32> to vector<8x16xf32>
    %cst_52 = arith.constant dense<0.000000e+00> : vector<8x8xf32>
    %114 = tpu.matmul %112, %113, %cst_52 {dimension_numbers = #tpu.dot_dimension_numbers<[1], [1], [0], [0], [0, 0, 1, 0], [], []>, precision = #tpu.contract_precision<fp32>} : vector<8x16xf32>, vector<8x16xf32>, vector<8x8xf32> -> vector<8x8xf32>
    %115 = arith.addf %114, %99 : vector<8x8xf32>
    %116 = tpu.concatenate %86, %90, %94, %98, %103, %107, %111, %115 in 0 : vector<8x8xf32>, vector<8x8xf32>, vector<8x8xf32>, vector<8x8xf32>, vector<8x8xf32>, vector<8x8xf32>, vector<8x8xf32>, vector<8x8xf32> -> vector<64x8xf32>
    %cst_53 = arith.constant dense<0xFF800000> : vector<64xf32>
    %117 = vector.multi_reduction <maximumf>, %116, %cst_53 [1] : vector<64x8xf32> to vector<64xf32>
    %118 = vector.shape_cast %117 : vector<64xf32> to vector<64x1xf32>
    %119 = vector.broadcast %118 : vector<64x1xf32> to vector<64x8xf32>
    %120 = arith.subf %116, %119 : vector<64x8xf32>
    %121 = math.exp %120 : vector<64x8xf32>
    %cst_54 = arith.constant dense<0.000000e+00> : vector<64xf32>
    %122 = vector.multi_reduction <add>, %121, %cst_54 [1] : vector<64x8xf32> to vector<64xf32>
    %123 = vector.shape_cast %122 : vector<64xf32> to vector<64x1xf32>
    %124 = vector.broadcast %123 : vector<64x1xf32> to vector<64x8xf32>
    %125 = arith.divf %121, %124 : vector<64x8xf32>
    %126 = vector.extract_strided_slice %125 {offsets = [0, 0], sizes = [8, 8], strides = [1, 1]} : vector<64x8xf32> to vector<8x8xf32>
    %127 = vector.extract_strided_slice %63 {offsets = [0, 0], sizes = [8, 16], strides = [1, 1]} : vector<16x16xf32> to vector<8x16xf32>
    %cst_55 = arith.constant dense<0.000000e+00> : vector<8x16xf32>
    %128 = tpu.matmul %126, %127, %cst_55 {dimension_numbers = #tpu.dot_dimension_numbers<[1], [0], [0], [1], [0, 0, 1, 1], [], []>, precision = #tpu.contract_precision<fp32>} : vector<8x8xf32>, vector<8x16xf32>, vector<8x16xf32> -> vector<8x16xf32>
    %129 = vector.extract_strided_slice %9 {offsets = [0, 0], sizes = [16, 32], strides = [1, 1]} : vector<64x32xf32> to vector<16x32xf32>
    %cst_56 = arith.constant dense<0.000000e+00> : vector<8x32xf32>
    %130 = tpu.matmul %128, %129, %cst_56 {dimension_numbers = #tpu.dot_dimension_numbers<[1], [0], [0], [1], [0, 0, 1, 1], [], []>, precision = #tpu.contract_precision<fp32>} : vector<8x16xf32>, vector<16x32xf32>, vector<8x32xf32> -> vector<8x32xf32>
    %131 = vector.extract_strided_slice %125 {offsets = [8, 0], sizes = [8, 8], strides = [1, 1]} : vector<64x8xf32> to vector<8x8xf32>
    %132 = vector.extract_strided_slice %69 {offsets = [0, 0], sizes = [8, 16], strides = [1, 1]} : vector<16x16xf32> to vector<8x16xf32>
    %cst_57 = arith.constant dense<0.000000e+00> : vector<8x16xf32>
    %133 = tpu.matmul %131, %132, %cst_57 {dimension_numbers = #tpu.dot_dimension_numbers<[1], [0], [0], [1], [0, 0, 1, 1], [], []>, precision = #tpu.contract_precision<fp32>} : vector<8x8xf32>, vector<8x16xf32>, vector<8x16xf32> -> vector<8x16xf32>
    %134 = vector.extract_strided_slice %9 {offsets = [16, 0], sizes = [16, 32], strides = [1, 1]} : vector<64x32xf32> to vector<16x32xf32>
    %cst_58 = arith.constant dense<0.000000e+00> : vector<8x32xf32>
    %135 = tpu.matmul %133, %134, %cst_58 {dimension_numbers = #tpu.dot_dimension_numbers<[1], [0], [0], [1], [0, 0, 1, 1], [], []>, precision = #tpu.contract_precision<fp32>} : vector<8x16xf32>, vector<16x32xf32>, vector<8x32xf32> -> vector<8x32xf32>
    %136 = arith.addf %130, %135 : vector<8x32xf32>
    %137 = vector.extract_strided_slice %125 {offsets = [16, 0], sizes = [8, 8], strides = [1, 1]} : vector<64x8xf32> to vector<8x8xf32>
    %138 = vector.extract_strided_slice %75 {offsets = [0, 0], sizes = [8, 16], strides = [1, 1]} : vector<16x16xf32> to vector<8x16xf32>
    %cst_59 = arith.constant dense<0.000000e+00> : vector<8x16xf32>
    %139 = tpu.matmul %137, %138, %cst_59 {dimension_numbers = #tpu.dot_dimension_numbers<[1], [0], [0], [1], [0, 0, 1, 1], [], []>, precision = #tpu.contract_precision<fp32>} : vector<8x8xf32>, vector<8x16xf32>, vector<8x16xf32> -> vector<8x16xf32>
    %140 = vector.extract_strided_slice %9 {offsets = [32, 0], sizes = [16, 32], strides = [1, 1]} : vector<64x32xf32> to vector<16x32xf32>
    %cst_60 = arith.constant dense<0.000000e+00> : vector<8x32xf32>
    %141 = tpu.matmul %139, %140, %cst_60 {dimension_numbers = #tpu.dot_dimension_numbers<[1], [0], [0], [1], [0, 0, 1, 1], [], []>, precision = #tpu.contract_precision<fp32>} : vector<8x16xf32>, vector<16x32xf32>, vector<8x32xf32> -> vector<8x32xf32>
    %142 = arith.addf %136, %141 : vector<8x32xf32>
    %143 = vector.extract_strided_slice %125 {offsets = [24, 0], sizes = [8, 8], strides = [1, 1]} : vector<64x8xf32> to vector<8x8xf32>
    %144 = vector.extract_strided_slice %81 {offsets = [0, 0], sizes = [8, 16], strides = [1, 1]} : vector<16x16xf32> to vector<8x16xf32>
    %cst_61 = arith.constant dense<0.000000e+00> : vector<8x16xf32>
    %145 = tpu.matmul %143, %144, %cst_61 {dimension_numbers = #tpu.dot_dimension_numbers<[1], [0], [0], [1], [0, 0, 1, 1], [], []>, precision = #tpu.contract_precision<fp32>} : vector<8x8xf32>, vector<8x16xf32>, vector<8x16xf32> -> vector<8x16xf32>
    %146 = vector.extract_strided_slice %9 {offsets = [48, 0], sizes = [16, 32], strides = [1, 1]} : vector<64x32xf32> to vector<16x32xf32>
    %cst_62 = arith.constant dense<0.000000e+00> : vector<8x32xf32>
    %147 = tpu.matmul %145, %146, %cst_62 {dimension_numbers = #tpu.dot_dimension_numbers<[1], [0], [0], [1], [0, 0, 1, 1], [], []>, precision = #tpu.contract_precision<fp32>} : vector<8x16xf32>, vector<16x32xf32>, vector<8x32xf32> -> vector<8x32xf32>
    %148 = arith.addf %142, %147 : vector<8x32xf32>
    %149 = vector.extract_strided_slice %125 {offsets = [32, 0], sizes = [8, 8], strides = [1, 1]} : vector<64x8xf32> to vector<8x8xf32>
    %150 = vector.extract_strided_slice %63 {offsets = [8, 0], sizes = [8, 16], strides = [1, 1]} : vector<16x16xf32> to vector<8x16xf32>
    %cst_63 = arith.constant dense<0.000000e+00> : vector<8x16xf32>
    %151 = tpu.matmul %149, %150, %cst_63 {dimension_numbers = #tpu.dot_dimension_numbers<[1], [0], [0], [1], [0, 0, 1, 1], [], []>, precision = #tpu.contract_precision<fp32>} : vector<8x8xf32>, vector<8x16xf32>, vector<8x16xf32> -> vector<8x16xf32>
    %152 = vector.extract_strided_slice %9 {offsets = [0, 0], sizes = [16, 32], strides = [1, 1]} : vector<64x32xf32> to vector<16x32xf32>
    %cst_64 = arith.constant dense<0.000000e+00> : vector<8x32xf32>
    %153 = tpu.matmul %151, %152, %cst_64 {dimension_numbers = #tpu.dot_dimension_numbers<[1], [0], [0], [1], [0, 0, 1, 1], [], []>, precision = #tpu.contract_precision<fp32>} : vector<8x16xf32>, vector<16x32xf32>, vector<8x32xf32> -> vector<8x32xf32>
    %154 = vector.extract_strided_slice %125 {offsets = [40, 0], sizes = [8, 8], strides = [1, 1]} : vector<64x8xf32> to vector<8x8xf32>
    %155 = vector.extract_strided_slice %69 {offsets = [8, 0], sizes = [8, 16], strides = [1, 1]} : vector<16x16xf32> to vector<8x16xf32>
    %cst_65 = arith.constant dense<0.000000e+00> : vector<8x16xf32>
    %156 = tpu.matmul %154, %155, %cst_65 {dimension_numbers = #tpu.dot_dimension_numbers<[1], [0], [0], [1], [0, 0, 1, 1], [], []>, precision = #tpu.contract_precision<fp32>} : vector<8x8xf32>, vector<8x16xf32>, vector<8x16xf32> -> vector<8x16xf32>
    %157 = vector.extract_strided_slice %9 {offsets = [16, 0], sizes = [16, 32], strides = [1, 1]} : vector<64x32xf32> to vector<16x32xf32>
    %cst_66 = arith.constant dense<0.000000e+00> : vector<8x32xf32>
    %158 = tpu.matmul %156, %157, %cst_66 {dimension_numbers = #tpu.dot_dimension_numbers<[1], [0], [0], [1], [0, 0, 1, 1], [], []>, precision = #tpu.contract_precision<fp32>} : vector<8x16xf32>, vector<16x32xf32>, vector<8x32xf32> -> vector<8x32xf32>
    %159 = arith.addf %153, %158 : vector<8x32xf32>
    %160 = vector.extract_strided_slice %125 {offsets = [48, 0], sizes = [8, 8], strides = [1, 1]} : vector<64x8xf32> to vector<8x8xf32>
    %161 = vector.extract_strided_slice %75 {offsets = [8, 0], sizes = [8, 16], strides = [1, 1]} : vector<16x16xf32> to vector<8x16xf32>
    %cst_67 = arith.constant dense<0.000000e+00> : vector<8x16xf32>
    %162 = tpu.matmul %160, %161, %cst_67 {dimension_numbers = #tpu.dot_dimension_numbers<[1], [0], [0], [1], [0, 0, 1, 1], [], []>, precision = #tpu.contract_precision<fp32>} : vector<8x8xf32>, vector<8x16xf32>, vector<8x16xf32> -> vector<8x16xf32>
    %163 = vector.extract_strided_slice %9 {offsets = [32, 0], sizes = [16, 32], strides = [1, 1]} : vector<64x32xf32> to vector<16x32xf32>
    %cst_68 = arith.constant dense<0.000000e+00> : vector<8x32xf32>
    %164 = tpu.matmul %162, %163, %cst_68 {dimension_numbers = #tpu.dot_dimension_numbers<[1], [0], [0], [1], [0, 0, 1, 1], [], []>, precision = #tpu.contract_precision<fp32>} : vector<8x16xf32>, vector<16x32xf32>, vector<8x32xf32> -> vector<8x32xf32>
    %165 = arith.addf %159, %164 : vector<8x32xf32>
    %166 = vector.extract_strided_slice %125 {offsets = [56, 0], sizes = [8, 8], strides = [1, 1]} : vector<64x8xf32> to vector<8x8xf32>
    %167 = vector.extract_strided_slice %81 {offsets = [8, 0], sizes = [8, 16], strides = [1, 1]} : vector<16x16xf32> to vector<8x16xf32>
    %cst_69 = arith.constant dense<0.000000e+00> : vector<8x16xf32>
    %168 = tpu.matmul %166, %167, %cst_69 {dimension_numbers = #tpu.dot_dimension_numbers<[1], [0], [0], [1], [0, 0, 1, 1], [], []>, precision = #tpu.contract_precision<fp32>} : vector<8x8xf32>, vector<8x16xf32>, vector<8x16xf32> -> vector<8x16xf32>
    %169 = vector.extract_strided_slice %9 {offsets = [48, 0], sizes = [16, 32], strides = [1, 1]} : vector<64x32xf32> to vector<16x32xf32>
    %cst_70 = arith.constant dense<0.000000e+00> : vector<8x32xf32>
    %170 = tpu.matmul %168, %169, %cst_70 {dimension_numbers = #tpu.dot_dimension_numbers<[1], [0], [0], [1], [0, 0, 1, 1], [], []>, precision = #tpu.contract_precision<fp32>} : vector<8x16xf32>, vector<16x32xf32>, vector<8x32xf32> -> vector<8x32xf32>
    %171 = arith.addf %165, %170 : vector<8x32xf32>
    %172 = tpu.concatenate %148, %171 in 0 : vector<8x32xf32>, vector<8x32xf32> -> vector<16x32xf32>
    %173 = vector.extract_strided_slice %6 {offsets = [24, 0], sizes = [1, 32], strides = [1, 1]} : vector<34x64xf32> to vector<1x32xf32>
    %174 = vector.broadcast %173 : vector<1x32xf32> to vector<16x32xf32>
    %175 = arith.addf %172, %174 : vector<16x32xf32>
    %176 = arith.addf %1, %175 : vector<16x32xf32>
    %177 = vector.extract_strided_slice %6 {offsets = [28, 0], sizes = [1, 32], strides = [1, 1]} : vector<34x64xf32> to vector<1x32xf32>
    %178 = vector.extract_strided_slice %6 {offsets = [29, 0], sizes = [1, 32], strides = [1, 1]} : vector<34x64xf32> to vector<1x32xf32>
    %cst_71 = arith.constant dense<0.000000e+00> : vector<16xf32>
    %179 = vector.multi_reduction <add>, %176, %cst_71 [1] : vector<16x32xf32> to vector<16xf32>
    %180 = vector.shape_cast %179 : vector<16xf32> to vector<16x1xf32>
    %cst_72 = arith.constant 3.200000e+01 : f32
    %181 = vector.broadcast %cst_72 : f32 to vector<16x1xf32>
    %182 = arith.divf %180, %181 : vector<16x1xf32>
    %183 = vector.broadcast %182 : vector<16x1xf32> to vector<16x32xf32>
    %184 = arith.subf %176, %183 : vector<16x32xf32>
    %185 = arith.mulf %184, %184 : vector<16x32xf32>
    %cst_73 = arith.constant dense<0.000000e+00> : vector<16xf32>
    %186 = vector.multi_reduction <add>, %185, %cst_73 [1] : vector<16x32xf32> to vector<16xf32>
    %187 = vector.shape_cast %186 : vector<16xf32> to vector<16x1xf32>
    %cst_74 = arith.constant 3.200000e+01 : f32
    %188 = vector.broadcast %cst_74 : f32 to vector<16x1xf32>
    %189 = arith.divf %187, %188 : vector<16x1xf32>
    %190 = vector.broadcast %182 : vector<16x1xf32> to vector<16x32xf32>
    %191 = arith.subf %176, %190 : vector<16x32xf32>
    %cst_75 = arith.constant 9.99999974E-6 : f32
    %192 = vector.broadcast %cst_75 : f32 to vector<16x1xf32>
    %193 = arith.addf %189, %192 : vector<16x1xf32>
    %194 = math.rsqrt %193 : vector<16x1xf32>
    %195 = vector.broadcast %194 : vector<16x1xf32> to vector<16x32xf32>
    %196 = arith.mulf %191, %195 : vector<16x32xf32>
    %197 = vector.broadcast %177 : vector<1x32xf32> to vector<16x32xf32>
    %198 = arith.mulf %196, %197 : vector<16x32xf32>
    %199 = vector.broadcast %178 : vector<1x32xf32> to vector<16x32xf32>
    %200 = arith.addf %198, %199 : vector<16x32xf32>
    %201 = vector.extract_strided_slice %5 {offsets = [16, 0], sizes = [16, 8], strides = [1, 1]} : vector<32x8xf32> to vector<16x8xf32>
    %c1_76 = arith.constant 1 : index
    %c0_77 = arith.constant 0 : index
    %c0_78 = arith.constant 0 : index
    %202 = vector.load %arg3[%c1_76, %c0_77, %c0_78] : memref<4x64x32xf32, #tpu.memory_space<vmem>>, vector<1x64x32xf32>
    %203 = vector.shape_cast %202 : vector<1x64x32xf32> to vector<64x32xf32>
    %c12 = arith.constant 12 : index
    %c0_79 = arith.constant 0 : index
    %c0_80 = arith.constant 0 : index
    %204 = vector.load %arg2[%c12, %c0_79, %c0_80] : memref<24x32x16xf32, #tpu.memory_space<vmem>>, vector<1x32x16xf32>
    %205 = vector.shape_cast %204 : vector<1x32x16xf32> to vector<32x16xf32>
    %cst_81 = arith.constant dense<0.000000e+00> : vector<16x16xf32>
    %206 = tpu.matmul %1, %205, %cst_81 {dimension_numbers = #tpu.dot_dimension_numbers<[1], [0], [0], [1], [0, 0, 1, 1], [], []>, precision = #tpu.contract_precision<fp32>} : vector<16x32xf32>, vector<32x16xf32>, vector<16x16xf32> -> vector<16x16xf32>
    %207 = vector.extract_strided_slice %6 {offsets = [12, 0], sizes = [1, 16], strides = [1, 1]} : vector<34x64xf32> to vector<1x16xf32>
    %208 = vector.broadcast %207 : vector<1x16xf32> to vector<16x16xf32>
    %209 = arith.addf %206, %208 : vector<16x16xf32>
    %c13 = arith.constant 13 : index
    %c0_82 = arith.constant 0 : index
    %c0_83 = arith.constant 0 : index
    %210 = vector.load %arg2[%c13, %c0_82, %c0_83] : memref<24x32x16xf32, #tpu.memory_space<vmem>>, vector<1x32x16xf32>
    %211 = vector.shape_cast %210 : vector<1x32x16xf32> to vector<32x16xf32>
    %cst_84 = arith.constant dense<0.000000e+00> : vector<16x16xf32>
    %212 = tpu.matmul %1, %211, %cst_84 {dimension_numbers = #tpu.dot_dimension_numbers<[1], [0], [0], [1], [0, 0, 1, 1], [], []>, precision = #tpu.contract_precision<fp32>} : vector<16x32xf32>, vector<32x16xf32>, vector<16x16xf32> -> vector<16x16xf32>
    %213 = vector.extract_strided_slice %6 {offsets = [13, 0], sizes = [1, 16], strides = [1, 1]} : vector<34x64xf32> to vector<1x16xf32>
    %214 = vector.broadcast %213 : vector<1x16xf32> to vector<16x16xf32>
    %215 = arith.addf %212, %214 : vector<16x16xf32>
    %c14 = arith.constant 14 : index
    %c0_85 = arith.constant 0 : index
    %c0_86 = arith.constant 0 : index
    %216 = vector.load %arg2[%c14, %c0_85, %c0_86] : memref<24x32x16xf32, #tpu.memory_space<vmem>>, vector<1x32x16xf32>
    %217 = vector.shape_cast %216 : vector<1x32x16xf32> to vector<32x16xf32>
    %cst_87 = arith.constant dense<0.000000e+00> : vector<16x16xf32>
    %218 = tpu.matmul %1, %217, %cst_87 {dimension_numbers = #tpu.dot_dimension_numbers<[1], [0], [0], [1], [0, 0, 1, 1], [], []>, precision = #tpu.contract_precision<fp32>} : vector<16x32xf32>, vector<32x16xf32>, vector<16x16xf32> -> vector<16x16xf32>
    %219 = vector.extract_strided_slice %6 {offsets = [14, 0], sizes = [1, 16], strides = [1, 1]} : vector<34x64xf32> to vector<1x16xf32>
    %220 = vector.broadcast %219 : vector<1x16xf32> to vector<16x16xf32>
    %221 = arith.addf %218, %220 : vector<16x16xf32>
    %c15 = arith.constant 15 : index
    %c0_88 = arith.constant 0 : index
    %c0_89 = arith.constant 0 : index
    %222 = vector.load %arg2[%c15, %c0_88, %c0_89] : memref<24x32x16xf32, #tpu.memory_space<vmem>>, vector<1x32x16xf32>
    %223 = vector.shape_cast %222 : vector<1x32x16xf32> to vector<32x16xf32>
    %cst_90 = arith.constant dense<0.000000e+00> : vector<16x16xf32>
    %224 = tpu.matmul %1, %223, %cst_90 {dimension_numbers = #tpu.dot_dimension_numbers<[1], [0], [0], [1], [0, 0, 1, 1], [], []>, precision = #tpu.contract_precision<fp32>} : vector<16x32xf32>, vector<32x16xf32>, vector<16x16xf32> -> vector<16x16xf32>
    %225 = vector.extract_strided_slice %6 {offsets = [15, 0], sizes = [1, 16], strides = [1, 1]} : vector<34x64xf32> to vector<1x16xf32>
    %226 = vector.broadcast %225 : vector<1x16xf32> to vector<16x16xf32>
    %227 = arith.addf %224, %226 : vector<16x16xf32>
    %c16 = arith.constant 16 : index
    %c0_91 = arith.constant 0 : index
    %c0_92 = arith.constant 0 : index
    %228 = vector.load %arg2[%c16, %c0_91, %c0_92] : memref<24x32x16xf32, #tpu.memory_space<vmem>>, vector<1x32x16xf32>
    %229 = vector.shape_cast %228 : vector<1x32x16xf32> to vector<32x16xf32>
    %cst_93 = arith.constant dense<0.000000e+00> : vector<16x16xf32>
    %230 = tpu.matmul %2, %229, %cst_93 {dimension_numbers = #tpu.dot_dimension_numbers<[1], [0], [0], [1], [0, 0, 1, 1], [], []>, precision = #tpu.contract_precision<fp32>} : vector<16x32xf32>, vector<32x16xf32>, vector<16x16xf32> -> vector<16x16xf32>
    %231 = vector.extract_strided_slice %6 {offsets = [16, 0], sizes = [1, 16], strides = [1, 1]} : vector<34x64xf32> to vector<1x16xf32>
    %232 = vector.broadcast %231 : vector<1x16xf32> to vector<16x16xf32>
    %233 = arith.addf %230, %232 : vector<16x16xf32>
    %c17 = arith.constant 17 : index
    %c0_94 = arith.constant 0 : index
    %c0_95 = arith.constant 0 : index
    %234 = vector.load %arg2[%c17, %c0_94, %c0_95] : memref<24x32x16xf32, #tpu.memory_space<vmem>>, vector<1x32x16xf32>
    %235 = vector.shape_cast %234 : vector<1x32x16xf32> to vector<32x16xf32>
    %cst_96 = arith.constant dense<0.000000e+00> : vector<16x16xf32>
    %236 = tpu.matmul %2, %235, %cst_96 {dimension_numbers = #tpu.dot_dimension_numbers<[1], [0], [0], [1], [0, 0, 1, 1], [], []>, precision = #tpu.contract_precision<fp32>} : vector<16x32xf32>, vector<32x16xf32>, vector<16x16xf32> -> vector<16x16xf32>
    %237 = vector.extract_strided_slice %6 {offsets = [17, 0], sizes = [1, 16], strides = [1, 1]} : vector<34x64xf32> to vector<1x16xf32>
    %238 = vector.broadcast %237 : vector<1x16xf32> to vector<16x16xf32>
    %239 = arith.addf %236, %238 : vector<16x16xf32>
    %c18 = arith.constant 18 : index
    %c0_97 = arith.constant 0 : index
    %c0_98 = arith.constant 0 : index
    %240 = vector.load %arg2[%c18, %c0_97, %c0_98] : memref<24x32x16xf32, #tpu.memory_space<vmem>>, vector<1x32x16xf32>
    %241 = vector.shape_cast %240 : vector<1x32x16xf32> to vector<32x16xf32>
    %cst_99 = arith.constant dense<0.000000e+00> : vector<16x16xf32>
    %242 = tpu.matmul %2, %241, %cst_99 {dimension_numbers = #tpu.dot_dimension_numbers<[1], [0], [0], [1], [0, 0, 1, 1], [], []>, precision = #tpu.contract_precision<fp32>} : vector<16x32xf32>, vector<32x16xf32>, vector<16x16xf32> -> vector<16x16xf32>
    %243 = vector.extract_strided_slice %6 {offsets = [18, 0], sizes = [1, 16], strides = [1, 1]} : vector<34x64xf32> to vector<1x16xf32>
    %244 = vector.broadcast %243 : vector<1x16xf32> to vector<16x16xf32>
    %245 = arith.addf %242, %244 : vector<16x16xf32>
    %c19 = arith.constant 19 : index
    %c0_100 = arith.constant 0 : index
    %c0_101 = arith.constant 0 : index
    %246 = vector.load %arg2[%c19, %c0_100, %c0_101] : memref<24x32x16xf32, #tpu.memory_space<vmem>>, vector<1x32x16xf32>
    %247 = vector.shape_cast %246 : vector<1x32x16xf32> to vector<32x16xf32>
    %cst_102 = arith.constant dense<0.000000e+00> : vector<16x16xf32>
    %248 = tpu.matmul %2, %247, %cst_102 {dimension_numbers = #tpu.dot_dimension_numbers<[1], [0], [0], [1], [0, 0, 1, 1], [], []>, precision = #tpu.contract_precision<fp32>} : vector<16x32xf32>, vector<32x16xf32>, vector<16x16xf32> -> vector<16x16xf32>
    %249 = vector.extract_strided_slice %6 {offsets = [19, 0], sizes = [1, 16], strides = [1, 1]} : vector<34x64xf32> to vector<1x16xf32>
    %250 = vector.broadcast %249 : vector<1x16xf32> to vector<16x16xf32>
    %251 = arith.addf %248, %250 : vector<16x16xf32>
    %c20 = arith.constant 20 : index
    %c0_103 = arith.constant 0 : index
    %c0_104 = arith.constant 0 : index
    %252 = vector.load %arg2[%c20, %c0_103, %c0_104] : memref<24x32x16xf32, #tpu.memory_space<vmem>>, vector<1x32x16xf32>
    %253 = vector.shape_cast %252 : vector<1x32x16xf32> to vector<32x16xf32>
    %cst_105 = arith.constant dense<0.000000e+00> : vector<16x16xf32>
    %254 = tpu.matmul %2, %253, %cst_105 {dimension_numbers = #tpu.dot_dimension_numbers<[1], [0], [0], [1], [0, 0, 1, 1], [], []>, precision = #tpu.contract_precision<fp32>} : vector<16x32xf32>, vector<32x16xf32>, vector<16x16xf32> -> vector<16x16xf32>
    %255 = vector.extract_strided_slice %6 {offsets = [20, 0], sizes = [1, 16], strides = [1, 1]} : vector<34x64xf32> to vector<1x16xf32>
    %256 = vector.broadcast %255 : vector<1x16xf32> to vector<16x16xf32>
    %257 = arith.addf %254, %256 : vector<16x16xf32>
    %c21 = arith.constant 21 : index
    %c0_106 = arith.constant 0 : index
    %c0_107 = arith.constant 0 : index
    %258 = vector.load %arg2[%c21, %c0_106, %c0_107] : memref<24x32x16xf32, #tpu.memory_space<vmem>>, vector<1x32x16xf32>
    %259 = vector.shape_cast %258 : vector<1x32x16xf32> to vector<32x16xf32>
    %cst_108 = arith.constant dense<0.000000e+00> : vector<16x16xf32>
    %260 = tpu.matmul %2, %259, %cst_108 {dimension_numbers = #tpu.dot_dimension_numbers<[1], [0], [0], [1], [0, 0, 1, 1], [], []>, precision = #tpu.contract_precision<fp32>} : vector<16x32xf32>, vector<32x16xf32>, vector<16x16xf32> -> vector<16x16xf32>
    %261 = vector.extract_strided_slice %6 {offsets = [21, 0], sizes = [1, 16], strides = [1, 1]} : vector<34x64xf32> to vector<1x16xf32>
    %262 = vector.broadcast %261 : vector<1x16xf32> to vector<16x16xf32>
    %263 = arith.addf %260, %262 : vector<16x16xf32>
    %c22 = arith.constant 22 : index
    %c0_109 = arith.constant 0 : index
    %c0_110 = arith.constant 0 : index
    %264 = vector.load %arg2[%c22, %c0_109, %c0_110] : memref<24x32x16xf32, #tpu.memory_space<vmem>>, vector<1x32x16xf32>
    %265 = vector.shape_cast %264 : vector<1x32x16xf32> to vector<32x16xf32>
    %cst_111 = arith.constant dense<0.000000e+00> : vector<16x16xf32>
    %266 = tpu.matmul %2, %265, %cst_111 {dimension_numbers = #tpu.dot_dimension_numbers<[1], [0], [0], [1], [0, 0, 1, 1], [], []>, precision = #tpu.contract_precision<fp32>} : vector<16x32xf32>, vector<32x16xf32>, vector<16x16xf32> -> vector<16x16xf32>
    %267 = vector.extract_strided_slice %6 {offsets = [22, 0], sizes = [1, 16], strides = [1, 1]} : vector<34x64xf32> to vector<1x16xf32>
    %268 = vector.broadcast %267 : vector<1x16xf32> to vector<16x16xf32>
    %269 = arith.addf %266, %268 : vector<16x16xf32>
    %c23 = arith.constant 23 : index
    %c0_112 = arith.constant 0 : index
    %c0_113 = arith.constant 0 : index
    %270 = vector.load %arg2[%c23, %c0_112, %c0_113] : memref<24x32x16xf32, #tpu.memory_space<vmem>>, vector<1x32x16xf32>
    %271 = vector.shape_cast %270 : vector<1x32x16xf32> to vector<32x16xf32>
    %cst_114 = arith.constant dense<0.000000e+00> : vector<16x16xf32>
    %272 = tpu.matmul %2, %271, %cst_114 {dimension_numbers = #tpu.dot_dimension_numbers<[1], [0], [0], [1], [0, 0, 1, 1], [], []>, precision = #tpu.contract_precision<fp32>} : vector<16x32xf32>, vector<32x16xf32>, vector<16x16xf32> -> vector<16x16xf32>
    %273 = vector.extract_strided_slice %6 {offsets = [23, 0], sizes = [1, 16], strides = [1, 1]} : vector<34x64xf32> to vector<1x16xf32>
    %274 = vector.broadcast %273 : vector<1x16xf32> to vector<16x16xf32>
    %275 = arith.addf %272, %274 : vector<16x16xf32>
    %276 = vector.extract_strided_slice %201 {offsets = [0, 0], sizes = [8, 8], strides = [1, 1]} : vector<16x8xf32> to vector<8x8xf32>
    %277 = vector.extract_strided_slice %209 {offsets = [0, 0], sizes = [8, 16], strides = [1, 1]} : vector<16x16xf32> to vector<8x16xf32>
    %278 = vector.extract_strided_slice %233 {offsets = [0, 0], sizes = [8, 16], strides = [1, 1]} : vector<16x16xf32> to vector<8x16xf32>
    %cst_115 = arith.constant dense<0.000000e+00> : vector<8x8xf32>
    %279 = tpu.matmul %277, %278, %cst_115 {dimension_numbers = #tpu.dot_dimension_numbers<[1], [1], [0], [0], [0, 0, 1, 0], [], []>, precision = #tpu.contract_precision<fp32>} : vector<8x16xf32>, vector<8x16xf32>, vector<8x8xf32> -> vector<8x8xf32>
    %280 = arith.addf %279, %276 : vector<8x8xf32>
    %281 = vector.extract_strided_slice %215 {offsets = [0, 0], sizes = [8, 16], strides = [1, 1]} : vector<16x16xf32> to vector<8x16xf32>
    %282 = vector.extract_strided_slice %239 {offsets = [0, 0], sizes = [8, 16], strides = [1, 1]} : vector<16x16xf32> to vector<8x16xf32>
    %cst_116 = arith.constant dense<0.000000e+00> : vector<8x8xf32>
    %283 = tpu.matmul %281, %282, %cst_116 {dimension_numbers = #tpu.dot_dimension_numbers<[1], [1], [0], [0], [0, 0, 1, 0], [], []>, precision = #tpu.contract_precision<fp32>} : vector<8x16xf32>, vector<8x16xf32>, vector<8x8xf32> -> vector<8x8xf32>
    %284 = arith.addf %283, %276 : vector<8x8xf32>
    %285 = vector.extract_strided_slice %221 {offsets = [0, 0], sizes = [8, 16], strides = [1, 1]} : vector<16x16xf32> to vector<8x16xf32>
    %286 = vector.extract_strided_slice %245 {offsets = [0, 0], sizes = [8, 16], strides = [1, 1]} : vector<16x16xf32> to vector<8x16xf32>
    %cst_117 = arith.constant dense<0.000000e+00> : vector<8x8xf32>
    %287 = tpu.matmul %285, %286, %cst_117 {dimension_numbers = #tpu.dot_dimension_numbers<[1], [1], [0], [0], [0, 0, 1, 0], [], []>, precision = #tpu.contract_precision<fp32>} : vector<8x16xf32>, vector<8x16xf32>, vector<8x8xf32> -> vector<8x8xf32>
    %288 = arith.addf %287, %276 : vector<8x8xf32>
    %289 = vector.extract_strided_slice %227 {offsets = [0, 0], sizes = [8, 16], strides = [1, 1]} : vector<16x16xf32> to vector<8x16xf32>
    %290 = vector.extract_strided_slice %251 {offsets = [0, 0], sizes = [8, 16], strides = [1, 1]} : vector<16x16xf32> to vector<8x16xf32>
    %cst_118 = arith.constant dense<0.000000e+00> : vector<8x8xf32>
    %291 = tpu.matmul %289, %290, %cst_118 {dimension_numbers = #tpu.dot_dimension_numbers<[1], [1], [0], [0], [0, 0, 1, 0], [], []>, precision = #tpu.contract_precision<fp32>} : vector<8x16xf32>, vector<8x16xf32>, vector<8x8xf32> -> vector<8x8xf32>
    %292 = arith.addf %291, %276 : vector<8x8xf32>
    %293 = vector.extract_strided_slice %201 {offsets = [8, 0], sizes = [8, 8], strides = [1, 1]} : vector<16x8xf32> to vector<8x8xf32>
    %294 = vector.extract_strided_slice %209 {offsets = [8, 0], sizes = [8, 16], strides = [1, 1]} : vector<16x16xf32> to vector<8x16xf32>
    %295 = vector.extract_strided_slice %233 {offsets = [8, 0], sizes = [8, 16], strides = [1, 1]} : vector<16x16xf32> to vector<8x16xf32>
    %cst_119 = arith.constant dense<0.000000e+00> : vector<8x8xf32>
    %296 = tpu.matmul %294, %295, %cst_119 {dimension_numbers = #tpu.dot_dimension_numbers<[1], [1], [0], [0], [0, 0, 1, 0], [], []>, precision = #tpu.contract_precision<fp32>} : vector<8x16xf32>, vector<8x16xf32>, vector<8x8xf32> -> vector<8x8xf32>
    %297 = arith.addf %296, %293 : vector<8x8xf32>
    %298 = vector.extract_strided_slice %215 {offsets = [8, 0], sizes = [8, 16], strides = [1, 1]} : vector<16x16xf32> to vector<8x16xf32>
    %299 = vector.extract_strided_slice %239 {offsets = [8, 0], sizes = [8, 16], strides = [1, 1]} : vector<16x16xf32> to vector<8x16xf32>
    %cst_120 = arith.constant dense<0.000000e+00> : vector<8x8xf32>
    %300 = tpu.matmul %298, %299, %cst_120 {dimension_numbers = #tpu.dot_dimension_numbers<[1], [1], [0], [0], [0, 0, 1, 0], [], []>, precision = #tpu.contract_precision<fp32>} : vector<8x16xf32>, vector<8x16xf32>, vector<8x8xf32> -> vector<8x8xf32>
    %301 = arith.addf %300, %293 : vector<8x8xf32>
    %302 = vector.extract_strided_slice %221 {offsets = [8, 0], sizes = [8, 16], strides = [1, 1]} : vector<16x16xf32> to vector<8x16xf32>
    %303 = vector.extract_strided_slice %245 {offsets = [8, 0], sizes = [8, 16], strides = [1, 1]} : vector<16x16xf32> to vector<8x16xf32>
    %cst_121 = arith.constant dense<0.000000e+00> : vector<8x8xf32>
    %304 = tpu.matmul %302, %303, %cst_121 {dimension_numbers = #tpu.dot_dimension_numbers<[1], [1], [0], [0], [0, 0, 1, 0], [], []>, precision = #tpu.contract_precision<fp32>} : vector<8x16xf32>, vector<8x16xf32>, vector<8x8xf32> -> vector<8x8xf32>
    %305 = arith.addf %304, %293 : vector<8x8xf32>
    %306 = vector.extract_strided_slice %227 {offsets = [8, 0], sizes = [8, 16], strides = [1, 1]} : vector<16x16xf32> to vector<8x16xf32>
    %307 = vector.extract_strided_slice %251 {offsets = [8, 0], sizes = [8, 16], strides = [1, 1]} : vector<16x16xf32> to vector<8x16xf32>
    %cst_122 = arith.constant dense<0.000000e+00> : vector<8x8xf32>
    %308 = tpu.matmul %306, %307, %cst_122 {dimension_numbers = #tpu.dot_dimension_numbers<[1], [1], [0], [0], [0, 0, 1, 0], [], []>, precision = #tpu.contract_precision<fp32>} : vector<8x16xf32>, vector<8x16xf32>, vector<8x8xf32> -> vector<8x8xf32>
    %309 = arith.addf %308, %293 : vector<8x8xf32>
    %310 = tpu.concatenate %280, %284, %288, %292, %297, %301, %305, %309 in 0 : vector<8x8xf32>, vector<8x8xf32>, vector<8x8xf32>, vector<8x8xf32>, vector<8x8xf32>, vector<8x8xf32>, vector<8x8xf32>, vector<8x8xf32> -> vector<64x8xf32>
    %cst_123 = arith.constant dense<0xFF800000> : vector<64xf32>
    %311 = vector.multi_reduction <maximumf>, %310, %cst_123 [1] : vector<64x8xf32> to vector<64xf32>
    %312 = vector.shape_cast %311 : vector<64xf32> to vector<64x1xf32>
    %313 = vector.broadcast %312 : vector<64x1xf32> to vector<64x8xf32>
    %314 = arith.subf %310, %313 : vector<64x8xf32>
    %315 = math.exp %314 : vector<64x8xf32>
    %cst_124 = arith.constant dense<0.000000e+00> : vector<64xf32>
    %316 = vector.multi_reduction <add>, %315, %cst_124 [1] : vector<64x8xf32> to vector<64xf32>
    %317 = vector.shape_cast %316 : vector<64xf32> to vector<64x1xf32>
    %318 = vector.broadcast %317 : vector<64x1xf32> to vector<64x8xf32>
    %319 = arith.divf %315, %318 : vector<64x8xf32>
    %320 = vector.extract_strided_slice %319 {offsets = [0, 0], sizes = [8, 8], strides = [1, 1]} : vector<64x8xf32> to vector<8x8xf32>
    %321 = vector.extract_strided_slice %257 {offsets = [0, 0], sizes = [8, 16], strides = [1, 1]} : vector<16x16xf32> to vector<8x16xf32>
    %cst_125 = arith.constant dense<0.000000e+00> : vector<8x16xf32>
    %322 = tpu.matmul %320, %321, %cst_125 {dimension_numbers = #tpu.dot_dimension_numbers<[1], [0], [0], [1], [0, 0, 1, 1], [], []>, precision = #tpu.contract_precision<fp32>} : vector<8x8xf32>, vector<8x16xf32>, vector<8x16xf32> -> vector<8x16xf32>
    %323 = vector.extract_strided_slice %203 {offsets = [0, 0], sizes = [16, 32], strides = [1, 1]} : vector<64x32xf32> to vector<16x32xf32>
    %cst_126 = arith.constant dense<0.000000e+00> : vector<8x32xf32>
    %324 = tpu.matmul %322, %323, %cst_126 {dimension_numbers = #tpu.dot_dimension_numbers<[1], [0], [0], [1], [0, 0, 1, 1], [], []>, precision = #tpu.contract_precision<fp32>} : vector<8x16xf32>, vector<16x32xf32>, vector<8x32xf32> -> vector<8x32xf32>
    %325 = vector.extract_strided_slice %319 {offsets = [8, 0], sizes = [8, 8], strides = [1, 1]} : vector<64x8xf32> to vector<8x8xf32>
    %326 = vector.extract_strided_slice %263 {offsets = [0, 0], sizes = [8, 16], strides = [1, 1]} : vector<16x16xf32> to vector<8x16xf32>
    %cst_127 = arith.constant dense<0.000000e+00> : vector<8x16xf32>
    %327 = tpu.matmul %325, %326, %cst_127 {dimension_numbers = #tpu.dot_dimension_numbers<[1], [0], [0], [1], [0, 0, 1, 1], [], []>, precision = #tpu.contract_precision<fp32>} : vector<8x8xf32>, vector<8x16xf32>, vector<8x16xf32> -> vector<8x16xf32>
    %328 = vector.extract_strided_slice %203 {offsets = [16, 0], sizes = [16, 32], strides = [1, 1]} : vector<64x32xf32> to vector<16x32xf32>
    %cst_128 = arith.constant dense<0.000000e+00> : vector<8x32xf32>
    %329 = tpu.matmul %327, %328, %cst_128 {dimension_numbers = #tpu.dot_dimension_numbers<[1], [0], [0], [1], [0, 0, 1, 1], [], []>, precision = #tpu.contract_precision<fp32>} : vector<8x16xf32>, vector<16x32xf32>, vector<8x32xf32> -> vector<8x32xf32>
    %330 = arith.addf %324, %329 : vector<8x32xf32>
    %331 = vector.extract_strided_slice %319 {offsets = [16, 0], sizes = [8, 8], strides = [1, 1]} : vector<64x8xf32> to vector<8x8xf32>
    %332 = vector.extract_strided_slice %269 {offsets = [0, 0], sizes = [8, 16], strides = [1, 1]} : vector<16x16xf32> to vector<8x16xf32>
    %cst_129 = arith.constant dense<0.000000e+00> : vector<8x16xf32>
    %333 = tpu.matmul %331, %332, %cst_129 {dimension_numbers = #tpu.dot_dimension_numbers<[1], [0], [0], [1], [0, 0, 1, 1], [], []>, precision = #tpu.contract_precision<fp32>} : vector<8x8xf32>, vector<8x16xf32>, vector<8x16xf32> -> vector<8x16xf32>
    %334 = vector.extract_strided_slice %203 {offsets = [32, 0], sizes = [16, 32], strides = [1, 1]} : vector<64x32xf32> to vector<16x32xf32>
    %cst_130 = arith.constant dense<0.000000e+00> : vector<8x32xf32>
    %335 = tpu.matmul %333, %334, %cst_130 {dimension_numbers = #tpu.dot_dimension_numbers<[1], [0], [0], [1], [0, 0, 1, 1], [], []>, precision = #tpu.contract_precision<fp32>} : vector<8x16xf32>, vector<16x32xf32>, vector<8x32xf32> -> vector<8x32xf32>
    %336 = arith.addf %330, %335 : vector<8x32xf32>
    %337 = vector.extract_strided_slice %319 {offsets = [24, 0], sizes = [8, 8], strides = [1, 1]} : vector<64x8xf32> to vector<8x8xf32>
    %338 = vector.extract_strided_slice %275 {offsets = [0, 0], sizes = [8, 16], strides = [1, 1]} : vector<16x16xf32> to vector<8x16xf32>
    %cst_131 = arith.constant dense<0.000000e+00> : vector<8x16xf32>
    %339 = tpu.matmul %337, %338, %cst_131 {dimension_numbers = #tpu.dot_dimension_numbers<[1], [0], [0], [1], [0, 0, 1, 1], [], []>, precision = #tpu.contract_precision<fp32>} : vector<8x8xf32>, vector<8x16xf32>, vector<8x16xf32> -> vector<8x16xf32>
    %340 = vector.extract_strided_slice %203 {offsets = [48, 0], sizes = [16, 32], strides = [1, 1]} : vector<64x32xf32> to vector<16x32xf32>
    %cst_132 = arith.constant dense<0.000000e+00> : vector<8x32xf32>
    %341 = tpu.matmul %339, %340, %cst_132 {dimension_numbers = #tpu.dot_dimension_numbers<[1], [0], [0], [1], [0, 0, 1, 1], [], []>, precision = #tpu.contract_precision<fp32>} : vector<8x16xf32>, vector<16x32xf32>, vector<8x32xf32> -> vector<8x32xf32>
    %342 = arith.addf %336, %341 : vector<8x32xf32>
    %343 = vector.extract_strided_slice %319 {offsets = [32, 0], sizes = [8, 8], strides = [1, 1]} : vector<64x8xf32> to vector<8x8xf32>
    %344 = vector.extract_strided_slice %257 {offsets = [8, 0], sizes = [8, 16], strides = [1, 1]} : vector<16x16xf32> to vector<8x16xf32>
    %cst_133 = arith.constant dense<0.000000e+00> : vector<8x16xf32>
    %345 = tpu.matmul %343, %344, %cst_133 {dimension_numbers = #tpu.dot_dimension_numbers<[1], [0], [0], [1], [0, 0, 1, 1], [], []>, precision = #tpu.contract_precision<fp32>} : vector<8x8xf32>, vector<8x16xf32>, vector<8x16xf32> -> vector<8x16xf32>
    %346 = vector.extract_strided_slice %203 {offsets = [0, 0], sizes = [16, 32], strides = [1, 1]} : vector<64x32xf32> to vector<16x32xf32>
    %cst_134 = arith.constant dense<0.000000e+00> : vector<8x32xf32>
    %347 = tpu.matmul %345, %346, %cst_134 {dimension_numbers = #tpu.dot_dimension_numbers<[1], [0], [0], [1], [0, 0, 1, 1], [], []>, precision = #tpu.contract_precision<fp32>} : vector<8x16xf32>, vector<16x32xf32>, vector<8x32xf32> -> vector<8x32xf32>
    %348 = vector.extract_strided_slice %319 {offsets = [40, 0], sizes = [8, 8], strides = [1, 1]} : vector<64x8xf32> to vector<8x8xf32>
    %349 = vector.extract_strided_slice %263 {offsets = [8, 0], sizes = [8, 16], strides = [1, 1]} : vector<16x16xf32> to vector<8x16xf32>
    %cst_135 = arith.constant dense<0.000000e+00> : vector<8x16xf32>
    %350 = tpu.matmul %348, %349, %cst_135 {dimension_numbers = #tpu.dot_dimension_numbers<[1], [0], [0], [1], [0, 0, 1, 1], [], []>, precision = #tpu.contract_precision<fp32>} : vector<8x8xf32>, vector<8x16xf32>, vector<8x16xf32> -> vector<8x16xf32>
    %351 = vector.extract_strided_slice %203 {offsets = [16, 0], sizes = [16, 32], strides = [1, 1]} : vector<64x32xf32> to vector<16x32xf32>
    %cst_136 = arith.constant dense<0.000000e+00> : vector<8x32xf32>
    %352 = tpu.matmul %350, %351, %cst_136 {dimension_numbers = #tpu.dot_dimension_numbers<[1], [0], [0], [1], [0, 0, 1, 1], [], []>, precision = #tpu.contract_precision<fp32>} : vector<8x16xf32>, vector<16x32xf32>, vector<8x32xf32> -> vector<8x32xf32>
    %353 = arith.addf %347, %352 : vector<8x32xf32>
    %354 = vector.extract_strided_slice %319 {offsets = [48, 0], sizes = [8, 8], strides = [1, 1]} : vector<64x8xf32> to vector<8x8xf32>
    %355 = vector.extract_strided_slice %269 {offsets = [8, 0], sizes = [8, 16], strides = [1, 1]} : vector<16x16xf32> to vector<8x16xf32>
    %cst_137 = arith.constant dense<0.000000e+00> : vector<8x16xf32>
    %356 = tpu.matmul %354, %355, %cst_137 {dimension_numbers = #tpu.dot_dimension_numbers<[1], [0], [0], [1], [0, 0, 1, 1], [], []>, precision = #tpu.contract_precision<fp32>} : vector<8x8xf32>, vector<8x16xf32>, vector<8x16xf32> -> vector<8x16xf32>
    %357 = vector.extract_strided_slice %203 {offsets = [32, 0], sizes = [16, 32], strides = [1, 1]} : vector<64x32xf32> to vector<16x32xf32>
    %cst_138 = arith.constant dense<0.000000e+00> : vector<8x32xf32>
    %358 = tpu.matmul %356, %357, %cst_138 {dimension_numbers = #tpu.dot_dimension_numbers<[1], [0], [0], [1], [0, 0, 1, 1], [], []>, precision = #tpu.contract_precision<fp32>} : vector<8x16xf32>, vector<16x32xf32>, vector<8x32xf32> -> vector<8x32xf32>
    %359 = arith.addf %353, %358 : vector<8x32xf32>
    %360 = vector.extract_strided_slice %319 {offsets = [56, 0], sizes = [8, 8], strides = [1, 1]} : vector<64x8xf32> to vector<8x8xf32>
    %361 = vector.extract_strided_slice %275 {offsets = [8, 0], sizes = [8, 16], strides = [1, 1]} : vector<16x16xf32> to vector<8x16xf32>
    %cst_139 = arith.constant dense<0.000000e+00> : vector<8x16xf32>
    %362 = tpu.matmul %360, %361, %cst_139 {dimension_numbers = #tpu.dot_dimension_numbers<[1], [0], [0], [1], [0, 0, 1, 1], [], []>, precision = #tpu.contract_precision<fp32>} : vector<8x8xf32>, vector<8x16xf32>, vector<8x16xf32> -> vector<8x16xf32>
    %363 = vector.extract_strided_slice %203 {offsets = [48, 0], sizes = [16, 32], strides = [1, 1]} : vector<64x32xf32> to vector<16x32xf32>
    %cst_140 = arith.constant dense<0.000000e+00> : vector<8x32xf32>
    %364 = tpu.matmul %362, %363, %cst_140 {dimension_numbers = #tpu.dot_dimension_numbers<[1], [0], [0], [1], [0, 0, 1, 1], [], []>, precision = #tpu.contract_precision<fp32>} : vector<8x16xf32>, vector<16x32xf32>, vector<8x32xf32> -> vector<8x32xf32>
    %365 = arith.addf %359, %364 : vector<8x32xf32>
    %366 = tpu.concatenate %342, %365 in 0 : vector<8x32xf32>, vector<8x32xf32> -> vector<16x32xf32>
    %367 = vector.extract_strided_slice %6 {offsets = [25, 0], sizes = [1, 32], strides = [1, 1]} : vector<34x64xf32> to vector<1x32xf32>
    %368 = vector.broadcast %367 : vector<1x32xf32> to vector<16x32xf32>
    %369 = arith.addf %366, %368 : vector<16x32xf32>
    %370 = arith.addf %200, %369 : vector<16x32xf32>
    %371 = vector.extract_strided_slice %6 {offsets = [30, 0], sizes = [1, 32], strides = [1, 1]} : vector<34x64xf32> to vector<1x32xf32>
    %372 = vector.extract_strided_slice %6 {offsets = [31, 0], sizes = [1, 32], strides = [1, 1]} : vector<34x64xf32> to vector<1x32xf32>
    %cst_141 = arith.constant dense<0.000000e+00> : vector<16xf32>
    %373 = vector.multi_reduction <add>, %370, %cst_141 [1] : vector<16x32xf32> to vector<16xf32>
    %374 = vector.shape_cast %373 : vector<16xf32> to vector<16x1xf32>
    %cst_142 = arith.constant 3.200000e+01 : f32
    %375 = vector.broadcast %cst_142 : f32 to vector<16x1xf32>
    %376 = arith.divf %374, %375 : vector<16x1xf32>
    %377 = vector.broadcast %376 : vector<16x1xf32> to vector<16x32xf32>
    %378 = arith.subf %370, %377 : vector<16x32xf32>
    %379 = arith.mulf %378, %378 : vector<16x32xf32>
    %cst_143 = arith.constant dense<0.000000e+00> : vector<16xf32>
    %380 = vector.multi_reduction <add>, %379, %cst_143 [1] : vector<16x32xf32> to vector<16xf32>
    %381 = vector.shape_cast %380 : vector<16xf32> to vector<16x1xf32>
    %cst_144 = arith.constant 3.200000e+01 : f32
    %382 = vector.broadcast %cst_144 : f32 to vector<16x1xf32>
    %383 = arith.divf %381, %382 : vector<16x1xf32>
    %384 = vector.broadcast %376 : vector<16x1xf32> to vector<16x32xf32>
    %385 = arith.subf %370, %384 : vector<16x32xf32>
    %cst_145 = arith.constant 9.99999974E-6 : f32
    %386 = vector.broadcast %cst_145 : f32 to vector<16x1xf32>
    %387 = arith.addf %383, %386 : vector<16x1xf32>
    %388 = math.rsqrt %387 : vector<16x1xf32>
    %389 = vector.broadcast %388 : vector<16x1xf32> to vector<16x32xf32>
    %390 = arith.mulf %385, %389 : vector<16x32xf32>
    %391 = vector.broadcast %371 : vector<1x32xf32> to vector<16x32xf32>
    %392 = arith.mulf %390, %391 : vector<16x32xf32>
    %393 = vector.broadcast %372 : vector<1x32xf32> to vector<16x32xf32>
    %394 = arith.addf %392, %393 : vector<16x32xf32>
    %c3_146 = arith.constant 3 : index
    %c0_147 = arith.constant 0 : index
    %c0_148 = arith.constant 0 : index
    %395 = vector.load %arg3[%c3_146, %c0_147, %c0_148] : memref<4x64x32xf32, #tpu.memory_space<vmem>>, vector<1x64x32xf32>
    %396 = vector.shape_cast %395 : vector<1x64x32xf32> to vector<64x32xf32>
    %cst_149 = arith.constant dense<0.000000e+00> : vector<16x64xf32>
    %397 = tpu.matmul %394, %396, %cst_149 {dimension_numbers = #tpu.dot_dimension_numbers<[1], [1], [0], [0], [0, 0, 1, 0], [], []>, precision = #tpu.contract_precision<fp32>} : vector<16x32xf32>, vector<64x32xf32>, vector<16x64xf32> -> vector<16x64xf32>
    %398 = vector.extract_strided_slice %6 {offsets = [26, 0], sizes = [1, 64], strides = [1, 1]} : vector<34x64xf32> to vector<1x64xf32>
    %399 = vector.broadcast %398 : vector<1x64xf32> to vector<16x64xf32>
    %400 = arith.addf %397, %399 : vector<16x64xf32>
    %cst_150 = arith.constant 0.000000e+00 : f32
    %401 = vector.broadcast %cst_150 : f32 to vector<16x64xf32>
    %402 = arith.maximumf %400, %401 : vector<16x64xf32>
    %c2_151 = arith.constant 2 : index
    %c0_152 = arith.constant 0 : index
    %c0_153 = arith.constant 0 : index
    %403 = vector.load %arg3[%c2_151, %c0_152, %c0_153] : memref<4x64x32xf32, #tpu.memory_space<vmem>>, vector<1x64x32xf32>
    %404 = vector.shape_cast %403 : vector<1x64x32xf32> to vector<64x32xf32>
    %cst_154 = arith.constant dense<0.000000e+00> : vector<16x32xf32>
    %405 = tpu.matmul %402, %404, %cst_154 {dimension_numbers = #tpu.dot_dimension_numbers<[1], [0], [0], [1], [0, 0, 1, 1], [], []>, precision = #tpu.contract_precision<fp32>} : vector<16x64xf32>, vector<64x32xf32>, vector<16x32xf32> -> vector<16x32xf32>
    %406 = vector.extract_strided_slice %6 {offsets = [27, 0], sizes = [1, 32], strides = [1, 1]} : vector<34x64xf32> to vector<1x32xf32>
    %407 = vector.broadcast %406 : vector<1x32xf32> to vector<16x32xf32>
    %408 = arith.addf %405, %407 : vector<16x32xf32>
    %409 = arith.addf %394, %408 : vector<16x32xf32>
    %410 = vector.extract_strided_slice %6 {offsets = [32, 0], sizes = [1, 32], strides = [1, 1]} : vector<34x64xf32> to vector<1x32xf32>
    %411 = vector.extract_strided_slice %6 {offsets = [33, 0], sizes = [1, 32], strides = [1, 1]} : vector<34x64xf32> to vector<1x32xf32>
    %cst_155 = arith.constant dense<0.000000e+00> : vector<16xf32>
    %412 = vector.multi_reduction <add>, %409, %cst_155 [1] : vector<16x32xf32> to vector<16xf32>
    %413 = vector.shape_cast %412 : vector<16xf32> to vector<16x1xf32>
    %cst_156 = arith.constant 3.200000e+01 : f32
    %414 = vector.broadcast %cst_156 : f32 to vector<16x1xf32>
    %415 = arith.divf %413, %414 : vector<16x1xf32>
    %416 = vector.broadcast %415 : vector<16x1xf32> to vector<16x32xf32>
    %417 = arith.subf %409, %416 : vector<16x32xf32>
    %418 = arith.mulf %417, %417 : vector<16x32xf32>
    %cst_157 = arith.constant dense<0.000000e+00> : vector<16xf32>
    %419 = vector.multi_reduction <add>, %418, %cst_157 [1] : vector<16x32xf32> to vector<16xf32>
    %420 = vector.shape_cast %419 : vector<16xf32> to vector<16x1xf32>
    %cst_158 = arith.constant 3.200000e+01 : f32
    %421 = vector.broadcast %cst_158 : f32 to vector<16x1xf32>
    %422 = arith.divf %420, %421 : vector<16x1xf32>
    %423 = vector.broadcast %415 : vector<16x1xf32> to vector<16x32xf32>
    %424 = arith.subf %409, %423 : vector<16x32xf32>
    %cst_159 = arith.constant 9.99999974E-6 : f32
    %425 = vector.broadcast %cst_159 : f32 to vector<16x1xf32>
    %426 = arith.addf %422, %425 : vector<16x1xf32>
    %427 = math.rsqrt %426 : vector<16x1xf32>
    %428 = vector.broadcast %427 : vector<16x1xf32> to vector<16x32xf32>
    %429 = arith.mulf %424, %428 : vector<16x32xf32>
    %430 = vector.broadcast %410 : vector<1x32xf32> to vector<16x32xf32>
    %431 = arith.mulf %429, %430 : vector<16x32xf32>
    %432 = vector.broadcast %411 : vector<1x32xf32> to vector<16x32xf32>
    %433 = arith.addf %431, %432 : vector<16x32xf32>
    %c0_160 = arith.constant 0 : index
    %c0_161 = arith.constant 0 : index
    %434 = vector.load %arg5[%c0_160, %c0_161] : memref<16x32xf32, #tpu.memory_space<vmem>>, vector<16x32xf32>
    tpu.vector_store %arg5[%c0_160, %c0_161], %433 {strides = array<i32>} : memref<16x32xf32, #tpu.memory_space<vmem>>, vector<16x32xf32>,
    return
  }
}

</mosaic_0001>

<bundles_post_ra>
// kernel: decoder_block.1
= control target key start
LH: loop header
LB: loop body
LE: loop exit
PB: predicated region body
PF: predicated region fallthrough
CT: control target
= control target key end

     0   :  { %vm54_vm0 = vcmask 261120   ;;  %s47263_s0 = inlined_call_operand.vmem [shape: f32[32,32], index: 0, kind: input, shape index: {}]   ;;  %s47264_s1 = inlined_call_operand.vmem [shape: f32[32,8], index: 1, kind: input, shape index: {}]   ;;  %s47265_s2 = inlined_call_operand.vmem [shape: f32[24,32,16], index: 2, kind: input, shape index: {}]   ;;  %s47266_s3 = inlined_call_operand.vmem [shape: f32[4,64,32], index: 3, kind: input, shape index: {}]   ;;  %s47267_s4 = inlined_call_operand.vmem [shape: f32[34,64], index: 4, kind: input, shape index: {}]   ;;  %s47268_s5 = inlined_call_operand.hbm [shape: f32[16,32], index: 5, kind: output, shape index: {}]  }
   0x1   :  { %v49_v0 = vld [vmem:[%s47265_s2 + $0x18] sm:$0xff]  ;;  %v48_v1 = vld [vmem:[%s47265_s2 + $0x10] sm:$0xff]  ;;  %v47_v2 = vld [vmem:[%s47265_s2 + $0x8] sm:$0xff] }
   0x2   :  { %v41695_v3 = vand.u32 4294901760, %v49_v0  ;;  %v41697_v4 = vand.u32 4294901760, %v48_v1  ;;  %v41699_v5 = vand.u32 4294901760, %v47_v2  ;;  %v46_v6 = vld [vmem:[%s47265_s2] sm:$0xff]  ;;  %v22_v8 = vld [vmem:[%s47263_s0 + $0x8] sm:$0xff] }
   0x3   :  { %v21_v7 = vld [vmem:[%s47263_s0] sm:$0xff]  ;;  %v41710_v9 = vand.u32 4294901760, %v46_v6  ;;  %v59_v11 = vsel %vm54_vm0, %v22_v8, 0 }
   0x4   :  { %v56_v10 = vsel %vm54_vm0, %v21_v7, 0  ;;  %38097 = vmatprep.subr.mxu0 %v41695_v3  ;;  %v176_v12 = vsub.f32 %v49_v0, %v41695_v3  ;;  %v183_v14 = vsub.f32 %v48_v1, %v41697_v4  ;;  %v41719_v15 = vand.u32 4294901760, %v59_v11 }
   0x5   :  { %v41716_v13 = vand.u32 4294901760, %v56_v10  ;;  %38098 = vmatpush3.msra.mxu0 %v41695_v3  ;;  %v190_v16 = vsub.f32 %v47_v2, %v41699_v5  ;;  %v197_v17 = vsub.f32 %v46_v6, %v41710_v9 }
   0x6   :  { %47313 = vst [vmem:[#allocation6_spill] sm:$0xff] %v41719_v15  ;;  %38099 = vmatprep.subr.mxu0 %v41697_v4  ;;  %v177_v18 = vand.u32 4294901760, %v176_v12  ;;  %v184_v20 = vand.u32 4294901760, %v183_v14  ;;  %v41729_v21 = vsub.f32 %v59_v11, %v41719_v15 }
   0x7   :  { %47312 = vst [vmem:[#allocation5_spill] sm:$0xff] %v41716_v13  ;;  %v41726_v19 = vsub.f32 %v56_v10, %v41716_v13  ;;  %38116 = vmatprep.mubr.f32.mxu1 %v41716_v13  ;;  %38100 = vmatpush3.msra.mxu0 %v41697_v4  ;;  %v41733_v22 = vand.u32 4294901760, %v190_v16  ;;  %v41735_v23 = vand.u32 4294901760, %v197_v17 }
   0x8   :  { %47315 = vst [vmem:[#allocation8_spill] sm:$0xff] %v41729_v21  ;;  %38101 = vmatprep.subr.mxu0 %v41699_v5  ;;  %v178_v24 = vsub.f32 %v176_v12, %v177_v18  ;;  %v185_v26 = vsub.f32 %v183_v14, %v184_v20  ;;  %v41742_v27 = vand.u32 4294901760, %v41729_v21 }
   0x9   :  { %47314 = vst [vmem:[#allocation7_spill] sm:$0xff] %v41726_v19  ;;  %v41739_v25 = vand.u32 4294901760, %v41726_v19 }
   0xa   :  { %47317 = vst [vmem:[#allocation10_spill] sm:$0xff] %v41742_v27 }
   0xb   :  { %47316 = vst [vmem:[#allocation9_spill] sm:$0xff] %v41739_v25 }
   0xc   :  { %10 = vsyncpa [#allocation3], 0  ;;  %38102 = vmatpush3.msra.mxu0 %v41699_v5  ;;  %v192_v28 = vsub.f32 %v190_v16, %v41733_v22  ;;  %v199_v29 = vsub.f32 %v197_v17, %v41735_v23  ;;  %v179_v30 = vand.u32 4294901760, %v178_v24  ;;  %v133_v31 = vsub.f32 %v41726_v19, %v41739_v25  ;;  %v36328_v38 = vld [vmem:[%s47265_s2 + $0x38] sm:$0xff]  ;;  %v36327_v39 = vld [vmem:[%s47265_s2 + $0x30] sm:$0xff]  ;;  %s41653_s30 = smov [#allocation2]  }
   0xd   :  { %38103 = vmatprep.subr.mxu0 %v41710_v9  ;;  %v186_v32 = vand.u32 4294901760, %v185_v26  ;;  %v143_v33 = vsub.f32 %v41729_v21, %v41742_v27  ;;  %v41767_v40 = vand.u32 4294901760, %v36328_v38  ;;  %v41772_v41 = vand.u32 4294901760, %v36327_v39  ;;  %v36326_v42 = vld [vmem:[%s47265_s2 + $0x28] sm:$0xff]  ;;  %v36325_v43 = vld [vmem:[%s47265_s2 + $0x20] sm:$0xff]  ;;  %v36332_v62 = vld [vmem:[%s47265_s2 + $0x58] sm:$0xff] }
   0xe   :  { %38104 = vmatpush3.msra.mxu0 %v41710_v9  ;;  %38108 = vmatprep.subr.mxu1 %v179_v30  ;;  %v41753_v34 = vand.u32 4294901760, %v133_v31  ;;  %v193_v36 = vand.u32 4294901760, %v192_v28  ;;  %v200_v37 = vand.u32 4294901760, %v199_v29  ;;  %v41784_v45 = vand.u32 4294901760, %v36326_v42  ;;  %v36331_v63 = vld [vmem:[%s47265_s2 + $0x50] sm:$0xff]  ;;  %v36330_v2 = vld [vmem:[%s47265_s2 + $0x48] sm:$0xff] }
   0xf   :  { %38119 = vmatprep.subr.mxu0 %v176_v12  ;;  %v41755_v35 = vand.u32 4294901760, %v143_v33  ;;  %38109 = vmatpush3.msra.mxu1 %v179_v30  ;;  %v713_v44 = vsub.f32 %v36328_v38, %v41767_v40  ;;  %v720_v46 = vsub.f32 %v36327_v39, %v41772_v41  ;;  %v41790_v47 = vand.u32 4294901760, %v36325_v43  ;;  %v36336_v28 = vld [vmem:[%s47265_s2 + $0x78] sm:$0xff]  ;;  %v36335_v29 = vld [vmem:[%s47265_s2 + $0x70] sm:$0xff]  ;;  %v36333_v33 = vld [vmem:[%s47265_s2 + $0x60] sm:$0xff]  ;;  %s36314_s6 = sshll.u32 %s41653_s30, 4  ;;  %s36315_s6 = int_to_ptr.vmem [resolvable:$true] %s36314_s6 }
  0x10   :  { %47318 = vst [vmem:[#allocation11_spill] sm:$0xff] %v41753_v34  ;;  %38105 = vmatprep.mubr.f32.mxu0 %v41753_v34  ;;  %38110 = vmatprep.subr.mxu1 %v186_v32  ;;  %v727_v49 = vsub.f32 %v36326_v42, %v41784_v45  ;;  %v41843_v0 = vand.u32 4294901760, %v36332_v62  ;;  %v41848_v1 = vand.u32 4294901760, %v36331_v63  ;;  %v41923_v30 = vand.u32 4294901760, %v36336_v28  ;;  %p41634_p1 = scmp.lt.s32.totalorder %s36315_s6, %s36315_s6 }
  0x11   :  { %47319 = vst [vmem:[#allocation12_spill] sm:$0xff] %v41755_v35  ;;  %38106 = vmatmul.mubr.f32.vlgmr.msra.gmra.mxu0 %v41755_v35  ;;  %38111 = vmatpush3.msra.mxu1 %v186_v32  ;;  %v41794_v48 = vand.u32 4294901760, %v713_v44  ;;  %v41801_v50 = vand.u32 4294901760, %v720_v46  ;;  %v734_v51 = vsub.f32 %v36325_v43, %v41790_v47  ;;  %v41928_v31 = vand.u32 4294901760, %v36335_v29  ;;  %v36334_v32 = vld [vmem:[%s47265_s2 + $0x68] sm:$0xff] }
  0x12   :  { %38120 = vmatpush3.msra.mxu0 %v176_v12  ;;  %38112 = vmatprep.subr.mxu1 %v193_v36  ;;  %v41811_v53 = vand.u32 4294901760, %v727_v49  ;;  %v1257_v6 = vsub.f32 %v36331_v63, %v41848_v1  ;;  %v41950_v39 = vand.u32 4294901760, %v36333_v33  ;;  %vm6496_vm1 = vcmask 130048  }
  0x13   :  { %38121 = vmatprep.subr.mxu0 %v183_v14  ;;  %38113 = vmatpush3.msra.mxu1 %v193_v36  ;;  %v715_v52 = vsub.f32 %v713_v44, %v41794_v48  ;;  %v722_v54 = vsub.f32 %v720_v46, %v41801_v50  ;;  %v41818_v55 = vand.u32 4294901760, %v734_v51  ;;  %v1787_v36 = vsub.f32 %v36336_v28, %v41923_v30 }
  0x14   :  { %38122 = vmatpush3.msra.mxu0 %v183_v14  ;;  %38114 = vmatprep.subr.mxu1 %v200_v37  ;;  %v729_v57 = vsub.f32 %v727_v49, %v41811_v53  ;;  %v41881_v10 = vand.u32 4294901760, %v1257_v6  ;;  %v1794_v38 = vsub.f32 %v36335_v29, %v41928_v31  ;;  %v1808_v43 = vsub.f32 %v36333_v33, %v41950_v39 }
  0x15   :  { %38123 = vmatprep.subr.mxu0 %v190_v16  ;;  %38115 = vmatpush3.msra.mxu1 %v200_v37  ;;  %v716_v56 = vand.u32 4294901760, %v715_v52  ;;  %v723_v58 = vand.u32 4294901760, %v722_v54  ;;  %v736_v59 = vsub.f32 %v734_v51, %v41818_v55  ;;  %v41943_v37 = vand.u32 4294901760, %v36334_v32  ;;  %v36340_v54 = vld [vmem:[%s47265_s2 + $0x98] sm:$0xff] }
  0x16   :  { %38124 = vmatpush3.msra.mxu0 %v190_v16  ;;  %38117 = vmatmul.mubr.f32.vlgmr.msra.gmra.mxu1 %v41719_v15  ;;  %v730_v60 = vand.u32 4294901760, %v729_v57  ;;  %v1259_v16 = vsub.f32 %v1257_v6, %v41881_v10  ;;  %v41961_v42 = vand.u32 4294901760, %v1794_v38  ;;  %vm41652_vm2 = vmmov 0  }
  0x17   :  { %38125 = vmatprep.subr.mxu0 %v197_v17  ;;  %38130 = vmatprep.subr.mxu1 %v41695_v3  ;;  %v737_v61 = vand.u32 4294901760, %v736_v59  ;;  %v36337_v59 = vld [vmem:[%s47265_s2 + $0x80] sm:$0xff]  ;;  %vm10113_vm3 = vcmask 64512   ;;  %vm35680_vm4 = vcmask 523264  }
  0x18   :  { %38126 = vmatpush3.msra.mxu0 %v197_v17  ;;  %38127 = vmatprep.mubr.f32.mxu0 %v41726_v19  ;;  %v42030_v63 = vand.u32 4294901760, %v36337_v59 }
  0x19   :  { %38131 = vmatpush3.msra.mxu1 %v41695_v3  ;;  %38128 = vmatmul.mubr.f32.vlgmr.msra.gmra.mxu0 %v41729_v21 }
  0x1a   :  { %38132 = vmatprep.subr.mxu1 %v41697_v4  ;;  %38141 = vmatprep.subr.mxu0 %v177_v18 }
  0x1b   :  { %38133 = vmatpush3.msra.mxu1 %v41697_v4  ;;  %38142 = vmatpush3.msra.mxu0 %v177_v18 }
  0x1c   :  { %38134 = vmatprep.subr.mxu1 %v41699_v5  ;;  %38143 = vmatprep.subr.mxu0 %v184_v20 }
  0x1d   :  { %38135 = vmatpush3.msra.mxu1 %v41699_v5  ;;  %38144 = vmatpush3.msra.mxu0 %v184_v20 }
  0x1e   :  { %38136 = vmatprep.subr.mxu1 %v41710_v9  ;;  %38145 = vmatprep.subr.mxu0 %v41733_v22 }
  0x1f   :  { %38137 = vmatpush3.msra.mxu1 %v41710_v9  ;;  %38138 = vmatprep.mubr.f32.mxu1 %v41739_v25 }
  0x20   :  { %38146 = vmatpush3.msra.mxu0 %v41733_v22  ;;  %38139 = vmatmul.mubr.f32.vlgmr.msra.gmra.mxu1 %v41742_v27  ;;  %v1260_v22 = vand.u32 4294901760, %v1259_v16  ;;  %v36344_v16 = vld [vmem:[%s47265_s2 + $0xb8] sm:$0xff] }
  0x21   :  { %38147 = vmatprep.subr.mxu0 %v41735_v23  ;;  %38152 = vmatprep.subr.mxu1 %v41695_v3 }
  0x22   :  { %38148 = vmatpush3.msra.mxu0 %v41735_v23  ;;  %38149 = vmatprep.mubr.f32.mxu0 %v41716_v13 }
  0x23   :  { %38153 = vmatpush3.msra.mxu1 %v41695_v3  ;;  %38150 = vmatmul.mubr.f32.vlgmr.msra.gmra.mxu0 %v41719_v15  ;;  %v36329_v3 = vld [vmem:[%s47265_s2 + $0x40] sm:$0xff] }
  0x24   :  { %38154 = vmatprep.subr.mxu1 %v41697_v4  ;;  %38163 = vmatprep.subr.mxu0 %v41767_v40  ;;  %v41870_v7 = vand.u32 4294901760, %v36329_v3 }
  0x25   :  { %38155 = vmatpush3.msra.mxu1 %v41697_v4  ;;  %38164 = vmatpush3.msra.mxu0 %v41767_v40  ;;  %v1250_v4 = vsub.f32 %v36332_v62, %v41843_v0 }
  0x26   :  { %38156 = vmatprep.subr.mxu1 %v41699_v5  ;;  %38165 = vmatprep.subr.mxu0 %v41772_v41  ;;  %v1271_v11 = vsub.f32 %v36329_v3, %v41870_v7  ;;  %v2345_v3 = vsub.f32 %v36337_v59, %v42030_v63 }
  0x27   :  { %38157 = vmatpush3.msra.mxu1 %v41699_v5  ;;  %38166 = vmatpush3.msra.mxu0 %v41772_v41  ;;  %v41863_v5 = vand.u32 4294901760, %v36330_v2  ;;  %v41874_v8 = vand.u32 4294901760, %v1250_v4 }
  0x28   :  { %38158 = vmatprep.subr.mxu1 %v41710_v9  ;;  %38167 = vmatprep.subr.mxu0 %v41784_v45  ;;  %v41898_v17 = vand.u32 4294901760, %v1271_v11 }
  0x29   :  { %38159 = vmatpush3.msra.mxu1 %v41710_v9  ;;  %38160 = vmatprep.mubr.f32.mxu1 %v41716_v13  ;;  %v1264_v9 = vsub.f32 %v36330_v2, %v41863_v5  ;;  %v1252_v12 = vsub.f32 %v1250_v4, %v41874_v8 }
  0x2a   :  { %38168 = vmatpush3.msra.mxu0 %v41784_v45  ;;  %38161 = vmatmul.mubr.f32.vlgmr.msra.gmra.mxu1 %v41719_v15  ;;  %v1273_v23 = vsub.f32 %v1271_v11, %v41898_v17 }
  0x2b   :  { %38169 = vmatprep.subr.mxu0 %v41790_v47  ;;  %38174 = vmatprep.subr.mxu1 %v716_v56  ;;  %v41891_v14 = vand.u32 4294901760, %v1264_v9  ;;  %v1253_v18 = vand.u32 4294901760, %v1252_v12 }
  0x2c   :  { %38170 = vmatpush3.msra.mxu0 %v41790_v47  ;;  %38175 = vmatpush3.msra.mxu1 %v716_v56  ;;  %v1274_v26 = vand.u32 4294901760, %v1273_v23  ;;  %v42003_v56 = vand.u32 4294901760, %v36340_v54  ;;  %v36341_v23 = vld [vmem:[%s47265_s2 + $0xa0] sm:$0xff] }
  0x2d   :  { %38171 = vmatprep.mubr.f32.mxu0 %v41753_v34  ;;  %38176 = vmatprep.subr.mxu1 %v723_v58  ;;  %v1266_v20 = vsub.f32 %v1264_v9, %v41891_v14  ;;  %v42110_v29 = vand.u32 4294901760, %v36341_v23 }
  0x2e   :  { %38185 = vmatprep.subr.mxu0 %v713_v44  ;;  %38172 = vmatmul.mubr.f32.vlgmr.msra.gmra.mxu0 %v41755_v35 }
  0x2f   :  { %38177 = vmatpush3.msra.mxu1 %v723_v58  ;;  %38186 = vmatpush3.msra.mxu0 %v713_v44  ;;  %v1267_v24 = vand.u32 4294901760, %v1266_v20  ;;  %v36338_v58 = vld [vmem:[%s47265_s2 + $0x88] sm:$0xff]  ;;  %v2882_v33 = vsub.f32 %v36341_v23, %v42110_v29 }
  0x30   :  { %38178 = vmatprep.subr.mxu1 %v730_v60  ;;  %38187 = vmatprep.subr.mxu0 %v720_v46 }
  0x31   :  { %38179 = vmatpush3.msra.mxu1 %v730_v60  ;;  %38188 = vmatpush3.msra.mxu0 %v720_v46  ;;  %v1796_v46 = vsub.f32 %v1794_v38, %v41961_v42  ;;  %v2324_v60 = vsub.f32 %v36340_v54, %v42003_v56 }
  0x32   :  { %38180 = vmatprep.subr.mxu1 %v737_v61  ;;  %38189 = vmatprep.subr.mxu0 %v727_v49 }
  0x33   :  { %38181 = vmatpush3.msra.mxu1 %v737_v61  ;;  %38182 = vmatprep.mubr.f32.mxu1 %v41716_v13  ;;  %v42023_v61 = vand.u32 4294901760, %v36338_v58 }
  0x34   :  { %38190 = vmatpush3.msra.mxu0 %v727_v49  ;;  %38183 = vmatmul.mubr.f32.vlgmr.msra.gmra.mxu1 %v41719_v15 }
  0x35   :  { %38191 = vmatprep.subr.mxu0 %v734_v51  ;;  %38196 = vmatprep.subr.mxu1 %v41767_v40 }
  0x36   :  { %38192 = vmatpush3.msra.mxu0 %v734_v51  ;;  %38193 = vmatprep.mubr.f32.mxu0 %v41726_v19 }
  0x37   :  { %38197 = vmatpush3.msra.mxu1 %v41767_v40  ;;  %38194 = vmatmul.mubr.f32.vlgmr.msra.gmra.mxu0 %v41729_v21 }
  0x38   :  { %38198 = vmatprep.subr.mxu1 %v41772_v41  ;;  %38207 = vmatprep.subr.mxu0 %v41794_v48 }
  0x39   :  { %38199 = vmatpush3.msra.mxu1 %v41772_v41  ;;  %38208 = vmatpush3.msra.mxu0 %v41794_v48 }
  0x3a   :  { %38200 = vmatprep.subr.mxu1 %v41784_v45  ;;  %38209 = vmatprep.subr.mxu0 %v41801_v50 }
  0x3b   :  { %38201 = vmatpush3.msra.mxu1 %v41784_v45  ;;  %38210 = vmatpush3.msra.mxu0 %v41801_v50  ;;  %v1797_v50 = vand.u32 4294901760, %v1796_v46  ;;  %v36348_v46 = vld [vmem:[%s47265_s2 + $0xd8] sm:$0xff] }
  0x3c   :  { %38202 = vmatprep.subr.mxu1 %v41790_v47  ;;  %38211 = vmatprep.subr.mxu0 %v41811_v53 }
  0x3d   :  { %38203 = vmatpush3.msra.mxu1 %v41790_v47  ;;  %38204 = vmatprep.mubr.f32.mxu1 %v41739_v25 }
  0x3e   :  { %38212 = vmatpush3.msra.mxu0 %v41811_v53  ;;  %38205 = vmatmul.mubr.f32.vlgmr.msra.gmra.mxu1 %v41742_v27 }
  0x3f   :  { %38213 = vmatprep.subr.mxu0 %v41818_v55  ;;  %38218 = vmatprep.subr.mxu1 %v41767_v40 }
  0x40   :  { %38214 = vmatpush3.msra.mxu0 %v41818_v55  ;;  %38215 = vmatprep.mubr.f32.mxu0 %v41716_v13  ;;  %v36339_v55 = vld [vmem:[%s47265_s2 + $0x90] sm:$0xff] }
  0x41   :  { %38219 = vmatpush3.msra.mxu1 %v41767_v40  ;;  %38216 = vmatmul.mubr.f32.vlgmr.msra.gmra.mxu0 %v41719_v15  ;;  %v41954_v40 = vand.u32 4294901760, %v1787_v36  ;;  %v42008_v57 = vand.u32 4294901760, %v36339_v55 }
  0x42   :  { %38220 = vmatprep.subr.mxu1 %v41772_v41  ;;  %38229 = vmatprep.subr.mxu0 %v41843_v0 }
  0x43   :  { %38221 = vmatpush3.msra.mxu1 %v41772_v41  ;;  %38230 = vmatpush3.msra.mxu0 %v41843_v0  ;;  %v1801_v41 = vsub.f32 %v36334_v32, %v41943_v37  ;;  %v1789_v44 = vsub.f32 %v1787_v36, %v41954_v40  ;;  %v2331_v62 = vsub.f32 %v36339_v55, %v42008_v57 }
  0x44   :  { %38222 = vmatprep.subr.mxu1 %v41784_v45  ;;  %38231 = vmatprep.subr.mxu0 %v41848_v1 }
  0x45   :  { %38223 = vmatpush3.msra.mxu1 %v41784_v45  ;;  %38232 = vmatpush3.msra.mxu0 %v41848_v1  ;;  %v41971_v45 = vand.u32 4294901760, %v1801_v41  ;;  %v1790_v48 = vand.u32 4294901760, %v1789_v44  ;;  %v42041_v2 = vand.u32 4294901760, %v2331_v62 }
  0x46   :  { %38224 = vmatprep.subr.mxu1 %v41790_v47  ;;  %38233 = vmatprep.subr.mxu0 %v41863_v5 }
  0x47   :  { %38225 = vmatpush3.msra.mxu1 %v41790_v47  ;;  %38226 = vmatprep.mubr.f32.mxu1 %v41716_v13  ;;  %v41978_v47 = vand.u32 4294901760, %v1808_v43  ;;  %v1803_v49 = vsub.f32 %v1801_v41, %v41971_v45 }
  0x48   :  { %38234 = vmatpush3.msra.mxu0 %v41863_v5  ;;  %38227 = vmatmul.mubr.f32.vlgmr.msra.gmra.mxu1 %v41719_v15 }
  0x49   :  { %38235 = vmatprep.subr.mxu0 %v41870_v7  ;;  %38240 = vmatprep.subr.mxu1 %v1253_v18  ;;  %v1810_v51 = vsub.f32 %v1808_v43, %v41978_v47  ;;  %v1804_v52 = vand.u32 4294901760, %v1803_v49  ;;  %v36346_v49 = vld [vmem:[%s47265_s2 + $0xc8] sm:$0xff] }
  0x4a   :  { %38236 = vmatpush3.msra.mxu0 %v41870_v7  ;;  %38241 = vmatpush3.msra.mxu1 %v1253_v18  ;;  %v42083_v18 = vand.u32 4294901760, %v36344_v16 }
  0x4b   :  { %38237 = vmatprep.mubr.f32.mxu0 %v41753_v34  ;;  %38242 = vmatprep.subr.mxu1 %v1260_v22  ;;  %v1811_v53 = vand.u32 4294901760, %v1810_v51  ;;  %v36345_v51 = vld [vmem:[%s47265_s2 + $0xc0] sm:$0xff] }
  0x4c   :  { %38251 = vmatprep.subr.mxu0 %v1250_v4  ;;  %38238 = vmatmul.mubr.f32.vlgmr.msra.gmra.mxu0 %v41755_v35  ;;  %v42190_v55 = vand.u32 4294901760, %v36345_v51 }
  0x4d   :  { %38243 = vmatpush3.msra.mxu1 %v1260_v22  ;;  %38252 = vmatpush3.msra.mxu0 %v1250_v4  ;;  %v36342_v22 = vld [vmem:[%s47265_s2 + $0xa8] sm:$0xff] }
  0x4e   :  { %38244 = vmatprep.subr.mxu1 %v1267_v24  ;;  %38253 = vmatprep.subr.mxu0 %v1257_v6  ;;  %v42210_v59 = vsub.f32 %v36345_v51, %v42190_v55 }
  0x4f   :  { %38245 = vmatpush3.msra.mxu1 %v1267_v24  ;;  %38254 = vmatpush3.msra.mxu0 %v1257_v6  ;;  %v2333_v6 = vsub.f32 %v2331_v62, %v42041_v2  ;;  %v2861_v24 = vsub.f32 %v36344_v16, %v42083_v18  ;;  %v42281_v16 = vld [vmem:[%s47267_s4] sm:$0xff] }
  0x50   :  { %38246 = vmatprep.subr.mxu1 %v1274_v26  ;;  %38255 = vmatprep.subr.mxu0 %v1264_v9 }
  0x51   :  { %38247 = vmatpush3.msra.mxu1 %v1274_v26  ;;  %38248 = vmatprep.mubr.f32.mxu1 %v41716_v13  ;;  %v42103_v26 = vand.u32 4294901760, %v36342_v22 }
  0x52   :  { %38256 = vmatpush3.msra.mxu0 %v1264_v9  ;;  %38249 = vmatmul.mubr.f32.vlgmr.msra.gmra.mxu1 %v41719_v15 }
  0x53   :  { %38257 = vmatprep.subr.mxu0 %v1271_v11  ;;  %38262 = vmatprep.subr.mxu1 %v41843_v0 }
  0x54   :  { %38258 = vmatpush3.msra.mxu0 %v1271_v11  ;;  %38259 = vmatprep.mubr.f32.mxu0 %v41726_v19 }
  0x55   :  { %38263 = vmatpush3.msra.mxu1 %v41843_v0  ;;  %38260 = vmatmul.mubr.f32.vlgmr.msra.gmra.mxu0 %v41729_v21 }
  0x56   :  { %38264 = vmatprep.subr.mxu1 %v41848_v1  ;;  %38273 = vmatprep.subr.mxu0 %v41874_v8 }
  0x57   :  { %38265 = vmatpush3.msra.mxu1 %v41848_v1  ;;  %38274 = vmatpush3.msra.mxu0 %v41874_v8 }
  0x58   :  { %38266 = vmatprep.subr.mxu1 %v41863_v5  ;;  %38275 = vmatprep.subr.mxu0 %v41881_v10 }
  0x59   :  { %38267 = vmatpush3.msra.mxu1 %v41863_v5  ;;  %38276 = vmatpush3.msra.mxu0 %v41881_v10  ;;  %v2334_v10 = vand.u32 4294901760, %v2333_v6  ;;  %v50_v6 = vlaneseq }
  0x5a   :  { %38268 = vmatprep.subr.mxu1 %v41870_v7  ;;  %38277 = vmatprep.subr.mxu0 %v41891_v14 }
  0x5b   :  { %38269 = vmatpush3.msra.mxu1 %v41870_v7  ;;  %38270 = vmatprep.mubr.f32.mxu1 %v41739_v25 }
  0x5c   :  { %38278 = vmatpush3.msra.mxu0 %v41891_v14  ;;  %38271 = vmatmul.mubr.f32.vlgmr.msra.gmra.mxu1 %v41742_v27 }
  0x5d   :  { %38279 = vmatprep.subr.mxu0 %v41898_v17  ;;  %38284 = vmatprep.subr.mxu1 %v41843_v0 }
  0x5e   :  { %38280 = vmatpush3.msra.mxu0 %v41898_v17  ;;  %38281 = vmatprep.mubr.f32.mxu0 %v41716_v13  ;;  %v36343_v17 = vld [vmem:[%s47265_s2 + $0xb0] sm:$0xff] }
  0x5f   :  { %38285 = vmatpush3.msra.mxu1 %v41843_v0  ;;  %38282 = vmatmul.mubr.f32.vlgmr.msra.gmra.mxu0 %v41719_v15  ;;  %v42034_v0 = vand.u32 4294901760, %v2324_v60  ;;  %v42088_v20 = vand.u32 4294901760, %v36343_v17 }
  0x60   :  { %38286 = vmatprep.subr.mxu1 %v41848_v1  ;;  %38295 = vmatprep.subr.mxu0 %v41923_v30 }
  0x61   :  { %38287 = vmatpush3.msra.mxu1 %v41848_v1  ;;  %38296 = vmatpush3.msra.mxu0 %v41923_v30  ;;  %v2338_v1 = vsub.f32 %v36338_v58, %v42023_v61  ;;  %v2326_v4 = vsub.f32 %v2324_v60, %v42034_v0  ;;  %v2868_v28 = vsub.f32 %v36343_v17, %v42088_v20  ;;  %v36349_v17 = vld [vmem:[%s47265_s2 + $0xe0] sm:$0xff] }
  0x62   :  { %38288 = vmatprep.subr.mxu1 %v41863_v5  ;;  %38297 = vmatprep.subr.mxu0 %v41928_v31 }
  0x63   :  { %38289 = vmatpush3.msra.mxu1 %v41863_v5  ;;  %38298 = vmatpush3.msra.mxu0 %v41928_v31  ;;  %v42051_v5 = vand.u32 4294901760, %v2338_v1  ;;  %v2327_v8 = vand.u32 4294901760, %v2326_v4  ;;  %v42121_v32 = vand.u32 4294901760, %v2868_v28 }
  0x64   :  { %38290 = vmatprep.subr.mxu1 %v41870_v7  ;;  %38299 = vmatprep.subr.mxu0 %v41943_v37 }
  0x65   :  { %38291 = vmatpush3.msra.mxu1 %v41870_v7  ;;  %38292 = vmatprep.mubr.f32.mxu1 %v41716_v13  ;;  %v42058_v7 = vand.u32 4294901760, %v2345_v3  ;;  %v2340_v9 = vsub.f32 %v2338_v1, %v42051_v5 }
  0x66   :  { %38300 = vmatpush3.msra.mxu0 %v41943_v37  ;;  %38293 = vmatmul.mubr.f32.vlgmr.msra.gmra.mxu1 %v41719_v15 }
  0x67   :  { %38301 = vmatprep.subr.mxu0 %v41950_v39  ;;  %38306 = vmatprep.subr.mxu1 %v1790_v48  ;;  %v2347_v11 = vsub.f32 %v2345_v3, %v42058_v7  ;;  %v2341_v12 = vand.u32 4294901760, %v2340_v9  ;;  %v36351_v9 = vld [vmem:[%s47265_s2 + $0xf0] sm:$0xff] }
  0x68   :  { %38302 = vmatpush3.msra.mxu0 %v41950_v39  ;;  %38307 = vmatpush3.msra.mxu1 %v1790_v48  ;;  %v42162_v48 = vand.u32 4294901760, %v36348_v46 }
  0x69   :  { %38303 = vmatprep.mubr.f32.mxu0 %v41753_v34  ;;  %38308 = vmatprep.subr.mxu1 %v1797_v50  ;;  %v2348_v14 = vand.u32 4294901760, %v2347_v11  ;;  %v36350_v11 = vld [vmem:[%s47265_s2 + $0xe8] sm:$0xff] }
  0x6a   :  { %38317 = vmatprep.subr.mxu0 %v1787_v36  ;;  %38304 = vmatmul.mubr.f32.vlgmr.msra.gmra.mxu0 %v41755_v35 }
  0x6b   :  { %38309 = vmatpush3.msra.mxu1 %v1797_v50  ;;  %38318 = vmatpush3.msra.mxu0 %v1787_v36 }
  0x6c   :  { %38310 = vmatprep.subr.mxu1 %v1804_v52  ;;  %38319 = vmatprep.subr.mxu0 %v1794_v38 }
  0x6d   :  { %38311 = vmatpush3.msra.mxu1 %v1804_v52  ;;  %38320 = vmatpush3.msra.mxu0 %v1794_v38  ;;  %v2870_v38 = vsub.f32 %v2868_v28, %v42121_v32  ;;  %v42179_v52 = vsub.f32 %v36348_v46, %v42162_v48 }
  0x6e   :  { %38312 = vmatprep.subr.mxu1 %v1811_v53  ;;  %38321 = vmatprep.subr.mxu0 %v1801_v41 }
  0x6f   :  { %38313 = vmatpush3.msra.mxu1 %v1811_v53  ;;  %38314 = vmatprep.mubr.f32.mxu1 %v41716_v13  ;;  %v42181_v53 = vand.u32 4294901760, %v36346_v49 }
  0x70   :  { %38322 = vmatpush3.msra.mxu0 %v1801_v41  ;;  %38315 = vmatmul.mubr.f32.vlgmr.msra.gmra.mxu1 %v41719_v15 }
  0x71   :  { %38323 = vmatprep.subr.mxu0 %v1808_v43  ;;  %38328 = vmatprep.subr.mxu1 %v41923_v30 }
  0x72   :  { %38324 = vmatpush3.msra.mxu0 %v1808_v43  ;;  %38325 = vmatprep.mubr.f32.mxu0 %v41726_v19 }
  0x73   :  { %38329 = vmatpush3.msra.mxu1 %v41923_v30  ;;  %38326 = vmatmul.mubr.f32.vlgmr.msra.gmra.mxu0 %v41729_v21 }
  0x74   :  { %38330 = vmatprep.subr.mxu1 %v41928_v31  ;;  %38339 = vmatprep.subr.mxu0 %v41954_v40 }
  0x75   :  { %38331 = vmatpush3.msra.mxu1 %v41928_v31  ;;  %38340 = vmatpush3.msra.mxu0 %v41954_v40 }
  0x76   :  { %38332 = vmatprep.subr.mxu1 %v41943_v37  ;;  %38341 = vmatprep.subr.mxu0 %v41961_v42 }
  0x77   :  { %38333 = vmatpush3.msra.mxu1 %v41943_v37  ;;  %38342 = vmatpush3.msra.mxu0 %v41961_v42  ;;  %v2871_v42 = vand.u32 4294901760, %v2870_v38 }
  0x78   :  { %38334 = vmatprep.subr.mxu1 %v41950_v39  ;;  %38343 = vmatprep.subr.mxu0 %v41971_v45 }
  0x79   :  { %38335 = vmatpush3.msra.mxu1 %v41950_v39  ;;  %38336 = vmatprep.mubr.f32.mxu1 %v41739_v25 }
  0x7a   :  { %38344 = vmatpush3.msra.mxu0 %v41971_v45  ;;  %38337 = vmatmul.mubr.f32.vlgmr.msra.gmra.mxu1 %v41742_v27 }
  0x7b   :  { %38345 = vmatprep.subr.mxu0 %v41978_v47  ;;  %38350 = vmatprep.subr.mxu1 %v41923_v30 }
  0x7c   :  { %38346 = vmatpush3.msra.mxu0 %v41978_v47  ;;  %38347 = vmatprep.mubr.f32.mxu0 %v41716_v13  ;;  %v36347_v47 = vld [vmem:[%s47265_s2 + $0xd0] sm:$0xff] }
  0x7d   :  { %38351 = vmatpush3.msra.mxu1 %v41923_v30  ;;  %38348 = vmatmul.mubr.f32.vlgmr.msra.gmra.mxu0 %v41719_v15  ;;  %v42114_v30 = vand.u32 4294901760, %v2861_v24  ;;  %v42169_v50 = vand.u32 4294901760, %v36347_v47 }
  0x7e   :  { %38352 = vmatprep.subr.mxu1 %v41928_v31  ;;  %38361 = vmatprep.subr.mxu0 %v42003_v56 }
  0x7f   :  { %38353 = vmatpush3.msra.mxu1 %v41928_v31  ;;  %38362 = vmatpush3.msra.mxu0 %v42003_v56  ;;  %v2875_v31 = vsub.f32 %v36342_v22, %v42103_v26  ;;  %v2863_v36 = vsub.f32 %v2861_v24, %v42114_v30  ;;  %v42188_v54 = vsub.f32 %v36347_v47, %v42169_v50 }
  0x80   :  { %38354 = vmatprep.subr.mxu1 %v41943_v37  ;;  %38363 = vmatprep.subr.mxu0 %v42008_v57 }
  0x81   :  { %38355 = vmatpush3.msra.mxu1 %v41943_v37  ;;  %38364 = vmatpush3.msra.mxu0 %v42008_v57  ;;  %v42131_v37 = vand.u32 4294901760, %v2875_v31  ;;  %v2864_v40 = vand.u32 4294901760, %v2863_v36  ;;  %v42207_v58 = vand.u32 4294901760, %v42188_v54 }
  0x82   :  { %38356 = vmatprep.subr.mxu1 %v41950_v39  ;;  %38365 = vmatprep.subr.mxu0 %v42023_v61 }
  0x83   :  { %38357 = vmatpush3.msra.mxu1 %v41950_v39  ;;  %38358 = vmatprep.mubr.f32.mxu1 %v41716_v13  ;;  %v42138_v39 = vand.u32 4294901760, %v2882_v33  ;;  %v2877_v41 = vsub.f32 %v2875_v31, %v42131_v37 }
  0x84   :  { %38366 = vmatpush3.msra.mxu0 %v42023_v61  ;;  %38359 = vmatmul.mubr.f32.vlgmr.msra.gmra.mxu1 %v41719_v15 }
  0x85   :  { %38367 = vmatprep.subr.mxu0 %v42030_v63  ;;  %38372 = vmatprep.subr.mxu1 %v2327_v8  ;;  %v2884_v43 = vsub.f32 %v2882_v33, %v42138_v39  ;;  %v2878_v44 = vand.u32 4294901760, %v2877_v41 }
  0x86   :  { %38368 = vmatpush3.msra.mxu0 %v42030_v63  ;;  %38373 = vmatpush3.msra.mxu1 %v2327_v8  ;;  %v42254_v8 = vshrl.u32 %v50_v6, 7 }
  0x87   :  { %38369 = vmatprep.mubr.f32.mxu0 %v41753_v34  ;;  %38374 = vmatprep.subr.mxu1 %v2334_v10  ;;  %v2885_v45 = vand.u32 4294901760, %v2884_v43 }
  0x88   :  { %38383 = vmatprep.subr.mxu0 %v2324_v60  ;;  %38370 = vmatmul.mubr.f32.vlgmr.msra.gmra.mxu0 %v41755_v35 }
  0x89   :  { %38375 = vmatpush3.msra.mxu1 %v2334_v10  ;;  %38384 = vmatpush3.msra.mxu0 %v2324_v60 }
  0x8a   :  { %38376 = vmatprep.subr.mxu1 %v2341_v12  ;;  %38385 = vmatprep.subr.mxu0 %v2331_v62 }
  0x8b   :  { %38377 = vmatpush3.msra.mxu1 %v2341_v12  ;;  %38386 = vmatpush3.msra.mxu0 %v2331_v62  ;;  %v3407_v62 = vsub.f32 %v42188_v54, %v42207_v58  ;;  %v42272_v12 = vsub.s32 0, %v42254_v8 }
  0x8c   :  { %38378 = vmatprep.subr.mxu1 %v2348_v14  ;;  %38387 = vmatprep.subr.mxu0 %v2338_v1 }
  0x8d   :  { %38379 = vmatpush3.msra.mxu1 %v2348_v14  ;;  %38380 = vmatprep.mubr.f32.mxu1 %v41716_v13  ;;  %47320 = vst [vmem:[#allocation13_spill] sm:$0xff] %v42272_v12  ;;  %v42276_v14 = vand.u32 4294901760, %v36351_v9  ;;  %v42299_v22 = vrot.slane %v42281_v16, %v42272_v12 }
  0x8e   :  { %38388 = vmatpush3.msra.mxu0 %v2338_v1  ;;  %38381 = vmatmul.mubr.f32.vlgmr.msra.gmra.mxu1 %v41719_v15 }
  0x8f   :  { %38389 = vmatprep.subr.mxu0 %v2345_v3  ;;  %38394 = vmatprep.subr.mxu1 %v42003_v56  ;;  %v42304_v23 = vsub.f32 %v36351_v9, %v42276_v14 }
  0x90   :  { %38390 = vmatpush3.msra.mxu0 %v2345_v3  ;;  %38391 = vmatprep.mubr.f32.mxu0 %v41726_v19 }
  0x91   :  { %38395 = vmatpush3.msra.mxu1 %v42003_v56  ;;  %38392 = vmatmul.mubr.f32.vlgmr.msra.gmra.mxu0 %v41729_v21 }
  0x92   :  { %38396 = vmatprep.subr.mxu1 %v42008_v57  ;;  %38405 = vmatprep.subr.mxu0 %v42034_v0 }
  0x93   :  { %38397 = vmatpush3.msra.mxu1 %v42008_v57  ;;  %38406 = vmatpush3.msra.mxu0 %v42034_v0 }
  0x94   :  { %38398 = vmatprep.subr.mxu1 %v42023_v61  ;;  %38407 = vmatprep.subr.mxu0 %v42041_v2 }
  0x95   :  { %38399 = vmatpush3.msra.mxu1 %v42023_v61  ;;  %38408 = vmatpush3.msra.mxu0 %v42041_v2  ;;  %v3408_v2 = vand.u32 4294901760, %v3407_v62 }
  0x96   :  { %38400 = vmatprep.subr.mxu1 %v42030_v63  ;;  %38409 = vmatprep.subr.mxu0 %v42051_v5 }
  0x97   :  { %38401 = vmatpush3.msra.mxu1 %v42030_v63  ;;  %38402 = vmatprep.mubr.f32.mxu1 %v41739_v25 }
  0x98   :  { %38410 = vmatpush3.msra.mxu0 %v42051_v5  ;;  %38403 = vmatmul.mubr.f32.vlgmr.msra.gmra.mxu1 %v41742_v27 }
  0x99   :  { %38411 = vmatprep.subr.mxu0 %v42058_v7  ;;  %38416 = vmatprep.subr.mxu1 %v42003_v56 }
  0x9a   :  { %38412 = vmatpush3.msra.mxu0 %v42058_v7  ;;  %38413 = vmatprep.mubr.f32.mxu0 %v41716_v13  ;;  %v36352_v7 = vld [vmem:[%s47265_s2 + $0xf8] sm:$0xff] }
  0x9b   :  { %38417 = vmatpush3.msra.mxu1 %v42003_v56  ;;  %38414 = vmatmul.mubr.f32.vlgmr.msra.gmra.mxu0 %v41719_v15  ;;  %v42197_v56 = vand.u32 4294901760, %v42179_v52  ;;  %v42264_v10 = vand.u32 4294901760, %v36352_v7 }
  0x9c   :  { %38418 = vmatprep.subr.mxu1 %v42008_v57  ;;  %38427 = vmatprep.subr.mxu0 %v42083_v18 }
  0x9d   :  { %38419 = vmatpush3.msra.mxu1 %v42008_v57  ;;  %38428 = vmatpush3.msra.mxu0 %v42083_v18  ;;  %v42200_v57 = vsub.f32 %v36346_v49, %v42181_v53  ;;  %v3400_v60 = vsub.f32 %v42179_v52, %v42197_v56 }
  0x9e   :  { %38420 = vmatprep.subr.mxu1 %v42023_v61  ;;  %38429 = vmatprep.subr.mxu0 %v42088_v20 }
  0x9f   :  { %38421 = vmatpush3.msra.mxu1 %v42023_v61  ;;  %38430 = vmatpush3.msra.mxu0 %v42088_v20  ;;  %v42219_v61 = vand.u32 4294901760, %v42200_v57  ;;  %v3401_v0 = vand.u32 4294901760, %v3400_v60 }
  0xa0   :  { %38422 = vmatprep.subr.mxu1 %v42030_v63  ;;  %38431 = vmatprep.subr.mxu0 %v42103_v26 }
  0xa1   :  { %38423 = vmatpush3.msra.mxu1 %v42030_v63  ;;  %38424 = vmatprep.mubr.f32.mxu1 %v41716_v13  ;;  %v42228_v63 = vand.u32 4294901760, %v42210_v59  ;;  %v3414_v1 = vsub.f32 %v42200_v57, %v42219_v61 }
  0xa2   :  { %38432 = vmatpush3.msra.mxu0 %v42103_v26  ;;  %38425 = vmatmul.mubr.f32.vlgmr.msra.gmra.mxu1 %v41719_v15 }
  0xa3   :  { %38433 = vmatprep.subr.mxu0 %v42110_v29  ;;  %38438 = vmatprep.subr.mxu1 %v2864_v40  ;;  %v3421_v3 = vsub.f32 %v42210_v59, %v42228_v63  ;;  %v3415_v4 = vand.u32 4294901760, %v3414_v1 }
  0xa4   :  { %38434 = vmatpush3.msra.mxu0 %v42110_v29  ;;  %38439 = vmatpush3.msra.mxu1 %v2864_v40 }
  0xa5   :  { %38435 = vmatprep.mubr.f32.mxu0 %v41753_v34  ;;  %38440 = vmatprep.subr.mxu1 %v2871_v42  ;;  %v3422_v5 = vand.u32 4294901760, %v3421_v3 }
  0xa6   :  { %38449 = vmatprep.subr.mxu0 %v2861_v24  ;;  %38436 = vmatmul.mubr.f32.vlgmr.msra.gmra.mxu0 %v41755_v35 }
  0xa7   :  { %38441 = vmatpush3.msra.mxu1 %v2871_v42  ;;  %38450 = vmatpush3.msra.mxu0 %v2861_v24  ;;  %v42306_v24 = vand.u32 4294901760, %v36349_v17 }
  0xa8   :  { %38442 = vmatprep.subr.mxu1 %v2878_v44  ;;  %38451 = vmatprep.subr.mxu0 %v2868_v28 }
  0xa9   :  { %38443 = vmatpush3.msra.mxu1 %v2878_v44  ;;  %38452 = vmatpush3.msra.mxu0 %v2868_v28 }
  0xaa   :  { %38444 = vmatprep.subr.mxu1 %v2885_v45  ;;  %38453 = vmatprep.subr.mxu0 %v2875_v31 }
  0xab   :  { %38445 = vmatpush3.msra.mxu1 %v2885_v45  ;;  %38446 = vmatprep.mubr.f32.mxu1 %v41716_v13 }
  0xac   :  { %38454 = vmatpush3.msra.mxu0 %v2875_v31  ;;  %38447 = vmatmul.mubr.f32.vlgmr.msra.gmra.mxu1 %v41719_v15  ;;  %v42324_v31 = vand.u32 4294901760, %v42304_v23 }
  0xad   :  { %38455 = vmatprep.subr.mxu0 %v2882_v33  ;;  %38460 = vmatprep.subr.mxu1 %v42083_v18 }
  0xae   :  { %38456 = vmatpush3.msra.mxu0 %v2882_v33  ;;  %38457 = vmatprep.mubr.f32.mxu0 %v41726_v19 }
  0xaf   :  { %38461 = vmatpush3.msra.mxu1 %v42083_v18  ;;  %38458 = vmatmul.mubr.f32.vlgmr.msra.gmra.mxu0 %v41729_v21 }
  0xb0   :  { %38462 = vmatprep.subr.mxu1 %v42088_v20  ;;  %38471 = vmatprep.subr.mxu0 %v42114_v30 }
  0xb1   :  { %38463 = vmatpush3.msra.mxu1 %v42088_v20  ;;  %38472 = vmatpush3.msra.mxu0 %v42114_v30 }
  0xb2   :  { %38464 = vmatprep.subr.mxu1 %v42103_v26  ;;  %38473 = vmatprep.subr.mxu0 %v42121_v32 }
  0xb3   :  { %38465 = vmatpush3.msra.mxu1 %v42103_v26  ;;  %38474 = vmatpush3.msra.mxu0 %v42121_v32  ;;  %v42327_v32 = vsub.f32 %v36349_v17, %v42306_v24 }
  0xb4   :  { %38466 = vmatprep.subr.mxu1 %v42110_v29  ;;  %38475 = vmatprep.subr.mxu0 %v42131_v37 }
  0xb5   :  { %38467 = vmatpush3.msra.mxu1 %v42110_v29  ;;  %38468 = vmatprep.mubr.f32.mxu1 %v41739_v25  ;;  %v42347_v40 = vand.u32 4294901760, %v42327_v32 }
  0xb6   :  { %38476 = vmatpush3.msra.mxu0 %v42131_v37  ;;  %38469 = vmatmul.mubr.f32.vlgmr.msra.gmra.mxu1 %v41742_v27 }
  0xb7   :  { %38477 = vmatprep.subr.mxu0 %v42138_v39  ;;  %38482 = vmatprep.subr.mxu1 %v42083_v18  ;;  %v3958_v47 = vsub.f32 %v42327_v32, %v42347_v40 }
  0xb8   :  { %38478 = vmatpush3.msra.mxu0 %v42138_v39  ;;  %38479 = vmatprep.mubr.f32.mxu0 %v41716_v13  ;;  %v3944_v39 = vsub.f32 %v42304_v23, %v42324_v31 }
  0xb9   :  { %38483 = vmatpush3.msra.mxu1 %v42083_v18  ;;  %38480 = vmatmul.mubr.f32.vlgmr.msra.gmra.mxu0 %v41719_v15  ;;  %v42291_v18 = vsub.f32 %v36352_v7, %v42264_v10 }
  0xba   :  { %38484 = vmatprep.subr.mxu1 %v42088_v20  ;;  %38493 = vmatprep.subr.mxu0 %v42162_v48  ;;  %v3945_v46 = vand.u32 4294901760, %v3944_v39 }
  0xbb   :  { %38485 = vmatpush3.msra.mxu1 %v42088_v20  ;;  %38490 = vmatprep.mubr.f32.mxu1 %v41716_v13  ;;  %v42293_v20 = vand.u32 4294901760, %v36350_v11 }
  0xbc   :  { %38486 = vmatprep.subr.mxu1 %v42103_v26  ;;  %38494 = vmatpush3.msra.mxu0 %v42162_v48 }
  0xbd   :  { %38487 = vmatpush3.msra.mxu1 %v42103_v26  ;;  %38495 = vmatprep.subr.mxu0 %v42169_v50  ;;  %v42313_v26 = vand.u32 4294901760, %v42291_v18  ;;  %v42316_v28 = vsub.f32 %v36350_v11, %v42293_v20 }
  0xbe   :  { %38488 = vmatprep.subr.mxu1 %v42110_v29  ;;  %38496 = vmatpush3.msra.mxu0 %v42169_v50 }
  0xbf   :  { %38489 = vmatpush3.msra.mxu1 %v42110_v29  ;;  %38497 = vmatprep.subr.mxu0 %v42181_v53  ;;  %v3937_v33 = vsub.f32 %v42291_v18, %v42313_v26  ;;  %v42336_v36 = vand.u32 4294901760, %v42316_v28 }
  0xc0   :  { %38491 = vmatmul.mubr.f32.vlgmr.msra.gmra.mxu1 %v41719_v15  ;;  %38504 = vmatprep.subr.mxu1 %v3401_v0 }
  0xc1   :  { %38505 = vmatpush3.msra.mxu1 %v3401_v0  ;;  %38498 = vmatpush3.msra.mxu0 %v42181_v53  ;;  %v3938_v42 = vand.u32 4294901760, %v3937_v33  ;;  %v3951_v43 = vsub.f32 %v42316_v28, %v42336_v36 }
  0xc2   :  { %38506 = vmatprep.subr.mxu1 %v3408_v2  ;;  %38499 = vmatprep.subr.mxu0 %v42190_v55 }
  0xc3   :  { %38507 = vmatpush3.msra.mxu1 %v3408_v2  ;;  %38500 = vmatpush3.msra.mxu0 %v42190_v55 }
  0xc4   :  { %38508 = vmatprep.subr.mxu1 %v3415_v4  ;;  %38501 = vmatprep.mubr.f32.mxu0 %v41753_v34 }
  0xc5   :  { %38509 = vmatpush3.msra.mxu1 %v3415_v4  ;;  %38515 = vmatprep.subr.mxu0 %v42179_v52 }
  0xc6   :  { %38510 = vmatprep.subr.mxu1 %v3422_v5  ;;  %38502 = vmatmul.mubr.f32.vlgmr.msra.gmra.mxu0 %v41755_v35 }
  0xc7   :  { %38511 = vmatpush3.msra.mxu1 %v3422_v5  ;;  %38516 = vmatpush3.msra.mxu0 %v42179_v52  ;;  %v36353_v5 = vld [vmem:[%s47265_s2 + $0x100] sm:$0xff] }
  0xc8   :  { %38512 = vmatprep.mubr.f32.mxu1 %v41716_v13  ;;  %38517 = vmatprep.subr.mxu0 %v42188_v54  ;;  %v42435_v11 = vand.u32 4294901760, %v36353_v5 }
  0xc9   :  { %38526 = vmatprep.subr.mxu1 %v42162_v48  ;;  %38513 = vmatmul.mubr.f32.vlgmr.msra.gmra.mxu1 %v41719_v15 }
  0xca   :  { %38518 = vmatpush3.msra.mxu0 %v42188_v54  ;;  %38527 = vmatpush3.msra.mxu1 %v42162_v48 }
  0xcb   :  { %38519 = vmatprep.subr.mxu0 %v42200_v57  ;;  %38528 = vmatprep.subr.mxu1 %v42169_v50 }
  0xcc   :  { %38520 = vmatpush3.msra.mxu0 %v42200_v57  ;;  %38529 = vmatpush3.msra.mxu1 %v42169_v50  ;;  %v42385_v57 = vsub.s32 1, %v42254_v8 }
  0xcd   :  { %38521 = vmatprep.subr.mxu0 %v42210_v59  ;;  %38530 = vmatprep.subr.mxu1 %v42181_v53 }
  0xce   :  { %38522 = vmatpush3.msra.mxu0 %v42210_v59  ;;  %38531 = vmatpush3.msra.mxu1 %v42181_v53  ;;  %47321 = vst [vmem:[#allocation14_spill] sm:$0xff] %v42385_v57  ;;  %v36355_v59 = vld [vmem:[%s47265_s2 + $0x110] sm:$0xff]  ;;  %v42411_v1 = vrot.slane %v42281_v16, %v42385_v57 }
  0xcf   :  { %38523 = vmatprep.mubr.f32.mxu0 %v41726_v19  ;;  %38532 = vmatprep.subr.mxu1 %v42190_v55 }
  0xd0   :  { %38537 = vmatprep.subr.mxu0 %v42197_v56  ;;  %38524 = vmatmul.mubr.f32.vlgmr.msra.gmra.mxu0 %v41729_v21 }
  0xd1   :  { %38533 = vmatpush3.msra.mxu1 %v42190_v55  ;;  %38538 = vmatpush3.msra.mxu0 %v42197_v56  ;;  %v38107_v29 = vpop.f32.mrf.mxu0  ;;  %v36356_v56 = vld [vmem:[%s47265_s2 + $0x118] sm:$0xff] }
  0xd2   :  { %38534 = vmatprep.mubr.f32.mxu1 %v41739_v25  ;;  %38539 = vmatprep.subr.mxu0 %v42207_v58  ;;  %v147_v30 = vadd.f32 %v38107_v29, %v42299_v22 }
  0xd3   :  { %38548 = vmatprep.subr.mxu1 %v42162_v48  ;;  %38535 = vmatmul.mubr.f32.vlgmr.msra.gmra.mxu1 %v41742_v27  ;;  %v42338_v37 = vpop.f32.mrf.mxu0 }
  0xd4   :  { %38540 = vmatpush3.msra.mxu0 %v42207_v58  ;;  %38549 = vmatpush3.msra.mxu1 %v42162_v48  ;;  %v3952_v48 = vand.u32 4294901760, %v3951_v43  ;;  %v42387_v58 = vand.u32 4294901760, %v36356_v56 }
  0xd5   :  { %38541 = vmatprep.subr.mxu0 %v42219_v61  ;;  %38550 = vmatprep.subr.mxu1 %v42169_v50 }
  0xd6   :  { %38542 = vmatpush3.msra.mxu0 %v42219_v61  ;;  %38551 = vmatpush3.msra.mxu1 %v42169_v50  ;;  %v38118_v38 = vpop.f32.mrf.mxu1  ;;  %v3959_v50 = vand.u32 4294901760, %v3958_v47  ;;  %v36354_v61 = vld [vmem:[%s47265_s2 + $0x108] sm:$0xff]  ;;  %v42414_v2 = vsub.f32 %v36356_v56, %v42387_v58 }
  0xd7   :  { %38543 = vmatprep.subr.mxu0 %v42228_v63  ;;  %38552 = vmatprep.subr.mxu1 %v42181_v53  ;;  %v244_v41 = vadd.f32 %v38118_v38, %v147_v30  ;;  %v42420_v4 = vand.u32 4294901760, %v36354_v61  ;;  %v42461_v30 = vsub.f32 %v36353_v5, %v42435_v11 }
  0xd8   :  { %38544 = vmatpush3.msra.mxu0 %v42228_v63  ;;  %38545 = vmatprep.mubr.f32.mxu0 %v41716_v13  ;;  %v42365_v49 = vpop.f32.mrf.mxu1  ;;  %v42403_v63 = vand.u32 4294901760, %v36355_v59  ;;  %v42438_v17 = vand.u32 4294901760, %v42414_v2 }
  0xd9   :  { %38553 = vmatpush3.msra.mxu1 %v42181_v53  ;;  %38546 = vmatmul.mubr.f32.vlgmr.msra.gmra.mxu0 %v41719_v15  ;;  %v38129_v44 = vpop.f32.mrf.mxu0  ;;  %v42477_v38 = vand.u32 4294901760, %v42461_v30 }
  0xda   :  { %38554 = vmatprep.subr.mxu1 %v42190_v55  ;;  %38559 = vmatprep.subr.mxu0 %v42264_v10  ;;  %v331_v45 = vadd.f32 %v38129_v44, %v244_v41  ;;  %v42430_v7 = vsub.f32 %v36355_v59, %v42403_v63  ;;  %v4474_v29 = vsub.f32 %v42414_v2, %v42438_v17 }
  0xdb   :  { %38555 = vmatpush3.msra.mxu1 %v42190_v55  ;;  %38556 = vmatprep.mubr.f32.mxu1 %v41716_v13  ;;  %v42370_v52 = vpop.f32.mrf.mxu0  ;;  %v4495_v41 = vsub.f32 %v42461_v30, %v42477_v38 }
  0xdc   :  { %38560 = vmatpush3.msra.mxu0 %v42264_v10  ;;  %38557 = vmatmul.mubr.f32.vlgmr.msra.gmra.mxu1 %v41719_v15 }
  0xdd   :  { %38561 = vmatprep.subr.mxu0 %v42276_v14  ;;  %38570 = vmatprep.subr.mxu1 %v3938_v42 }
  0xde   :  { %38562 = vmatpush3.msra.mxu0 %v42276_v14  ;;  %38571 = vmatpush3.msra.mxu1 %v3938_v42 }
  0xdf   :  { %38563 = vmatprep.subr.mxu0 %v42293_v20  ;;  %38572 = vmatprep.subr.mxu1 %v3945_v46 }
  0xe0   :  { %38564 = vmatpush3.msra.mxu0 %v42293_v20  ;;  %38573 = vmatpush3.msra.mxu1 %v3945_v46  ;;  %v38140_v51 = vpop.f32.mrf.mxu1  ;;  %v4496_v46 = vand.u32 4294901760, %v4495_v41 }
  0xe1   :  { %38565 = vmatprep.subr.mxu0 %v42306_v24  ;;  %38574 = vmatprep.subr.mxu1 %v3952_v48  ;;  %v416_v53 = vadd.f32 %v38140_v51, %v331_v45  ;;  %v36360_v51 = vld [vmem:[%s47265_s2 + $0x138] sm:$0xff] }
  0xe2   :  { %38566 = vmatpush3.msra.mxu0 %v42306_v24  ;;  %38575 = vmatpush3.msra.mxu1 %v3952_v48  ;;  %v42394_v60 = vpop.f32.mrf.mxu1  ;;  %v42524_v56 = vand.u32 4294901760, %v36360_v51 }
  0xe3   :  { %38567 = vmatprep.mubr.f32.mxu0 %v41753_v34  ;;  %38576 = vmatprep.subr.mxu1 %v3959_v50  ;;  %v38151_v54 = vpop.f32.mrf.mxu0 }
  0xe4   :  { %38581 = vmatprep.subr.mxu0 %v42291_v18  ;;  %38568 = vmatmul.mubr.f32.vlgmr.msra.gmra.mxu0 %v41755_v35  ;;  %v505_v55 = vadd.f32 %v38151_v54, %v416_v53  ;;  %v36359_v54 = vld [vmem:[%s47265_s2 + $0x130] sm:$0xff] }
  0xe5   :  { %38577 = vmatpush3.msra.mxu1 %v3959_v50  ;;  %38582 = vmatpush3.msra.mxu0 %v42291_v18  ;;  %v42418_v3 = vpop.f32.mrf.mxu0  ;;  %v42443_v18 = vsub.f32 %v36354_v61, %v42420_v4  ;;  %v42508_v50 = vsub.s32 2, %v42254_v8  ;;  %v42541_v5 = vand.u32 4294901760, %v36359_v54 }
  0xe6   :  { %38578 = vmatprep.mubr.f32.mxu1 %v41716_v13  ;;  %38583 = vmatprep.subr.mxu0 %v42304_v23 }
  0xe7   :  { %38592 = vmatprep.subr.mxu1 %v42264_v10  ;;  %38579 = vmatmul.mubr.f32.vlgmr.msra.gmra.mxu1 %v41719_v15  ;;  %47322 = vst [vmem:[#allocation15_spill] sm:$0xff] %v42508_v50  ;;  %v42532_v61 = vrot.slane %v42281_v16, %v42508_v50 }
  0xe8   :  { %38584 = vmatpush3.msra.mxu0 %v42304_v23  ;;  %38593 = vmatpush3.msra.mxu1 %v42264_v10 }
  0xe9   :  { %38585 = vmatprep.subr.mxu0 %v42316_v28  ;;  %38594 = vmatprep.subr.mxu1 %v42276_v14 }
  0xea   :  { %38586 = vmatpush3.msra.mxu0 %v42316_v28  ;;  %38595 = vmatpush3.msra.mxu1 %v42276_v14  ;;  %v38162_v62 = vpop.f32.mrf.mxu1 }
  0xeb   :  { %38587 = vmatprep.subr.mxu0 %v42327_v32  ;;  %38596 = vmatprep.subr.mxu1 %v42293_v20  ;;  %v42407_v0 = vadd.f32 %v38162_v62, %v505_v55  ;;  %v36358_v62 = vld [vmem:[%s47265_s2 + $0x128] sm:$0xff] }
  0xec   :  { %38588 = vmatpush3.msra.mxu0 %v42327_v32  ;;  %38597 = vmatpush3.msra.mxu1 %v42293_v20  ;;  %v42449_v23 = vpop.f32.mrf.mxu1 }
  0xed   :  { %38589 = vmatprep.mubr.f32.mxu0 %v41726_v19  ;;  %38598 = vmatprep.subr.mxu1 %v42306_v24 }
  0xee   :  { %38603 = vmatprep.subr.mxu0 %v42313_v26  ;;  %38590 = vmatmul.mubr.f32.vlgmr.msra.gmra.mxu0 %v41729_v21  ;;  %v38173_v6 = vpop.f32.mrf.mxu0 }
  0xef   :  { %38599 = vmatpush3.msra.mxu1 %v42306_v24  ;;  %38604 = vmatpush3.msra.mxu0 %v42313_v26  ;;  %v684_v9 = vadd.f32 %v38173_v6, %v42411_v1  ;;  %v42452_v26 = vand.u32 4294901760, %v42430_v7  ;;  %v36357_v6 = vld [vmem:[%s47265_s2 + $0x120] sm:$0xff] }
  0xf0   :  { %38600 = vmatprep.mubr.f32.mxu1 %v41739_v25  ;;  %38605 = vmatprep.subr.mxu0 %v42324_v31  ;;  %v42456_v28 = vpop.f32.mrf.mxu0 }
  0xf1   :  { %38614 = vmatprep.subr.mxu1 %v42264_v10  ;;  %38601 = vmatmul.mubr.f32.vlgmr.msra.gmra.mxu1 %v41742_v27  ;;  %v4481_v33 = vsub.f32 %v42430_v7, %v42452_v26 }
  0xf2   :  { %38606 = vmatpush3.msra.mxu0 %v42324_v31  ;;  %38615 = vmatpush3.msra.mxu1 %v42264_v10  ;;  %v42466_v31 = vand.u32 4294901760, %v42443_v18 }
  0xf3   :  { %38607 = vmatprep.subr.mxu0 %v42336_v36  ;;  %38616 = vmatprep.subr.mxu1 %v42276_v14 }
  0xf4   :  { %38608 = vmatpush3.msra.mxu0 %v42336_v36  ;;  %38617 = vmatpush3.msra.mxu1 %v42276_v14  ;;  %v38184_v10 = vpop.f32.mrf.mxu1  ;;  %v4475_v36 = vand.u32 4294901760, %v4474_v29  ;;  %v42560_v29 = vand.u32 4294901760, %v36357_v6 }
  0xf5   :  { %38609 = vmatprep.subr.mxu0 %v42347_v40  ;;  %38618 = vmatprep.subr.mxu1 %v42293_v20  ;;  %v781_v32 = vadd.f32 %v38184_v10, %v684_v9  ;;  %v42550_v9 = vand.u32 4294901760, %v36358_v62 }
  0xf6   :  { %38610 = vmatpush3.msra.mxu0 %v42347_v40  ;;  %38611 = vmatprep.mubr.f32.mxu0 %v41716_v13  ;;  %v4488_v40 = vsub.f32 %v42443_v18, %v42466_v31  ;;  %v42490_v42 = vpop.f32.mrf.mxu1 }
  0xf7   :  { %38619 = vmatpush3.msra.mxu1 %v42293_v20  ;;  %38612 = vmatmul.mubr.f32.vlgmr.msra.gmra.mxu0 %v41719_v15  ;;  %v38195_v14 = vpop.f32.mrf.mxu0  ;;  %v4482_v20 = vand.u32 4294901760, %v4481_v33 }
  0xf8   :  { %38620 = vmatprep.subr.mxu1 %v42306_v24  ;;  %38622 = vmatprep.mubr.f32.mxu1 %v41716_v13  ;;  %v868_v39 = vadd.f32 %v38195_v14, %v781_v32  ;;  %v5023_v32 = vsub.f32 %v36358_v62, %v42550_v9 }
  0xf9   :  { %38621 = vmatpush3.msra.mxu1 %v42306_v24  ;;  %38625 = vmatprep.subr.mxu0 %v42387_v58  ;;  %v4489_v24 = vand.u32 4294901760, %v4488_v40  ;;  %v42496_v44 = vpop.f32.mrf.mxu0 }
  0xfa   :  { %38623 = vmatmul.mubr.f32.vlgmr.msra.gmra.mxu1 %v41719_v15  ;;  %38626 = vmatpush3.msra.mxu0 %v42387_v58  ;;  %v42588_v40 = vand.u32 4294901760, %v5023_v32 }
  0xfb   :  { %38627 = vmatprep.subr.mxu0 %v42403_v63  ;;  %38636 = vmatprep.subr.mxu1 %v4475_v36 }
  0xfc   :  { %38628 = vmatpush3.msra.mxu0 %v42403_v63  ;;  %38633 = vmatprep.mubr.f32.mxu0 %v41753_v34 }
  0xfd   :  { %38629 = vmatprep.subr.mxu0 %v42420_v4  ;;  %38637 = vmatpush3.msra.mxu1 %v4475_v36  ;;  %v5030_v36 = vsub.f32 %v36357_v6, %v42560_v29  ;;  %v36364_v6 = vld [vmem:[%s47265_s2 + $0x158] sm:$0xff] }
  0xfe   :  { %38630 = vmatpush3.msra.mxu0 %v42420_v4  ;;  %v38206_v43 = vpop.f32.mrf.mxu1  ;;  %38638 = vmatprep.subr.mxu1 %v4482_v20 }
  0xff   :  { %38631 = vmatprep.subr.mxu0 %v42435_v11  ;;  %v953_v45 = vadd.f32 %v38206_v43, %v868_v39  ;;  %38639 = vmatpush3.msra.mxu1 %v4482_v20 }
 0x100   :  { %38632 = vmatpush3.msra.mxu0 %v42435_v11  ;;  %38640 = vmatprep.subr.mxu1 %v4489_v24  ;;  %v42513_v53 = vpop.f32.mrf.mxu1 }
 0x101   :  { %38647 = vmatprep.subr.mxu0 %v42414_v2  ;;  %38634 = vmatmul.mubr.f32.vlgmr.msra.gmra.mxu0 %v41755_v35  ;;  %v38217_v47 = vpop.f32.mrf.mxu0 }
 0x102   :  { %38648 = vmatpush3.msra.mxu0 %v42414_v2  ;;  %v1042_v48 = vadd.f32 %v38217_v47, %v953_v45  ;;  %38641 = vmatpush3.msra.mxu1 %v4489_v24  ;;  %v42595_v24 = vand.u32 4294901760, %v5030_v36 }
 0x103   :  { %38649 = vmatprep.subr.mxu0 %v42430_v7  ;;  %38642 = vmatprep.subr.mxu1 %v4496_v46  ;;  %v42537_v2 = vpop.f32.mrf.mxu0 }
 0x104   :  { %38650 = vmatpush3.msra.mxu0 %v42430_v7  ;;  %38643 = vmatpush3.msra.mxu1 %v4496_v46 }
 0x105   :  { %38651 = vmatprep.subr.mxu0 %v42443_v18  ;;  %38644 = vmatprep.mubr.f32.mxu1 %v41716_v13 }
 0x106   :  { %38652 = vmatpush3.msra.mxu0 %v42443_v18  ;;  %38658 = vmatprep.subr.mxu1 %v42387_v58  ;;  %v42553_v18 = vsub.f32 %v36360_v51, %v42524_v56 }
 0x107   :  { %38653 = vmatprep.subr.mxu0 %v42461_v30  ;;  %38645 = vmatmul.mubr.f32.vlgmr.msra.gmra.mxu1 %v41719_v15 }
 0x108   :  { %38654 = vmatpush3.msra.mxu0 %v42461_v30  ;;  %38655 = vmatprep.mubr.f32.mxu0 %v41726_v19  ;;  %v38228_v55 = vpop.f32.mrf.mxu1  ;;  %v5016_v30 = vsub.f32 %v36359_v54, %v42541_v5 }
 0x109   :  { %38659 = vmatpush3.msra.mxu1 %v42387_v58  ;;  %38669 = vmatprep.subr.mxu0 %v42438_v17  ;;  %v42528_v59 = vadd.f32 %v38228_v55, %v1042_v48 }
 0x10a   :  { %38656 = vmatmul.mubr.f32.vlgmr.msra.gmra.mxu0 %v41729_v21  ;;  %38660 = vmatprep.subr.mxu1 %v42403_v63  ;;  %v42565_v10 = vpop.f32.mrf.mxu1  ;;  %v42579_v14 = vand.u32 4294901760, %v5016_v30 }
 0x10b   :  { %38670 = vmatpush3.msra.mxu0 %v42438_v17  ;;  %38661 = vmatpush3.msra.mxu1 %v42403_v63 }
 0x10c   :  { %38671 = vmatprep.subr.mxu0 %v42452_v26  ;;  %38662 = vmatprep.subr.mxu1 %v42420_v4  ;;  %v38239_v7 = vpop.f32.mrf.mxu0  ;;  %v5018_v41 = vsub.f32 %v5016_v30, %v42579_v14 }
 0x10d   :  { %38672 = vmatpush3.msra.mxu0 %v42452_v26  ;;  %38663 = vmatpush3.msra.mxu1 %v42420_v4  ;;  %v1221_v17 = vadd.f32 %v38239_v7, %v42532_v61  ;;  %v42570_v26 = vand.u32 4294901760, %v42553_v18 }
 0x10e   :  { %38673 = vmatprep.subr.mxu0 %v42466_v31  ;;  %38664 = vmatprep.subr.mxu1 %v42435_v11  ;;  %v42575_v33 = vpop.f32.mrf.mxu0  ;;  %v5019_v46 = vand.u32 4294901760, %v5018_v41 }
 0x10f   :  { %38674 = vmatpush3.msra.mxu0 %v42466_v31  ;;  %38665 = vmatpush3.msra.mxu1 %v42435_v11 }
 0x110   :  { %38675 = vmatprep.subr.mxu0 %v42477_v38  ;;  %38666 = vmatprep.mubr.f32.mxu1 %v41739_v25 }
 0x111   :  { %38676 = vmatpush3.msra.mxu0 %v42477_v38  ;;  %38680 = vmatprep.subr.mxu1 %v42387_v58  ;;  %v5011_v38 = vsub.f32 %v42553_v18, %v42570_v26 }
 0x112   :  { %38667 = vmatmul.mubr.f32.vlgmr.msra.gmra.mxu1 %v41742_v27  ;;  %38677 = vmatprep.mubr.f32.mxu0 %v41716_v13  ;;  %v38250_v31 = vpop.f32.mrf.mxu1 }
 0x113   :  { %38681 = vmatpush3.msra.mxu1 %v42387_v58  ;;  %38691 = vmatprep.subr.mxu0 %v42524_v56  ;;  %v1318_v39 = vadd.f32 %v38250_v31, %v1221_v17  ;;  %v5012_v43 = vand.u32 4294901760, %v5011_v38  ;;  %v36363_v17 = vld [vmem:[%s47265_s2 + $0x150] sm:$0xff] }
 0x114   :  { %38678 = vmatmul.mubr.f32.vlgmr.msra.gmra.mxu0 %v41719_v15  ;;  %38682 = vmatprep.subr.mxu1 %v42403_v63  ;;  %v42604_v45 = vpop.f32.mrf.mxu1 }
 0x115   :  { %38692 = vmatpush3.msra.mxu0 %v42524_v56  ;;  %38683 = vmatpush3.msra.mxu1 %v42403_v63  ;;  %v38261_v20 = vpop.f32.mrf.mxu0  ;;  %v5025_v63 = vsub.f32 %v5023_v32, %v42588_v40 }
 0x116   :  { %38693 = vmatprep.subr.mxu0 %v42541_v5  ;;  %v1405_v58 = vadd.f32 %v38261_v20, %v1318_v39  ;;  %38684 = vmatprep.subr.mxu1 %v42420_v4  ;;  %v42643_v39 = vand.u32 4294901760, %v36363_v17 }
 0x117   :  { %38694 = vmatpush3.msra.mxu0 %v42541_v5  ;;  %38685 = vmatpush3.msra.mxu1 %v42420_v4  ;;  %v5032_v4 = vsub.f32 %v5030_v36, %v42595_v24  ;;  %v5026_v48 = vand.u32 4294901760, %v5025_v63  ;;  %v42612_v51 = vpop.f32.mrf.mxu0 }
 0x118   :  { %38695 = vmatprep.subr.mxu0 %v42550_v9  ;;  %38686 = vmatprep.subr.mxu1 %v42435_v11 }
 0x119   :  { %38696 = vmatpush3.msra.mxu0 %v42550_v9  ;;  %38687 = vmatpush3.msra.mxu1 %v42435_v11  ;;  %v5033_v54 = vand.u32 4294901760, %v5032_v4 }
 0x11a   :  { %38688 = vmatprep.mubr.f32.mxu1 %v41716_v13  ;;  %38697 = vmatprep.subr.mxu0 %v42560_v29 }
 0x11b   :  { %38689 = vmatmul.mubr.f32.vlgmr.msra.gmra.mxu1 %v41719_v15  ;;  %38698 = vmatpush3.msra.mxu0 %v42560_v29 }
 0x11c   :  { %38702 = vmatprep.subr.mxu1 %v5012_v43  ;;  %38699 = vmatprep.mubr.f32.mxu0 %v41753_v34  ;;  %v38272_v47 = vpop.f32.mrf.mxu1 }
 0x11d   :  { %38703 = vmatpush3.msra.mxu1 %v5012_v43  ;;  %38713 = vmatprep.subr.mxu0 %v42553_v18  ;;  %v1490_v11 = vadd.f32 %v38272_v47, %v1405_v58  ;;  %v36361_v58 = vld [vmem:[%s47265_s2 + $0x140] sm:$0xff] }
 0x11e   :  { %38700 = vmatmul.mubr.f32.vlgmr.msra.gmra.mxu0 %v41755_v35  ;;  %38704 = vmatprep.subr.mxu1 %v5019_v46  ;;  %v42620_v7 = vpop.f32.mrf.mxu1  ;;  %v42667_v63 = vand.u32 4294901760, %v36361_v58 }
 0x11f   :  { %38714 = vmatpush3.msra.mxu0 %v42553_v18  ;;  %38705 = vmatpush3.msra.mxu1 %v5019_v46  ;;  %v38283_v55 = vpop.f32.mrf.mxu0  ;;  %v42625_v18 = vsub.s32 3, %v42254_v8  ;;  %v42670_v46 = vsub.f32 %v36363_v17, %v42643_v39 }
 0x120   :  { %38715 = vmatprep.subr.mxu0 %v5016_v30  ;;  %v1579_v62 = vadd.f32 %v38283_v55, %v1490_v11  ;;  %38706 = vmatprep.subr.mxu1 %v5026_v48  ;;  %v5567_v55 = vsub.f32 %v36361_v58, %v42667_v63 }
 0x121   :  { %38716 = vmatpush3.msra.mxu0 %v5016_v30  ;;  %38707 = vmatpush3.msra.mxu1 %v5026_v48  ;;  %47323 = vst [vmem:[#allocation16_spill] sm:$0xff] %v42625_v18  ;;  %v42645_v38 = vpop.f32.mrf.mxu0  ;;  %v42651_v20 = vrot.slane %v42281_v16, %v42625_v18 }
 0x122   :  { %38717 = vmatprep.subr.mxu0 %v5023_v32  ;;  %38708 = vmatprep.subr.mxu1 %v5033_v54 }
 0x123   :  { %38718 = vmatpush3.msra.mxu0 %v5023_v32  ;;  %38709 = vmatpush3.msra.mxu1 %v5033_v54  ;;  %v42632_v32 = vand.u32 4294901760, %v36364_v6  ;;  %v42690_v54 = vand.u32 4294901760, %v42670_v46 }
 0x124   :  { %38719 = vmatprep.subr.mxu0 %v5030_v36  ;;  %38710 = vmatprep.mubr.f32.mxu1 %v41716_v13 }
 0x125   :  { %38720 = vmatpush3.msra.mxu0 %v5030_v36  ;;  %38724 = vmatprep.subr.mxu1 %v42524_v56  ;;  %v36362_v36 = vld [vmem:[%s47265_s2 + $0x148] sm:$0xff]  ;;  %v42661_v43 = vsub.f32 %v36364_v6, %v42632_v32 }
 0x126   :  { %38711 = vmatmul.mubr.f32.vlgmr.msra.gmra.mxu1 %v41719_v15  ;;  %38721 = vmatprep.mubr.f32.mxu0 %v41726_v19  ;;  %v38294_v30 = vpop.f32.mrf.mxu1  ;;  %v42658_v41 = vand.u32 4294901760, %v36362_v36 }
 0x127   :  { %38725 = vmatpush3.msra.mxu1 %v42524_v56  ;;  %38735 = vmatprep.subr.mxu0 %v42570_v26  ;;  %v42636_v31 = vadd.f32 %v38294_v30, %v1579_v62  ;;  %v5555_v30 = vsub.f32 %v42670_v46, %v42690_v54 }
 0x128   :  { %38722 = vmatmul.mubr.f32.vlgmr.msra.gmra.mxu0 %v41729_v21  ;;  %38726 = vmatprep.subr.mxu1 %v42541_v5  ;;  %v42675_v47 = vpop.f32.mrf.mxu1  ;;  %v5560_v48 = vsub.f32 %v36362_v36, %v42658_v41  ;;  %v42707_v36 = vand.u32 4294901760, %v5567_v55 }
 0x129   :  { %38736 = vmatpush3.msra.mxu0 %v42570_v26  ;;  %38727 = vmatpush3.msra.mxu1 %v42541_v5 }
 0x12a   :  { %38737 = vmatprep.subr.mxu0 %v42579_v14  ;;  %38728 = vmatprep.subr.mxu1 %v42550_v9  ;;  %v38305_v26 = vpop.f32.mrf.mxu0  ;;  %v42699_v6 = vand.u32 4294901760, %v5560_v48 }
 0x12b   :  { %38738 = vmatpush3.msra.mxu0 %v42579_v14  ;;  %38729 = vmatpush3.msra.mxu1 %v42550_v9  ;;  %v1758_v4 = vadd.f32 %v38305_v26, %v42651_v20  ;;  %v42680_v14 = vand.u32 4294901760, %v42661_v43 }
 0x12c   :  { %38739 = vmatprep.subr.mxu0 %v42588_v40  ;;  %38730 = vmatprep.subr.mxu1 %v42560_v29  ;;  %v5562_v58 = vsub.f32 %v5560_v48, %v42699_v6 }
 0x12d   :  { %38740 = vmatpush3.msra.mxu0 %v42588_v40  ;;  %38731 = vmatpush3.msra.mxu1 %v42560_v29  ;;  %v42685_v40 = vpop.f32.mrf.mxu0 }
 0x12e   :  { %38741 = vmatprep.subr.mxu0 %v42595_v24  ;;  %38732 = vmatprep.mubr.f32.mxu1 %v41739_v25 }
 0x12f   :  { %38742 = vmatpush3.msra.mxu0 %v42595_v24  ;;  %38746 = vmatprep.subr.mxu1 %v42524_v56  ;;  %v5548_v24 = vsub.f32 %v42661_v43, %v42680_v14 }
 0x130   :  { %38733 = vmatmul.mubr.f32.vlgmr.msra.gmra.mxu1 %v41742_v27  ;;  %38743 = vmatprep.mubr.f32.mxu0 %v41716_v13  ;;  %v38316_v11 = vpop.f32.mrf.mxu1 }
 0x131   :  { %38747 = vmatpush3.msra.mxu1 %v42524_v56  ;;  %38757 = vmatprep.subr.mxu0 %v42632_v32  ;;  %v1855_v62 = vadd.f32 %v38316_v11, %v1758_v4  ;;  %v5556_v4 = vand.u32 4294901760, %v5555_v30 }
 0x132   :  { %38744 = vmatmul.mubr.f32.vlgmr.msra.gmra.mxu0 %v41719_v15  ;;  %38748 = vmatprep.subr.mxu1 %v42541_v5  ;;  %v42716_v26 = vpop.f32.mrf.mxu1 }
 0x133   :  { %38758 = vmatpush3.msra.mxu0 %v42632_v32  ;;  %38749 = vmatpush3.msra.mxu1 %v42541_v5  ;;  %v38327_v17 = vpop.f32.mrf.mxu0  ;;  %v5549_v5 = vand.u32 4294901760, %v5548_v24 }
 0x134   :  { %38759 = vmatprep.subr.mxu0 %v42643_v39  ;;  %v1942_v56 = vadd.f32 %v38327_v17, %v1855_v62  ;;  %38750 = vmatprep.subr.mxu1 %v42550_v9  ;;  %v5563_v62 = vand.u32 4294901760, %v5562_v58 }
 0x135   :  { %38760 = vmatpush3.msra.mxu0 %v42643_v39  ;;  %38751 = vmatpush3.msra.mxu1 %v42550_v9  ;;  %v5569_v9 = vsub.f32 %v5567_v55, %v42707_v36  ;;  %v42724_v24 = vpop.f32.mrf.mxu0 }
 0x136   :  { %38761 = vmatprep.subr.mxu0 %v42658_v41  ;;  %38752 = vmatprep.subr.mxu1 %v42560_v29 }
 0x137   :  { %38762 = vmatpush3.msra.mxu0 %v42658_v41  ;;  %38753 = vmatpush3.msra.mxu1 %v42560_v29  ;;  %v5570_v17 = vand.u32 4294901760, %v5569_v9  ;;  %v36366_v9 = vld [vmem:[%s47265_s2 + $0x168] sm:$0xff] }
 0x138   :  { %38754 = vmatprep.mubr.f32.mxu1 %v41716_v13  ;;  %38763 = vmatprep.subr.mxu0 %v42667_v63 }
 0x139   :  { %38755 = vmatmul.mubr.f32.vlgmr.msra.gmra.mxu1 %v41719_v15  ;;  %38764 = vmatpush3.msra.mxu0 %v42667_v63 }
 0x13a   :  { %38768 = vmatprep.subr.mxu1 %v5549_v5  ;;  %38765 = vmatprep.mubr.f32.mxu0 %v41753_v34  ;;  %v38338_v11 = vpop.f32.mrf.mxu1 }
 0x13b   :  { %38769 = vmatpush3.msra.mxu1 %v5549_v5  ;;  %38779 = vmatprep.subr.mxu0 %v42661_v43  ;;  %v2027_v29 = vadd.f32 %v38338_v11, %v1942_v56  ;;  %v42732_v56 = vsub.s32 4, %v42254_v8 }
 0x13c   :  { %38766 = vmatmul.mubr.f32.vlgmr.msra.gmra.mxu0 %v41755_v35  ;;  %38770 = vmatprep.subr.mxu1 %v5556_v4  ;;  %v42737_v5 = vpop.f32.mrf.mxu1 }
 0x13d   :  { %38780 = vmatpush3.msra.mxu0 %v42661_v43  ;;  %38771 = vmatpush3.msra.mxu1 %v5556_v4  ;;  %v38349_v30 = vpop.f32.mrf.mxu0  ;;  %47324 = vst [vmem:[#allocation17_spill] sm:$0xff] %v42732_v56  ;;  %v36368_v43 = vld [vmem:[%s47265_s2 + $0x178] sm:$0xff] }
 0x13e   :  { %38781 = vmatprep.subr.mxu0 %v42670_v46  ;;  %v2116_v18 = vadd.f32 %v38349_v30, %v2027_v29  ;;  %38772 = vmatprep.subr.mxu1 %v5563_v62  ;;  %v42746_v58 = vand.u32 4294901760, %v36368_v43  ;;  %v42770_v29 = vand.u32 4294901760, %v36366_v9  ;;  %v137_v30 = vadd.f32 %v42338_v37, %v42299_v22 }
 0x13f   :  { %38782 = vmatpush3.msra.mxu0 %v42670_v46  ;;  %38773 = vmatpush3.msra.mxu1 %v5563_v62  ;;  %v36367_v46 = vld [vmem:[%s47265_s2 + $0x170] sm:$0xff]  ;;  %v42757_v11 = vpop.f32.mrf.mxu0 }
 0x140   :  { %38783 = vmatprep.subr.mxu0 %v5560_v48  ;;  %38774 = vmatprep.subr.mxu1 %v5570_v17  ;;  %v42761_v62 = vand.u32 4294901760, %v36367_v46  ;;  %v42796_v37 = vsub.f32 %v36366_v9, %v42770_v29 }
 0x141   :  { %38784 = vmatpush3.msra.mxu0 %v5560_v48  ;;  %38775 = vmatpush3.msra.mxu1 %v5570_v17  ;;  %v42773_v17 = vsub.f32 %v36368_v43, %v42746_v58 }
 0x142   :  { %38785 = vmatprep.subr.mxu0 %v5567_v55  ;;  %38776 = vmatprep.mubr.f32.mxu1 %v41716_v13  ;;  %v42816_v9 = vand.u32 4294901760, %v42796_v37 }
 0x143   :  { %38786 = vmatpush3.msra.mxu0 %v5567_v55  ;;  %38790 = vmatprep.subr.mxu1 %v42632_v32  ;;  %v2208_v55 = vrot.slane %v42281_v16, %v42732_v56  ;;  %v36365_v16 = vld [vmem:[%s47265_s2 + $0x160] sm:$0xff]  ;;  %v42784_v56 = vsub.f32 %v36367_v46, %v42761_v62  ;;  %v42793_v22 = vand.u32 4294901760, %v42773_v17 }
 0x144   :  { %38777 = vmatmul.mubr.f32.vlgmr.msra.gmra.mxu1 %v41719_v15  ;;  %38787 = vmatprep.mubr.f32.mxu0 %v41726_v19  ;;  %v38360_v48 = vpop.f32.mrf.mxu1 }
 0x145   :  { %38791 = vmatpush3.msra.mxu1 %v42632_v32  ;;  %38801 = vmatprep.subr.mxu0 %v42680_v14  ;;  %v42750_v4 = vadd.f32 %v38360_v48, %v2116_v18  ;;  %v42781_v48 = vand.u32 4294901760, %v36365_v16 }
 0x146   :  { %38788 = vmatmul.mubr.f32.vlgmr.msra.gmra.mxu0 %v41729_v21  ;;  %38792 = vmatprep.subr.mxu1 %v42643_v39  ;;  %v42788_v43 = vpop.f32.mrf.mxu1 }
 0x147   :  { %47325 = vst [vmem:[#allocation18_spill] sm:$0xff] %v42750_v4  ;;  %38802 = vmatpush3.msra.mxu0 %v42680_v14  ;;  %38793 = vmatpush3.msra.mxu1 %v42643_v39  ;;  %v42807_v50 = vsub.f32 %v36365_v16, %v42781_v48 }
 0x148   :  { %38803 = vmatprep.subr.mxu0 %v42690_v54  ;;  %38794 = vmatprep.subr.mxu1 %v42658_v41  ;;  %v38371_v18 = vpop.f32.mrf.mxu0 }
 0x149   :  { %38804 = vmatpush3.msra.mxu0 %v42690_v54  ;;  %38795 = vmatpush3.msra.mxu1 %v42658_v41  ;;  %v2295_v14 = vadd.f32 %v38371_v18, %v2208_v55  ;;  %v238_v54 = vadd.f32 %v42365_v49, %v137_v30  ;;  %v42804_v18 = vand.u32 4294901760, %v42784_v56 }
 0x14a   :  { %38805 = vmatprep.subr.mxu0 %v42699_v6  ;;  %38796 = vmatprep.subr.mxu1 %v42667_v63 }
 0x14b   :  { %38806 = vmatpush3.msra.mxu0 %v42699_v6  ;;  %38797 = vmatpush3.msra.mxu1 %v42667_v63  ;;  %v2284_v6 = vpop.f32.mrf.mxu0  ;;  %v324_v30 = vadd.f32 %v42370_v52, %v238_v54 }
 0x14c   :  { %38807 = vmatprep.subr.mxu0 %v42707_v36  ;;  %38798 = vmatprep.mubr.f32.mxu1 %v41739_v25  ;;  %v2285_v54 = vadd.f32 %v2284_v6, %v2208_v55 }
 0x14d   :  { %38808 = vmatpush3.msra.mxu0 %v42707_v36  ;;  %38812 = vmatprep.subr.mxu1 %v42632_v32  ;;  %v6085_v36 = vsub.f32 %v42773_v17, %v42793_v22  ;;  %v408_v4 = vadd.f32 %v42394_v60, %v324_v30 }
 0x14e   :  { %38799 = vmatmul.mubr.f32.vlgmr.msra.gmra.mxu1 %v41742_v27  ;;  %38809 = vmatprep.mubr.f32.mxu0 %v41716_v13  ;;  %v38382_v46 = vpop.f32.mrf.mxu1 }
 0x14f   :  { %38813 = vmatpush3.msra.mxu1 %v42632_v32  ;;  %38823 = vmatprep.subr.mxu0 %v42746_v58  ;;  %v2392_v49 = vadd.f32 %v38382_v46, %v2295_v14  ;;  %v6092_v14 = vsub.f32 %v42784_v56, %v42804_v18  ;;  %v42826_v46 = vand.u32 4294901760, %v42807_v50  ;;  %v6086_v52 = vand.u32 4294901760, %v6085_v36 }
 0x150   :  { %38810 = vmatmul.mubr.f32.vlgmr.msra.gmra.mxu0 %v41719_v15  ;;  %38814 = vmatprep.subr.mxu1 %v42643_v39  ;;  %v499_v30 = vadd.f32 %v42418_v3, %v408_v4 }
 0x151   :  { %38824 = vmatpush3.msra.mxu0 %v42746_v58  ;;  %38815 = vmatpush3.msra.mxu1 %v42643_v39  ;;  %v38393_v32 = vpop.f32.mrf.mxu0  ;;  %v6099_v39 = vsub.f32 %v42796_v37, %v42816_v9  ;;  %v6093_v60 = vand.u32 4294901760, %v6092_v14 }
 0x152   :  { %38825 = vmatprep.subr.mxu0 %v42761_v62  ;;  %v2479_v16 = vadd.f32 %v38393_v32, %v2392_v49  ;;  %38816 = vmatprep.subr.mxu1 %v42658_v41  ;;  %v2385_v49 = vpop.f32.mrf.mxu1  ;;  %v580_v6 = vadd.f32 %v42449_v23, %v499_v30 }
 0x153   :  { %38826 = vmatpush3.msra.mxu0 %v42761_v62  ;;  %38817 = vmatpush3.msra.mxu1 %v42658_v41  ;;  %v6106_v41 = vsub.f32 %v42807_v50, %v42826_v46  ;;  %v2386_v36 = vadd.f32 %v2385_v49, %v2285_v54  ;;  %v2471_v32 = vpop.f32.mrf.mxu0 }
 0x154   :  { %38827 = vmatprep.subr.mxu0 %v42770_v29  ;;  %38818 = vmatprep.subr.mxu1 %v42667_v63  ;;  %v6498_v23 = vsel %vm6496_vm1, %v580_v6, 0 }
 0x155   :  { %38828 = vmatpush3.msra.mxu0 %v42770_v29  ;;  %38819 = vmatpush3.msra.mxu1 %v42667_v63  ;;  %v6100_v63 = vand.u32 4294901760, %v6099_v39  ;;  %v6107_v3 = vand.u32 4294901760, %v6106_v41  ;;  %v42857_v54 = vand.u32 4294901760, %v6498_v23 }
 0x156   :  { %38820 = vmatprep.mubr.f32.mxu1 %v41716_v13  ;;  %38829 = vmatprep.subr.mxu0 %v42781_v48 }
 0x157   :  { %38821 = vmatmul.mubr.f32.vlgmr.msra.gmra.mxu1 %v41719_v15  ;;  %38830 = vmatpush3.msra.mxu0 %v42781_v48 }
 0x158   :  { %38834 = vmatprep.subr.mxu1 %v6086_v52  ;;  %38831 = vmatprep.mubr.f32.mxu0 %v41753_v34  ;;  %v38404_v55 = vpop.f32.mrf.mxu1 }
 0x159   :  { %38835 = vmatpush3.msra.mxu1 %v6086_v52  ;;  %38845 = vmatprep.subr.mxu0 %v42773_v17  ;;  %v2564_v14 = vadd.f32 %v38404_v55, %v2479_v16  ;;  %v2472_v52 = vadd.f32 %v2471_v32, %v2386_v36 }
 0x15a   :  { %38832 = vmatmul.mubr.f32.vlgmr.msra.gmra.mxu0 %v41755_v35  ;;  %38836 = vmatprep.subr.mxu1 %v6093_v60  ;;  %v2555_v39 = vpop.f32.mrf.mxu1 }
 0x15b   :  { %38846 = vmatpush3.msra.mxu0 %v42773_v17  ;;  %38837 = vmatpush3.msra.mxu1 %v6093_v60  ;;  %v38415_v4 = vpop.f32.mrf.mxu0  ;;  %v2556_v16 = vadd.f32 %v2555_v39, %v2472_v52  ;;  %v42855_v17 = vsub.s32 5, %v42254_v8  ;;  %v47278_v39 = vmov 0.0  }
 0x15c   :  { %38847 = vmatprep.subr.mxu0 %v42784_v56  ;;  %v2653_v34 = vadd.f32 %v38415_v4, %v2564_v14  ;;  %38838 = vmatprep.subr.mxu1 %v6100_v63 }
 0x15d   :  { %38848 = vmatpush3.msra.mxu0 %v42784_v56  ;;  %38839 = vmatpush3.msra.mxu1 %v6100_v63  ;;  %47326 = vst [vmem:[#allocation19_spill] sm:$0xff] %v42855_v17  ;;  %v2646_v49 = vpop.f32.mrf.mxu0  ;;  %v674_v56 = vadd.f32 %v42456_v28, %v42411_v1  ;;  %v42879_v28 = vsub.f32 %v6498_v23, %v42857_v54 }
 0x15e   :  { %38849 = vmatprep.subr.mxu0 %v42796_v37  ;;  %38840 = vmatprep.subr.mxu1 %v6107_v3  ;;  %v2647_v60 = vadd.f32 %v2646_v49, %v2556_v16 }
 0x15f   :  { %38850 = vmatpush3.msra.mxu0 %v42796_v37  ;;  %38841 = vmatpush3.msra.mxu1 %v6107_v3  ;;  %v775_v55 = vadd.f32 %v42490_v42, %v674_v56  ;;  %v6571_v32 = vand.u32 4294901760, %v42879_v28 }
 0x160   :  { %38851 = vmatprep.subr.mxu0 %v42807_v50  ;;  %38842 = vmatprep.mubr.f32.mxu1 %v41716_v13 }
 0x161   :  { %38852 = vmatpush3.msra.mxu0 %v42807_v50  ;;  %38856 = vmatprep.subr.mxu1 %v42746_v58  ;;  %v42874_v50 = vld [vmem:[%s47267_s4] sm:$0xff]  ;;  %v861_v42 = vadd.f32 %v42496_v44, %v775_v55  ;;  %v6572_v44 = vsub.f32 %v42879_v28, %v6571_v32 }
 0x162   :  { %38843 = vmatmul.mubr.f32.vlgmr.msra.gmra.mxu1 %v41719_v15  ;;  %38853 = vmatprep.mubr.f32.mxu0 %v41726_v19  ;;  %v38426_v37 = vpop.f32.mrf.mxu1  ;;  %v2745_v1 = vrot.slane %v42874_v50, %v42855_v17 }
 0x163   :  { %38857 = vmatpush3.msra.mxu1 %v42746_v58  ;;  %38867 = vmatprep.subr.mxu0 %v42793_v22  ;;  %v42869_v41 = vadd.f32 %v38426_v37, %v2653_v34  ;;  %v945_v3 = vadd.f32 %v42513_v53, %v861_v42  ;;  %v1211_v42 = vadd.f32 %v42575_v33, %v42532_v61 }
 0x164   :  { %38854 = vmatmul.mubr.f32.vlgmr.msra.gmra.mxu0 %v41729_v21  ;;  %38858 = vmatprep.subr.mxu1 %v42761_v62  ;;  %v2727_v30 = vpop.f32.mrf.mxu1 }
 0x165   :  { %38868 = vmatpush3.msra.mxu0 %v42793_v22  ;;  %38859 = vmatpush3.msra.mxu1 %v42761_v62  ;;  %v2728_v34 = vadd.f32 %v2727_v30, %v2647_v60  ;;  %v1036_v52 = vadd.f32 %v42537_v2, %v945_v3  ;;  %v1312_v61 = vadd.f32 %v42604_v45, %v1211_v42 }
 0x166   :  { %38869 = vmatprep.subr.mxu0 %v42804_v18  ;;  %38860 = vmatprep.subr.mxu1 %v42770_v29  ;;  %v38437_v63 = vpop.f32.mrf.mxu0 }
 0x167   :  { %v6501_v6 = vsel %vm6496_vm1, %v2728_v34, 0  ;;  %38870 = vmatpush3.msra.mxu0 %v42804_v18  ;;  %38861 = vmatpush3.msra.mxu1 %v42770_v29  ;;  %v2832_v36 = vadd.f32 %v38437_v63, %v2745_v1  ;;  %v1117_v49 = vadd.f32 %v42565_v10, %v1036_v52 }
 0x168   :  { %v42892_v22 = vand.u32 4294901760, %v6501_v6  ;;  %38871 = vmatprep.subr.mxu0 %v42816_v9  ;;  %38862 = vmatprep.subr.mxu1 %v42781_v48  ;;  %v2821_v18 = vpop.f32.mrf.mxu0 }
 0x169   :  { %38872 = vmatpush3.msra.mxu0 %v42816_v9  ;;  %38863 = vmatpush3.msra.mxu1 %v42781_v48  ;;  %v6950_v10 = vsel %vm6496_vm1, %v1117_v49, 0 }
 0x16a   :  { %v6611_v14 = vsub.f32 %v6501_v6, %v42892_v22  ;;  %38873 = vmatprep.subr.mxu0 %v42826_v46  ;;  %38864 = vmatprep.mubr.f32.mxu1 %v41739_v25 }
 0x16b   :  { %38874 = vmatpush3.msra.mxu0 %v42826_v46  ;;  %38875 = vmatprep.mubr.f32.mxu0 %v41716_v13 }
 0x16c   :  { %v6612_v4 = vand.u32 4294901760, %v6611_v14  ;;  %38878 = vmatprep.subr.mxu1 %v42746_v58  ;;  %38865 = vmatmul.mubr.f32.vlgmr.msra.gmra.mxu1 %v41742_v27  ;;  %v38448_v9 = vpop.f32.mrf.mxu1 }
 0x16d   :  { %38876 = vmatmul.mubr.f32.vlgmr.msra.gmra.mxu0 %v41719_v15  ;;  %38879 = vmatpush3.msra.mxu1 %v42746_v58  ;;  %v2929_v46 = vadd.f32 %v38448_v9, %v2832_v36  ;;  %v6573_v58 = vand.u32 4294901760, %v6572_v44  ;;  %v42964_v44 = vsub.s32 6, %v42254_v8 }
 0x16e   :  { %38889 = vmatprep.subr.mxu0 %v47278_v39  ;;  %38880 = vmatprep.subr.mxu1 %v42761_v62  ;;  %v6613_v23 = vsub.f32 %v6611_v14, %v6612_v4  ;;  %v2922_v56 = vpop.f32.mrf.mxu1 }
 0x16f   :  { %38890 = vmatpush3.xpose.msra.mxu0 %v42892_v22  ;;  %38881 = vmatpush3.msra.mxu1 %v42761_v62  ;;  %v38459_v53 = vpop.f32.mrf.mxu0  ;;  %v2822_v62 = vadd.f32 %v2821_v18, %v2745_v1  ;;  %v42937_v1 = vand.u32 4294901760, %v6950_v10  ;;  %47327 = vst [vmem:[#allocation20_spill] sm:$0xff] %v42964_v44 }
 0x170   :  { %v3016_v16 = vadd.f32 %v38459_v53, %v2929_v46  ;;  %38882 = vmatprep.subr.mxu1 %v42770_v29  ;;  %38891 = vmatprep.mubr.msk.f32.mxu0 %vm41652_vm2, %v47278_v39  ;;  %v6614_v2 = vand.u32 4294901760, %v6613_v23  ;;  %v3282_v46 = vrot.slane %v42874_v50, %v42964_v44  ;;  %v1398_v53 = vadd.f32 %v42612_v51, %v1312_v61 }
 0x171   :  { %38883 = vmatpush3.msra.mxu1 %v42770_v29  ;;  %38899 = vmatprep.subr.mxu0 %v47278_v39  ;;  %v2923_v37 = vadd.f32 %v2922_v56, %v2822_v62  ;;  %v42950_v6 = vsub.f32 %v6950_v10, %v42937_v1 }
 0x172   :  { %38892 = vmatmul.mubr.f32.vlgmr.msra.gmra.mxu0 %v6573_v58  ;;  %38884 = vmatprep.subr.mxu1 %v42781_v48  ;;  %v1482_v45 = vadd.f32 %v42620_v7, %v1398_v53 }
 0x173   :  { %38900 = vmatpush3.xpose.msra.mxu0 %v6611_v14  ;;  %38885 = vmatpush3.msra.mxu1 %v42781_v48  ;;  %v3008_v48 = vpop.f32.mrf.mxu0  ;;  %v7023_v3 = vand.u32 4294901760, %v42950_v6 }
 0x174   :  { %38886 = vmatprep.mubr.f32.mxu1 %v41716_v13  ;;  %38901 = vmatprep.mubr.msk.f32.mxu0 %vm41652_vm2, %v47278_v39  ;;  %v3009_v63 = vadd.f32 %v3008_v48, %v2923_v37  ;;  %v1573_v10 = vadd.f32 %v42645_v38, %v1482_v45 }
 0x175   :  { %38887 = vmatmul.mubr.f32.vlgmr.msra.gmra.mxu1 %v41719_v15  ;;  %38894 = vmatprep.subr.mxu1 %v47278_v39 }
 0x176   :  { %38902 = vmatmul.mubr.f32.vlgmr.msra.gmra.mxu0 %v42879_v28  ;;  %38909 = vmatprep.subr.mxu0 %v47278_v39  ;;  %v38470_v29 = vpop.f32.mrf.mxu1  ;;  %v1654_v37 = vadd.f32 %v42675_v47, %v1573_v10 }
 0x177   :  { %v3101_v60 = vadd.f32 %v38470_v29, %v3016_v16  ;;  %38895 = vmatpush3.xpose.msra.mxu1 %v6614_v2  ;;  %38910 = vmatpush3.xpose.msra.mxu0 %v6612_v4 }
 0x178   :  { %38896 = vmatprep.mubr.msk.f32.mxu1 %vm41652_vm2, %v47278_v39  ;;  %38911 = vmatprep.mubr.msk.f32.mxu0 %vm41652_vm2, %v47278_v39  ;;  %v3092_v34 = vpop.f32.mrf.mxu1  ;;  %v7402_v38 = vsel %vm6496_vm1, %v1654_v37, 0 }
 0x179   :  { %v38481_v30 = vpop.f32.mrf.mxu0  ;;  %38904 = vmatprep.subr.mxu1 %v47278_v39  ;;  %38919 = vmatprep.subr.mxu0 %v47278_v39  ;;  %v3093_v36 = vadd.f32 %v3092_v34, %v3009_v63 }
 0x17a   :  { %v3190_v55 = vadd.f32 %v38481_v30, %v3101_v60  ;;  %38897 = vmatmul.mubr.f32.vlgmr.msra.gmra.mxu1 %v42857_v54  ;;  %38912 = vmatmul.mubr.f32.vlgmr.msra.gmra.mxu0 %v42857_v54 }
 0x17b   :  { %38905 = vmatpush3.xpose.msra.mxu1 %v42892_v22  ;;  %38906 = vmatprep.mubr.msk.f32.mxu1 %vm41652_vm2, %v47278_v39  ;;  %v3183_v14 = vpop.f32.mrf.mxu0 }
 0x17c   :  { %38914 = vmatprep.subr.mxu1 %v47278_v39  ;;  %38921 = vmatprep.mubr.msk.f32.mxu0 %vm41652_vm2, %v47278_v39  ;;  %v3184_v4 = vadd.f32 %v3183_v14, %v3093_v36  ;;  %v42992_v36 = vand.u32 4294901760, %v7402_v38 }
 0x17e   :  { %38907 = vmatmul.mubr.f32.vlgmr.msra.gmra.mxu1 %v6571_v32 }
 0x17f   :  { %38915 = vmatpush3.xpose.msra.mxu1 %v42892_v22  ;;  %38916 = vmatprep.mubr.msk.f32.mxu1 %vm41652_vm2, %v47278_v39  ;;  %v7024_v22 = vsub.f32 %v42950_v6, %v7023_v3 }
 0x180   :  { %v38492_v18 = vpop.f32.mrf.mxu1  ;;  %38924 = vmatprep.subr.mxu1 %v47278_v39 }
 0x181   :  { %v42961_v9 = vadd.f32 %v38492_v18, %v3190_v55  ;;  %v7474_v18 = vsub.f32 %v7402_v38, %v42992_v36 }
 0x182   :  { %v3264_v33 = vpop.f32.mrf.mxu1  ;;  %38917 = vmatmul.mubr.f32.vlgmr.msra.gmra.mxu1 %v42857_v54  ;;  %v7025_v54 = vand.u32 4294901760, %v7024_v22 }
 0x183   :  { %v3265_v28 = vadd.f32 %v3264_v33, %v3184_v4  ;;  %38926 = vmatprep.mubr.msk.f32.mxu1 %vm41652_vm2, %v47278_v39 }
 0x185   :  { %v6953_v32 = vsel %vm6496_vm1, %v3265_v28, 0  ;;  %v1748_v28 = vadd.f32 %v42685_v40, %v42651_v20 }
 0x186   :  { %v6986_v23 = vand.u32 4294901760, %v6953_v32  ;;  %v38503_v52 = vpop.f32.mrf.mxu0 }
 0x187   :  { %v3369_v16 = vadd.f32 %v38503_v52, %v3282_v46  ;;  %v1849_v52 = vadd.f32 %v42716_v26, %v1748_v28 }
 0x188   :  { %v7063_v58 = vsub.f32 %v6953_v32, %v6986_v23  ;;  %38920 = vmatpush3.xpose.msra.mxu0 %v6986_v23  ;;  %v3358_v49 = vpop.f32.mrf.mxu0 }
 0x189   :  { %38929 = vmatprep.subr.mxu0 %v47278_v39  ;;  %v38514_v62 = vpop.f32.mrf.mxu1  ;;  %v3359_v51 = vadd.f32 %v3358_v49, %v3282_v46  ;;  %v1935_v20 = vadd.f32 %v42724_v24, %v1849_v52 }
 0x18a   :  { %v7064_v2 = vand.u32 4294901760, %v7063_v58  ;;  %v3466_v56 = vadd.f32 %v38514_v62, %v3369_v16 }
 0x18b   :  { %38922 = vmatmul.mubr.f32.vlgmr.msra.gmra.mxu0 %v7025_v54  ;;  %v3459_v7 = vpop.f32.mrf.mxu1  ;;  %v2019_v62 = vadd.f32 %v42737_v5, %v1935_v20 }
 0x18c   :  { %38930 = vmatpush3.xpose.msra.mxu0 %v7063_v58  ;;  %38931 = vmatprep.mubr.msk.f32.mxu0 %vm41652_vm2, %v47278_v39  ;;  %v7065_v29 = vsub.f32 %v7063_v58, %v7064_v2  ;;  %v3460_v60 = vadd.f32 %v3459_v7, %v3359_v51 }
 0x18d   :  { %38939 = vmatprep.subr.mxu0 %v47278_v39  ;;  %v2110_v10 = vadd.f32 %v42757_v11, %v2019_v62 }
 0x18e   :  { %v7066_v48 = vand.u32 4294901760, %v7065_v29 }
 0x18f   :  { %38932 = vmatmul.mubr.f32.vlgmr.msra.gmra.mxu0 %v42950_v6 }
 0x190   :  { %38925 = vmatpush3.xpose.msra.mxu1 %v7066_v48  ;;  %38940 = vmatpush3.xpose.msra.mxu0 %v7064_v2  ;;  %v38525_v30 = vpop.f32.mrf.mxu0 }
 0x191   :  { %v3553_v34 = vadd.f32 %v38525_v30, %v3466_v56  ;;  %38941 = vmatprep.mubr.msk.f32.mxu0 %vm41652_vm2, %v47278_v39  ;;  %38934 = vmatprep.subr.mxu1 %v47278_v39 }
 0x192   :  { %v3545_v55 = vpop.f32.mrf.mxu0  ;;  %38949 = vmatprep.subr.mxu0 %v47278_v39 }
 0x193   :  { %38927 = vmatmul.mubr.f32.vlgmr.msra.gmra.mxu1 %v42937_v1  ;;  %38942 = vmatmul.mubr.f32.vlgmr.msra.gmra.mxu0 %v42937_v1  ;;  %v38536_v47 = vpop.f32.mrf.mxu1  ;;  %v3546_v63 = vadd.f32 %v3545_v55, %v3460_v60 }
 0x194   :  { %v3638_v6 = vadd.f32 %v38536_v47, %v3553_v34  ;;  %38935 = vmatpush3.xpose.msra.mxu1 %v6986_v23  ;;  %38936 = vmatprep.mubr.msk.f32.mxu1 %vm41652_vm2, %v47278_v39 }
 0x195   :  { %v3629_v42 = vpop.f32.mrf.mxu1  ;;  %38944 = vmatprep.subr.mxu1 %v47278_v39  ;;  %38951 = vmatprep.mubr.msk.f32.mxu0 %vm41652_vm2, %v47278_v39 }
 0x196   :  { %v3630_v14 = vadd.f32 %v3629_v42, %v3546_v63 }
 0x197   :  { %38937 = vmatmul.mubr.f32.vlgmr.msra.gmra.mxu1 %v7023_v3  ;;  %v7475_v3 = vand.u32 4294901760, %v7474_v18 }
 0x198   :  { %38945 = vmatpush3.xpose.msra.mxu1 %v6986_v23  ;;  %38946 = vmatprep.mubr.msk.f32.mxu1 %vm41652_vm2, %v47278_v39 }
 0x199   :  { %v38547_v4 = vpop.f32.mrf.mxu0  ;;  %38954 = vmatprep.subr.mxu1 %v47278_v39  ;;  %v7476_v45 = vsub.f32 %v7474_v18, %v7475_v3 }
 0x19a   :  { %v3727_v61 = vadd.f32 %v38547_v4, %v3638_v6  ;;  %v8306_v4 = vsel %vm6496_vm1, %v42407_v0, 0 }
 0x19b   :  { %v3720_v33 = vpop.f32.mrf.mxu0  ;;  %38947 = vmatmul.mubr.f32.vlgmr.msra.gmra.mxu1 %v42937_v1  ;;  %v43011_v1 = vsub.s32 7, %v42254_v8  ;;  %v7477_v49 = vand.u32 4294901760, %v7476_v45  ;;  %v43073_v28 = vand.u32 4294901760, %v8306_v4 }
 0x19c   :  { %v3721_v32 = vadd.f32 %v3720_v33, %v3630_v14  ;;  %v38558_v22 = vpop.f32.mrf.mxu1  ;;  %38956 = vmatprep.mubr.msk.f32.mxu1 %vm41652_vm2, %v47278_v39 }
 0x19d   :  { %v43006_v46 = vadd.f32 %v38558_v22, %v3727_v61  ;;  %47328 = vst [vmem:[#allocation21_spill] sm:$0xff] %v43011_v1  ;;  %v43020_v26 = vrot.slane %v42874_v50, %v43011_v1  ;;  %v2191_v50 = vadd.f32 %v42788_v43, %v2110_v10 }
 0x19e   :  { %v3801_v53 = vpop.f32.mrf.mxu1 }
 0x19f   :  { %v3802_v23 = vadd.f32 %v3801_v53, %v3721_v32  ;;  %v7854_v11 = vsel %vm6496_vm1, %v2191_v50, 0  ;;  %v8309_v53 = vsel %vm6496_vm1, %v42869_v41, 0 }
 0x1a0   :  { %v43046_v30 = vand.u32 4294901760, %v7854_v11 }
 0x1a1   :  { %v7405_v16 = vsel %vm6496_vm1, %v3802_v23, 0 }
 0x1a2   :  { %v7438_v58 = vand.u32 4294901760, %v7405_v16  ;;  %v43052_v55 = vsub.f32 %v7854_v11, %v43046_v30 }
 0x1a4   :  { %v7515_v40 = vsub.f32 %v7405_v16, %v7438_v58  ;;  %38950 = vmatpush3.xpose.msra.mxu0 %v7438_v58  ;;  %v43014_v54 = vpop.f32.mrf.mxu0  ;;  %v7927_v14 = vand.u32 4294901760, %v43052_v55  ;;  %v43081_v16 = vsub.f32 %v8306_v4, %v43073_v28  ;;  %v9210_v4 = vsel %vm6496_vm1, %v42636_v31, 0 }
 0x1a5   :  { %38959 = vmatprep.subr.mxu0 %v47278_v39  ;;  %v3906_v11 = vadd.f32 %v43014_v54, %v43020_v26 }
 0x1a6   :  { %v7516_v2 = vand.u32 4294901760, %v7515_v40  ;;  %v3895_v56 = vpop.f32.mrf.mxu0  ;;  %v7928_v22 = vsub.f32 %v43052_v55, %v7927_v14 }
 0x1a7   :  { %38952 = vmatmul.mubr.f32.vlgmr.msra.gmra.mxu0 %v7477_v49  ;;  %v43022_v8 = vpop.f32.mrf.mxu1  ;;  %v3896_v5 = vadd.f32 %v3895_v56, %v43020_v26  ;;  %v8379_v49 = vand.u32 4294901760, %v43081_v16 }
 0x1a8   :  { %38960 = vmatpush3.xpose.msra.mxu0 %v7515_v40  ;;  %38961 = vmatprep.mubr.msk.f32.mxu0 %vm41652_vm2, %v47278_v39  ;;  %v7517_v24 = vsub.f32 %v7515_v40, %v7516_v2  ;;  %v7929_v45 = vand.u32 4294901760, %v7928_v22  ;;  %v43141_v22 = vand.u32 4294901760, %v9210_v4 }
 0x1a9   :  { %38969 = vmatprep.subr.mxu0 %v47278_v39  ;;  %v3996_v29 = vpop.f32.mrf.mxu1 }
 0x1aa   :  { %v7518_v51 = vand.u32 4294901760, %v7517_v24  ;;  %v3997_v7 = vadd.f32 %v3996_v29, %v3896_v5 }
 0x1ab   :  { %38962 = vmatmul.mubr.f32.vlgmr.msra.gmra.mxu0 %v7474_v18  ;;  %v43065_v18 = vld [vmem:[%s47267_s4 + $0x8] sm:$0xff] }
 0x1ac   :  { %38955 = vmatpush3.xpose.msra.mxu1 %v7518_v51  ;;  %38970 = vmatpush3.xpose.msra.mxu0 %v7516_v2  ;;  %v8758_v2 = vsel %vm6496_vm1, %v42528_v59, 0  ;;  %v8380_v59 = vsub.f32 %v43081_v16, %v8379_v49 }
 0x1ad   :  { %38971 = vmatprep.mubr.msk.f32.mxu0 %vm41652_vm2, %v47278_v39  ;;  %38964 = vmatprep.subr.mxu1 %v47278_v39  ;;  %v43096_v51 = vand.u32 4294901760, %v8758_v2 }
 0x1ae   :  { %v43033_v37 = vpop.f32.mrf.mxu0  ;;  %38979 = vmatprep.subr.mxu0 %v47278_v39 }
 0x1af   :  { %38957 = vmatmul.mubr.f32.vlgmr.msra.gmra.mxu1 %v42992_v36  ;;  %38972 = vmatmul.mubr.f32.vlgmr.msra.gmra.mxu0 %v42992_v36 }
 0x1b0   :  { %v4082_v48 = vpop.f32.mrf.mxu0  ;;  %38965 = vmatpush3.xpose.msra.mxu1 %v7438_v58  ;;  %38966 = vmatprep.mubr.msk.f32.mxu1 %vm41652_vm2, %v47278_v39 }
 0x1b1   :  { %v43041_v43 = vpop.f32.mrf.mxu1  ;;  %38974 = vmatprep.subr.mxu1 %v47278_v39  ;;  %38981 = vmatprep.mubr.msk.f32.mxu0 %vm41652_vm2, %v47278_v39  ;;  %v4083_v60 = vadd.f32 %v4082_v48, %v3997_v7  ;;  %v8761_v7 = vsel %vm6496_vm1, %v42961_v9, 0  ;;  %v8381_v9 = vand.u32 4294901760, %v8380_v59 }
 0x1b2   :  { %v43121_v54 = vand.u32 4294901760, %v8761_v7 }
 0x1b3   :  { %v4166_v34 = vpop.f32.mrf.mxu1  ;;  %38967 = vmatmul.mubr.f32.vlgmr.msra.gmra.mxu1 %v7475_v3 }
 0x1b4   :  { %38975 = vmatpush3.xpose.msra.mxu1 %v7438_v58  ;;  %38976 = vmatprep.mubr.msk.f32.mxu1 %vm41652_vm2, %v47278_v39  ;;  %v4167_v38 = vadd.f32 %v4166_v34, %v4083_v60  ;;  %v43084_v58 = vand.u32 4294901760, %v8309_v53  ;;  %v43115_v60 = vsub.f32 %v8758_v2, %v43096_v51 }
 0x1b5   :  { %38984 = vmatprep.subr.mxu1 %v47278_v39 }
 0x1b6   :  { %v8419_v56 = vsub.f32 %v8309_v53, %v43084_v58 }
 0x1b7   :  { %v43054_v47 = vpop.f32.mrf.mxu0  ;;  %38977 = vmatmul.mubr.f32.vlgmr.msra.gmra.mxu1 %v42992_v36  ;;  %v43071_v36 = vrot.slane %v43065_v18, %v42272_v12 }
 0x1b8   :  { %38986 = vmatprep.mubr.msk.f32.mxu1 %vm41652_vm2, %v47278_v39  ;;  %v8420_v50 = vand.u32 4294901760, %v8419_v56 }
 0x1b9   :  { %v4257_v63 = vpop.f32.mrf.mxu0 }
 0x1ba   :  { %v4258_v6 = vadd.f32 %v4257_v63, %v4167_v38  ;;  %v43059_v42 = vpop.f32.mrf.mxu1  ;;  %v8421_v26 = vsub.f32 %v8419_v56, %v8420_v50  ;;  %v4003_v38 = vadd.f32 %v43022_v8, %v3906_v11  ;;  %v8831_v63 = vand.u32 4294901760, %v43115_v60 }
 0x1bc   :  { %v4338_v61 = vpop.f32.mrf.mxu1  ;;  %v8422_v8 = vand.u32 4294901760, %v8421_v26  ;;  %v8832_v31 = vsub.f32 %v43115_v60, %v8831_v63 }
 0x1bd   :  { %v4339_v33 = vadd.f32 %v4338_v61, %v4258_v6  ;;  %v8871_v61 = vsub.f32 %v8761_v7, %v43121_v54 }
 0x1bf   :  { %v7857_v32 = vsel %vm6496_vm1, %v4339_v33, 0  ;;  %v4090_v33 = vadd.f32 %v43033_v37, %v4003_v38 }
 0x1c0   :  { %v7890_v3 = vand.u32 4294901760, %v7857_v32 }
 0x1c1   :  { %v38635_v23 = vpop.f32.mrf.mxu0  ;;  %v4175_v53 = vadd.f32 %v43041_v43, %v4090_v33 }
 0x1c2   :  { %v7967_v52 = vsub.f32 %v7857_v32, %v7890_v3  ;;  %38980 = vmatpush3.xpose.msra.mxu0 %v7890_v3  ;;  %v4443_v0 = vadd.f32 %v38635_v23, %v43071_v36 }
 0x1c3   :  { %38989 = vmatprep.subr.mxu0 %v47278_v39  ;;  %v43088_v40 = vpop.f32.mrf.mxu0 }
 0x1c4   :  { %v7968_v20 = vand.u32 4294901760, %v7967_v52  ;;  %v4433_v23 = vadd.f32 %v43088_v40, %v43071_v36  ;;  %v4264_v40 = vadd.f32 %v43054_v47, %v4175_v53 }
 0x1c5   :  { %38982 = vmatmul.mubr.f32.vlgmr.msra.gmra.mxu0 %v7929_v45 }
 0x1c6   :  { %38990 = vmatpush3.xpose.msra.mxu0 %v7967_v52  ;;  %38991 = vmatprep.mubr.msk.f32.mxu0 %vm41652_vm2, %v47278_v39  ;;  %v7969_v41 = vsub.f32 %v7967_v52, %v7968_v20  ;;  %v43162_v52 = vsub.f32 %v9210_v4, %v43141_v22 }
 0x1c7   :  { %38999 = vmatprep.subr.mxu0 %v47278_v39  ;;  %v38646_v62 = vpop.f32.mrf.mxu1 }
 0x1c8   :  { %v7970_v24 = vand.u32 4294901760, %v7969_v41  ;;  %v4540_v10 = vadd.f32 %v38646_v62, %v4443_v0  ;;  %v43170_v0 = vrot.slane %v43065_v18, %v42385_v57 }
 0x1c9   :  { %38992 = vmatmul.mubr.f32.vlgmr.msra.gmra.mxu0 %v43052_v55  ;;  %v43112_v48 = vpop.f32.mrf.mxu1 }
 0x1ca   :  { %38985 = vmatpush3.xpose.msra.mxu1 %v7970_v24  ;;  %39000 = vmatpush3.xpose.msra.mxu0 %v7968_v20  ;;  %v38657_v5 = vpop.f32.mrf.mxu0  ;;  %v4534_v62 = vadd.f32 %v43112_v48, %v4433_v23  ;;  %v47329_v24 = vld [vmem:[#allocation18_spill] sm:$0xff] }
 0x1cb   :  { %39001 = vmatprep.mubr.msk.f32.mxu0 %vm41652_vm2, %v47278_v39  ;;  %38994 = vmatprep.subr.mxu1 %v47278_v39  ;;  %v4627_v29 = vadd.f32 %v38657_v5, %v4540_v10  ;;  %v4345_v10 = vadd.f32 %v43059_v42, %v4264_v40 }
 0x1cc   :  { %39009 = vmatprep.subr.mxu0 %v47278_v39  ;;  %v43125_v34 = vpop.f32.mrf.mxu0 }
 0x1cd   :  { %38987 = vmatmul.mubr.f32.vlgmr.msra.gmra.mxu1 %v43046_v30  ;;  %39002 = vmatmul.mubr.f32.vlgmr.msra.gmra.mxu0 %v43046_v30  ;;  %v4620_v5 = vadd.f32 %v43125_v34, %v4534_v62  ;;  %v9665_v7 = vsel %vm6496_vm1, %v4345_v10, 0 }
 0x1ce   :  { %38995 = vmatpush3.xpose.msra.mxu1 %v7890_v3  ;;  %39010 = vmatpush3.xpose.msra.mxu0 %v43084_v58  ;;  %v43223_v38 = vand.u32 4294901760, %v9665_v7 }
 0x1cf   :  { %38996 = vmatprep.mubr.msk.f32.mxu1 %vm41652_vm2, %v47278_v39  ;;  %39011 = vmatprep.mubr.msk.f32.mxu0 %vm41652_vm2, %v47278_v39 }
 0x1d0   :  { %39004 = vmatprep.subr.mxu1 %v47278_v39  ;;  %39019 = vmatprep.subr.mxu0 %v47278_v39 }
 0x1d1   :  { %38997 = vmatmul.mubr.f32.vlgmr.msra.gmra.mxu1 %v7927_v14  ;;  %39012 = vmatmul.mubr.f32.vlgmr.msra.gmra.mxu0 %v8381_v9 }
 0x1d2   :  { %39005 = vmatpush3.xpose.msra.mxu1 %v7890_v3  ;;  %39020 = vmatpush3.xpose.msra.mxu0 %v8419_v56  ;;  %v38668_v55 = vpop.f32.mrf.mxu1  ;;  %v8872_v3 = vand.u32 4294901760, %v8871_v61  ;;  %v9283_v56 = vand.u32 4294901760, %v43162_v52 }
 0x1d3   :  { %39006 = vmatprep.mubr.msk.f32.mxu1 %vm41652_vm2, %v47278_v39  ;;  %39021 = vmatprep.mubr.msk.f32.mxu0 %vm41652_vm2, %v47278_v39  ;;  %v4712_v6 = vadd.f32 %v38668_v55, %v4627_v29 }
 0x1d4   :  { %39014 = vmatprep.subr.mxu1 %v47278_v39  ;;  %39029 = vmatprep.subr.mxu0 %v47278_v39  ;;  %v38679_v14 = vpop.f32.mrf.mxu0  ;;  %v4703_v37 = vpop.f32.mrf.mxu1  ;;  %v8873_v36 = vsub.f32 %v8871_v61, %v8872_v3  ;;  %v9284_v42 = vsub.f32 %v43162_v52, %v9283_v56 }
 0x1d5   :  { %39007 = vmatmul.mubr.f32.vlgmr.msra.gmra.mxu1 %v43046_v30  ;;  %39022 = vmatmul.mubr.f32.vlgmr.msra.gmra.mxu0 %v43081_v16  ;;  %v4801_v32 = vadd.f32 %v38679_v14, %v4712_v6  ;;  %v9213_v30 = vsel %vm6496_vm1, %v43006_v46, 0  ;;  %v8833_v46 = vand.u32 4294901760, %v8832_v31  ;;  %v9662_v16 = vsel %vm6496_vm1, %v47329_v24, 0 }
 0x1d6   :  { %39015 = vmatpush3.xpose.msra.mxu1 %v8422_v8  ;;  %39030 = vmatpush3.xpose.msra.mxu0 %v8420_v50  ;;  %v43172_v45 = vand.u32 4294901760, %v9213_v30  ;;  %v4794_v20 = vpop.f32.mrf.mxu0  ;;  %v43198_v59 = vand.u32 4294901760, %v9662_v16  ;;  %v4704_v11 = vadd.f32 %v4703_v37, %v4620_v5  ;;  %v9285_v26 = vand.u32 4294901760, %v9284_v42 }
 0x1d7   :  { %39016 = vmatprep.mubr.msk.f32.mxu1 %vm41652_vm2, %v47278_v39  ;;  %39031 = vmatprep.mubr.msk.f32.mxu0 %vm41652_vm2, %v47278_v39  ;;  %v9775_v14 = vsub.f32 %v9665_v7, %v43223_v38 }
 0x1d8   :  { %39024 = vmatprep.subr.mxu1 %v47278_v39  ;;  %39039 = vmatprep.subr.mxu0 %v47278_v39  ;;  %v43217_v9 = vsub.f32 %v9662_v16, %v43198_v59 }
 0x1d9   :  { %39017 = vmatmul.mubr.f32.vlgmr.msra.gmra.mxu1 %v43073_v28  ;;  %39032 = vmatmul.mubr.f32.vlgmr.msra.gmra.mxu0 %v43073_v28  ;;  %v9776_v31 = vand.u32 4294901760, %v9775_v14 }
 0x1da   :  { %39025 = vmatpush3.xpose.msra.mxu1 %v43084_v58  ;;  %39040 = vmatpush3.xpose.msra.mxu0 %v43121_v54  ;;  %v9735_v8 = vand.u32 4294901760, %v43217_v9 }
 0x1db   :  { %39026 = vmatprep.mubr.msk.f32.mxu1 %vm41652_vm2, %v47278_v39  ;;  %39041 = vmatprep.mubr.msk.f32.mxu0 %vm41652_vm2, %v47278_v39  ;;  %v38690_v43 = vpop.f32.mrf.mxu1 }
 0x1dc   :  { %39034 = vmatprep.subr.mxu1 %v47278_v39  ;;  %39049 = vmatprep.subr.mxu0 %v47278_v39  ;;  %v43176_v41 = vadd.f32 %v38690_v43, %v4801_v32  ;;  %v9736_v32 = vsub.f32 %v43217_v9, %v9735_v8 }
 0x1dd   :  { %39027 = vmatmul.mubr.f32.vlgmr.msra.gmra.mxu1 %v8379_v49  ;;  %39042 = vmatmul.mubr.f32.vlgmr.msra.gmra.mxu0 %v8833_v46  ;;  %v9323_v49 = vsub.f32 %v9213_v30, %v43172_v45  ;;  %v9777_v46 = vsub.f32 %v9775_v14, %v9776_v31 }
 0x1de   :  { %39035 = vmatpush3.xpose.msra.mxu1 %v43084_v58  ;;  %39050 = vmatpush3.xpose.msra.mxu0 %v8871_v61  ;;  %v38701_v2 = vpop.f32.mrf.mxu0  ;;  %v8874_v58 = vand.u32 4294901760, %v8873_v36  ;;  %v4795_v61 = vadd.f32 %v4794_v20, %v4704_v11  ;;  %v9737_v53 = vand.u32 4294901760, %v9736_v32  ;;  %v47330_v20 = vld [vmem:[#allocation15_spill] sm:$0xff] }
 0x1df   :  { %39036 = vmatprep.mubr.msk.f32.mxu1 %vm41652_vm2, %v47278_v39  ;;  %39051 = vmatprep.mubr.msk.f32.mxu0 %vm41652_vm2, %v47278_v39  ;;  %v4980_v47 = vadd.f32 %v38701_v2, %v43170_v0  ;;  %v9324_v29 = vand.u32 4294901760, %v9323_v49  ;;  %v43283_v40 = vrot.slane %v43065_v18, %v47330_v20 }
 0x1e0   :  { %39044 = vmatprep.subr.mxu1 %v47278_v39  ;;  %39059 = vmatprep.subr.mxu0 %v47278_v39  ;;  %v43209_v50 = vpop.f32.mrf.mxu0 }
 0x1e1   :  { %39037 = vmatmul.mubr.f32.vlgmr.msra.gmra.mxu1 %v43073_v28  ;;  %39052 = vmatmul.mubr.f32.vlgmr.msra.gmra.mxu0 %v43115_v60  ;;  %v4875_v28 = vpop.f32.mrf.mxu1  ;;  %v9325_v55 = vsub.f32 %v9323_v49, %v9324_v29 }
 0x1e2   :  { %39045 = vmatpush3.xpose.msra.mxu1 %v8874_v58  ;;  %39060 = vmatpush3.xpose.msra.mxu0 %v8872_v3 }
 0x1e3   :  { %39046 = vmatprep.mubr.msk.f32.mxu1 %vm41652_vm2, %v47278_v39  ;;  %39061 = vmatprep.mubr.msk.f32.mxu0 %vm41652_vm2, %v47278_v39  ;;  %v9326_v60 = vand.u32 4294901760, %v9325_v55 }
 0x1e4   :  { %39054 = vmatprep.subr.mxu1 %v47278_v39  ;;  %39069 = vmatprep.subr.mxu0 %v47278_v39 }
 0x1e5   :  { %39047 = vmatmul.mubr.f32.vlgmr.msra.gmra.mxu1 %v43096_v51  ;;  %39062 = vmatmul.mubr.f32.vlgmr.msra.gmra.mxu0 %v43096_v51 }
 0x1e6   :  { %39055 = vmatpush3.xpose.msra.mxu1 %v43121_v54  ;;  %39070 = vmatpush3.xpose.msra.mxu0 %v43172_v45  ;;  %v38712_v48 = vpop.f32.mrf.mxu1 }
 0x1e7   :  { %39056 = vmatprep.mubr.msk.f32.mxu1 %vm41652_vm2, %v47278_v39  ;;  %39071 = vmatprep.mubr.msk.f32.mxu0 %vm41652_vm2, %v47278_v39  ;;  %v5077_v34 = vadd.f32 %v38712_v48, %v4980_v47 }
 0x1e8   :  { %39064 = vmatprep.subr.mxu1 %v47278_v39  ;;  %39079 = vmatprep.subr.mxu0 %v47278_v39  ;;  %v38723_v6 = vpop.f32.mrf.mxu0 }
 0x1e9   :  { %39057 = vmatmul.mubr.f32.vlgmr.msra.gmra.mxu1 %v8831_v63  ;;  %39072 = vmatmul.mubr.f32.vlgmr.msra.gmra.mxu0 %v9285_v26  ;;  %v5164_v4 = vadd.f32 %v38723_v6, %v5077_v34  ;;  %v43238_v63 = vpop.f32.mrf.mxu1 }
 0x1ea   :  { %39065 = vmatpush3.xpose.msra.mxu1 %v43121_v54  ;;  %39080 = vmatpush3.xpose.msra.mxu0 %v9323_v49  ;;  %v4876_v54 = vadd.f32 %v4875_v28, %v4795_v61  ;;  %v43242_v33 = vpop.f32.mrf.mxu0 }
 0x1eb   :  { %39066 = vmatprep.mubr.msk.f32.mxu1 %vm41652_vm2, %v47278_v39  ;;  %39081 = vmatprep.mubr.msk.f32.mxu0 %vm41652_vm2, %v47278_v39 }
 0x1ec   :  { %39074 = vmatprep.subr.mxu1 %v47278_v39  ;;  %39089 = vmatprep.subr.mxu0 %v47278_v39  ;;  %v43257_v3 = vand.u32 4294901760, %v4876_v54 }
 0x1ed   :  { %39067 = vmatmul.mubr.f32.vlgmr.msra.gmra.mxu1 %v43096_v51  ;;  %39082 = vmatmul.mubr.f32.vlgmr.msra.gmra.mxu0 %v43162_v52  ;;  %v9778_v52 = vand.u32 4294901760, %v9777_v46 }
 0x1ee   :  { %39075 = vmatpush3.xpose.msra.mxu1 %v9326_v60  ;;  %39090 = vmatpush3.xpose.msra.mxu0 %v9324_v29  ;;  %v43271_v36 = vsub.f32 %v4876_v54, %v43257_v3 }
 0x1ef   :  { %39076 = vmatprep.mubr.msk.f32.mxu1 %vm41652_vm2, %v47278_v39  ;;  %39091 = vmatprep.mubr.msk.f32.mxu0 %vm41652_vm2, %v47278_v39 }
 0x1f0   :  { %39084 = vmatprep.subr.mxu1 %v47278_v39  ;;  %39099 = vmatprep.subr.mxu0 %v47278_v39  ;;  %v38734_v51 = vpop.f32.mrf.mxu1  ;;  %v47277_v62 = vand.u32 4294901760, %v43271_v36 }
 0x1f1   :  { %39077 = vmatmul.mubr.f32.vlgmr.msra.gmra.mxu1 %v43141_v22  ;;  %39092 = vmatmul.mubr.f32.vlgmr.msra.gmra.mxu0 %v43141_v22  ;;  %v5249_v37 = vadd.f32 %v38734_v51, %v5164_v4 }
 0x1f2   :  { %39085 = vmatpush3.xpose.msra.mxu1 %v43172_v45  ;;  %39100 = vmatpush3.xpose.msra.mxu0 %v43223_v38  ;;  %v38745_v30 = vpop.f32.mrf.mxu0  ;;  %v43267_v43 = vpop.f32.mrf.mxu1  ;;  %v10315_v24 = vsub.f32 %v43271_v36, %v47277_v62 }
 0x1f3   :  { %39086 = vmatprep.mubr.msk.f32.mxu1 %vm41652_vm2, %v47278_v39  ;;  %39101 = vmatprep.mubr.msk.f32.mxu0 %vm41652_vm2, %v47278_v39  ;;  %v5338_v23 = vadd.f32 %v38745_v30, %v5249_v37 }
 0x1f4   :  { %39094 = vmatprep.subr.mxu1 %v47278_v39  ;;  %39109 = vmatprep.subr.mxu0 %v47278_v39  ;;  %v43286_v2 = vpop.f32.mrf.mxu0  ;;  %v10316_v16 = vand.u32 4294901760, %v10315_v24 }
 0x1f5   :  { %39087 = vmatmul.mubr.f32.vlgmr.msra.gmra.mxu1 %v9283_v56  ;;  %39102 = vmatmul.mubr.f32.vlgmr.msra.gmra.mxu0 %v9737_v53 }
 0x1f6   :  { %39095 = vmatpush3.xpose.msra.mxu1 %v43172_v45  ;;  %39110 = vmatpush3.xpose.msra.mxu0 %v9775_v14 }
 0x1f7   :  { %39096 = vmatprep.mubr.msk.f32.mxu1 %vm41652_vm2, %v47278_v39  ;;  %39111 = vmatprep.mubr.msk.f32.mxu0 %vm41652_vm2, %v47278_v39 }
 0x1f8   :  { %39104 = vmatprep.subr.mxu1 %v47278_v39  ;;  %39119 = vmatprep.subr.mxu0 %v47278_v39 }
 0x1f9   :  { %39097 = vmatmul.mubr.f32.vlgmr.msra.gmra.mxu1 %v43141_v22  ;;  %39112 = vmatmul.mubr.f32.vlgmr.msra.gmra.mxu0 %v43217_v9  ;;  %v38756_v45 = vpop.f32.mrf.mxu1 }
 0x1fa   :  { %39105 = vmatpush3.xpose.msra.mxu1 %v9778_v52  ;;  %39120 = vmatpush3.xpose.msra.mxu0 %v9776_v31  ;;  %v43288_v56 = vadd.f32 %v38756_v45, %v5338_v23 }
 0x1fb   :  { %39106 = vmatprep.mubr.msk.f32.mxu1 %vm41652_vm2, %v47278_v39  ;;  %39121 = vmatprep.mubr.msk.f32.mxu0 %vm41652_vm2, %v47278_v39  ;;  %v43315_v49 = vpop.f32.mrf.mxu1 }
 0x1fc   :  { %39114 = vmatprep.subr.mxu1 %v47278_v39  ;;  %39129 = vmatprep.subr.mxu0 %v47278_v39  ;;  %v38767_v22 = vpop.f32.mrf.mxu0 }
 0x1fd   :  { %39107 = vmatmul.mubr.f32.vlgmr.msra.gmra.mxu1 %v43198_v59  ;;  %39122 = vmatmul.mubr.f32.vlgmr.msra.gmra.mxu0 %v43198_v59  ;;  %v5517_v47 = vadd.f32 %v38767_v22, %v43283_v40  ;;  %v25_v22 = vld [vmem:[%s47264_s1] sm:$0xff] }
 0x1fe   :  { %39115 = vmatpush3.xpose.msra.mxu1 %v43223_v38  ;;  %39116 = vmatprep.mubr.msk.f32.mxu1 %vm41652_vm2, %v47278_v39  ;;  %v43317_v58 = vpop.f32.mrf.mxu0 }
 0x1ff   :  { %39124 = vmatprep.subr.mxu1 %v47278_v39  ;;  %39130 = vmatpush3.msra.mxu0 %v43257_v3 }
 0x200   :  { %39131 = vmatprep.mubr.msk.f32.mxu0 %vm41652_vm2, %v47278_v39  ;;  %39139 = vmatprep.subr.mxu0 %v47278_v39 }
 0x201   :  { %39117 = vmatmul.mubr.f32.vlgmr.msra.gmra.mxu1 %v9735_v8 }
 0x202   :  { %39125 = vmatpush3.xpose.msra.mxu1 %v43223_v38  ;;  %39126 = vmatprep.mubr.msk.f32.mxu1 %vm41652_vm2, %v47278_v39  ;;  %v47331_v38 = vld [vmem:[#allocation16_spill] sm:$0xff] }
 0x203   :  { %39134 = vmatprep.subr.mxu1 %v47278_v39  ;;  %v43332_v55 = vrot.slane %v43065_v18, %v47331_v38 }
 0x204   :  { %v38778_v10 = vpop.f32.mrf.mxu1 }
 0x205   :  { %39127 = vmatmul.mubr.f32.vlgmr.msra.gmra.mxu1 %v43198_v59  ;;  %v5614_v5 = vadd.f32 %v38778_v10, %v5517_v47 }
 0x206   :  { %39135 = vmatpush3.msra.mxu1 %v10316_v16  ;;  %v38789_v42 = vpop.f32.mrf.mxu0  ;;  %39136 = vmatprep.mubr.msk.f32.mxu1 %vm41652_vm2, %v47278_v39  ;;  %v43324_v28 = vpop.f32.mrf.mxu1  ;;  %v43354_v16 = vmul.f32 -1e+09, %v25_v22 }
 0x207   :  { %v5701_v29 = vadd.f32 %v38789_v42, %v5614_v5  ;;  %39144 = vmatprep.subr.mxu1 %v47278_v39 }
 0x208   :  { %v43326_v7 = vpop.f32.mrf.mxu0 }
 0x20e   :  { %v38800_v11 = vpop.f32.mrf.mxu1 }
 0x20f   :  { %v5786_v48 = vadd.f32 %v38800_v11, %v5701_v29 }
 0x210   :  { %v38811_v9 = vpop.f32.mrf.mxu0  ;;  %v43328_v34 = vpop.f32.mrf.mxu1 }
 0x211   :  { %v5875_v26 = vadd.f32 %v38811_v9, %v5786_v48 }
 0x212   :  { %v43334_v6 = vpop.f32.mrf.mxu0 }
 0x217   :  { %v38822_v59 = vpop.f32.mrf.mxu1 }
 0x218   :  { %v43336_v4 = vadd.f32 %v38822_v59, %v5875_v26 }
 0x219   :  { %v43339_v14 = vpop.f32.mrf.mxu1 }
 0x21a   :  { %v38833_v61 = vpop.f32.mrf.mxu0 }
 0x21b   :  { %v6054_v8 = vadd.f32 %v38833_v61, %v43332_v55 }
 0x21c   :  { %v43341_v60 = vpop.f32.mrf.mxu0 }
 0x222   :  { %v38844_v54 = vpop.f32.mrf.mxu1 }
 0x223   :  { %v6151_v32 = vadd.f32 %v38844_v54, %v6054_v8 }
 0x224   :  { %v38855_v31 = vpop.f32.mrf.mxu0  ;;  %v43343_v37 = vpop.f32.mrf.mxu1 }
 0x225   :  { %v6238_v51 = vadd.f32 %v38855_v31, %v6151_v32 }
 0x226   :  { %v43345_v30 = vpop.f32.mrf.mxu0 }
 0x22c   :  { %v38866_v18 = vpop.f32.mrf.mxu1 }
 0x22d   :  { %v38877_v53 = vpop.f32.mrf.mxu0  ;;  %v6323_v23 = vadd.f32 %v38866_v18, %v6238_v51 }
 0x22e   :  { %v43349_v45 = vpop.f32.mrf.mxu1 }
 0x22f   :  { %v43347_v46 = vpop.f32.mrf.mxu0  ;;  %v6412_v52 = vadd.f32 %v38877_v53, %v6323_v23 }
 0x232   :  { %v6575_v47 = vpop.f32.mrf.mxu0 }
 0x233   :  { %v6576_v48 = vadd.f32 %v6575_v47, %v43354_v16 }
 0x234   :  { %v38893_v24 = vpop.f32.mrf.mxu0 }
 0x235   :  { %v38888_v10 = vpop.f32.mrf.mxu1 }
 0x236   :  { %v43356_v5 = vadd.f32 %v38888_v10, %v6412_v52  ;;  %v6725_v42 = vpop.f32.mrf.mxu0 }
 0x237   :  { %v43358_v29 = vpop.f32.mrf.mxu1 }
 0x238   :  { %v38903_v11 = vpop.f32.mrf.mxu0 }
 0x23a   :  { %v6651_v9 = vpop.f32.mrf.mxu1  ;;  %v6873_v26 = vpop.f32.mrf.mxu0 }
 0x23b   :  { %v6652_v59 = vadd.f32 %v6651_v9, %v6576_v48 }
 0x23c   :  { %v38898_v61 = vpop.f32.mrf.mxu1  ;;  %v38913_v8 = vpop.f32.mrf.mxu0 }
 0x23d   :  { %v6726_v54 = vadd.f32 %v6725_v42, %v6652_v59 }
 0x23e   :  { %v6799_v32 = vpop.f32.mrf.mxu1 }
 0x23f   :  { %v6800_v31 = vadd.f32 %v6799_v32, %v6726_v54 }
 0x240   :  { %v38908_v51 = vpop.f32.mrf.mxu1 }
 0x241   :  { %v6874_v18 = vadd.f32 %v6873_v26, %v6800_v31 }
 0x242   :  { %v6945_v53 = vpop.f32.mrf.mxu1 }
 0x243   :  { %v43361_v23 = vadd.f32 %v6945_v53, %v6874_v18 }
 0x244   :  { %v38918_v52 = vpop.f32.mrf.mxu1 }
 0x245   :  { %v10114_v22 = vsel %vm10113_vm3, %v43361_v23, -inf }
 0x246   :  { %10115 = vmax.xlane.f32.xlu0 %v10114_v22 }
 0x24b   :  { %v7027_v47 = vpop.f32.mrf.mxu0 }
 0x24c   :  { %v7028_v48 = vadd.f32 %v7027_v47, %v43354_v16 }
 0x24d   :  { %v38923_v24 = vpop.f32.mrf.mxu0 }
 0x24f   :  { %v7177_v10 = vpop.f32.mrf.mxu0 }
 0x251   :  { %v38933_v11 = vpop.f32.mrf.mxu0 }
 0x253   :  { %v7103_v42 = vpop.f32.mrf.mxu1  ;;  %v7325_v9 = vpop.f32.mrf.mxu0 }
 0x254   :  { %v7104_v59 = vadd.f32 %v7103_v42, %v7028_v48 }
 0x255   :  { %v38928_v61 = vpop.f32.mrf.mxu1  ;;  %v38943_v26 = vpop.f32.mrf.mxu0 }
 0x256   :  { %v7178_v8 = vadd.f32 %v7177_v10, %v7104_v59 }
 0x257   :  { %v7251_v54 = vpop.f32.mrf.mxu1 }
 0x258   :  { %v7252_v32 = vadd.f32 %v7251_v54, %v7178_v8 }
 0x259   :  { %v38938_v31 = vpop.f32.mrf.mxu1 }
 0x25a   :  { %v7326_v51 = vadd.f32 %v7325_v9, %v7252_v32 }
 0x25b   :  { %v7397_v18 = vpop.f32.mrf.mxu1 }
 0x25c   :  { %v43366_v53 = vadd.f32 %v7397_v18, %v7326_v51 }
 0x25d   :  { %v38948_v52 = vpop.f32.mrf.mxu1 }
 0x25e   :  { %v10117_v22 = vsel %vm10113_vm3, %v43366_v53, -inf }
 0x25f   :  { %10118 = vmax.xlane.f32.xlu0 %v10117_v22 }
 0x267   :  { %v7479_v24 = vpop.f32.mrf.mxu0 }
 0x268   :  { %v7480_v48 = vadd.f32 %v7479_v24, %v43354_v16 }
 0x269   :  { %v38953_v47 = vpop.f32.mrf.mxu0 }
 0x26b   :  { %v7629_v11 = vpop.f32.mrf.mxu0 }
 0x26d   :  { %v38963_v62 = vpop.f32.mrf.mxu0 }
 0x26f   :  { %v7555_v42 = vpop.f32.mrf.mxu1  ;;  %v7777_v10 = vpop.f32.mrf.mxu0 }
 0x270   :  { %v7556_v59 = vadd.f32 %v7555_v42, %v7480_v48 }
 0x271   :  { %v38958_v61 = vpop.f32.mrf.mxu1  ;;  %v38973_v26 = vpop.f32.mrf.mxu0 }
 0x272   :  { %v7630_v9 = vadd.f32 %v7629_v11, %v7556_v59 }
 0x273   :  { %v7703_v8 = vpop.f32.mrf.mxu1 }
 0x274   :  { %v7704_v54 = vadd.f32 %v7703_v8, %v7630_v9  ;;  %v26_v8 = vld [vmem:[%s47264_s1 + $0x8] sm:$0xff] }
 0x275   :  { %v38968_v32 = vpop.f32.mrf.mxu1 }
 0x276   :  { %v7778_v31 = vadd.f32 %v7777_v10, %v7704_v54 }
 0x277   :  { %v7849_v51 = vpop.f32.mrf.mxu1 }
 0x278   :  { %v43371_v18 = vadd.f32 %v7849_v51, %v7778_v31 }
 0x279   :  { %v38978_v52 = vpop.f32.mrf.mxu1 }
 0x27a   :  { %v10120_v22 = vsel %vm10113_vm3, %v43371_v18, -inf  ;;  %v30_v52 = vmul.f32 -1e+09, %v26_v8 }
 0x27b   :  { %10121 = vmax.xlane.f32.xlu0 %v10120_v22 }
 0x285   :  { %v7931_v62 = vpop.f32.mrf.mxu0 }
 0x286   :  { %v7932_v48 = vadd.f32 %v7931_v62, %v43354_v16 }
 0x287   :  { %v38983_v24 = vpop.f32.mrf.mxu0 }
 0x289   :  { %v8081_v47 = vpop.f32.mrf.mxu0 }
 0x28b   :  { %v38993_v39 = vpop.f32.mrf.mxu0 }
 0x28d   :  { %v8007_v42 = vpop.f32.mrf.mxu1  ;;  %v8229_v11 = vpop.f32.mrf.mxu0 }
 0x28e   :  { %v8008_v59 = vadd.f32 %v8007_v42, %v7932_v48 }
 0x28f   :  { %v38988_v61 = vpop.f32.mrf.mxu1  ;;  %v39003_v26 = vpop.f32.mrf.mxu0 }
 0x290   :  { %v8082_v10 = vadd.f32 %v8081_v47, %v8008_v59 }
 0x291   :  { %v8155_v9 = vpop.f32.mrf.mxu1  ;;  %v8383_v54 = vpop.f32.mrf.mxu0 }
 0x292   :  { %v8156_v32 = vadd.f32 %v8155_v9, %v8082_v10  ;;  %v8384_v42 = vadd.f32 %v8383_v54, %v30_v52 }
 0x293   :  { %v38998_v31 = vpop.f32.mrf.mxu1  ;;  %v39013_v51 = vpop.f32.mrf.mxu0 }
 0x294   :  { %v8230_v22 = vadd.f32 %v8229_v11, %v8156_v32 }
 0x295   :  { %v8301_v39 = vpop.f32.mrf.mxu1  ;;  %v8533_v24 = vpop.f32.mrf.mxu0 }
 0x296   :  { %v43379_v16 = vadd.f32 %v8301_v39, %v8230_v22 }
 0x297   :  { %v39008_v62 = vpop.f32.mrf.mxu1  ;;  %v39023_v48 = vpop.f32.mrf.mxu0 }
 0x298   :  { %v10123_v47 = vsel %vm10113_vm3, %v43379_v16, -inf }
 0x299   :  { %v8459_v59 = vpop.f32.mrf.mxu1  ;;  %10124 = vmax.xlane.f32.xlu0 %v10123_v47  ;;  %v8681_v61 = vpop.f32.mrf.mxu0 }
 0x29a   :  { %v8460_v26 = vadd.f32 %v8459_v59, %v8384_v42 }
 0x29b   :  { %v39018_v38 = vpop.f32.mrf.mxu1  ;;  %v39033_v10 = vpop.f32.mrf.mxu0 }
 0x29c   :  { %v8534_v9 = vadd.f32 %v8533_v24, %v8460_v26 }
 0x29d   :  { %v8607_v31 = vpop.f32.mrf.mxu1  ;;  %v8835_v8 = vpop.f32.mrf.mxu0 }
 0x29e   :  { %v8608_v11 = vadd.f32 %v8607_v31, %v8534_v9  ;;  %v8836_v32 = vadd.f32 %v8835_v8, %v30_v52 }
 0x29f   :  { %v39028_v51 = vpop.f32.mrf.mxu1  ;;  %v39043_v22 = vpop.f32.mrf.mxu0 }
 0x2a0   :  { %v8682_v39 = vadd.f32 %v8681_v61, %v8608_v11 }
 0x2a1   :  { %v8753_v62 = vpop.f32.mrf.mxu1  ;;  %v8985_v48 = vpop.f32.mrf.mxu0 }
 0x2a2   :  { %v43383_v54 = vadd.f32 %v8753_v62, %v8682_v39 }
 0x2a3   :  { %v39038_v20 = vpop.f32.mrf.mxu1  ;;  %v39053_v57 = vpop.f32.mrf.mxu0 }
 0x2a4   :  { %v10126_v47 = vsel %vm10113_vm3, %v43383_v54, -inf }
 0x2a5   :  { %v8911_v42 = vpop.f32.mrf.mxu1  ;;  %10127 = vmax.xlane.f32.xlu0 %v10126_v47  ;;  %v9133_v38 = vpop.f32.mrf.mxu0 }
 0x2a6   :  { %v8912_v24 = vadd.f32 %v8911_v42, %v8836_v32 }
 0x2a7   :  { %v39048_v59 = vpop.f32.mrf.mxu1  ;;  %v39063_v26 = vpop.f32.mrf.mxu0 }
 0x2a8   :  { %v8986_v10 = vadd.f32 %v8985_v48, %v8912_v24 }
 0x2a9   :  { %v9059_v9 = vpop.f32.mrf.mxu1  ;;  %v9287_v31 = vpop.f32.mrf.mxu0 }
 0x2aa   :  { %v9060_v8 = vadd.f32 %v9059_v9, %v8986_v10  ;;  %v9288_v61 = vadd.f32 %v9287_v31, %v30_v52 }
 0x2ab   :  { %v39058_v11 = vpop.f32.mrf.mxu1  ;;  %v39073_v51 = vpop.f32.mrf.mxu0 }
 0x2ac   :  { %v9134_v22 = vadd.f32 %v9133_v38, %v9060_v8 }
 0x2ad   :  { %v9205_v39 = vpop.f32.mrf.mxu1  ;;  %v9437_v20 = vpop.f32.mrf.mxu0 }
 0x2ae   :  { %v43387_v57 = vadd.f32 %v9205_v39, %v9134_v22 }
 0x2af   :  { %v39068_v62 = vpop.f32.mrf.mxu1  ;;  %v39083_v12 = vpop.f32.mrf.mxu0 }
 0x2b1   :  { %v9363_v1 = vpop.f32.mrf.mxu1  ;;  %v9585_v47 = vpop.f32.mrf.mxu0 }
 0x2b2   :  { %v9364_v44 = vadd.f32 %v9363_v1, %v9288_v61 }
 0x2b3   :  { %v39078_v32 = vpop.f32.mrf.mxu1  ;;  %v39093_v42 = vpop.f32.mrf.mxu0 }
 0x2b4   :  { %v9438_v59 = vadd.f32 %v9437_v20, %v9364_v44 }
 0x2b5   :  { %v9511_v48 = vpop.f32.mrf.mxu1  ;;  %v9739_v24 = vpop.f32.mrf.mxu0 }
 0x2b6   :  { %v9512_v26 = vadd.f32 %v9511_v48, %v9438_v59  ;;  %v9740_v10 = vadd.f32 %v9739_v24, %v30_v52 }
 0x2b7   :  { %v39088_v9 = vpop.f32.mrf.mxu1  ;;  %v39103_v31 = vpop.f32.mrf.mxu0 }
 0x2b8   :  { %v9586_v11 = vadd.f32 %v9585_v47, %v9512_v26 }
 0x2b9   :  { %v9657_v38 = vpop.f32.mrf.mxu1  ;;  %v9889_v8 = vpop.f32.mrf.mxu0 }
 0x2ba   :  { %v43389_v51 = vadd.f32 %v9657_v38, %v9586_v11 }
 0x2bb   :  { %v39098_v22 = vpop.f32.mrf.mxu1  ;;  %v39113_v39 = vpop.f32.mrf.mxu0 }
 0x2bd   :  { %v9815_v12 = vpop.f32.mrf.mxu1  ;;  %v10037_v62 = vpop.f32.mrf.mxu0 }
 0x2be   :  { %v9816_v17 = vadd.f32 %v9815_v12, %v9740_v10 }
 0x2bf   :  { %v39108_v1 = vpop.f32.mrf.mxu1  ;;  %v39123_v61 = vpop.f32.mrf.mxu0 }
 0x2c0   :  { %v9890_v32 = vadd.f32 %v9889_v8, %v9816_v17 }
 0x2c1   :  { %v9963_v44 = vpop.f32.mrf.mxu1 }
 0x2c2   :  { %v9964_v20 = vadd.f32 %v9963_v44, %v9890_v32 }
 0x2c3   :  { %v39118_v42 = vpop.f32.mrf.mxu1 }
 0x2c4   :  { %v10038_v59 = vadd.f32 %v10037_v62, %v9964_v20 }
 0x2c5   :  { %v10109_v52 = vpop.f32.mrf.mxu1 }
 0x2c6   :  { %v43391_v48 = vadd.f32 %v10109_v52, %v10038_v59  ;;  %v10129_v52 = vsel %vm10113_vm3, %v43387_v57, -inf }
 0x2c7   :  { %v39128_v47 = vpop.f32.mrf.mxu1 }
 0x2cf   :  { %v10116_v24 = vpop.xlane.xlu0 %10115 }
 0x2d0   :  { %v10138_v26 = vsub.f32 %v43361_v23, %v10116_v24  ;;  %v10135_v24 = vsel %vm10113_vm3, %v43391_v48, -inf }
 0x2d2   :  { %v10146_v9 = vmul.f32 1.442695, %v10138_v26  ;;  %v4970_v26 = vadd.f32 %v43209_v50, %v43170_v0 }
 0x2d4   :  { %41546 = vpow2.f32 %v10146_v9  ;;  %v5071_v9 = vadd.f32 %v43238_v63, %v4970_v26  ;;  %v47332_v63 = vmov 0.0  }
 0x2e1   :  { %v41547_v31 = vpop.eup %41546 }
 0x2e2   :  { %v10162_v11 = vsel %vm10113_vm3, %v41547_v31, 0.0 }
 0x2e3   :  { %10163 = vadd.xlane.f32.xlu1 %v10162_v11  ;;  %v5157_v11 = vadd.f32 %v43242_v33, %v5071_v9 }
 0x2e8   :  { %v10119_v10 = vpop.xlane.xlu0 %10118 }
 0x2e9   :  { %v10139_v17 = vsub.f32 %v43366_v53, %v10119_v10  ;;  %v5241_v10 = vadd.f32 %v43267_v43, %v5157_v11 }
 0x2eb   :  { %v10148_v38 = vmul.f32 1.442695, %v10139_v17 }
 0x2ed   :  { %41548 = vpow2.f32 %v10148_v38  ;;  %v5332_v38 = vadd.f32 %v43286_v2, %v5241_v10 }
 0x2fa   :  { %v43396_v8 = vpop.eup %41548 }
 0x2fb   :  { %v10165_v22 = vsel %vm10113_vm3, %v43396_v8, 0.0 }
 0x2fc   :  { %10166 = vadd.xlane.f32.xlu1 %v10165_v22  ;;  %v5413_v22 = vadd.f32 %v43315_v49, %v5332_v38 }
 0x304   :  { %v10122_v39 = vpop.xlane.xlu0 %10121 }
 0x305   :  { %v10140_v23 = vsub.f32 %v43371_v18, %v10122_v39  ;;  %v10685_v39 = vand.u32 4294901760, %v5413_v22 }
 0x307   :  { %v10150_v12 = vmul.f32 1.442695, %v10140_v23 }
 0x309   :  { %41550 = vpow2.f32 %v10150_v12  ;;  %v10762_v12 = vsub.f32 %v5413_v22, %v10685_v39 }
 0x30b   :  { %v10763_v0 = vand.u32 4294901760, %v10762_v12 }
 0x30d   :  { %v10764_v43 = vsub.f32 %v10762_v12, %v10763_v0 }
 0x316   :  { %v43401_v62 = vpop.eup %41550 }
 0x317   :  { %v10168_v1 = vsel %vm10113_vm3, %v43401_v62, 0.0 }
 0x318   :  { %10169 = vadd.xlane.f32.xlu1 %v10168_v1 }
 0x322   :  { %v10125_v53 = vpop.xlane.xlu0 %10124 }
 0x323   :  { %v10141_v61 = vsub.f32 %v43379_v16, %v10125_v53 }
 0x325   :  { %v10152_v32 = vmul.f32 1.442695, %v10141_v61 }
 0x327   :  { %41552 = vpow2.f32 %v10152_v32  ;;  %v10765_v32 = vand.u32 4294901760, %v10764_v43 }
 0x32e   :  { %v10128_v44 = vpop.xlane.xlu0 %10127 }
 0x32f   :  { %v10142_v20 = vsub.f32 %v43383_v54, %v10128_v44  ;;  %v10132_v54 = vsel %vm10113_vm3, %v43389_v51, -inf }
 0x331   :  { %v10154_v42 = vmul.f32 1.442695, %v10142_v20 }
 0x333   :  { %41554 = vpow2.f32 %v10154_v42 }
 0x334   :  { %v43407_v59 = vpop.eup %41552 }
 0x335   :  { %v10171_v18 = vsel %vm10113_vm3, %v43407_v59, 0.0 }
 0x336   :  { %10172 = vadd.xlane.f32.xlu1 %v10171_v18 }
 0x33a   :  { %10130 = vmax.xlane.f32.xlu1 %v10129_v52 }
 0x340   :  { %v43413_v47 = vpop.eup %41554 }
 0x341   :  { %v10174_v16 = vsel %vm10113_vm3, %v43413_v47, 0.0 }
 0x342   :  { %10175 = vadd.xlane.f32.xlu0 %v10174_v16 }
 0x346   :  { %10133 = vmax.xlane.f32.xlu0 %v10132_v54 }
 0x34a   :  { %10136 = vmax.xlane.f32.xlu0 %v10135_v24 }
 0x36c   :  { %v10164_v17 = vpop.xlane.xlu1 %10163 }
 0x36d   :  { %41556 = vrcp.f32 %v10164_v17 }
 0x37a   :  { %v41557_v23 = vpop.eup %41556 }
 0x37b   :  { %v10187_v1 = vmul.f32 %v41557_v23, %v41547_v31 }
 0x37d   :  { %v10203_v53 = vsel %vm10113_vm3, %v10187_v1, 0 }
 0x37e   :  { %v10271_v61 = vand.u32 4294901760, %v10203_v53 }
 0x380   :  { %v10272_v50 = vsub.f32 %v10203_v53, %v10271_v61  ;;  %39137 = vmatmul.mubr.f32.vlgmr.msra.gmra.mxu1 %v10271_v61 }
 0x381   :  { %39145 = vmatpush3.msra.mxu1 %v43257_v3  ;;  %39146 = vmatprep.mubr.msk.f32.mxu1 %vm41652_vm2, %v47332_v63 }
 0x382   :  { %39154 = vmatprep.subr.mxu1 %v47332_v63  ;;  %v10273_v33 = vand.u32 4294901760, %v10272_v50 }
 0x384   :  { %39147 = vmatmul.mubr.f32.vlgmr.msra.gmra.mxu1 %v10273_v33  ;;  %v10274_v2 = vsub.f32 %v10272_v50, %v10273_v33  ;;  %v40_v33 = vld [vmem:[%s47266_s3 + $0x10] sm:$0xff] }
 0x385   :  { %39155 = vmatpush3.msra.mxu1 %v43257_v3  ;;  %v10167_v49 = vpop.xlane.xlu1 %10166  ;;  %39156 = vmatprep.mubr.msk.f32.mxu1 %vm41652_vm2, %v47332_v63  ;;  %v47333_v3 = vand.u32 4294901760, %v43271_v36 }
 0x386   :  { %41558 = vrcp.f32 %v10167_v49  ;;  %39164 = vmatprep.subr.mxu1 %v47332_v63  ;;  %v10275_v31 = vand.u32 4294901760, %v10274_v2  ;;  %v43502_v2 = vand.u32 4294901760, %v40_v33 }
 0x388   :  { %39132 = vmatmul.mubr.f32.vlgmr.msra.gmra.mxu0 %v10275_v31  ;;  %39157 = vmatmul.mubr.f32.vlgmr.msra.gmra.mxu1 %v10271_v61  ;;  %v43510_v31 = vsub.f32 %v40_v33, %v43502_v2  ;;  %v5507_v33 = vadd.f32 %v43317_v58, %v43283_v40 }
 0x389   :  { %39140 = vmatpush3.msra.mxu0 %v43271_v36  ;;  %39165 = vmatpush3.msra.mxu1 %v10765_v32 }
 0x38a   :  { %39141 = vmatprep.mubr.msk.f32.mxu0 %vm41652_vm2, %v47332_v63  ;;  %39149 = vmatprep.subr.mxu0 %v47332_v63 }
 0x38b   :  { %39166 = vmatprep.mubr.msk.f32.mxu1 %vm41652_vm2, %v47332_v63  ;;  %39174 = vmatprep.subr.mxu1 %v47332_v63 }
 0x38c   :  { %39142 = vmatmul.mubr.f32.vlgmr.msra.gmra.mxu0 %v10272_v50 }
 0x38d   :  { %39150 = vmatpush3.msra.mxu0 %v47333_v3  ;;  %39151 = vmatprep.mubr.msk.f32.mxu0 %vm41652_vm2, %v47332_v63  ;;  %v43517_v3 = vand.u32 4294901760, %v43510_v31 }
 0x38e   :  { %39159 = vmatprep.subr.mxu0 %v47332_v63 }
 0x390   :  { %39152 = vmatmul.mubr.f32.vlgmr.msra.gmra.mxu0 %v10271_v61 }
 0x391   :  { %39160 = vmatpush3.msra.mxu0 %v10685_v39  ;;  %39161 = vmatprep.mubr.msk.f32.mxu0 %vm41652_vm2, %v47332_v63 }
 0x392   :  { %39169 = vmatprep.subr.mxu0 %v47332_v63 }
 0x393   :  { %v41559_v44 = vpop.eup %41558 }
 0x394   :  { %v10189_v20 = vmul.f32 %v41559_v44, %v43396_v8 }
 0x396   :  { %v10652_v42 = vsel %vm10113_vm3, %v10189_v20, 0  ;;  %v11219_v20 = vsub.f32 %v43510_v31, %v43517_v3 }
 0x397   :  { %v10720_v18 = vand.u32 4294901760, %v10652_v42 }
 0x399   :  { %v10721_v36 = vsub.f32 %v10652_v42, %v10720_v18  ;;  %39167 = vmatmul.mubr.f32.vlgmr.msra.gmra.mxu1 %v10720_v18  ;;  %v43524_v42 = vand.u32 4294901760, %v11219_v20 }
 0x39a   :  { %39175 = vmatpush3.msra.mxu1 %v10685_v39  ;;  %39176 = vmatprep.mubr.msk.f32.mxu1 %vm41652_vm2, %v47332_v63 }
 0x39b   :  { %39184 = vmatprep.subr.mxu1 %v47332_v63  ;;  %v10722_v52 = vand.u32 4294901760, %v10721_v36 }
 0x39d   :  { %39177 = vmatmul.mubr.f32.vlgmr.msra.gmra.mxu1 %v10722_v52  ;;  %v10723_v16 = vsub.f32 %v10721_v36, %v10722_v52 }
 0x39e   :  { %39185 = vmatpush3.msra.mxu1 %v10685_v39  ;;  %39186 = vmatprep.mubr.msk.f32.mxu1 %vm41652_vm2, %v47332_v63 }
 0x39f   :  { %v10724_v54 = vand.u32 4294901760, %v10723_v16  ;;  %39196 = vmatprep.subr.mxu1 %v47332_v63 }
 0x3a1   :  { %39162 = vmatmul.mubr.f32.vlgmr.msra.gmra.mxu0 %v10724_v54  ;;  %39187 = vmatmul.mubr.f32.vlgmr.msra.gmra.mxu1 %v10720_v18  ;;  %v43470_v8 = vpop.xlane.xlu1 %10169 }
 0x3a2   :  { %39170 = vmatpush3.msra.mxu0 %v10762_v12  ;;  %39171 = vmatprep.mubr.msk.f32.mxu0 %vm41652_vm2, %v47332_v63 }
 0x3a3   :  { %39179 = vmatprep.subr.mxu0 %v47332_v63  ;;  %39200 = vmatprep.mubr.msk.f32.mxu1 %vm41652_vm2, %v47332_v63 }
 0x3a5   :  { %39172 = vmatmul.mubr.f32.vlgmr.msra.gmra.mxu0 %v10721_v36 }
 0x3a6   :  { %39180 = vmatpush3.msra.mxu0 %v10763_v0  ;;  %39181 = vmatprep.mubr.msk.f32.mxu0 %vm41652_vm2, %v47332_v63 }
 0x3a7   :  { %39189 = vmatprep.subr.mxu0 %v47332_v63 }
 0x3a9   :  { %39182 = vmatmul.mubr.f32.vlgmr.msra.gmra.mxu0 %v10720_v18 }
 0x3aa   :  { %39193 = vmatprep.mubr.msk.f32.mxu0 %vm41652_vm2, %v47332_v63 }
 0x3bf   :  { %v43472_v24 = vpop.xlane.xlu1 %10172 }
 0x3c3   :  { %v10131_v26 = vpop.xlane.xlu1 %10130 }
 0x3c4   :  { %v10143_v9 = vsub.f32 %v43387_v57, %v10131_v26 }
 0x3c6   :  { %v10156_v11 = vmul.f32 1.442695, %v10143_v9 }
 0x3c8   :  { %41560 = vpow2.f32 %v10156_v11 }
 0x3cb   :  { %v43475_v10 = vpop.xlane.xlu0 %10175 }
 0x3cf   :  { %v10134_v17 = vpop.xlane.xlu0 %10133 }
 0x3d0   :  { %v10144_v38 = vsub.f32 %v43389_v51, %v10134_v17 }
 0x3d2   :  { %v10158_v22 = vmul.f32 1.442695, %v10144_v38 }
 0x3d3   :  { %v10137_v39 = vpop.xlane.xlu0 %10136 }
 0x3d4   :  { %41562 = vpow2.f32 %v10158_v22  ;;  %v10145_v23 = vsub.f32 %v43391_v48, %v10137_v39  ;;  %v41_v48 = vld [vmem:[%s47266_s3 + $0x18] sm:$0xff] }
 0x3d5   :  { %v43479_v12 = vpop.eup %41560  ;;  %v43494_v50 = vand.u32 4294901760, %v41_v48 }
 0x3d6   :  { %v10160_v1 = vmul.f32 1.442695, %v10145_v23  ;;  %v10177_v53 = vsel %vm10113_vm3, %v43479_v12, 0.0 }
 0x3d7   :  { %10178 = vadd.xlane.f32.xlu1 %v10177_v53  ;;  %v43500_v43 = vsub.f32 %v41_v48, %v43494_v50  ;;  %39190 = vmatpush3.msra.mxu0 %v43494_v50 }
 0x3d8   :  { %41564 = vpow2.f32 %v10160_v1  ;;  %39191 = vmatprep.subr.mxu0 %v47332_v63 }
 0x3d9   :  { %v43507_v49 = vand.u32 4294901760, %v43500_v43  ;;  %39192 = vmatpush3.msra.mxu0 %v43502_v2  ;;  %41566 = vrcp.f32 %v43470_v8 }
 0x3da   :  { %39203 = vmatprep.subr.mxu0 %v47332_v63  ;;  %41568 = vrcp.f32 %v43472_v24 }
 0x3db   :  { %v11212_v32 = vsub.f32 %v43500_v43, %v43507_v49  ;;  %41570 = vrcp.f32 %v43475_v10  ;;  %v43815_v10 = vand.u32 4294901760, %v43176_v41 }
 0x3dd   :  { %v43519_v44 = vand.u32 4294901760, %v11212_v32 }
 0x3df   :  { %39197 = vmatpush3.msra.mxu1 %v43519_v44 }
 0x3e0   :  { %39198 = vmatprep.subr.mxu1 %v47332_v63 }
 0x3e1   :  { %v43483_v57 = vpop.eup %41562  ;;  %39199 = vmatpush3.msra.mxu1 %v43524_v42 }
 0x3e2   :  { %v10180_v61 = vsel %vm10113_vm3, %v43483_v57, 0.0  ;;  %39210 = vmatprep.subr.mxu1 %v47332_v63 }
 0x3e3   :  { %10181 = vadd.xlane.f32.xlu1 %v10180_v61 }
 0x3e5   :  { %v43487_v51 = vpop.eup %41564 }
 0x3e6   :  { %v10183_v0 = vsel %vm10113_vm3, %v43487_v51, 0.0 }
 0x3e7   :  { %10184 = vadd.xlane.f32.xlu1 %v10183_v0 }
 0x440   :  { %v10353_v18 = vpop.f32.mrf.mxu1 }
 0x442   :  { %v39138_v36 = vpop.f32.mrf.mxu1 }
 0x444   :  { %v10501_v52 = vpop.f32.mrf.mxu1 }
 0x446   :  { %v39148_v16 = vpop.f32.mrf.mxu1 }
 0x448   :  { %v10277_v54 = vpop.f32.mrf.mxu0  ;;  %v10647_v26 = vpop.f32.mrf.mxu1 }
 0x449   :  { %v10354_v36 = vadd.f32 %v10353_v18, %v10277_v54 }
 0x44a   :  { %v39133_v9 = vpop.f32.mrf.mxu0  ;;  %v39158_v11 = vpop.f32.mrf.mxu1 }
 0x44b   :  { %v39_v9 = vld [vmem:[%s47266_s3 + $0x8] sm:$0xff] }
 0x44c   :  { %v10427_v17 = vpop.f32.mrf.mxu0  ;;  %v43538_v25 = vand.u32 4294901760, %v39_v9 }
 0x44e   :  { %v39143_v38 = vpop.f32.mrf.mxu0 }
 0x44f   :  { %v10428_v38 = vadd.f32 %v10427_v17, %v10354_v36  ;;  %v43544_v17 = vsub.f32 %v39_v9, %v43538_v25 }
 0x450   :  { %v10575_v22 = vpop.f32.mrf.mxu0 }
 0x451   :  { %v10502_v54 = vadd.f32 %v10501_v52, %v10428_v38 }
 0x452   :  { %v39153_v39 = vpop.f32.mrf.mxu0 }
 0x459   :  { %v10802_v23 = vpop.f32.mrf.mxu1 }
 0x45b   :  { %v39168_v1 = vpop.f32.mrf.mxu1 }
 0x45c   :  { %v38_v1 = vld [vmem:[%s47266_s3] sm:$0xff] }
 0x45d   :  { %v10950_v53 = vpop.f32.mrf.mxu1  ;;  %v43540_v18 = vand.u32 4294901760, %v38_v1 }
 0x45f   :  { %v39178_v61 = vpop.f32.mrf.mxu1  ;;  %v43547_v36 = vsub.f32 %v38_v1, %v43540_v18 }
 0x460   :  { %v5608_v61 = vadd.f32 %v43324_v28, %v5507_v33  ;;  %v10576_v28 = vadd.f32 %v10575_v22, %v10502_v54 }
 0x461   :  { %v10726_v0 = vpop.f32.mrf.mxu0  ;;  %v11096_v48 = vpop.f32.mrf.mxu1  ;;  %v43556_v52 = vand.u32 4294901760, %v43547_v36 }
 0x462   :  { %v10803_v16 = vadd.f32 %v10802_v23, %v10726_v0  ;;  %v5694_v0 = vadd.f32 %v43326_v7, %v5608_v61 }
 0x463   :  { %v39163_v32 = vpop.f32.mrf.mxu0  ;;  %v39188_v20 = vpop.f32.mrf.mxu1 }
 0x465   :  { %v10876_v11 = vpop.f32.mrf.mxu0 }
 0x466   :  { %v10877_v39 = vadd.f32 %v10876_v11, %v10803_v16  ;;  %v43552_v16 = vand.u32 4294901760, %v43544_v17 }
 0x467   :  { %v39173_v27 = vpop.f32.mrf.mxu0 }
 0x468   :  { %v10951_v40 = vadd.f32 %v10950_v53, %v10877_v39  ;;  %v5778_v53 = vadd.f32 %v43328_v34, %v5694_v0  ;;  %v11674_v9 = vsub.f32 %v43544_v17, %v43552_v16 }
 0x469   :  { %v11024_v58 = vpop.f32.mrf.mxu0 }
 0x46a   :  { %v11025_v23 = vadd.f32 %v11024_v58, %v10951_v40  ;;  %v5869_v22 = vadd.f32 %v43334_v6, %v5778_v53  ;;  %v43575_v39 = vand.u32 4294901760, %v11674_v9  ;;  %v43_v9 = vld [vmem:[%s47266_s3 + $0x28] sm:$0xff] }
 0x46b   :  { %v39183_v32 = vpop.f32.mrf.mxu0 }
 0x46c   :  { %v11097_v20 = vadd.f32 %v11096_v48, %v11025_v23  ;;  %v10648_v48 = vadd.f32 %v10647_v26, %v10576_v28  ;;  %v11681_v26 = vsub.f32 %v43547_v36, %v43556_v52  ;;  %v5950_v6 = vadd.f32 %v43339_v14, %v5869_v22  ;;  %v41567_v14 = vpop.eup %41566 }
 0x46d   :  { %v10191_v23 = vmul.f32 %v41567_v14, %v43401_v62 }
 0x46e   :  { %v11101_v27 = vsel %vm6496_vm1, %v11097_v20, 0  ;;  %v11563_v11 = vsel %vm6496_vm1, %v10648_v48, 0  ;;  %v43581_v61 = vand.u32 4294901760, %v11681_v26  ;;  %v43584_v40 = vand.u32 4294901760, %v5950_v6  ;;  %v42_v26 = vld [vmem:[%s47266_s3 + $0x20] sm:$0xff] }
 0x46f   :  { %v11170_v33 = vand.u32 4294901760, %v11101_v27  ;;  %v43578_v1 = vand.u32 4294901760, %v11563_v11  ;;  %v12025_v62 = vsel %vm10113_vm3, %v10191_v23, 0 }
 0x470   :  { %v43598_v54 = vsub.f32 %v5950_v6, %v43584_v40  ;;  %v43681_v6 = vand.u32 4294901760, %v42_v26 }
 0x471   :  { %v11171_v7 = vsub.f32 %v11101_v27, %v11170_v33  ;;  %39201 = vmatmul.mubr.f32.vlgmr.msra.gmra.mxu1 %v11170_v33  ;;  %v11633_v58 = vsub.f32 %v11563_v11, %v43578_v1  ;;  %v12093_v27 = vand.u32 4294901760, %v12025_v62 }
 0x472   :  { %39211 = vmatpush3.msra.mxu1 %v43494_v50  ;;  %39214 = vmatprep.mubr.msk.f32.mxu1 %vm41652_vm2, %v47332_v63  ;;  %v12136_v32 = vand.u32 4294901760, %v43598_v54 }
 0x473   :  { %v11172_v34 = vand.u32 4294901760, %v11171_v7  ;;  %39212 = vmatprep.subr.mxu1 %v47332_v63  ;;  %v11634_v0 = vand.u32 4294901760, %v11633_v58 }
 0x474   :  { %39213 = vmatpush3.msra.mxu1 %v43502_v2  ;;  %v12137_v28 = vsub.f32 %v43598_v54, %v12136_v32 }
 0x475   :  { %v11173_v8 = vsub.f32 %v11171_v7, %v11172_v34  ;;  %39224 = vmatprep.subr.mxu1 %v47332_v63  ;;  %39215 = vmatmul.mubr.f32.vlgmr.msra.gmra.mxu1 %v11172_v34  ;;  %v11635_v20 = vsub.f32 %v11633_v58, %v11634_v0 }
 0x476   :  { %39225 = vmatpush3.msra.mxu1 %v43494_v50  ;;  %39228 = vmatprep.mubr.msk.f32.mxu1 %vm41652_vm2, %v47332_v63 }
 0x477   :  { %v11174_v38 = vand.u32 4294901760, %v11173_v8  ;;  %39226 = vmatprep.subr.mxu1 %v47332_v63  ;;  %v11636_v53 = vand.u32 4294901760, %v11635_v20  ;;  %v43673_v8 = vand.u32 4294901760, %v43_v9 }
 0x478   :  { %39227 = vmatpush3.msra.mxu1 %v43502_v2 }
 0x479   :  { %39238 = vmatprep.subr.mxu1 %v47332_v63  ;;  %39194 = vmatmul.mubr.f32.vlgmr.msra.gmra.mxu0 %v11174_v38  ;;  %v43679_v11 = vsub.f32 %v43_v9, %v43673_v8 }
 0x47a   :  { %39204 = vmatpush3.msra.mxu0 %v43500_v43  ;;  %39229 = vmatmul.mubr.f32.vlgmr.msra.gmra.mxu1 %v11170_v33 }
 0x47b   :  { %39239 = vmatpush3.msra.mxu1 %v43575_v39  ;;  %39205 = vmatprep.subr.mxu0 %v47332_v63  ;;  %v43686_v38 = vand.u32 4294901760, %v43679_v11 }
 0x47c   :  { %39240 = vmatprep.subr.mxu1 %v47332_v63  ;;  %39206 = vmatpush3.msra.mxu0 %v43510_v31 }
 0x47d   :  { %39241 = vmatpush3.msra.mxu1 %v43581_v61  ;;  %39207 = vmatprep.mubr.msk.f32.mxu0 %vm41652_vm2, %v47332_v63 }
 0x47e   :  { %39217 = vmatprep.subr.mxu0 %v47332_v63  ;;  %39242 = vmatprep.mubr.msk.f32.mxu1 %vm41652_vm2, %v47332_v63 }
 0x47f   :  { %39252 = vmatprep.subr.mxu1 %v47332_v63  ;;  %39208 = vmatmul.mubr.f32.vlgmr.msra.gmra.mxu0 %v11171_v7  ;;  %v12094_v7 = vsub.f32 %v12025_v62, %v12093_v27 }
 0x480   :  { %39218 = vmatpush3.msra.mxu0 %v43507_v49  ;;  %39243 = vmatmul.mubr.f32.vlgmr.msra.gmra.mxu1 %v43578_v1 }
 0x481   :  { %39253 = vmatpush3.msra.mxu1 %v43538_v25  ;;  %39219 = vmatprep.subr.mxu0 %v47332_v63  ;;  %v12095_v48 = vand.u32 4294901760, %v12094_v7 }
 0x482   :  { %39254 = vmatprep.subr.mxu1 %v47332_v63  ;;  %39220 = vmatpush3.msra.mxu0 %v43517_v3 }
 0x483   :  { %39255 = vmatpush3.msra.mxu1 %v43540_v18  ;;  %39221 = vmatprep.mubr.msk.f32.mxu0 %vm41652_vm2, %v47332_v63  ;;  %v12096_v22 = vsub.f32 %v12094_v7, %v12095_v48 }
 0x484   :  { %39231 = vmatprep.subr.mxu0 %v47332_v63  ;;  %39256 = vmatprep.mubr.msk.f32.mxu1 %vm41652_vm2, %v47332_v63 }
 0x485   :  { %39266 = vmatprep.subr.mxu1 %v47332_v63  ;;  %39222 = vmatmul.mubr.f32.vlgmr.msra.gmra.mxu0 %v11170_v33  ;;  %v12138_v33 = vand.u32 4294901760, %v12137_v28  ;;  %v12097_v34 = vand.u32 4294901760, %v12096_v22 }
 0x486   :  { %39232 = vmatpush3.msra.mxu0 %v43538_v25  ;;  %39257 = vmatmul.mubr.f32.vlgmr.msra.gmra.mxu1 %v11634_v0 }
 0x487   :  { %39267 = vmatpush3.msra.mxu1 %v43538_v25  ;;  %39233 = vmatprep.subr.mxu0 %v47332_v63 }
 0x488   :  { %39268 = vmatprep.subr.mxu1 %v47332_v63  ;;  %39234 = vmatpush3.msra.mxu0 %v43540_v18 }
 0x489   :  { %39269 = vmatpush3.msra.mxu1 %v43540_v18  ;;  %39235 = vmatprep.mubr.msk.f32.mxu0 %vm41652_vm2, %v47332_v63 }
 0x48a   :  { %39245 = vmatprep.subr.mxu0 %v47332_v63  ;;  %39270 = vmatprep.mubr.msk.f32.mxu1 %vm41652_vm2, %v47332_v63 }
 0x48b   :  { %39278 = vmatprep.subr.mxu1 %v47332_v63  ;;  %39236 = vmatmul.mubr.f32.vlgmr.msra.gmra.mxu0 %v11636_v53 }
 0x48c   :  { %39246 = vmatpush3.msra.mxu0 %v43544_v17  ;;  %39271 = vmatmul.mubr.f32.vlgmr.msra.gmra.mxu1 %v43578_v1 }
 0x48d   :  { %39279 = vmatpush3.msra.mxu1 %v12138_v33  ;;  %39247 = vmatprep.subr.mxu0 %v47332_v63 }
 0x48e   :  { %39248 = vmatpush3.msra.mxu0 %v43547_v36  ;;  %39249 = vmatprep.mubr.msk.f32.mxu0 %vm41652_vm2, %v47332_v63 }
 0x48f   :  { %39259 = vmatprep.subr.mxu0 %v47332_v63  ;;  %39280 = vmatprep.mubr.msk.f32.mxu1 %vm41652_vm2, %v47332_v63 }
 0x490   :  { %39288 = vmatprep.subr.mxu1 %v47332_v63  ;;  %39250 = vmatmul.mubr.f32.vlgmr.msra.gmra.mxu0 %v11633_v58 }
 0x491   :  { %39260 = vmatpush3.msra.mxu0 %v43552_v16  ;;  %39281 = vmatmul.mubr.f32.vlgmr.msra.gmra.mxu1 %v12093_v27 }
 0x492   :  { %39289 = vmatpush3.msra.mxu1 %v43584_v40  ;;  %39261 = vmatprep.subr.mxu0 %v47332_v63 }
 0x493   :  { %39262 = vmatpush3.msra.mxu0 %v43556_v52  ;;  %39263 = vmatprep.mubr.msk.f32.mxu0 %vm41652_vm2, %v47332_v63 }
 0x494   :  { %39273 = vmatprep.subr.mxu0 %v47332_v63  ;;  %39290 = vmatprep.mubr.msk.f32.mxu1 %vm41652_vm2, %v47332_v63 }
 0x495   :  { %39298 = vmatprep.subr.mxu1 %v47332_v63  ;;  %39264 = vmatmul.mubr.f32.vlgmr.msra.gmra.mxu0 %v43578_v1  ;;  %v43689_v1 = vsub.f32 %v42_v26, %v43681_v6 }
 0x496   :  { %39274 = vmatpush3.msra.mxu0 %v43584_v40  ;;  %39291 = vmatmul.mubr.f32.vlgmr.msra.gmra.mxu1 %v12095_v48 }
 0x497   :  { %39299 = vmatpush3.msra.mxu1 %v43584_v40  ;;  %39275 = vmatprep.mubr.msk.f32.mxu0 %vm41652_vm2, %v47332_v63  ;;  %v12585_v40 = vsub.f32 %v43679_v11, %v43686_v38  ;;  %v43696_v14 = vand.u32 4294901760, %v43689_v1 }
 0x498   :  { %39283 = vmatprep.subr.mxu0 %v47332_v63  ;;  %39300 = vmatprep.mubr.msk.f32.mxu1 %vm41652_vm2, %v47332_v63 }
 0x499   :  { %39276 = vmatmul.mubr.f32.vlgmr.msra.gmra.mxu0 %v12097_v34  ;;  %39310 = vmatprep.subr.mxu1 %v47332_v63  ;;  %v43698_v58 = vand.u32 4294901760, %v12585_v40 }
 0x49a   :  { %39284 = vmatpush3.msra.mxu0 %v43598_v54  ;;  %39301 = vmatmul.mubr.f32.vlgmr.msra.gmra.mxu1 %v12093_v27  ;;  %v12592_v54 = vsub.f32 %v43689_v1, %v43696_v14 }
 0x49b   :  { %39285 = vmatprep.mubr.msk.f32.mxu0 %vm41652_vm2, %v47332_v63  ;;  %39293 = vmatprep.subr.mxu0 %v47332_v63 }
 0x49c   :  { %39314 = vmatprep.mubr.msk.f32.mxu1 %vm41652_vm2, %v47332_v63  ;;  %39311 = vmatpush3.msra.mxu1 %v43698_v58  ;;  %v43703_v23 = vand.u32 4294901760, %v12592_v54 }
 0x49d   :  { %39286 = vmatmul.mubr.f32.vlgmr.msra.gmra.mxu0 %v12094_v7  ;;  %39312 = vmatprep.subr.mxu1 %v47332_v63 }
 0x49e   :  { %39294 = vmatpush3.msra.mxu0 %v12136_v32  ;;  %39295 = vmatprep.mubr.msk.f32.mxu0 %vm41652_vm2, %v47332_v63 }
 0x49f   :  { %39303 = vmatprep.subr.mxu0 %v47332_v63  ;;  %39313 = vmatpush3.msra.mxu1 %v43703_v23 }
 0x4a0   :  { %39324 = vmatprep.subr.mxu1 %v47332_v63 }
 0x4a1   :  { %39296 = vmatmul.mubr.f32.vlgmr.msra.gmra.mxu0 %v12093_v27 }
 0x4a2   :  { %39307 = vmatprep.mubr.msk.f32.mxu0 %vm41652_vm2, %v47332_v63  ;;  %39304 = vmatpush3.msra.mxu0 %v43673_v8 }
 0x4a3   :  { %39305 = vmatprep.subr.mxu0 %v47332_v63 }
 0x4a4   :  { %39306 = vmatpush3.msra.mxu0 %v43681_v6 }
 0x4a5   :  { %39317 = vmatprep.subr.mxu0 %v47332_v63 }
 0x531   :  { %v11257_v0 = vpop.f32.mrf.mxu1 }
 0x533   :  { %v39202_v32 = vpop.f32.mrf.mxu1 }
 0x534   :  { %v6044_v32 = vadd.f32 %v43341_v60, %v43332_v55 }
 0x535   :  { %v11408_v62 = vpop.f32.mrf.mxu1 }
 0x537   :  { %v39216_v20 = vpop.f32.mrf.mxu1 }
 0x539   :  { %v11176_v28 = vpop.f32.mrf.mxu0 }
 0x53a   :  { %v11258_v27 = vadd.f32 %v11257_v0, %v11176_v28  ;;  %v11558_v53 = vpop.f32.mrf.mxu1 }
 0x53b   :  { %v39195_v33 = vpop.f32.mrf.mxu0 }
 0x53c   :  { %v39230_v7 = vpop.f32.mrf.mxu1  ;;  %v6145_v33 = vadd.f32 %v43343_v37, %v6044_v32 }
 0x53f   :  { %v11333_v48 = vpop.f32.mrf.mxu0 }
 0x540   :  { %v11334_v22 = vadd.f32 %v11333_v48, %v11258_v27  ;;  %v11719_v34 = vpop.f32.mrf.mxu1 }
 0x541   :  { %v39209_v9 = vpop.f32.mrf.mxu0 }
 0x542   :  { %v39244_v26 = vpop.f32.mrf.mxu1  ;;  %v11409_v40 = vadd.f32 %v11408_v62, %v11334_v22  ;;  %v6231_v62 = vadd.f32 %v43345_v30, %v6145_v33 }
 0x545   :  { %v11485_v54 = vpop.f32.mrf.mxu0 }
 0x546   :  { %v11486_v21 = vadd.f32 %v11485_v54, %v11409_v40  ;;  %v11870_v19 = vpop.f32.mrf.mxu1 }
 0x547   :  { %v39223_v15 = vpop.f32.mrf.mxu0 }
 0x548   :  { %v39258_v35 = vpop.f32.mrf.mxu1  ;;  %v11559_v13 = vadd.f32 %v11558_v53, %v11486_v21  ;;  %v6315_v21 = vadd.f32 %v43349_v45, %v6231_v62 }
 0x54b   :  { %v11638_v20 = vpop.f32.mrf.mxu0 }
 0x54c   :  { %v11639_v0 = vadd.f32 %v11638_v20, %v11559_v13  ;;  %v12020_v28 = vpop.f32.mrf.mxu1 }
 0x54d   :  { %v39237_v7 = vpop.f32.mrf.mxu0 }
 0x54e   :  { %v39272_v27 = vpop.f32.mrf.mxu1  ;;  %v11720_v48 = vadd.f32 %v11719_v34, %v11639_v0  ;;  %v6406_v34 = vadd.f32 %v43347_v46, %v6315_v21 }
 0x550   :  { %v11795_v9 = vpop.f32.mrf.mxu0 }
 0x551   :  { %v11796_v22 = vadd.f32 %v11795_v9, %v11720_v48  ;;  %v12175_v26 = vpop.f32.mrf.mxu1 }
 0x552   :  { %v39251_v40 = vpop.f32.mrf.mxu0 }
 0x553   :  { %v39282_v15 = vpop.f32.mrf.mxu1  ;;  %v11871_v35 = vadd.f32 %v11870_v19, %v11796_v22  ;;  %v6487_v19 = vadd.f32 %v43358_v29, %v6406_v34  ;;  %v41569_v22 = vpop.eup %41568 }
 0x554   :  { %v10193_v46 = vmul.f32 %v41569_v22, %v43407_v59 }
 0x555   :  { %v11947_v53 = vpop.f32.mrf.mxu0  ;;  %v12970_v24 = vand.u32 4294901760, %v6487_v19 }
 0x556   :  { %v11948_v13 = vadd.f32 %v11947_v53, %v11871_v35  ;;  %v12323_v55 = vpop.f32.mrf.mxu1  ;;  %v12937_v53 = vsel %vm10113_vm3, %v10193_v46, 0 }
 0x557   :  { %v39265_v60 = vpop.f32.mrf.mxu0  ;;  %v43718_v15 = vsub.f32 %v6487_v19, %v12970_v24 }
 0x558   :  { %v43714_v37 = vadd.f32 %v12020_v28, %v11948_v13  ;;  %v39292_v54 = vpop.f32.mrf.mxu1  ;;  %v13005_v60 = vand.u32 4294901760, %v12937_v53 }
 0x559   :  { %v12099_v32 = vpop.f32.mrf.mxu0  ;;  %v13048_v21 = vand.u32 4294901760, %v43718_v15 }
 0x55a   :  { %v12469_v30 = vpop.f32.mrf.mxu1  ;;  %v12176_v0 = vadd.f32 %v12175_v26, %v12099_v32  ;;  %v13006_v32 = vsub.f32 %v12937_v53, %v13005_v60 }
 0x55b   :  { %v39277_v20 = vpop.f32.mrf.mxu0 }
 0x55c   :  { %v39302_v33 = vpop.f32.mrf.mxu1 }
 0x55d   :  { %v12249_v7 = vpop.f32.mrf.mxu0  ;;  %v45_v33 = vld [vmem:[%s47266_s3 + $0x38] sm:$0xff] }
 0x55e   :  { %v12250_v45 = vadd.f32 %v12249_v7, %v12176_v0  ;;  %v43775_v19 = vand.u32 4294901760, %v45_v33  ;;  %v44_v7 = vld [vmem:[%s47266_s3 + $0x30] sm:$0xff] }
 0x55f   :  { %v39287_v27 = vpop.f32.mrf.mxu0 }
 0x560   :  { %v12324_v48 = vadd.f32 %v12323_v55, %v12250_v45  ;;  %v13049_v55 = vsub.f32 %v43718_v15, %v13048_v21  ;;  %v43781_v45 = vsub.f32 %v45_v33, %v43775_v19  ;;  %v43783_v27 = vand.u32 4294901760, %v44_v7 }
 0x561   :  { %v12397_v9 = vpop.f32.mrf.mxu0 }
 0x562   :  { %v12398_v62 = vadd.f32 %v12397_v9, %v12324_v48  ;;  %v13050_v34 = vand.u32 4294901760, %v13049_v55  ;;  %v43788_v48 = vand.u32 4294901760, %v43781_v45 }
 0x563   :  { %v39297_v28 = vpop.f32.mrf.mxu0 }
 0x564   :  { %v12470_v40 = vadd.f32 %v12469_v30, %v12398_v62  ;;  %v13007_v30 = vand.u32 4294901760, %v13006_v32  ;;  %v13497_v9 = vsub.f32 %v43781_v45, %v43788_v48 }
 0x566   :  { %v12474_v35 = vsel %vm6496_vm1, %v12470_v40, 0  ;;  %v13008_v20 = vsub.f32 %v13006_v32, %v13007_v30  ;;  %v43800_v22 = vand.u32 4294901760, %v13497_v9 }
 0x567   :  { %v12543_v26 = vand.u32 4294901760, %v12474_v35 }
 0x568   :  { %v13009_v0 = vand.u32 4294901760, %v13008_v20 }
 0x569   :  { %v12544_v29 = vsub.f32 %v12474_v35, %v12543_v26  ;;  %39315 = vmatmul.mubr.f32.vlgmr.msra.gmra.mxu1 %v12543_v26 }
 0x56a   :  { %39325 = vmatpush3.msra.mxu1 %v43673_v8  ;;  %39328 = vmatprep.mubr.msk.f32.mxu1 %vm41652_vm2, %v47332_v63 }
 0x56b   :  { %v12545_v13 = vand.u32 4294901760, %v12544_v29  ;;  %39326 = vmatprep.subr.mxu1 %v47332_v63 }
 0x56c   :  { %39327 = vmatpush3.msra.mxu1 %v43681_v6 }
 0x56d   :  { %v12546_v59 = vsub.f32 %v12544_v29, %v12545_v13  ;;  %39338 = vmatprep.subr.mxu1 %v47332_v63  ;;  %39329 = vmatmul.mubr.f32.vlgmr.msra.gmra.mxu1 %v12545_v13 }
 0x56e   :  { %39339 = vmatpush3.msra.mxu1 %v43673_v8  ;;  %39342 = vmatprep.mubr.msk.f32.mxu1 %vm41652_vm2, %v47332_v63 }
 0x56f   :  { %v12547_v54 = vand.u32 4294901760, %v12546_v59  ;;  %39340 = vmatprep.subr.mxu1 %v47332_v63 }
 0x570   :  { %39341 = vmatpush3.msra.mxu1 %v43681_v6 }
 0x571   :  { %39350 = vmatprep.subr.mxu1 %v47332_v63  ;;  %39308 = vmatmul.mubr.f32.vlgmr.msra.gmra.mxu0 %v12547_v54 }
 0x572   :  { %39318 = vmatpush3.msra.mxu0 %v43679_v11  ;;  %39343 = vmatmul.mubr.f32.vlgmr.msra.gmra.mxu1 %v12543_v26 }
 0x573   :  { %39351 = vmatpush3.msra.mxu1 %v13050_v34  ;;  %39319 = vmatprep.subr.mxu0 %v47332_v63 }
 0x574   :  { %39320 = vmatpush3.msra.mxu0 %v43689_v1  ;;  %39321 = vmatprep.mubr.msk.f32.mxu0 %vm41652_vm2, %v47332_v63 }
 0x575   :  { %39331 = vmatprep.subr.mxu0 %v47332_v63  ;;  %39352 = vmatprep.mubr.msk.f32.mxu1 %vm41652_vm2, %v47332_v63 }
 0x576   :  { %39360 = vmatprep.subr.mxu1 %v47332_v63  ;;  %39322 = vmatmul.mubr.f32.vlgmr.msra.gmra.mxu0 %v12544_v29 }
 0x577   :  { %39332 = vmatpush3.msra.mxu0 %v43686_v38  ;;  %39353 = vmatmul.mubr.f32.vlgmr.msra.gmra.mxu1 %v13005_v60 }
 0x578   :  { %39361 = vmatpush3.msra.mxu1 %v12970_v24  ;;  %39333 = vmatprep.subr.mxu0 %v47332_v63 }
 0x579   :  { %39334 = vmatpush3.msra.mxu0 %v43696_v14  ;;  %39335 = vmatprep.mubr.msk.f32.mxu0 %vm41652_vm2, %v47332_v63 }
 0x57a   :  { %39345 = vmatprep.subr.mxu0 %v47332_v63  ;;  %39362 = vmatprep.mubr.msk.f32.mxu1 %vm41652_vm2, %v47332_v63 }
 0x57b   :  { %39370 = vmatprep.subr.mxu1 %v47332_v63  ;;  %39336 = vmatmul.mubr.f32.vlgmr.msra.gmra.mxu0 %v12543_v26 }
 0x57c   :  { %39346 = vmatpush3.msra.mxu0 %v12970_v24  ;;  %39363 = vmatmul.mubr.f32.vlgmr.msra.gmra.mxu1 %v13007_v30 }
 0x57d   :  { %39371 = vmatpush3.msra.mxu1 %v12970_v24  ;;  %39347 = vmatprep.mubr.msk.f32.mxu0 %vm41652_vm2, %v47332_v63  ;;  %v43791_v24 = vsub.f32 %v44_v7, %v43783_v27 }
 0x57e   :  { %39355 = vmatprep.subr.mxu0 %v47332_v63  ;;  %39372 = vmatprep.mubr.msk.f32.mxu1 %vm41652_vm2, %v47332_v63 }
 0x57f   :  { %39348 = vmatmul.mubr.f32.vlgmr.msra.gmra.mxu0 %v13009_v0  ;;  %39382 = vmatprep.subr.mxu1 %v47332_v63  ;;  %v43798_v62 = vand.u32 4294901760, %v43791_v24 }
 0x580   :  { %39356 = vmatpush3.msra.mxu0 %v43718_v15  ;;  %39373 = vmatmul.mubr.f32.vlgmr.msra.gmra.mxu1 %v13005_v60 }
 0x581   :  { %39357 = vmatprep.mubr.msk.f32.mxu0 %vm41652_vm2, %v47332_v63  ;;  %39365 = vmatprep.subr.mxu0 %v47332_v63  ;;  %v13504_v28 = vsub.f32 %v43791_v24, %v43798_v62 }
 0x582   :  { %39386 = vmatprep.mubr.msk.f32.mxu1 %vm41652_vm2, %v47332_v63  ;;  %39383 = vmatpush3.msra.mxu1 %v43800_v22 }
 0x583   :  { %39358 = vmatmul.mubr.f32.vlgmr.msra.gmra.mxu0 %v13006_v32  ;;  %v43805_v40 = vand.u32 4294901760, %v13504_v28  ;;  %39384 = vmatprep.subr.mxu1 %v47332_v63 }
 0x584   :  { %39366 = vmatpush3.msra.mxu0 %v13048_v21  ;;  %39367 = vmatprep.mubr.msk.f32.mxu0 %vm41652_vm2, %v47332_v63 }
 0x585   :  { %39375 = vmatprep.subr.mxu0 %v47332_v63  ;;  %39385 = vmatpush3.msra.mxu1 %v43805_v40 }
 0x586   :  { %39396 = vmatprep.subr.mxu1 %v47332_v63 }
 0x587   :  { %39368 = vmatmul.mubr.f32.vlgmr.msra.gmra.mxu0 %v13005_v60 }
 0x588   :  { %39379 = vmatprep.mubr.msk.f32.mxu0 %vm41652_vm2, %v47332_v63  ;;  %39376 = vmatpush3.msra.mxu0 %v43775_v19 }
 0x589   :  { %39377 = vmatprep.subr.mxu0 %v47332_v63 }
 0x58a   :  { %39378 = vmatpush3.msra.mxu0 %v43783_v27 }
 0x58b   :  { %39389 = vmatprep.subr.mxu0 %v47332_v63 }
 0x629   :  { %v12630_v15 = vpop.f32.mrf.mxu1 }
 0x62b   :  { %v39316_v46 = vpop.f32.mrf.mxu1 }
 0x62d   :  { %v12781_v35 = vpop.f32.mrf.mxu1 }
 0x62f   :  { %v39330_v26 = vpop.f32.mrf.mxu1 }
 0x631   :  { %v12549_v21 = vpop.f32.mrf.mxu0 }
 0x632   :  { %v12631_v29 = vadd.f32 %v12630_v15, %v12549_v21  ;;  %v12931_v53 = vpop.f32.mrf.mxu1 }
 0x633   :  { %v39309_v13 = vpop.f32.mrf.mxu0 }
 0x634   :  { %v39344_v59 = vpop.f32.mrf.mxu1 }
 0x636   :  { %v12706_v55 = vpop.f32.mrf.mxu0 }
 0x637   :  { %v12707_v60 = vadd.f32 %v12706_v55, %v12631_v29  ;;  %v13087_v54 = vpop.f32.mrf.mxu1 }
 0x638   :  { %v39323_v34 = vpop.f32.mrf.mxu0 }
 0x639   :  { %v39354_v32 = vpop.f32.mrf.mxu1  ;;  %v12782_v30 = vadd.f32 %v12781_v35, %v12707_v60  ;;  %v10179_v34 = vpop.xlane.xlu1 %10178 }
 0x63a   :  { %41572 = vrcp.f32 %v10179_v34 }
 0x63b   :  { %v12858_v20 = vpop.f32.mrf.mxu0 }
 0x63c   :  { %v12859_v0 = vadd.f32 %v12858_v20, %v12782_v30  ;;  %v13235_v33 = vpop.f32.mrf.mxu1  ;;  %v41571_v30 = vpop.eup %41570 }
 0x63d   :  { %v39337_v7 = vpop.f32.mrf.mxu0 }
 0x63e   :  { %v12932_v9 = vadd.f32 %v12931_v53, %v12859_v0  ;;  %v39364_v28 = vpop.f32.mrf.mxu1 }
 0x63f   :  { %v13011_v46 = vpop.f32.mrf.mxu0 }
 0x640   :  { %v43812_v15 = vadd.f32 %v12932_v9, %v43714_v37  ;;  %v13381_v26 = vpop.f32.mrf.mxu1  ;;  %v13088_v13 = vadd.f32 %v13087_v54, %v13011_v46  ;;  %v43819_v37 = vsub.f32 %v43176_v41, %v43815_v10  ;;  %v10195_v54 = vmul.f32 %v41571_v30, %v43413_v47 }
 0x641   :  { %v39349_v21 = vpop.f32.mrf.mxu0 }
 0x642   :  { %v39374_v29 = vpop.f32.mrf.mxu1  ;;  %v13849_v46 = vsel %vm10113_vm3, %v10195_v54, 0 }
 0x643   :  { %v13161_v59 = vpop.f32.mrf.mxu0  ;;  %v43834_v21 = vand.u32 4294901760, %v13849_v46  ;;  %v43840_v29 = vand.u32 4294901760, %v43288_v56 }
 0x644   :  { %v13162_v55 = vadd.f32 %v13161_v59, %v13088_v13 }
 0x645   :  { %v39359_v35 = vpop.f32.mrf.mxu0  ;;  %v13918_v34 = vsub.f32 %v13849_v46, %v43834_v21 }
 0x646   :  { %v13236_v60 = vadd.f32 %v13235_v33, %v13162_v55  ;;  %v13960_v33 = vand.u32 4294901760, %v43819_v37 }
 0x647   :  { %v13309_v32 = vpop.f32.mrf.mxu0  ;;  %v41573_v13 = vpop.eup %41572 }
 0x648   :  { %v13310_v53 = vadd.f32 %v13309_v32, %v13236_v60  ;;  %v13961_v41 = vsub.f32 %v43819_v37, %v13960_v33  ;;  %v10197_v35 = vmul.f32 %v41573_v13, %v43479_v12  ;;  %v43850_v60 = vsub.f32 %v43288_v56, %v43840_v29 }
 0x649   :  { %v39369_v20 = vpop.f32.mrf.mxu0  ;;  %v13919_v12 = vand.u32 4294901760, %v13918_v34 }
 0x64a   :  { %v13382_v0 = vadd.f32 %v13381_v26, %v13310_v53  ;;  %v13962_v55 = vand.u32 4294901760, %v13961_v41  ;;  %v14298_v56 = vsel %vm10113_vm3, %v10197_v35, 0  ;;  %v14409_v32 = vand.u32 4294901760, %v43850_v60 }
 0x64b   :  { %v13920_v53 = vsub.f32 %v13918_v34, %v13919_v12  ;;  %v14366_v30 = vand.u32 4294901760, %v14298_v56 }
 0x64c   :  { %v13386_v7 = vsel %vm6496_vm1, %v13382_v0, 0  ;;  %v14410_v20 = vsub.f32 %v43850_v60, %v14409_v32 }
 0x64d   :  { %v13455_v9 = vand.u32 4294901760, %v13386_v7  ;;  %v13921_v0 = vand.u32 4294901760, %v13920_v53  ;;  %v14367_v54 = vsub.f32 %v14298_v56, %v14366_v30 }
 0x64f   :  { %v13456_v28 = vsub.f32 %v13386_v7, %v13455_v9  ;;  %39387 = vmatmul.mubr.f32.vlgmr.msra.gmra.mxu1 %v13455_v9  ;;  %v14411_v7 = vand.u32 4294901760, %v14410_v20 }
 0x650   :  { %39397 = vmatpush3.msra.mxu1 %v43775_v19  ;;  %39400 = vmatprep.mubr.msk.f32.mxu1 %vm41652_vm2, %v47332_v63 }
 0x651   :  { %v13457_v26 = vand.u32 4294901760, %v13456_v28  ;;  %39398 = vmatprep.subr.mxu1 %v47332_v63 }
 0x652   :  { %39399 = vmatpush3.msra.mxu1 %v43783_v27 }
 0x653   :  { %v13458_v47 = vsub.f32 %v13456_v28, %v13457_v26  ;;  %39410 = vmatprep.subr.mxu1 %v47332_v63  ;;  %39401 = vmatmul.mubr.f32.vlgmr.msra.gmra.mxu1 %v13457_v26 }
 0x654   :  { %39411 = vmatpush3.msra.mxu1 %v43775_v19  ;;  %39414 = vmatprep.mubr.msk.f32.mxu1 %vm41652_vm2, %v47332_v63 }
 0x655   :  { %v13459_v59 = vand.u32 4294901760, %v13458_v47  ;;  %39412 = vmatprep.subr.mxu1 %v47332_v63 }
 0x656   :  { %39413 = vmatpush3.msra.mxu1 %v43783_v27 }
 0x657   :  { %39422 = vmatprep.subr.mxu1 %v47332_v63  ;;  %39380 = vmatmul.mubr.f32.vlgmr.msra.gmra.mxu0 %v13459_v59 }
 0x658   :  { %39390 = vmatpush3.msra.mxu0 %v43781_v45  ;;  %39415 = vmatmul.mubr.f32.vlgmr.msra.gmra.mxu1 %v13455_v9 }
 0x659   :  { %39423 = vmatpush3.msra.mxu1 %v13962_v55  ;;  %39391 = vmatprep.subr.mxu0 %v47332_v63 }
 0x65a   :  { %39392 = vmatpush3.msra.mxu0 %v43791_v24  ;;  %39393 = vmatprep.mubr.msk.f32.mxu0 %vm41652_vm2, %v47332_v63 }
 0x65b   :  { %39403 = vmatprep.subr.mxu0 %v47332_v63  ;;  %39424 = vmatprep.mubr.msk.f32.mxu1 %vm41652_vm2, %v47332_v63 }
 0x65c   :  { %39432 = vmatprep.subr.mxu1 %v47332_v63  ;;  %39394 = vmatmul.mubr.f32.vlgmr.msra.gmra.mxu0 %v13456_v28 }
 0x65d   :  { %39404 = vmatpush3.msra.mxu0 %v43788_v48  ;;  %39425 = vmatmul.mubr.f32.vlgmr.msra.gmra.mxu1 %v43834_v21 }
 0x65e   :  { %39433 = vmatpush3.msra.mxu1 %v43815_v10  ;;  %39405 = vmatprep.subr.mxu0 %v47332_v63 }
 0x65f   :  { %39406 = vmatpush3.msra.mxu0 %v43798_v62  ;;  %39407 = vmatprep.mubr.msk.f32.mxu0 %vm41652_vm2, %v47332_v63 }
 0x660   :  { %39417 = vmatprep.subr.mxu0 %v47332_v63  ;;  %39434 = vmatprep.mubr.msk.f32.mxu1 %vm41652_vm2, %v47332_v63 }
 0x661   :  { %39442 = vmatprep.subr.mxu1 %v47332_v63  ;;  %39408 = vmatmul.mubr.f32.vlgmr.msra.gmra.mxu0 %v13455_v9 }
 0x662   :  { %39418 = vmatpush3.msra.mxu0 %v43815_v10  ;;  %39435 = vmatmul.mubr.f32.vlgmr.msra.gmra.mxu1 %v13919_v12 }
 0x663   :  { %39443 = vmatpush3.msra.mxu1 %v43815_v10  ;;  %39419 = vmatprep.mubr.msk.f32.mxu0 %vm41652_vm2, %v47332_v63  ;;  %v14368_v10 = vand.u32 4294901760, %v14367_v54 }
 0x664   :  { %39427 = vmatprep.subr.mxu0 %v47332_v63  ;;  %39444 = vmatprep.mubr.msk.f32.mxu1 %vm41652_vm2, %v47332_v63 }
 0x665   :  { %39452 = vmatprep.subr.mxu1 %v47332_v63  ;;  %39420 = vmatmul.mubr.f32.vlgmr.msra.gmra.mxu0 %v13921_v0  ;;  %v14369_v9 = vsub.f32 %v14367_v54, %v14368_v10 }
 0x666   :  { %39428 = vmatpush3.msra.mxu0 %v43819_v37  ;;  %39445 = vmatmul.mubr.f32.vlgmr.msra.gmra.mxu1 %v43834_v21 }
 0x667   :  { %39453 = vmatpush3.msra.mxu1 %v14411_v7  ;;  %39429 = vmatprep.mubr.msk.f32.mxu0 %vm41652_vm2, %v47332_v63  ;;  %v14370_v37 = vand.u32 4294901760, %v14369_v9 }
 0x668   :  { %39437 = vmatprep.subr.mxu0 %v47332_v63  ;;  %39454 = vmatprep.mubr.msk.f32.mxu1 %vm41652_vm2, %v47332_v63 }
 0x669   :  { %39462 = vmatprep.subr.mxu1 %v47332_v63  ;;  %39430 = vmatmul.mubr.f32.vlgmr.msra.gmra.mxu0 %v13918_v34 }
 0x66a   :  { %39438 = vmatpush3.msra.mxu0 %v13960_v33  ;;  %39455 = vmatmul.mubr.f32.vlgmr.msra.gmra.mxu1 %v14366_v30 }
 0x66b   :  { %39463 = vmatpush3.msra.mxu1 %v43840_v29  ;;  %39439 = vmatprep.mubr.msk.f32.mxu0 %vm41652_vm2, %v47332_v63 }
 0x66c   :  { %39447 = vmatprep.subr.mxu0 %v47332_v63  ;;  %39464 = vmatprep.mubr.msk.f32.mxu1 %vm41652_vm2, %v47332_v63 }
 0x66d   :  { %39472 = vmatprep.subr.mxu1 %v47332_v63  ;;  %39440 = vmatmul.mubr.f32.vlgmr.msra.gmra.mxu0 %v43834_v21 }
 0x66e   :  { %39448 = vmatpush3.msra.mxu0 %v43840_v29  ;;  %39465 = vmatmul.mubr.f32.vlgmr.msra.gmra.mxu1 %v14368_v10 }
 0x66f   :  { %39473 = vmatpush3.msra.mxu1 %v43840_v29  ;;  %39449 = vmatprep.mubr.msk.f32.mxu0 %vm41652_vm2, %v47332_v63 }
 0x670   :  { %39457 = vmatprep.subr.mxu0 %v47332_v63  ;;  %39474 = vmatprep.mubr.msk.f32.mxu1 %vm41652_vm2, %v47332_v63 }
 0x671   :  { %39450 = vmatmul.mubr.f32.vlgmr.msra.gmra.mxu0 %v14370_v37  ;;  %39484 = vmatprep.subr.mxu1 %v47332_v63 }
 0x672   :  { %39458 = vmatpush3.msra.mxu0 %v43850_v60  ;;  %39475 = vmatmul.mubr.f32.vlgmr.msra.gmra.mxu1 %v14366_v30 }
 0x673   :  { %39459 = vmatprep.mubr.msk.f32.mxu0 %vm41652_vm2, %v47332_v63  ;;  %39467 = vmatprep.subr.mxu0 %v47332_v63 }
 0x674   :  { %39485 = vmatpush3.msra.mxu1 %v43519_v44  ;;  %39488 = vmatprep.mubr.msk.f32.mxu1 %vm41652_vm2, %v47332_v63 }
 0x675   :  { %39460 = vmatmul.mubr.f32.vlgmr.msra.gmra.mxu0 %v14367_v54  ;;  %39486 = vmatprep.subr.mxu1 %v47332_v63 }
 0x676   :  { %39468 = vmatpush3.msra.mxu0 %v14409_v32  ;;  %39469 = vmatprep.mubr.msk.f32.mxu0 %vm41652_vm2, %v47332_v63 }
 0x677   :  { %39487 = vmatpush3.msra.mxu1 %v43524_v42  ;;  %39477 = vmatprep.subr.mxu0 %v47332_v63 }
 0x678   :  { %39498 = vmatprep.subr.mxu1 %v47332_v63 }
 0x679   :  { %39470 = vmatmul.mubr.f32.vlgmr.msra.gmra.mxu0 %v14366_v30 }
 0x67a   :  { %39478 = vmatpush3.msra.mxu0 %v43494_v50  ;;  %39481 = vmatprep.mubr.msk.f32.mxu0 %vm41652_vm2, %v47332_v63 }
 0x67b   :  { %39479 = vmatprep.subr.mxu0 %v47332_v63 }
 0x67c   :  { %39480 = vmatpush3.msra.mxu0 %v43502_v2 }
 0x67d   :  { %39491 = vmatprep.subr.mxu0 %v47332_v63 }
 0x70f   :  { %v13542_v44 = vpop.f32.mrf.mxu1 }
 0x711   :  { %v39388_v33 = vpop.f32.mrf.mxu1 }
 0x713   :  { %v13693_v28 = vpop.f32.mrf.mxu1 }
 0x715   :  { %v39402_v42 = vpop.f32.mrf.mxu1 }
 0x717   :  { %v13461_v46 = vpop.f32.mrf.mxu0 }
 0x718   :  { %v13543_v26 = vadd.f32 %v13542_v44, %v13461_v46  ;;  %v13843_v41 = vpop.f32.mrf.mxu1 }
 0x719   :  { %v39381_v47 = vpop.f32.mrf.mxu0 }
 0x71a   :  { %v39416_v21 = vpop.f32.mrf.mxu1 }
 0x71c   :  { %v13618_v13 = vpop.f32.mrf.mxu0 }
 0x71d   :  { %v13619_v29 = vadd.f32 %v13618_v13, %v13543_v26  ;;  %v13999_v59 = vpop.f32.mrf.mxu1 }
 0x71e   :  { %v39395_v55 = vpop.f32.mrf.mxu0 }
 0x71f   :  { %v39426_v34 = vpop.f32.mrf.mxu1  ;;  %v13694_v35 = vadd.f32 %v13693_v28, %v13619_v29 }
 0x721   :  { %v13770_v60 = vpop.f32.mrf.mxu0 }
 0x722   :  { %v13771_v12 = vadd.f32 %v13770_v60, %v13694_v35  ;;  %v14147_v56 = vpop.f32.mrf.mxu1 }
 0x723   :  { %v39409_v32 = vpop.f32.mrf.mxu0 }
 0x724   :  { %v13844_v53 = vadd.f32 %v13843_v41, %v13771_v12  ;;  %v39436_v30 = vpop.f32.mrf.mxu1 }
 0x725   :  { %v13923_v20 = vpop.f32.mrf.mxu0 }
 0x726   :  { %v43928_v0 = vadd.f32 %v13844_v53, %v43812_v15  ;;  %v14293_v54 = vpop.f32.mrf.mxu1  ;;  %v14000_v41 = vadd.f32 %v13999_v59, %v13923_v20 }
 0x727   :  { %v39421_v7 = vpop.f32.mrf.mxu0 }
 0x728   :  { %47334 = vst [vmem:[#allocation18_spill] sm:$0xff] %v43928_v0  ;;  %v39446_v10 = vpop.f32.mrf.mxu1 }
 0x729   :  { %v14073_v9 = vpop.f32.mrf.mxu0 }
 0x72a   :  { %v14448_v37 = vpop.f32.mrf.mxu1  ;;  %v14074_v15 = vadd.f32 %v14073_v9, %v14000_v41 }
 0x72b   :  { %v39431_v44 = vpop.f32.mrf.mxu0 }
 0x72c   :  { %v39456_v33 = vpop.f32.mrf.mxu1  ;;  %v14148_v53 = vadd.f32 %v14147_v56, %v14074_v15  ;;  %v10182_v44 = vpop.xlane.xlu1 %10181 }
 0x72d   :  { %v14221_v42 = vpop.f32.mrf.mxu0  ;;  %41574 = vrcp.f32 %v10182_v44 }
 0x72e   :  { %v14596_v46 = vpop.f32.mrf.mxu1  ;;  %v14222_v33 = vadd.f32 %v14221_v42, %v14148_v53  ;;  %v43948_v42 = vand.u32 4294901760, %v43336_v4 }
 0x72f   :  { %v39441_v28 = vpop.f32.mrf.mxu0 }
 0x730   :  { %v39466_v26 = vpop.f32.mrf.mxu1  ;;  %v14294_v59 = vadd.f32 %v14293_v54, %v14222_v33 }
 0x731   :  { %v14372_v47 = vpop.f32.mrf.mxu0 }
 0x732   :  { %v14742_v21 = vpop.f32.mrf.mxu1  ;;  %v14449_v29 = vadd.f32 %v14448_v37, %v14372_v47  ;;  %v15209_v9 = vsel %vm6496_vm1, %v14294_v59, 0 }
 0x733   :  { %v39451_v13 = vpop.f32.mrf.mxu0  ;;  %v43943_v37 = vand.u32 4294901760, %v15209_v9 }
 0x734   :  { %v39476_v55 = vpop.f32.mrf.mxu1 }
 0x735   :  { %v14522_v34 = vpop.f32.mrf.mxu0 }
 0x736   :  { %v14523_v35 = vadd.f32 %v14522_v34, %v14449_v29 }
 0x737   :  { %v39461_v60 = vpop.f32.mrf.mxu0 }
 0x738   :  { %v14597_v12 = vadd.f32 %v14596_v46, %v14523_v35 }
 0x739   :  { %v14670_v32 = vpop.f32.mrf.mxu0 }
 0x73a   :  { %v14671_v30 = vadd.f32 %v14670_v32, %v14597_v12 }
 0x73b   :  { %v39471_v7 = vpop.f32.mrf.mxu0 }
 0x73c   :  { %v14743_v10 = vadd.f32 %v14742_v21, %v14671_v30 }
 0x73e   :  { %v14747_v28 = vsel %vm6496_vm1, %v14743_v10, 0 }
 0x73f   :  { %v14816_v26 = vand.u32 4294901760, %v14747_v28 }
 0x741   :  { %v14817_v13 = vsub.f32 %v14747_v28, %v14816_v26  ;;  %39489 = vmatmul.mubr.f32.vlgmr.msra.gmra.mxu1 %v14816_v26 }
 0x742   :  { %39499 = vmatpush3.msra.mxu1 %v43494_v50  ;;  %39502 = vmatprep.mubr.msk.f32.mxu1 %vm41652_vm2, %v47332_v63 }
 0x743   :  { %v14818_v20 = vand.u32 4294901760, %v14817_v13  ;;  %39500 = vmatprep.subr.mxu1 %v47332_v63 }
 0x744   :  { %39501 = vmatpush3.msra.mxu1 %v43502_v2 }
 0x745   :  { %v14819_v56 = vsub.f32 %v14817_v13, %v14818_v20  ;;  %39512 = vmatprep.subr.mxu1 %v47332_v63  ;;  %39503 = vmatmul.mubr.f32.vlgmr.msra.gmra.mxu1 %v14818_v20 }
 0x746   :  { %39513 = vmatpush3.msra.mxu1 %v43494_v50  ;;  %39516 = vmatprep.mubr.msk.f32.mxu1 %vm41652_vm2, %v47332_v63  ;;  %v41575_v50 = vpop.eup %41574 }
 0x747   :  { %v14820_v54 = vand.u32 4294901760, %v14819_v56  ;;  %39514 = vmatprep.subr.mxu1 %v47332_v63 }
 0x748   :  { %39515 = vmatpush3.msra.mxu1 %v43502_v2  ;;  %v15279_v2 = vsub.f32 %v15209_v9, %v43943_v37 }
 0x749   :  { %39526 = vmatprep.subr.mxu1 %v47332_v63  ;;  %39482 = vmatmul.mubr.f32.vlgmr.msra.gmra.mxu0 %v14820_v54 }
 0x74a   :  { %39492 = vmatpush3.msra.mxu0 %v43500_v43  ;;  %39517 = vmatmul.mubr.f32.vlgmr.msra.gmra.mxu1 %v14816_v26  ;;  %v43963_v43 = vsub.f32 %v43336_v4, %v43948_v42 }
 0x74b   :  { %39527 = vmatpush3.msra.mxu1 %v43575_v39  ;;  %39493 = vmatprep.subr.mxu0 %v47332_v63  ;;  %v15280_v39 = vand.u32 4294901760, %v15279_v2 }
 0x74c   :  { %39528 = vmatprep.subr.mxu1 %v47332_v63  ;;  %39494 = vmatpush3.msra.mxu0 %v43510_v31  ;;  %v10199_v31 = vmul.f32 %v41575_v50, %v43483_v57  ;;  %v15782_v4 = vand.u32 4294901760, %v43963_v43 }
 0x74d   :  { %39529 = vmatpush3.msra.mxu1 %v43581_v61  ;;  %39495 = vmatprep.mubr.msk.f32.mxu0 %vm41652_vm2, %v47332_v63 }
 0x74e   :  { %39505 = vmatprep.subr.mxu0 %v47332_v63  ;;  %39530 = vmatprep.mubr.msk.f32.mxu1 %vm41652_vm2, %v47332_v63  ;;  %v15671_v57 = vsel %vm10113_vm3, %v10199_v31, 0 }
 0x74f   :  { %39540 = vmatprep.subr.mxu1 %v47332_v63  ;;  %39496 = vmatmul.mubr.f32.vlgmr.msra.gmra.mxu0 %v14817_v13  ;;  %v15739_v61 = vand.u32 4294901760, %v15671_v57 }
 0x750   :  { %39506 = vmatpush3.msra.mxu0 %v43507_v49  ;;  %39531 = vmatmul.mubr.f32.vlgmr.msra.gmra.mxu1 %v43943_v37  ;;  %v15281_v49 = vsub.f32 %v15279_v2, %v15280_v39 }
 0x751   :  { %39541 = vmatpush3.msra.mxu1 %v43538_v25  ;;  %39507 = vmatprep.subr.mxu0 %v47332_v63  ;;  %v15740_v47 = vsub.f32 %v15671_v57, %v15739_v61 }
 0x752   :  { %39542 = vmatprep.subr.mxu1 %v47332_v63  ;;  %39508 = vmatpush3.msra.mxu0 %v43517_v3  ;;  %v15783_v3 = vsub.f32 %v43963_v43, %v15782_v4  ;;  %v15282_v46 = vand.u32 4294901760, %v15281_v49 }
 0x753   :  { %39543 = vmatpush3.msra.mxu1 %v43540_v18  ;;  %39509 = vmatprep.mubr.msk.f32.mxu0 %vm41652_vm2, %v47332_v63 }
 0x754   :  { %39519 = vmatprep.subr.mxu0 %v47332_v63  ;;  %39544 = vmatprep.mubr.msk.f32.mxu1 %vm41652_vm2, %v47332_v63 }
 0x755   :  { %39554 = vmatprep.subr.mxu1 %v47332_v63  ;;  %39510 = vmatmul.mubr.f32.vlgmr.msra.gmra.mxu0 %v14816_v26 }
 0x756   :  { %39520 = vmatpush3.msra.mxu0 %v43538_v25  ;;  %39545 = vmatmul.mubr.f32.vlgmr.msra.gmra.mxu1 %v15280_v39 }
 0x757   :  { %39555 = vmatpush3.msra.mxu1 %v43538_v25  ;;  %39521 = vmatprep.subr.mxu0 %v47332_v63  ;;  %v15784_v25 = vand.u32 4294901760, %v15783_v3 }
 0x758   :  { %39556 = vmatprep.subr.mxu1 %v47332_v63  ;;  %39522 = vmatpush3.msra.mxu0 %v43540_v18 }
 0x759   :  { %39557 = vmatpush3.msra.mxu1 %v43540_v18  ;;  %39523 = vmatprep.mubr.msk.f32.mxu0 %vm41652_vm2, %v47332_v63  ;;  %v15741_v18 = vand.u32 4294901760, %v15740_v47 }
 0x75a   :  { %39533 = vmatprep.subr.mxu0 %v47332_v63  ;;  %39558 = vmatprep.mubr.msk.f32.mxu1 %vm41652_vm2, %v47332_v63 }
 0x75b   :  { %39566 = vmatprep.subr.mxu1 %v47332_v63  ;;  %39524 = vmatmul.mubr.f32.vlgmr.msra.gmra.mxu0 %v15282_v46 }
 0x75c   :  { %39534 = vmatpush3.msra.mxu0 %v43544_v17  ;;  %39559 = vmatmul.mubr.f32.vlgmr.msra.gmra.mxu1 %v43943_v37  ;;  %v15742_v17 = vsub.f32 %v15740_v47, %v15741_v18 }
 0x75d   :  { %39567 = vmatpush3.msra.mxu1 %v15784_v25  ;;  %39535 = vmatprep.subr.mxu0 %v47332_v63 }
 0x75e   :  { %39536 = vmatpush3.msra.mxu0 %v43547_v36  ;;  %39537 = vmatprep.mubr.msk.f32.mxu0 %vm41652_vm2, %v47332_v63  ;;  %v15743_v36 = vand.u32 4294901760, %v15742_v17 }
 0x75f   :  { %39547 = vmatprep.subr.mxu0 %v47332_v63  ;;  %39568 = vmatprep.mubr.msk.f32.mxu1 %vm41652_vm2, %v47332_v63 }
 0x760   :  { %39576 = vmatprep.subr.mxu1 %v47332_v63  ;;  %39538 = vmatmul.mubr.f32.vlgmr.msra.gmra.mxu0 %v15279_v2  ;;  %v10185_v2 = vpop.xlane.xlu1 %10184 }
 0x761   :  { %39548 = vmatpush3.msra.mxu0 %v43552_v16  ;;  %39569 = vmatmul.mubr.f32.vlgmr.msra.gmra.mxu1 %v15739_v61  ;;  %41576 = vrcp.f32 %v10185_v2 }
 0x762   :  { %39577 = vmatpush3.msra.mxu1 %v43948_v42  ;;  %39549 = vmatprep.subr.mxu0 %v47332_v63 }
 0x763   :  { %39550 = vmatpush3.msra.mxu0 %v43556_v52  ;;  %39551 = vmatprep.mubr.msk.f32.mxu0 %vm41652_vm2, %v47332_v63 }
 0x764   :  { %39561 = vmatprep.subr.mxu0 %v47332_v63  ;;  %39578 = vmatprep.mubr.msk.f32.mxu1 %vm41652_vm2, %v47332_v63 }
 0x765   :  { %39586 = vmatprep.subr.mxu1 %v47332_v63  ;;  %39552 = vmatmul.mubr.f32.vlgmr.msra.gmra.mxu0 %v43943_v37 }
 0x766   :  { %39562 = vmatpush3.msra.mxu0 %v43948_v42  ;;  %39579 = vmatmul.mubr.f32.vlgmr.msra.gmra.mxu1 %v15741_v18 }
 0x767   :  { %39587 = vmatpush3.msra.mxu1 %v43948_v42  ;;  %39563 = vmatprep.mubr.msk.f32.mxu0 %vm41652_vm2, %v47332_v63 }
 0x768   :  { %39571 = vmatprep.subr.mxu0 %v47332_v63  ;;  %39588 = vmatprep.mubr.msk.f32.mxu1 %vm41652_vm2, %v47332_v63 }
 0x769   :  { %39564 = vmatmul.mubr.f32.vlgmr.msra.gmra.mxu0 %v15743_v36  ;;  %39598 = vmatprep.subr.mxu1 %v47332_v63 }
 0x76a   :  { %39572 = vmatpush3.msra.mxu0 %v43963_v43  ;;  %39589 = vmatmul.mubr.f32.vlgmr.msra.gmra.mxu1 %v15739_v61 }
 0x76b   :  { %39573 = vmatprep.mubr.msk.f32.mxu0 %vm41652_vm2, %v47332_v63  ;;  %39581 = vmatprep.subr.mxu0 %v47332_v63 }
 0x76c   :  { %39599 = vmatpush3.msra.mxu1 %v43698_v58  ;;  %39602 = vmatprep.mubr.msk.f32.mxu1 %vm41652_vm2, %v47332_v63 }
 0x76d   :  { %39574 = vmatmul.mubr.f32.vlgmr.msra.gmra.mxu0 %v15740_v47  ;;  %39600 = vmatprep.subr.mxu1 %v47332_v63 }
 0x76e   :  { %39582 = vmatpush3.msra.mxu0 %v15782_v4  ;;  %39583 = vmatprep.mubr.msk.f32.mxu0 %vm41652_vm2, %v47332_v63 }
 0x76f   :  { %39601 = vmatpush3.msra.mxu1 %v43703_v23  ;;  %39591 = vmatprep.subr.mxu0 %v47332_v63 }
 0x770   :  { %39612 = vmatprep.subr.mxu1 %v47332_v63 }
 0x771   :  { %39584 = vmatmul.mubr.f32.vlgmr.msra.gmra.mxu0 %v15739_v61 }
 0x772   :  { %39592 = vmatpush3.msra.mxu0 %v43673_v8  ;;  %39595 = vmatprep.mubr.msk.f32.mxu0 %vm41652_vm2, %v47332_v63 }
 0x773   :  { %39593 = vmatprep.subr.mxu0 %v47332_v63 }
 0x774   :  { %39594 = vmatpush3.msra.mxu0 %v43681_v6 }
 0x775   :  { %39605 = vmatprep.subr.mxu0 %v47332_v63 }
 0x801   :  { %v14903_v16 = vpop.f32.mrf.mxu1 }
 0x803   :  { %v39490_v52 = vpop.f32.mrf.mxu1 }
 0x805   :  { %v15054_v58 = vpop.f32.mrf.mxu1 }
 0x807   :  { %v39504_v23 = vpop.f32.mrf.mxu1 }
 0x808   :  { %v16616_v23 = vand.u32 4294901760, %v43356_v5 }
 0x809   :  { %v14822_v21 = vpop.f32.mrf.mxu0 }
 0x80a   :  { %v14904_v41 = vadd.f32 %v14903_v16, %v14822_v21  ;;  %v15204_v29 = vpop.f32.mrf.mxu1 }
 0x80b   :  { %v39483_v55 = vpop.f32.mrf.mxu0 }
 0x80c   :  { %v39518_v34 = vpop.f32.mrf.mxu1 }
 0x80f   :  { %v14979_v15 = vpop.f32.mrf.mxu0 }
 0x810   :  { %v14980_v35 = vadd.f32 %v14979_v15, %v14904_v41  ;;  %v15365_v60 = vpop.f32.mrf.mxu1  ;;  %v44051_v15 = vsub.f32 %v43356_v5, %v16616_v23 }
 0x811   :  { %v39497_v12 = vpop.f32.mrf.mxu0 }
 0x812   :  { %v39532_v32 = vpop.f32.mrf.mxu1  ;;  %v15055_v53 = vadd.f32 %v15054_v58, %v14980_v35 }
 0x813   :  { %v16694_v32 = vand.u32 4294901760, %v44051_v15 }
 0x815   :  { %v15131_v30 = vpop.f32.mrf.mxu0  ;;  %v16695_v5 = vsub.f32 %v44051_v15, %v16694_v32 }
 0x816   :  { %v15132_v7 = vadd.f32 %v15131_v30, %v15055_v53  ;;  %v15516_v10 = vpop.f32.mrf.mxu1 }
 0x817   :  { %v39511_v44 = vpop.f32.mrf.mxu0 }
 0x818   :  { %v39546_v33 = vpop.f32.mrf.mxu1  ;;  %v15205_v28 = vadd.f32 %v15204_v29, %v15132_v7  ;;  %v41577_v29 = vpop.eup %41576 }
 0x819   :  { %v10201_v35 = vmul.f32 %v41577_v29, %v43487_v51  ;;  %v16696_v33 = vand.u32 4294901760, %v16695_v5 }
 0x81b   :  { %v15284_v26 = vpop.f32.mrf.mxu0  ;;  %v16583_v30 = vsel %vm10113_vm3, %v10201_v35, 0 }
 0x81c   :  { %v15285_v13 = vadd.f32 %v15284_v26, %v15205_v28  ;;  %v15666_v59 = vpop.f32.mrf.mxu1 }
 0x81d   :  { %v39525_v20 = vpop.f32.mrf.mxu0 }
 0x81e   :  { %v39560_v56 = vpop.f32.mrf.mxu1  ;;  %v15366_v9 = vadd.f32 %v15365_v60, %v15285_v13 }
 0x820   :  { %v15441_v54 = vpop.f32.mrf.mxu0 }
 0x821   :  { %v15442_v37 = vadd.f32 %v15441_v54, %v15366_v9  ;;  %v15821_v42 = vpop.f32.mrf.mxu1 }
 0x822   :  { %v39539_v50 = vpop.f32.mrf.mxu0 }
 0x823   :  { %v39570_v43 = vpop.f32.mrf.mxu1  ;;  %v15517_v31 = vadd.f32 %v15516_v10, %v15442_v37  ;;  %v16651_v10 = vand.u32 4294901760, %v16583_v30 }
 0x825   :  { %v15593_v39 = vpop.f32.mrf.mxu0  ;;  %v16652_v28 = vsub.f32 %v16583_v30, %v16651_v10 }
 0x826   :  { %v15594_v4 = vadd.f32 %v15593_v39, %v15517_v31  ;;  %v15969_v57 = vpop.f32.mrf.mxu1 }
 0x827   :  { %v39553_v49 = vpop.f32.mrf.mxu0 }
 0x828   :  { %v44047_v3 = vadd.f32 %v15666_v59, %v15594_v4  ;;  %v39580_v61 = vpop.f32.mrf.mxu1 }
 0x829   :  { %v15745_v46 = vpop.f32.mrf.mxu0 }
 0x82a   :  { %v16115_v25 = vpop.f32.mrf.mxu1  ;;  %v15822_v18 = vadd.f32 %v15821_v42, %v15745_v46 }
 0x82b   :  { %v39565_v47 = vpop.f32.mrf.mxu0 }
 0x82c   :  { %v39590_v17 = vpop.f32.mrf.mxu1 }
 0x82d   :  { %v15895_v36 = vpop.f32.mrf.mxu0  ;;  %v36380_v17 = vld [vmem:[%s47265_s2 + $0x198] sm:$0xff] }
 0x82e   :  { %v15896_v16 = vadd.f32 %v15895_v36, %v15822_v18 }
 0x82f   :  { %v39575_v52 = vpop.f32.mrf.mxu0 }
 0x830   :  { %v15970_v58 = vadd.f32 %v15969_v57, %v15896_v16 }
 0x831   :  { %v16043_v21 = vpop.f32.mrf.mxu0 }
 0x832   :  { %v16044_v41 = vadd.f32 %v16043_v21, %v15970_v58  ;;  %v44119_v58 = vand.u32 4294901760, %v36380_v17  ;;  %v36379_v21 = vld [vmem:[%s47265_s2 + $0x190] sm:$0xff] }
 0x833   :  { %v39585_v55 = vpop.f32.mrf.mxu0 }
 0x834   :  { %v16116_v34 = vadd.f32 %v16115_v25, %v16044_v41  ;;  %v44125_v55 = vsub.f32 %v36380_v17, %v44119_v58 }
 0x836   :  { %v16120_v60 = vsel %vm6496_vm1, %v16116_v34, 0  ;;  %v44127_v34 = vand.u32 4294901760, %v36379_v21  ;;  %v44139_v30 = vand.u32 4294901760, %v44125_v55 }
 0x837   :  { %v16189_v12 = vand.u32 4294901760, %v16120_v60 }
 0x839   :  { %v16190_v53 = vsub.f32 %v16120_v60, %v16189_v12  ;;  %39603 = vmatmul.mubr.f32.vlgmr.msra.gmra.mxu1 %v16189_v12  ;;  %v36377_v60 = vld [vmem:[%s47265_s2 + $0x180] sm:$0xff] }
 0x83a   :  { %39613 = vmatpush3.msra.mxu1 %v43673_v8  ;;  %39616 = vmatprep.mubr.msk.f32.mxu1 %vm41652_vm2, %v47332_v63  ;;  %v44144_v5 = vand.u32 4294901760, %v36377_v60 }
 0x83b   :  { %v16191_v7 = vand.u32 4294901760, %v16190_v53  ;;  %39614 = vmatprep.subr.mxu1 %v47332_v63 }
 0x83c   :  { %39615 = vmatpush3.msra.mxu1 %v43681_v6 }
 0x83d   :  { %v16192_v51 = vsub.f32 %v16190_v53, %v16191_v7  ;;  %39626 = vmatprep.subr.mxu1 %v47332_v63  ;;  %39617 = vmatmul.mubr.f32.vlgmr.msra.gmra.mxu1 %v16191_v7  ;;  %v44142_v7 = vsub.f32 %v36379_v21, %v44127_v34 }
 0x83e   :  { %39627 = vmatpush3.msra.mxu1 %v43673_v8  ;;  %39630 = vmatprep.mubr.msk.f32.mxu1 %vm41652_vm2, %v47332_v63  ;;  %v16653_v8 = vand.u32 4294901760, %v16652_v28 }
 0x83f   :  { %v16193_v44 = vand.u32 4294901760, %v16192_v51  ;;  %39628 = vmatprep.subr.mxu1 %v47332_v63 }
 0x840   :  { %39629 = vmatpush3.msra.mxu1 %v43681_v6 }
 0x841   :  { %39638 = vmatprep.subr.mxu1 %v47332_v63  ;;  %39596 = vmatmul.mubr.f32.vlgmr.msra.gmra.mxu0 %v16193_v44 }
 0x842   :  { %39606 = vmatpush3.msra.mxu0 %v43679_v11  ;;  %39631 = vmatmul.mubr.f32.vlgmr.msra.gmra.mxu1 %v16189_v12  ;;  %v16654_v11 = vsub.f32 %v16652_v28, %v16653_v8 }
 0x843   :  { %39639 = vmatpush3.msra.mxu1 %v16696_v33  ;;  %39607 = vmatprep.subr.mxu0 %v47332_v63  ;;  %v17676_v33 = vsub.f32 %v44125_v55, %v44139_v30 }
 0x844   :  { %39608 = vmatpush3.msra.mxu0 %v43689_v1  ;;  %39609 = vmatprep.mubr.msk.f32.mxu0 %vm41652_vm2, %v47332_v63  ;;  %v16655_v6 = vand.u32 4294901760, %v16654_v11 }
 0x845   :  { %39619 = vmatprep.subr.mxu0 %v47332_v63  ;;  %39640 = vmatprep.mubr.msk.f32.mxu1 %vm41652_vm2, %v47332_v63 }
 0x846   :  { %39648 = vmatprep.subr.mxu1 %v47332_v63  ;;  %39610 = vmatmul.mubr.f32.vlgmr.msra.gmra.mxu0 %v16190_v53 }
 0x847   :  { %39620 = vmatpush3.msra.mxu0 %v43686_v38  ;;  %39641 = vmatmul.mubr.f32.vlgmr.msra.gmra.mxu1 %v16651_v10 }
 0x848   :  { %39649 = vmatpush3.msra.mxu1 %v16616_v23  ;;  %39621 = vmatprep.subr.mxu0 %v47332_v63 }
 0x849   :  { %39622 = vmatpush3.msra.mxu0 %v43696_v14  ;;  %39623 = vmatprep.mubr.msk.f32.mxu0 %vm41652_vm2, %v47332_v63 }
 0x84a   :  { %39633 = vmatprep.subr.mxu0 %v47332_v63  ;;  %39650 = vmatprep.mubr.msk.f32.mxu1 %vm41652_vm2, %v47332_v63 }
 0x84b   :  { %39658 = vmatprep.subr.mxu1 %v47332_v63  ;;  %39624 = vmatmul.mubr.f32.vlgmr.msra.gmra.mxu0 %v16189_v12 }
 0x84c   :  { %39634 = vmatpush3.msra.mxu0 %v16616_v23  ;;  %39651 = vmatmul.mubr.f32.vlgmr.msra.gmra.mxu1 %v16653_v8  ;;  %v44160_v8 = vsub.f32 %v36377_v60, %v44144_v5 }
 0x84d   :  { %39659 = vmatpush3.msra.mxu1 %v16616_v23  ;;  %39635 = vmatprep.mubr.msk.f32.mxu0 %vm41652_vm2, %v47332_v63 }
 0x84e   :  { %39643 = vmatprep.subr.mxu0 %v47332_v63  ;;  %39660 = vmatprep.mubr.msk.f32.mxu1 %vm41652_vm2, %v47332_v63 }
 0x84f   :  { %39636 = vmatmul.mubr.f32.vlgmr.msra.gmra.mxu0 %v16655_v6  ;;  %39670 = vmatprep.subr.mxu1 %v47332_v63 }
 0x850   :  { %39644 = vmatpush3.msra.mxu0 %v44051_v15  ;;  %39661 = vmatmul.mubr.f32.vlgmr.msra.gmra.mxu1 %v16651_v10  ;;  %v36378_v15 = vld [vmem:[%s47265_s2 + $0x188] sm:$0xff] }
 0x851   :  { %39645 = vmatprep.mubr.msk.f32.mxu0 %vm41652_vm2, %v47332_v63  ;;  %39653 = vmatprep.subr.mxu0 %v47332_v63 }
 0x852   :  { %39671 = vmatpush3.msra.mxu1 %v43800_v22  ;;  %39674 = vmatprep.mubr.msk.f32.mxu1 %vm41652_vm2, %v47332_v63 }
 0x853   :  { %39646 = vmatmul.mubr.f32.vlgmr.msra.gmra.mxu0 %v16652_v28  ;;  %39672 = vmatprep.subr.mxu1 %v47332_v63  ;;  %v44156_v28 = vand.u32 4294901760, %v44142_v7 }
 0x854   :  { %39654 = vmatpush3.msra.mxu0 %v16694_v32  ;;  %39655 = vmatprep.mubr.msk.f32.mxu0 %vm41652_vm2, %v47332_v63  ;;  %v44136_v32 = vand.u32 4294901760, %v36378_v15 }
 0x855   :  { %39673 = vmatpush3.msra.mxu1 %v43805_v40  ;;  %39663 = vmatprep.subr.mxu0 %v47332_v63 }
 0x856   :  { %39684 = vmatprep.subr.mxu1 %v47332_v63 }
 0x857   :  { %39656 = vmatmul.mubr.f32.vlgmr.msra.gmra.mxu0 %v16651_v10  ;;  %v44150_v10 = vsub.f32 %v36378_v15, %v44136_v32  ;;  %v36386_v15 = vld [vmem:[%s47265_s2 + $0x1c8] sm:$0xff] }
 0x858   :  { %39664 = vmatpush3.msra.mxu0 %v43775_v19  ;;  %39667 = vmatprep.mubr.msk.f32.mxu0 %vm41652_vm2, %v47332_v63 }
 0x859   :  { %39665 = vmatprep.subr.mxu0 %v47332_v63  ;;  %v44167_v6 = vand.u32 4294901760, %v44150_v10 }
 0x85a   :  { %39666 = vmatpush3.msra.mxu0 %v43783_v27 }
 0x85b   :  { %39677 = vmatprep.subr.mxu0 %v47332_v63 }
 0x8f9   :  { %v16276_v38 = vpop.f32.mrf.mxu1 }
 0x8fb   :  { %v39604_v1 = vpop.f32.mrf.mxu1 }
 0x8fc   :  { %v17677_v1 = vand.u32 4294901760, %v17676_v33 }
 0x8fd   :  { %v16427_v14 = vpop.f32.mrf.mxu1 }
 0x8ff   :  { %v39618_v22 = vpop.f32.mrf.mxu1 }
 0x900   :  { %v44174_v22 = vand.u32 4294901760, %v44160_v8 }
 0x901   :  { %v16195_v40 = vpop.f32.mrf.mxu0 }
 0x902   :  { %v16277_v26 = vadd.f32 %v16276_v38, %v16195_v40  ;;  %v16577_v13 = vpop.f32.mrf.mxu1 }
 0x903   :  { %v39597_v59 = vpop.f32.mrf.mxu0 }
 0x904   :  { %v39632_v20 = vpop.f32.mrf.mxu1 }
 0x905   :  { %v36383_v20 = vld [vmem:[%s47265_s2 + $0x1b0] sm:$0xff] }
 0x906   :  { %v16352_v56 = vpop.f32.mrf.mxu0 }
 0x907   :  { %v16353_v9 = vadd.f32 %v16352_v56, %v16277_v26  ;;  %v16733_v54 = vpop.f32.mrf.mxu1  ;;  %v47336_v26 = vld [vmem:[#allocation5_spill] sm:$0xff]  ;;  %v47338_v56 = vld [vmem:[#allocation6_spill] sm:$0xff] }
 0x908   :  { %v39611_v37 = vpop.f32.mrf.mxu0 }
 0x909   :  { %v39642_v42 = vpop.f32.mrf.mxu1  ;;  %v16428_v50 = vadd.f32 %v16427_v14, %v16353_v9  ;;  %v17683_v14 = vsub.f32 %v44142_v7, %v44156_v28  ;;  %v36382_v9 = vld [vmem:[%s47265_s2 + $0x1a8] sm:$0xff] }
 0x90a   :  { %v36381_v42 = vld [vmem:[%s47265_s2 + $0x1a0] sm:$0xff] }
 0x90b   :  { %v16504_v2 = vpop.f32.mrf.mxu0  ;;  %v17684_v40 = vand.u32 4294901760, %v17683_v14 }
 0x90c   :  { %v16505_v43 = vadd.f32 %v16504_v2, %v16428_v50  ;;  %v16881_v31 = vpop.f32.mrf.mxu1  ;;  %v44233_v50 = vand.u32 4294901760, %v36382_v9 }
 0x90d   :  { %v39625_v39 = vpop.f32.mrf.mxu0 }
 0x90e   :  { %v16578_v4 = vadd.f32 %v16577_v13, %v16505_v43  ;;  %v39652_v57 = vpop.f32.mrf.mxu1  ;;  %v47337_v13 = vld [vmem:[#allocation12_spill] sm:$0xff]  ;;  %v44242_v43 = vand.u32 4294901760, %v36381_v42 }
 0x90f   :  { %v16657_v49 = vpop.f32.mrf.mxu0  ;;  %v47341_v57 = vld [vmem:[#allocation9_spill] sm:$0xff] }
 0x910   :  { %v44114_v61 = vadd.f32 %v16578_v4, %v44047_v3  ;;  %v17027_v46 = vpop.f32.mrf.mxu1  ;;  %v16734_v47 = vadd.f32 %v16733_v54, %v16657_v49  ;;  %v44221_v54 = vand.u32 4294901760, %v36383_v20  ;;  %v47340_v4 = vld [vmem:[#allocation8_spill] sm:$0xff]  ;;  %v44252_v49 = vsub.f32 %v36382_v9, %v44233_v50 }
 0x911   :  { %v39637_v25 = vpop.f32.mrf.mxu0 }
 0x912   :  { %v39662_v18 = vpop.f32.mrf.mxu1  ;;  %v44240_v2 = vsub.f32 %v36383_v20, %v44221_v54  ;;  %v44271_v17 = vand.u32 4294901760, %v44252_v49 }
 0x913   :  { %v16807_v36 = vpop.f32.mrf.mxu0 }
 0x914   :  { %v16808_v16 = vadd.f32 %v16807_v36, %v16734_v47  ;;  %v44259_v25 = vand.u32 4294901760, %v44240_v2  ;;  %v44262_v47 = vsub.f32 %v36381_v42, %v44242_v43 }
 0x915   :  { %v39647_v52 = vpop.f32.mrf.mxu0 }
 0x916   :  { %v16882_v23 = vadd.f32 %v16881_v31, %v16808_v16  ;;  %v47339_v31 = vld [vmem:[#allocation7_spill] sm:$0xff]  ;;  %v18220_v36 = vsub.f32 %v44240_v2, %v44259_v25  ;;  %v44280_v16 = vand.u32 4294901760, %v44262_v47 }
 0x917   :  { %v16955_v3 = vpop.f32.mrf.mxu0 }
 0x918   :  { %v16956_v41 = vadd.f32 %v16955_v3, %v16882_v23  ;;  %v18221_v23 = vand.u32 4294901760, %v18220_v36  ;;  %v18234_v21 = vsub.f32 %v44262_v47, %v44280_v16 }
 0x919   :  { %v39657_v29 = vpop.f32.mrf.mxu0 }
 0x91a   :  { %v17028_v35 = vadd.f32 %v17027_v46, %v16956_v41  ;;  %v47342_v46 = vld [vmem:[#allocation10_spill] sm:$0xff]  ;;  %v18235_v41 = vand.u32 4294901760, %v18234_v21  ;;  %v36395_v21 = vld [vmem:[%s47265_s2 + $0x210] sm:$0xff] }
 0x91b   :  { %v36388_v29 = vld [vmem:[%s47265_s2 + $0x1d8] sm:$0xff] }
 0x91c   :  { %v17032_v12 = vsel %vm6496_vm1, %v17028_v35, 0 }
 0x91d   :  { %v17101_v53 = vand.u32 4294901760, %v17032_v12 }
 0x91f   :  { %v17102_v51 = vsub.f32 %v17032_v12, %v17101_v53  ;;  %39675 = vmatmul.mubr.f32.vlgmr.msra.gmra.mxu1 %v17101_v53  ;;  %v36385_v12 = vld [vmem:[%s47265_s2 + $0x1c0] sm:$0xff] }
 0x920   :  { %39685 = vmatpush3.msra.mxu1 %v43775_v19  ;;  %39688 = vmatprep.mubr.msk.f32.mxu1 %vm41652_vm2, %v47332_v63 }
 0x921   :  { %v17103_v44 = vand.u32 4294901760, %v17102_v51  ;;  %39686 = vmatprep.subr.mxu1 %v47332_v63 }
 0x922   :  { %39687 = vmatpush3.msra.mxu1 %v43783_v27 }
 0x923   :  { %v17104_v11 = vsub.f32 %v17102_v51, %v17103_v44  ;;  %39689 = vmatmul.mubr.f32.vlgmr.msra.gmra.mxu1 %v17103_v44  ;;  %39698 = vmatprep.subr.mxu1 %v47332_v63 }
 0x924   :  { %39699 = vmatpush3.msra.mxu1 %v43775_v19  ;;  %39702 = vmatprep.mubr.msk.f32.mxu1 %vm41652_vm2, %v47332_v63  ;;  %v17690_v19 = vsub.f32 %v44150_v10, %v44167_v6 }
 0x925   :  { %v17105_v38 = vand.u32 4294901760, %v17104_v11  ;;  %39700 = vmatprep.subr.mxu1 %v47332_v63 }
 0x926   :  { %39701 = vmatpush3.msra.mxu1 %v43783_v27  ;;  %v17697_v27 = vsub.f32 %v44160_v8, %v44174_v22 }
 0x927   :  { %39668 = vmatmul.mubr.f32.vlgmr.msra.gmra.mxu0 %v17105_v38  ;;  %39703 = vmatmul.mubr.f32.vlgmr.msra.gmra.mxu1 %v17101_v53 }
 0x928   :  { %39678 = vmatpush3.msra.mxu0 %v43781_v45  ;;  %39681 = vmatprep.mubr.msk.f32.mxu0 %vm41652_vm2, %v47332_v63  ;;  %v17691_v45 = vand.u32 4294901760, %v17690_v19  ;;  %v36392_v19 = vld [vmem:[%s47265_s2 + $0x1f8] sm:$0xff] }
 0x929   :  { %39679 = vmatprep.subr.mxu0 %v47332_v63  ;;  %39716 = vmatprep.subr.mxu1 %v17677_v1 }
 0x92a   :  { %39680 = vmatpush3.msra.mxu0 %v43791_v24  ;;  %39717 = vmatpush3.msra.mxu1 %v17677_v1  ;;  %v17698_v24 = vand.u32 4294901760, %v17697_v27  ;;  %v36391_v27 = vld [vmem:[%s47265_s2 + $0x1f0] sm:$0xff] }
 0x92b   :  { %39691 = vmatprep.subr.mxu0 %v47332_v63  ;;  %39682 = vmatmul.mubr.f32.vlgmr.msra.gmra.mxu0 %v17102_v51 }
 0x92c   :  { %39692 = vmatpush3.msra.mxu0 %v43788_v48  ;;  %39695 = vmatprep.mubr.msk.f32.mxu0 %vm41652_vm2, %v47332_v63  ;;  %v47335_v48 = vld [vmem:[#allocation11_spill] sm:$0xff] }
 0x92d   :  { %39693 = vmatprep.subr.mxu0 %v47332_v63  ;;  %39718 = vmatprep.subr.mxu1 %v17684_v40 }
 0x92e   :  { %39694 = vmatpush3.msra.mxu0 %v43798_v62  ;;  %39719 = vmatpush3.msra.mxu1 %v17684_v40  ;;  %v36384_v62 = vld [vmem:[%s47265_s2 + $0x1b8] sm:$0xff]  ;;  %v44415_v40 = vand.u32 4294901760, %v36392_v19 }
 0x92f   :  { %39705 = vmatprep.subr.mxu0 %v44119_v58  ;;  %39696 = vmatmul.mubr.f32.vlgmr.msra.gmra.mxu0 %v17101_v53  ;;  %v44207_v59 = vand.u32 4294901760, %v36384_v62 }
 0x930   :  { %39706 = vmatpush3.msra.mxu0 %v44119_v58  ;;  %39720 = vmatprep.subr.mxu1 %v17691_v45 }
 0x931   :  { %39707 = vmatprep.subr.mxu0 %v44127_v34  ;;  %39721 = vmatpush3.msra.mxu1 %v17691_v45  ;;  %v44226_v37 = vsub.f32 %v36384_v62, %v44207_v59  ;;  %v36390_v45 = vld [vmem:[%s47265_s2 + $0x1e8] sm:$0xff]  ;;  %v44434_v62 = vsub.f32 %v36392_v19, %v44415_v40 }
 0x932   :  { %39708 = vmatpush3.msra.mxu0 %v44127_v34  ;;  %39722 = vmatprep.subr.mxu1 %v17698_v24  ;;  %v44441_v20 = vand.u32 4294901760, %v36390_v45 }
 0x933   :  { %39709 = vmatprep.subr.mxu0 %v44136_v32  ;;  %39713 = vmatprep.mubr.f32.mxu0 %v47335_v48  ;;  %v44247_v39 = vand.u32 4294901760, %v44226_v37 }
 0x934   :  { %39710 = vmatpush3.msra.mxu0 %v44136_v32  ;;  %39723 = vmatpush3.msra.mxu1 %v17698_v24  ;;  %v44429_v24 = vand.u32 4294901760, %v36391_v27  ;;  %v44460_v42 = vsub.f32 %v36390_v45, %v44441_v20  ;;  %v36399_v45 = vld [vmem:[%s47265_s2 + $0x230] sm:$0xff] }
 0x935   :  { %39711 = vmatprep.subr.mxu0 %v44144_v5  ;;  %39724 = vmatprep.mubr.f32.mxu1 %v47336_v26  ;;  %v18213_v18 = vsub.f32 %v44226_v37, %v44247_v39 }
 0x936   :  { %39712 = vmatpush3.msra.mxu0 %v44144_v5  ;;  %39738 = vmatprep.subr.mxu1 %v44119_v58  ;;  %v44448_v9 = vsub.f32 %v36391_v27, %v44429_v24 }
 0x937   :  { %39714 = vmatmul.mubr.f32.vlgmr.msra.gmra.mxu0 %v47337_v13  ;;  %39727 = vmatprep.subr.mxu0 %v44125_v55  ;;  %v18214_v52 = vand.u32 4294901760, %v18213_v18 }
 0x938   :  { %39725 = vmatmul.mubr.f32.vlgmr.msra.gmra.mxu1 %v47338_v56  ;;  %39728 = vmatpush3.msra.mxu0 %v44125_v55  ;;  %v44311_v55 = vand.u32 4294901760, %v36388_v29 }
 0x939   :  { %39739 = vmatpush3.msra.mxu1 %v44119_v58  ;;  %39729 = vmatprep.subr.mxu0 %v44142_v7 }
 0x93a   :  { %39740 = vmatprep.subr.mxu1 %v44127_v34  ;;  %39730 = vmatpush3.msra.mxu0 %v44142_v7  ;;  %v44330_v60 = vsub.f32 %v36388_v29, %v44311_v55 }
 0x93b   :  { %39741 = vmatpush3.msra.mxu1 %v44127_v34  ;;  %39731 = vmatprep.subr.mxu0 %v44150_v10 }
 0x93c   :  { %39742 = vmatprep.subr.mxu1 %v44136_v32  ;;  %39732 = vmatpush3.msra.mxu0 %v44150_v10  ;;  %v44351_v7 = vand.u32 4294901760, %v44330_v60 }
 0x93d   :  { %39743 = vmatpush3.msra.mxu1 %v44136_v32  ;;  %39733 = vmatprep.subr.mxu0 %v44160_v8 }
 0x93e   :  { %39744 = vmatprep.subr.mxu1 %v44144_v5  ;;  %39734 = vmatpush3.msra.mxu0 %v44160_v8  ;;  %v18750_v44 = vsub.f32 %v44330_v60, %v44351_v7 }
 0x93f   :  { %39735 = vmatprep.mubr.f32.mxu0 %v47339_v31  ;;  %39745 = vmatpush3.msra.mxu1 %v44144_v5 }
 0x940   :  { %39736 = vmatmul.mubr.f32.vlgmr.msra.gmra.mxu0 %v47340_v4  ;;  %39746 = vmatprep.mubr.f32.mxu1 %v47341_v57  ;;  %v18751_v11 = vand.u32 4294901760, %v18750_v44 }
 0x941   :  { %39749 = vmatprep.subr.mxu0 %v44139_v30  ;;  %39760 = vmatprep.subr.mxu1 %v44119_v58 }
 0x942   :  { %39747 = vmatmul.mubr.f32.vlgmr.msra.gmra.mxu1 %v47342_v46  ;;  %39750 = vmatpush3.msra.mxu0 %v44139_v30  ;;  %v44346_v30 = vand.u32 4294901760, %v36385_v12 }
 0x943   :  { %39761 = vmatpush3.msra.mxu1 %v44119_v58  ;;  %39751 = vmatprep.subr.mxu0 %v44156_v28  ;;  %v18227_v58 = vsub.f32 %v44252_v49, %v44271_v17 }
 0x944   :  { %39762 = vmatprep.subr.mxu1 %v44127_v34  ;;  %39752 = vmatpush3.msra.mxu0 %v44156_v28  ;;  %v44366_v10 = vsub.f32 %v36385_v12, %v44346_v30 }
 0x945   :  { %39763 = vmatpush3.msra.mxu1 %v44127_v34  ;;  %39753 = vmatprep.subr.mxu0 %v44167_v6  ;;  %v18228_v3 = vand.u32 4294901760, %v18227_v58  ;;  %v36387_v34 = vld [vmem:[%s47265_s2 + $0x1d0] sm:$0xff]  ;;  %v36396_v58 = vld [vmem:[%s47265_s2 + $0x218] sm:$0xff] }
 0x946   :  { %39764 = vmatprep.subr.mxu1 %v44136_v32  ;;  %39754 = vmatpush3.msra.mxu0 %v44167_v6  ;;  %v44325_v35 = vand.u32 4294901760, %v36387_v34  ;;  %v44384_v8 = vand.u32 4294901760, %v44366_v10 }
 0x947   :  { %39765 = vmatpush3.msra.mxu1 %v44136_v32  ;;  %39755 = vmatprep.subr.mxu0 %v44174_v22  ;;  %v44337_v32 = vand.u32 4294901760, %v36386_v15 }
 0x948   :  { %39766 = vmatprep.subr.mxu1 %v44144_v5  ;;  %39756 = vmatpush3.msra.mxu0 %v44174_v22  ;;  %v44344_v53 = vsub.f32 %v36387_v34, %v44325_v35  ;;  %v18771_v1 = vsub.f32 %v44366_v10, %v44384_v8 }
 0x949   :  { %39757 = vmatprep.mubr.f32.mxu0 %v47336_v26  ;;  %39767 = vmatpush3.msra.mxu1 %v44144_v5  ;;  %v44356_v5 = vsub.f32 %v36386_v15, %v44337_v32 }
 0x94a   :  { %39758 = vmatmul.mubr.f32.vlgmr.msra.gmra.mxu0 %v47338_v56  ;;  %39768 = vmatprep.mubr.f32.mxu1 %v47336_v26  ;;  %v44363_v51 = vand.u32 4294901760, %v44344_v53  ;;  %v18772_v22 = vand.u32 4294901760, %v18771_v1 }
 0x94b   :  { %39771 = vmatprep.subr.mxu0 %v44207_v59  ;;  %39782 = vmatprep.subr.mxu1 %v18214_v52  ;;  %v44375_v33 = vand.u32 4294901760, %v44356_v5 }
 0x94c   :  { %39769 = vmatmul.mubr.f32.vlgmr.msra.gmra.mxu1 %v47338_v56  ;;  %39772 = vmatpush3.msra.mxu0 %v44207_v59  ;;  %v18757_v28 = vsub.f32 %v44344_v53, %v44363_v51 }
 0x94d   :  { %39783 = vmatpush3.msra.mxu1 %v18214_v52  ;;  %39773 = vmatprep.subr.mxu0 %v44221_v54  ;;  %v18764_v6 = vsub.f32 %v44356_v5, %v44375_v33 }
 0x94e   :  { %39784 = vmatprep.subr.mxu1 %v18221_v23  ;;  %39774 = vmatpush3.msra.mxu0 %v44221_v54  ;;  %v18758_v38 = vand.u32 4294901760, %v18757_v28 }
 0x94f   :  { %39785 = vmatpush3.msra.mxu1 %v18221_v23  ;;  %39775 = vmatprep.subr.mxu0 %v44233_v50  ;;  %v18765_v14 = vand.u32 4294901760, %v18764_v6  ;;  %v44519_v23 = vand.u32 4294901760, %v36396_v58 }
 0x950   :  { %39786 = vmatprep.subr.mxu1 %v18228_v3  ;;  %39776 = vmatpush3.msra.mxu0 %v44233_v50 }
 0x951   :  { %39787 = vmatpush3.msra.mxu1 %v18228_v3  ;;  %39777 = vmatprep.subr.mxu0 %v44242_v43  ;;  %v44536_v3 = vand.u32 4294901760, %v36395_v21  ;;  %v44544_v29 = vsub.f32 %v36396_v58, %v44519_v23 }
 0x952   :  { %39788 = vmatprep.subr.mxu1 %v18235_v41  ;;  %39778 = vmatpush3.msra.mxu0 %v44242_v43 }
 0x953   :  { %39779 = vmatprep.mubr.f32.mxu0 %v47335_v48  ;;  %39789 = vmatpush3.msra.mxu1 %v18235_v41  ;;  %v24_v41 = vld [vmem:[%s47263_s0 + $0x18] sm:$0xff] }
 0x954   :  { %39780 = vmatmul.mubr.f32.vlgmr.msra.gmra.mxu0 %v47337_v13  ;;  %39790 = vmatprep.mubr.f32.mxu1 %v47336_v26 }
 0x955   :  { %39793 = vmatprep.subr.mxu0 %v44226_v37  ;;  %39804 = vmatprep.subr.mxu1 %v44207_v59 }
 0x956   :  { %39791 = vmatmul.mubr.f32.vlgmr.msra.gmra.mxu1 %v47338_v56  ;;  %39794 = vmatpush3.msra.mxu0 %v44226_v37  ;;  %v44455_v37 = vand.u32 4294901760, %v44434_v62 }
 0x957   :  { %39805 = vmatpush3.msra.mxu1 %v44207_v59  ;;  %39795 = vmatprep.subr.mxu0 %v44240_v2 }
 0x958   :  { %39806 = vmatprep.subr.mxu1 %v44221_v54  ;;  %39796 = vmatpush3.msra.mxu0 %v44240_v2 }
 0x959   :  { %39807 = vmatpush3.msra.mxu1 %v44221_v54  ;;  %39797 = vmatprep.subr.mxu0 %v44252_v49 }
 0x95a   :  { %39808 = vmatprep.subr.mxu1 %v44233_v50  ;;  %39798 = vmatpush3.msra.mxu0 %v44252_v49 }
 0x95b   :  { %39809 = vmatpush3.msra.mxu1 %v44233_v50  ;;  %39799 = vmatprep.subr.mxu0 %v44262_v47 }
 0x95c   :  { %39810 = vmatprep.subr.mxu1 %v44242_v43  ;;  %39800 = vmatpush3.msra.mxu0 %v44262_v47 }
 0x95d   :  { %39801 = vmatprep.mubr.f32.mxu0 %v47339_v31  ;;  %39811 = vmatpush3.msra.mxu1 %v44242_v43 }
 0x95e   :  { %39802 = vmatmul.mubr.f32.vlgmr.msra.gmra.mxu0 %v47340_v4  ;;  %39812 = vmatprep.mubr.f32.mxu1 %v47341_v57 }
 0x95f   :  { %39815 = vmatprep.subr.mxu0 %v44247_v39  ;;  %39826 = vmatprep.subr.mxu1 %v44207_v59 }
 0x960   :  { %39813 = vmatmul.mubr.f32.vlgmr.msra.gmra.mxu1 %v47342_v46  ;;  %39816 = vmatpush3.msra.mxu0 %v44247_v39  ;;  %v44479_v39 = vand.u32 4294901760, %v44460_v42 }
 0x961   :  { %39827 = vmatpush3.msra.mxu1 %v44207_v59  ;;  %39817 = vmatprep.subr.mxu0 %v44259_v25  ;;  %v36389_v59 = vld [vmem:[%s47265_s2 + $0x1e0] sm:$0xff] }
 0x962   :  { %39828 = vmatprep.subr.mxu1 %v44221_v54  ;;  %39818 = vmatpush3.msra.mxu0 %v44259_v25  ;;  %v19301_v18 = vsub.f32 %v44460_v42, %v44479_v39 }
 0x963   :  { %39829 = vmatpush3.msra.mxu1 %v44221_v54  ;;  %39819 = vmatprep.subr.mxu0 %v44271_v17  ;;  %v44450_v54 = vand.u32 4294901760, %v36389_v59 }
 0x964   :  { %39830 = vmatprep.subr.mxu1 %v44233_v50  ;;  %39820 = vmatpush3.msra.mxu0 %v44271_v17 }
 0x965   :  { %39831 = vmatpush3.msra.mxu1 %v44233_v50  ;;  %39821 = vmatprep.subr.mxu0 %v44280_v16  ;;  %v44467_v50 = vand.u32 4294901760, %v44448_v9  ;;  %v44470_v2 = vsub.f32 %v36389_v59, %v44450_v54 }
 0x966   :  { %39832 = vmatprep.subr.mxu1 %v44242_v43  ;;  %39822 = vmatpush3.msra.mxu0 %v44280_v16  ;;  %v19302_v16 = vand.u32 4294901760, %v19301_v18 }
 0x967   :  { %39823 = vmatprep.mubr.f32.mxu0 %v47336_v26  ;;  %39833 = vmatpush3.msra.mxu1 %v44242_v43  ;;  %v19287_v43 = vsub.f32 %v44434_v62, %v44455_v37  ;;  %v19294_v49 = vsub.f32 %v44448_v9, %v44467_v50  ;;  %v44488_v25 = vand.u32 4294901760, %v44470_v2 }
 0x968   :  { %39824 = vmatmul.mubr.f32.vlgmr.msra.gmra.mxu0 %v47338_v56  ;;  %39834 = vmatprep.mubr.f32.mxu1 %v47336_v26 }
 0x969   :  { %39837 = vmatprep.subr.mxu0 %v44311_v55  ;;  %39848 = vmatprep.subr.mxu1 %v18751_v11  ;;  %v19288_v47 = vand.u32 4294901760, %v19287_v43  ;;  %v19295_v17 = vand.u32 4294901760, %v19294_v49  ;;  %v19308_v36 = vsub.f32 %v44470_v2, %v44488_v25 }
 0x96a   :  { %39835 = vmatmul.mubr.f32.vlgmr.msra.gmra.mxu1 %v47338_v56  ;;  %39838 = vmatpush3.msra.mxu0 %v44311_v55 }
 0x96b   :  { %39849 = vmatpush3.msra.mxu1 %v18751_v11  ;;  %39839 = vmatprep.subr.mxu0 %v44325_v35  ;;  %v19309_v52 = vand.u32 4294901760, %v19308_v36 }
 0x96c   :  { %39850 = vmatprep.subr.mxu1 %v18758_v38  ;;  %39840 = vmatpush3.msra.mxu0 %v44325_v35 }
 0x96d   :  { %39851 = vmatpush3.msra.mxu1 %v18758_v38  ;;  %39841 = vmatprep.subr.mxu0 %v44337_v32 }
 0x96e   :  { %39852 = vmatprep.subr.mxu1 %v18765_v14  ;;  %39842 = vmatpush3.msra.mxu0 %v44337_v32 }
 0x96f   :  { %39853 = vmatpush3.msra.mxu1 %v18765_v14  ;;  %39843 = vmatprep.subr.mxu0 %v44346_v30 }
 0x970   :  { %39854 = vmatprep.subr.mxu1 %v18772_v22  ;;  %39844 = vmatpush3.msra.mxu0 %v44346_v30 }
 0x971   :  { %39845 = vmatprep.mubr.f32.mxu0 %v47335_v48  ;;  %39855 = vmatpush3.msra.mxu1 %v18772_v22 }
 0x972   :  { %39846 = vmatmul.mubr.f32.vlgmr.msra.gmra.mxu0 %v47337_v13  ;;  %39856 = vmatprep.mubr.f32.mxu1 %v47336_v26 }
 0x973   :  { %39859 = vmatprep.subr.mxu0 %v44330_v60  ;;  %39870 = vmatprep.subr.mxu1 %v44311_v55 }
 0x974   :  { %39857 = vmatmul.mubr.f32.vlgmr.msra.gmra.mxu1 %v47338_v56  ;;  %39860 = vmatpush3.msra.mxu0 %v44330_v60  ;;  %v44560_v60 = vsub.f32 %v36395_v21, %v44536_v3  ;;  %v36403_v21 = vld [vmem:[%s47265_s2 + $0x250] sm:$0xff] }
 0x975   :  { %39871 = vmatpush3.msra.mxu1 %v44311_v55  ;;  %39861 = vmatprep.subr.mxu0 %v44344_v53 }
 0x976   :  { %39872 = vmatprep.subr.mxu1 %v44325_v35  ;;  %39862 = vmatpush3.msra.mxu0 %v44344_v53 }
 0x977   :  { %39873 = vmatpush3.msra.mxu1 %v44325_v35  ;;  %39863 = vmatprep.subr.mxu0 %v44356_v5 }
 0x978   :  { %39874 = vmatprep.subr.mxu1 %v44337_v32  ;;  %39864 = vmatpush3.msra.mxu0 %v44356_v5 }
 0x979   :  { %39875 = vmatpush3.msra.mxu1 %v44337_v32  ;;  %39865 = vmatprep.subr.mxu0 %v44366_v10 }
 0x97a   :  { %39876 = vmatprep.subr.mxu1 %v44346_v30  ;;  %39866 = vmatpush3.msra.mxu0 %v44366_v10 }
 0x97b   :  { %39867 = vmatprep.mubr.f32.mxu0 %v47339_v31  ;;  %39877 = vmatpush3.msra.mxu1 %v44346_v30 }
 0x97c   :  { %39868 = vmatmul.mubr.f32.vlgmr.msra.gmra.mxu0 %v47340_v4  ;;  %39878 = vmatprep.mubr.f32.mxu1 %v47341_v57 }
 0x97d   :  { %39881 = vmatprep.subr.mxu0 %v44351_v7  ;;  %39892 = vmatprep.subr.mxu1 %v44311_v55 }
 0x97e   :  { %39879 = vmatmul.mubr.f32.vlgmr.msra.gmra.mxu1 %v47342_v46  ;;  %39882 = vmatpush3.msra.mxu0 %v44351_v7 }
 0x97f   :  { %39893 = vmatpush3.msra.mxu1 %v44311_v55  ;;  %39883 = vmatprep.subr.mxu0 %v44363_v51  ;;  %v36393_v55 = vld [vmem:[%s47265_s2 + $0x200] sm:$0xff] }
 0x980   :  { %39894 = vmatprep.subr.mxu1 %v44325_v35  ;;  %39884 = vmatpush3.msra.mxu0 %v44363_v51  ;;  %v44562_v12 = vand.u32 4294901760, %v36393_v55 }
 0x981   :  { %39895 = vmatpush3.msra.mxu1 %v44325_v35  ;;  %39885 = vmatprep.subr.mxu0 %v44375_v33  ;;  %v19711_v35 = vsel %vm54_vm0, %v24_v41, 0 }
 0x982   :  { %39896 = vmatprep.subr.mxu1 %v44337_v32  ;;  %39886 = vmatpush3.msra.mxu0 %v44375_v33  ;;  %v44576_v7 = vand.u32 4294901760, %v19711_v35 }
 0x983   :  { %39897 = vmatpush3.msra.mxu1 %v44337_v32  ;;  %39887 = vmatprep.subr.mxu0 %v44384_v8  ;;  %v44567_v32 = vand.u32 4294901760, %v44544_v29 }
 0x984   :  { %39898 = vmatprep.subr.mxu1 %v44346_v30  ;;  %39888 = vmatpush3.msra.mxu0 %v44384_v8  ;;  %v44601_v51 = vsub.f32 %v19711_v35, %v44576_v7 }
 0x985   :  { %39889 = vmatprep.mubr.f32.mxu0 %v47336_v26  ;;  %39899 = vmatpush3.msra.mxu1 %v44346_v30 }
 0x986   :  { %39890 = vmatmul.mubr.f32.vlgmr.msra.gmra.mxu0 %v47338_v56  ;;  %39900 = vmatprep.mubr.f32.mxu1 %v47336_v26  ;;  %v44622_v11 = vand.u32 4294901760, %v44601_v51 }
 0x987   :  { %39903 = vmatprep.subr.mxu0 %v44415_v40  ;;  %39914 = vmatprep.subr.mxu1 %v19288_v47 }
 0x988   :  { %39901 = vmatmul.mubr.f32.vlgmr.msra.gmra.mxu1 %v47338_v56  ;;  %39904 = vmatpush3.msra.mxu0 %v44415_v40  ;;  %v19795_v22 = vsub.f32 %v44601_v51, %v44622_v11 }
 0x989   :  { %39915 = vmatpush3.msra.mxu1 %v19288_v47  ;;  %39905 = vmatprep.subr.mxu0 %v44429_v24 }
 0x98a   :  { %39916 = vmatprep.subr.mxu1 %v19295_v17  ;;  %39906 = vmatpush3.msra.mxu0 %v44429_v24 }
 0x98b   :  { %39917 = vmatpush3.msra.mxu1 %v19295_v17  ;;  %39907 = vmatprep.subr.mxu0 %v44441_v20 }
 0x98c   :  { %39918 = vmatprep.subr.mxu1 %v19302_v16  ;;  %39908 = vmatpush3.msra.mxu0 %v44441_v20 }
 0x98d   :  { %39919 = vmatpush3.msra.mxu1 %v19302_v16  ;;  %39909 = vmatprep.subr.mxu0 %v44450_v54 }
 0x98e   :  { %39920 = vmatprep.subr.mxu1 %v19309_v52  ;;  %39910 = vmatpush3.msra.mxu0 %v44450_v54 }
 0x98f   :  { %39911 = vmatprep.mubr.f32.mxu0 %v47335_v48  ;;  %39921 = vmatpush3.msra.mxu1 %v19309_v52  ;;  %v36394_v48 = vld [vmem:[%s47265_s2 + $0x208] sm:$0xff] }
 0x990   :  { %39912 = vmatmul.mubr.f32.vlgmr.msra.gmra.mxu0 %v47337_v13  ;;  %39922 = vmatprep.mubr.f32.mxu1 %v47336_v26  ;;  %v23_v13 = vld [vmem:[%s47263_s0 + $0x10] sm:$0xff]  ;;  %v44551_v34 = vand.u32 4294901760, %v36394_v48 }
 0x991   :  { %39925 = vmatprep.subr.mxu0 %v44434_v62  ;;  %39936 = vmatprep.subr.mxu1 %v44415_v40  ;;  %v19708_v15 = vsel %vm54_vm0, %v23_v13, 0  ;;  %v36402_v13 = vld [vmem:[%s47265_s2 + $0x248] sm:$0xff] }
 0x992   :  { %39923 = vmatmul.mubr.f32.vlgmr.msra.gmra.mxu1 %v47338_v56  ;;  %39926 = vmatpush3.msra.mxu0 %v44434_v62  ;;  %v44569_v53 = vand.u32 4294901760, %v19708_v15  ;;  %v44574_v30 = vsub.f32 %v36394_v48, %v44551_v34  ;;  %v44669_v62 = vand.u32 4294901760, %v36399_v45 }
 0x993   :  { %39937 = vmatpush3.msra.mxu1 %v44415_v40  ;;  %39927 = vmatprep.subr.mxu0 %v44448_v9 }
 0x994   :  { %39938 = vmatprep.subr.mxu1 %v44429_v24  ;;  %39928 = vmatpush3.msra.mxu0 %v44448_v9  ;;  %v44593_v5 = vsub.f32 %v19708_v15, %v44569_v53 }
 0x995   :  { %39939 = vmatpush3.msra.mxu1 %v44429_v24  ;;  %39929 = vmatprep.subr.mxu0 %v44460_v42 }
 0x996   :  { %39940 = vmatprep.subr.mxu1 %v44441_v20  ;;  %39930 = vmatpush3.msra.mxu0 %v44460_v42  ;;  %v44615_v28 = vand.u32 4294901760, %v44593_v5 }
 0x997   :  { %39941 = vmatpush3.msra.mxu1 %v44441_v20  ;;  %39931 = vmatprep.subr.mxu0 %v44470_v2 }
 0x998   :  { %39942 = vmatprep.subr.mxu1 %v44450_v54  ;;  %39932 = vmatpush3.msra.mxu0 %v44470_v2  ;;  %v19785_v1 = vsub.f32 %v44593_v5, %v44615_v28 }
 0x999   :  { %39933 = vmatprep.mubr.f32.mxu0 %v47339_v31  ;;  %39943 = vmatpush3.msra.mxu1 %v44450_v54  ;;  %v44583_v31 = vand.u32 4294901760, %v44560_v60 }
 0x99a   :  { %39934 = vmatmul.mubr.f32.vlgmr.msra.gmra.mxu0 %v47340_v4  ;;  %39944 = vmatprep.mubr.f32.mxu1 %v47341_v57  ;;  %v44586_v4 = vsub.f32 %v36393_v55, %v44562_v12  ;;  %v19830_v57 = vsub.f32 %v44544_v29, %v44567_v32  ;;  %v44640_v19 = vand.u32 4294901760, %v19785_v1  ;;  %v36401_v55 = vld [vmem:[%s47265_s2 + $0x240] sm:$0xff] }
 0x99b   :  { %39947 = vmatprep.subr.mxu0 %v44455_v37  ;;  %39958 = vmatprep.subr.mxu1 %v44415_v40  ;;  %v19837_v10 = vsub.f32 %v44560_v60, %v44583_v31  ;;  %v44796_v15 = vand.u32 4294901760, %v36401_v55 }
 0x99c   :  { %39945 = vmatmul.mubr.f32.vlgmr.msra.gmra.mxu1 %v47342_v46  ;;  %39948 = vmatpush3.msra.mxu0 %v44455_v37  ;;  %v44598_v46 = vand.u32 4294901760, %v44574_v30  ;;  %v44610_v44 = vand.u32 4294901760, %v44586_v4  ;;  %v19831_v33 = vand.u32 4294901760, %v19830_v57 }
 0x99d   :  { %39959 = vmatpush3.msra.mxu1 %v44415_v40  ;;  %39949 = vmatprep.subr.mxu0 %v44467_v50  ;;  %v19838_v6 = vand.u32 4294901760, %v19837_v10  ;;  %v36400_v40 = vld [vmem:[%s47265_s2 + $0x238] sm:$0xff] }
 0x99e   :  { %39960 = vmatprep.subr.mxu1 %v44429_v24  ;;  %39950 = vmatpush3.msra.mxu0 %v44467_v50  ;;  %v19844_v8 = vsub.f32 %v44574_v30, %v44598_v46  ;;  %v19851_v38 = vsub.f32 %v44586_v4, %v44610_v44  ;;  %v44655_v27 = vand.u32 4294901760, %v36400_v40 }
 0x99f   :  { %39961 = vmatpush3.msra.mxu1 %v44429_v24  ;;  %39951 = vmatprep.subr.mxu0 %v44479_v39  ;;  %v36398_v24 = vld [vmem:[%s47265_s2 + $0x228] sm:$0xff] }
 0x9a0   :  { %39962 = vmatprep.subr.mxu1 %v44441_v20  ;;  %39952 = vmatpush3.msra.mxu0 %v44479_v39  ;;  %v19845_v14 = vand.u32 4294901760, %v19844_v8  ;;  %v44674_v59 = vsub.f32 %v36400_v40, %v44655_v27  ;;  %v44681_v9 = vand.u32 4294901760, %v36398_v24 }
 0x9a1   :  { %39963 = vmatpush3.msra.mxu1 %v44441_v20  ;;  %39953 = vmatprep.subr.mxu0 %v44488_v25  ;;  %v36397_v20 = vld [vmem:[%s47265_s2 + $0x220] sm:$0xff] }
 0x9a2   :  { %39964 = vmatprep.subr.mxu1 %v44450_v54  ;;  %39954 = vmatpush3.msra.mxu0 %v44488_v25  ;;  %v44690_v37 = vand.u32 4294901760, %v36397_v20  ;;  %v44695_v42 = vand.u32 4294901760, %v44674_v59  ;;  %v44700_v50 = vsub.f32 %v36398_v24, %v44681_v9 }
 0x9a3   :  { %39955 = vmatprep.mubr.f32.mxu0 %v47336_v26  ;;  %39965 = vmatpush3.msra.mxu1 %v44450_v54  ;;  %v44688_v54 = vsub.f32 %v36399_v45, %v44669_v62 }
 0x9a4   :  { %39956 = vmatmul.mubr.f32.vlgmr.msra.gmra.mxu0 %v47338_v56  ;;  %39966 = vmatprep.mubr.f32.mxu1 %v47336_v26  ;;  %v19852_v26 = vand.u32 4294901760, %v19851_v38  ;;  %v44710_v43 = vsub.f32 %v36397_v20, %v44690_v37  ;;  %v20367_v39 = vsub.f32 %v44674_v59, %v44695_v42  ;;  %v44719_v49 = vand.u32 4294901760, %v44700_v50  ;;  %v36407_v20 = vld [vmem:[%s47265_s2 + $0x270] sm:$0xff] }
 0x9a5   :  { %39969 = vmatprep.subr.mxu0 %v44519_v23  ;;  %39980 = vmatprep.subr.mxu1 %v19831_v33  ;;  %v44707_v2 = vand.u32 4294901760, %v44688_v54 }
 0x9a6   :  { %39967 = vmatmul.mubr.f32.vlgmr.msra.gmra.mxu1 %v47338_v56  ;;  %39970 = vmatpush3.msra.mxu0 %v44519_v23  ;;  %v44643_v56 = vand.u32 4294901760, %v19795_v22  ;;  %v44728_v47 = vand.u32 4294901760, %v44710_v43  ;;  %v20368_v18 = vand.u32 4294901760, %v20367_v39  ;;  %v20381_v17 = vsub.f32 %v44700_v50, %v44719_v49  ;;  %v36405_v39 = vld [vmem:[%s47265_s2 + $0x260] sm:$0xff] }
 0x9a7   :  { %39981 = vmatpush3.msra.mxu1 %v19831_v33  ;;  %39971 = vmatprep.subr.mxu0 %v44536_v3  ;;  %v20374_v25 = vsub.f32 %v44688_v54, %v44707_v2 }
 0x9a8   :  { %39982 = vmatprep.subr.mxu1 %v19838_v6  ;;  %39972 = vmatpush3.msra.mxu0 %v44536_v3  ;;  %v20388_v16 = vsub.f32 %v44710_v43, %v44728_v47  ;;  %v20382_v52 = vand.u32 4294901760, %v20381_v17 }
 0x9a9   :  { %39983 = vmatpush3.msra.mxu1 %v19838_v6  ;;  %39973 = vmatprep.subr.mxu0 %v44551_v34  ;;  %v20375_v36 = vand.u32 4294901760, %v20374_v25 }
 0x9aa   :  { %39984 = vmatprep.subr.mxu1 %v19845_v14  ;;  %39974 = vmatpush3.msra.mxu0 %v44551_v34  ;;  %v20389_v58 = vand.u32 4294901760, %v20388_v16  ;;  %v44900_v16 = vand.u32 4294901760, %v36405_v39 }
 0x9ab   :  { %39985 = vmatpush3.msra.mxu1 %v19845_v14  ;;  %39975 = vmatprep.subr.mxu0 %v44562_v12 }
 0x9ac   :  { %39986 = vmatprep.subr.mxu1 %v19852_v26  ;;  %39976 = vmatpush3.msra.mxu0 %v44562_v12 }
 0x9ad   :  { %39977 = vmatprep.mubr.f32.mxu0 %v44640_v19  ;;  %39987 = vmatpush3.msra.mxu1 %v19852_v26 }
 0x9ae   :  { %39978 = vmatmul.mubr.f32.vlgmr.msra.gmra.mxu0 %v44643_v56  ;;  %39988 = vmatprep.mubr.f32.mxu1 %v44569_v53 }
 0x9af   :  { %39991 = vmatprep.subr.mxu0 %v44544_v29  ;;  %40002 = vmatprep.subr.mxu1 %v44519_v23 }
 0x9b0   :  { %39989 = vmatmul.mubr.f32.vlgmr.msra.gmra.mxu1 %v44576_v7  ;;  %39992 = vmatpush3.msra.mxu0 %v44544_v29  ;;  %v44782_v29 = vand.u32 4294901760, %v36402_v13 }
 0x9b1   :  { %40003 = vmatpush3.msra.mxu1 %v44519_v23  ;;  %39993 = vmatprep.subr.mxu0 %v44560_v60 }
 0x9b2   :  { %40004 = vmatprep.subr.mxu1 %v44536_v3  ;;  %39994 = vmatpush3.msra.mxu0 %v44560_v60  ;;  %v44804_v60 = vsub.f32 %v36402_v13, %v44782_v29 }
 0x9b3   :  { %40005 = vmatpush3.msra.mxu1 %v44536_v3  ;;  %39995 = vmatprep.subr.mxu0 %v44574_v30 }
 0x9b4   :  { %40006 = vmatprep.subr.mxu1 %v44551_v34  ;;  %39996 = vmatpush3.msra.mxu0 %v44574_v30 }
 0x9b5   :  { %40007 = vmatpush3.msra.mxu1 %v44551_v34  ;;  %39997 = vmatprep.subr.mxu0 %v44586_v4 }
 0x9b6   :  { %40008 = vmatprep.subr.mxu1 %v44562_v12  ;;  %39998 = vmatpush3.msra.mxu0 %v44586_v4 }
 0x9b7   :  { %39999 = vmatprep.mubr.f32.mxu0 %v44593_v5  ;;  %40009 = vmatpush3.msra.mxu1 %v44562_v12 }
 0x9b8   :  { %40000 = vmatmul.mubr.f32.vlgmr.msra.gmra.mxu0 %v44601_v51  ;;  %40010 = vmatprep.mubr.f32.mxu1 %v44615_v28 }
 0x9b9   :  { %40013 = vmatprep.subr.mxu0 %v44567_v32  ;;  %40024 = vmatprep.subr.mxu1 %v44519_v23 }
 0x9ba   :  { %40011 = vmatmul.mubr.f32.vlgmr.msra.gmra.mxu1 %v44622_v11  ;;  %40014 = vmatpush3.msra.mxu0 %v44567_v32  ;;  %v44816_v32 = vsub.f32 %v36401_v55, %v44796_v15  ;;  %v44932_v55 = vsub.f32 %v36405_v39, %v44900_v16 }
 0x9bb   :  { %40025 = vmatpush3.msra.mxu1 %v44519_v23  ;;  %40015 = vmatprep.subr.mxu0 %v44583_v31  ;;  %v36404_v23 = vld [vmem:[%s47265_s2 + $0x258] sm:$0xff] }
 0x9bc   :  { %40026 = vmatprep.subr.mxu1 %v44536_v3  ;;  %40016 = vmatpush3.msra.mxu0 %v44583_v31  ;;  %v44764_v48 = vand.u32 4294901760, %v36404_v23  ;;  %v44823_v31 = vand.u32 4294901760, %v44804_v60  ;;  %v44834_v57 = vand.u32 4294901760, %v44816_v32 }
 0x9bd   :  { %40027 = vmatpush3.msra.mxu1 %v44536_v3  ;;  %40017 = vmatprep.subr.mxu0 %v44598_v46  ;;  %v44773_v3 = vand.u32 4294901760, %v36403_v21 }
 0x9be   :  { %40028 = vmatprep.subr.mxu1 %v44551_v34  ;;  %40018 = vmatpush3.msra.mxu0 %v44598_v46  ;;  %v44780_v41 = vsub.f32 %v36404_v23, %v44764_v48  ;;  %v20918_v10 = vsub.f32 %v44804_v60, %v44823_v31  ;;  %v20925_v8 = vsub.f32 %v44816_v32, %v44834_v57  ;;  %v47344_v23 = vld [vmem:[#allocation17_spill] sm:$0xff] }
 0x9bf   :  { %40029 = vmatpush3.msra.mxu1 %v44551_v34  ;;  %40019 = vmatprep.subr.mxu0 %v44610_v44  ;;  %v44792_v34 = vsub.f32 %v36403_v21, %v44773_v3 }
 0x9c0   :  { %40030 = vmatprep.subr.mxu1 %v44562_v12  ;;  %40020 = vmatpush3.msra.mxu0 %v44610_v44  ;;  %v44801_v35 = vand.u32 4294901760, %v44780_v41  ;;  %v20919_v38 = vand.u32 4294901760, %v20918_v10  ;;  %v20926_v14 = vand.u32 4294901760, %v20925_v8 }
 0x9c1   :  { %40021 = vmatprep.mubr.f32.mxu0 %v44569_v53  ;;  %40031 = vmatpush3.msra.mxu1 %v44562_v12  ;;  %v44811_v12 = vand.u32 4294901760, %v44792_v34 }
 0x9c2   :  { %40022 = vmatmul.mubr.f32.vlgmr.msra.gmra.mxu0 %v44576_v7  ;;  %40032 = vmatprep.mubr.f32.mxu1 %v44569_v53  ;;  %v20904_v30 = vsub.f32 %v44780_v41, %v44801_v35 }
 0x9c3   :  { %40035 = vmatprep.subr.mxu0 %v44655_v27  ;;  %40046 = vmatprep.subr.mxu1 %v20368_v18  ;;  %v20911_v4 = vsub.f32 %v44792_v34, %v44811_v12 }
 0x9c4   :  { %40033 = vmatmul.mubr.f32.vlgmr.msra.gmra.mxu1 %v44576_v7  ;;  %40036 = vmatpush3.msra.mxu0 %v44655_v27  ;;  %v20905_v46 = vand.u32 4294901760, %v20904_v30 }
 0x9c5   :  { %40047 = vmatpush3.msra.mxu1 %v20368_v18  ;;  %40037 = vmatprep.subr.mxu0 %v44669_v62  ;;  %v20912_v33 = vand.u32 4294901760, %v20911_v4 }
 0x9c6   :  { %40048 = vmatprep.subr.mxu1 %v20375_v36  ;;  %40038 = vmatpush3.msra.mxu0 %v44669_v62 }
 0x9c7   :  { %40049 = vmatpush3.msra.mxu1 %v20375_v36  ;;  %40039 = vmatprep.subr.mxu0 %v44681_v9 }
 0x9c8   :  { %40050 = vmatprep.subr.mxu1 %v20382_v52  ;;  %40040 = vmatpush3.msra.mxu0 %v44681_v9 }
 0x9c9   :  { %40051 = vmatpush3.msra.mxu1 %v20382_v52  ;;  %40041 = vmatprep.subr.mxu0 %v44690_v37 }
 0x9ca   :  { %40052 = vmatprep.subr.mxu1 %v20389_v58  ;;  %40042 = vmatpush3.msra.mxu0 %v44690_v37 }
 0x9cb   :  { %40043 = vmatprep.mubr.f32.mxu0 %v44640_v19  ;;  %40053 = vmatpush3.msra.mxu1 %v20389_v58  ;;  %v44910_v58 = vld [vmem:[%s47267_s4 + $0x8] sm:$0xff] }
 0x9cc   :  { %40044 = vmatmul.mubr.f32.vlgmr.msra.gmra.mxu0 %v44643_v56  ;;  %40054 = vmatprep.mubr.f32.mxu1 %v44569_v53  ;;  %v44914_v21 = vrot.slane %v44910_v58, %v47344_v23 }
 0x9cd   :  { %40057 = vmatprep.subr.mxu0 %v44674_v59  ;;  %40068 = vmatprep.subr.mxu1 %v44655_v27 }
 0x9ce   :  { %40055 = vmatmul.mubr.f32.vlgmr.msra.gmra.mxu1 %v44576_v7  ;;  %40058 = vmatpush3.msra.mxu0 %v44674_v59 }
 0x9cf   :  { %40069 = vmatpush3.msra.mxu1 %v44655_v27  ;;  %40059 = vmatprep.subr.mxu0 %v44688_v54 }
 0x9d0   :  { %40070 = vmatprep.subr.mxu1 %v44669_v62  ;;  %40060 = vmatpush3.msra.mxu0 %v44688_v54 }
 0x9d1   :  { %40071 = vmatpush3.msra.mxu1 %v44669_v62  ;;  %40061 = vmatprep.subr.mxu0 %v44700_v50 }
 0x9d2   :  { %40072 = vmatprep.subr.mxu1 %v44681_v9  ;;  %40062 = vmatpush3.msra.mxu0 %v44700_v50 }
 0x9d3   :  { %40073 = vmatpush3.msra.mxu1 %v44681_v9  ;;  %40063 = vmatprep.subr.mxu0 %v44710_v43 }
 0x9d4   :  { %40074 = vmatprep.subr.mxu1 %v44690_v37  ;;  %40064 = vmatpush3.msra.mxu0 %v44710_v43 }
 0x9d5   :  { %40065 = vmatprep.mubr.f32.mxu0 %v44593_v5  ;;  %40075 = vmatpush3.msra.mxu1 %v44690_v37 }
 0x9d6   :  { %40066 = vmatmul.mubr.f32.vlgmr.msra.gmra.mxu0 %v44601_v51  ;;  %40076 = vmatprep.mubr.f32.mxu1 %v44615_v28 }
 0x9d7   :  { %40079 = vmatprep.subr.mxu0 %v44695_v42  ;;  %40090 = vmatprep.subr.mxu1 %v44655_v27 }
 0x9d8   :  { %40077 = vmatmul.mubr.f32.vlgmr.msra.gmra.mxu1 %v44622_v11  ;;  %40080 = vmatpush3.msra.mxu0 %v44695_v42  ;;  %v36406_v42 = vld [vmem:[%s47265_s2 + $0x268] sm:$0xff] }
 0x9d9   :  { %40091 = vmatpush3.msra.mxu1 %v44655_v27  ;;  %40081 = vmatprep.subr.mxu0 %v44707_v2 }
 0x9da   :  { %40092 = vmatprep.subr.mxu1 %v44669_v62  ;;  %40082 = vmatpush3.msra.mxu0 %v44707_v2  ;;  %v44879_v2 = vand.u32 4294901760, %v36407_v20 }
 0x9db   :  { %40093 = vmatpush3.msra.mxu1 %v44669_v62  ;;  %40083 = vmatprep.subr.mxu0 %v44719_v49  ;;  %v36408_v62 = vld [vmem:[%s47265_s2 + $0x278] sm:$0xff] }
 0x9dc   :  { %40094 = vmatprep.subr.mxu1 %v44681_v9  ;;  %40084 = vmatpush3.msra.mxu0 %v44719_v49  ;;  %v44870_v54 = vand.u32 4294901760, %v36408_v62  ;;  %v44898_v36 = vsub.f32 %v36407_v20, %v44879_v2 }
 0x9dd   :  { %40095 = vmatpush3.msra.mxu1 %v44681_v9  ;;  %40085 = vmatprep.subr.mxu0 %v44728_v47 }
 0x9de   :  { %40096 = vmatprep.subr.mxu1 %v44690_v37  ;;  %40086 = vmatpush3.msra.mxu0 %v44728_v47  ;;  %v44889_v25 = vsub.f32 %v36408_v62, %v44870_v54  ;;  %v44891_v47 = vand.u32 4294901760, %v36406_v42  ;;  %v36410_v62 = vld [vmem:[%s47265_s2 + $0x288] sm:$0xff] }
 0x9df   :  { %40087 = vmatprep.mubr.f32.mxu0 %v44569_v53  ;;  %40097 = vmatpush3.msra.mxu1 %v44690_v37  ;;  %v17188_v44 = vpop.f32.mrf.mxu1 }
 0x9e0   :  { %40098 = vmatprep.mubr.f32.mxu1 %v44569_v53  ;;  %40088 = vmatmul.mubr.f32.vlgmr.msra.gmra.mxu0 %v44576_v7  ;;  %v44919_v13 = vand.u32 4294901760, %v44889_v25 }
 0x9e1   :  { %40099 = vmatmul.mubr.f32.vlgmr.msra.gmra.mxu1 %v44576_v7  ;;  %40101 = vmatprep.subr.mxu0 %v44764_v48  ;;  %v39676_v6 = vpop.f32.mrf.mxu1 }
 0x9e2   :  { %40102 = vmatpush3.msra.mxu0 %v44764_v48  ;;  %40112 = vmatprep.subr.mxu1 %v20905_v46 }
 0x9e3   :  { %40103 = vmatprep.subr.mxu0 %v44773_v3  ;;  %40113 = vmatpush3.msra.mxu1 %v20905_v46  ;;  %v17339_v1 = vpop.f32.mrf.mxu1 }
 0x9e4   :  { %40104 = vmatpush3.msra.mxu0 %v44773_v3  ;;  %40114 = vmatprep.subr.mxu1 %v20912_v33 }
 0x9e5   :  { %40105 = vmatprep.subr.mxu0 %v44782_v29  ;;  %40115 = vmatpush3.msra.mxu1 %v20912_v33  ;;  %v39690_v22 = vpop.f32.mrf.mxu1 }
 0x9e6   :  { %40106 = vmatpush3.msra.mxu0 %v44782_v29  ;;  %40116 = vmatprep.subr.mxu1 %v20919_v38 }
 0x9e7   :  { %40107 = vmatprep.subr.mxu0 %v44796_v15  ;;  %40117 = vmatpush3.msra.mxu1 %v20919_v38  ;;  %v17107_v26 = vpop.f32.mrf.mxu0  ;;  %v17489_v40 = vpop.f32.mrf.mxu1 }
 0x9e8   :  { %40108 = vmatpush3.msra.mxu0 %v44796_v15  ;;  %40109 = vmatprep.mubr.f32.mxu0 %v44640_v19  ;;  %v17189_v27 = vadd.f32 %v17188_v44, %v17107_v26 }
 0x9e9   :  { %40118 = vmatprep.subr.mxu1 %v20926_v14  ;;  %40123 = vmatprep.subr.mxu0 %v44780_v41  ;;  %v39669_v45 = vpop.f32.mrf.mxu0  ;;  %v39704_v24 = vpop.f32.mrf.mxu1 }
 0x9ea   :  { %40110 = vmatmul.mubr.f32.vlgmr.msra.gmra.mxu0 %v44643_v56  ;;  %40119 = vmatpush3.msra.mxu1 %v20926_v14 }
 0x9eb   :  { %40124 = vmatpush3.msra.mxu0 %v44780_v41  ;;  %40120 = vmatprep.mubr.f32.mxu1 %v44569_v53  ;;  %v17264_v59 = vpop.f32.mrf.mxu0  ;;  %v44922_v41 = vsub.f32 %v36406_v42, %v44891_v47  ;;  %v36409_v42 = vld [vmem:[%s47265_s2 + $0x280] sm:$0xff] }
 0x9ec   :  { %40125 = vmatprep.subr.mxu0 %v44792_v34  ;;  %40134 = vmatprep.subr.mxu1 %v44764_v48  ;;  %v17265_v9 = vadd.f32 %v17264_v59, %v17189_v27  ;;  %v36411_v27 = vld [vmem:[%s47265_s2 + $0x290] sm:$0xff] }
 0x9ed   :  { %40121 = vmatmul.mubr.f32.vlgmr.msra.gmra.mxu1 %v44576_v7  ;;  %40126 = vmatpush3.msra.mxu0 %v44792_v34  ;;  %v39683_v37 = vpop.f32.mrf.mxu0  ;;  %v45006_v20 = vand.u32 4294901760, %v36411_v27 }
 0x9ee   :  { %40135 = vmatpush3.msra.mxu1 %v44764_v48  ;;  %40127 = vmatprep.subr.mxu0 %v44804_v60  ;;  %v17340_v50 = vadd.f32 %v17339_v1, %v17265_v9  ;;  %v36412_v1 = vld [vmem:[%s47265_s2 + $0x298] sm:$0xff]  ;;  %v45015_v37 = vand.u32 4294901760, %v36410_v62 }
 0x9ef   :  { %40136 = vmatprep.subr.mxu1 %v44773_v3  ;;  %40128 = vmatpush3.msra.mxu0 %v44804_v60  ;;  %v17416_v43 = vpop.f32.mrf.mxu0  ;;  %v21441_v60 = vsub.f32 %v44889_v25, %v44919_v13  ;;  %v45029_v39 = vsub.f32 %v36411_v27, %v45006_v20 }
 0x9f0   :  { %40137 = vmatpush3.msra.mxu1 %v44773_v3  ;;  %40129 = vmatprep.subr.mxu0 %v44816_v32  ;;  %v17417_v49 = vadd.f32 %v17416_v43, %v17340_v50  ;;  %v47345_v50 = vld [vmem:[#allocation19_spill] sm:$0xff] }
 0x9f1   :  { %40138 = vmatprep.subr.mxu1 %v44782_v29  ;;  %40130 = vmatpush3.msra.mxu0 %v44816_v32  ;;  %v39697_v18 = vpop.f32.mrf.mxu0  ;;  %v45026_v43 = vrot.slane %v44910_v58, %v47345_v50 }
 0x9f2   :  { %40139 = vmatpush3.msra.mxu1 %v44782_v29  ;;  %40131 = vmatprep.mubr.f32.mxu0 %v44593_v5  ;;  %v17490_v17 = vadd.f32 %v17489_v40, %v17417_v49  ;;  %v44990_v40 = vand.u32 4294901760, %v36412_v1 }
 0x9f3   :  { %40140 = vmatprep.subr.mxu1 %v44796_v15  ;;  %40145 = vmatprep.subr.mxu0 %v44801_v35 }
 0x9f4   :  { %40132 = vmatmul.mubr.f32.vlgmr.msra.gmra.mxu0 %v44601_v51  ;;  %40141 = vmatpush3.msra.mxu1 %v44796_v15  ;;  %v44905_v52 = vadd.f32 %v17490_v17, %v44114_v61  ;;  %v44929_v61 = vand.u32 4294901760, %v44898_v36  ;;  %v45011_v9 = vsub.f32 %v36412_v1, %v44990_v40  ;;  %v45043_v17 = vsub.f32 %v36410_v62, %v45015_v37  ;;  %v36414_v62 = vld [vmem:[%s47265_s2 + $0x2a8] sm:$0xff] }
 0x9f5   :  { %40146 = vmatpush3.msra.mxu0 %v44801_v35  ;;  %40142 = vmatprep.mubr.f32.mxu1 %v44615_v28 }
 0x9f6   :  { %47343 = vst [vmem:[#allocation11_spill] sm:$0xff] %v44905_v52  ;;  %40147 = vmatprep.subr.mxu0 %v44811_v12  ;;  %40156 = vmatprep.subr.mxu1 %v44764_v48  ;;  %v21448_v30 = vsub.f32 %v44898_v36, %v44929_v61  ;;  %v45038_v18 = vand.u32 4294901760, %v45011_v9 }
 0x9f7   :  { %40143 = vmatmul.mubr.f32.vlgmr.msra.gmra.mxu1 %v44622_v11  ;;  %40148 = vmatpush3.msra.mxu0 %v44811_v12  ;;  %v39715_v34 = vpop.f32.mrf.mxu0  ;;  %v44942_v12 = vand.u32 4294901760, %v44922_v41 }
 0x9f8   :  { %40157 = vmatpush3.msra.mxu1 %v44764_v48  ;;  %40149 = vmatprep.subr.mxu0 %v44823_v31  ;;  %v17645_v35 = vadd.f32 %v39715_v34, %v44914_v21  ;;  %v39726_v32 = vpop.f32.mrf.mxu1  ;;  %v21449_v46 = vand.u32 4294901760, %v21448_v30 }
 0x9f9   :  { %40158 = vmatprep.subr.mxu1 %v44773_v3  ;;  %40150 = vmatpush3.msra.mxu0 %v44823_v31  ;;  %v44951_v31 = vand.u32 4294901760, %v44932_v55  ;;  %v21455_v4 = vsub.f32 %v44922_v41, %v44942_v12 }
 0x9fa   :  { %40159 = vmatpush3.msra.mxu1 %v44773_v3  ;;  %40151 = vmatprep.subr.mxu0 %v44834_v57  ;;  %v17742_v48 = vadd.f32 %v39726_v32, %v17645_v35  ;;  %v21442_v3 = vand.u32 4294901760, %v21441_v60  ;;  %v44969_v10 = vpop.f32.mrf.mxu1  ;;  %v21978_v35 = vsub.f32 %v45011_v9, %v45038_v18  ;;  %v45065_v32 = vand.u32 4294901760, %v45043_v17 }
 0x9fb   :  { %40160 = vmatprep.subr.mxu1 %v44782_v29  ;;  %40152 = vmatpush3.msra.mxu0 %v44834_v57  ;;  %v44961_v57 = vpop.f32.mrf.mxu0 }
 0x9fc   :  { %40153 = vmatprep.mubr.f32.mxu0 %v44569_v53  ;;  %40161 = vmatpush3.msra.mxu1 %v44782_v29  ;;  %v21462_v29 = vsub.f32 %v44932_v55, %v44951_v31 }
 0x9fd   :  { %40154 = vmatmul.mubr.f32.vlgmr.msra.gmra.mxu0 %v44576_v7  ;;  %40162 = vmatprep.subr.mxu1 %v44796_v15 }
 0x9fe   :  { %40167 = vmatprep.subr.mxu0 %v44870_v54  ;;  %40163 = vmatpush3.msra.mxu1 %v44796_v15  ;;  %v21456_v15 = vand.u32 4294901760, %v21455_v4  ;;  %v21463_v6 = vand.u32 4294901760, %v21462_v29 }
 0x9ff   :  { %40164 = vmatprep.mubr.f32.mxu1 %v44569_v53  ;;  %40168 = vmatpush3.msra.mxu0 %v44870_v54 }
 0xa00   :  { %40165 = vmatmul.mubr.f32.vlgmr.msra.gmra.mxu1 %v44576_v7  ;;  %40169 = vmatprep.subr.mxu0 %v44879_v2  ;;  %v39737_v44 = vpop.f32.mrf.mxu0 }
 0xa01   :  { %40178 = vmatprep.subr.mxu1 %v21442_v3  ;;  %40170 = vmatpush3.msra.mxu0 %v44879_v2  ;;  %v17829_v33 = vadd.f32 %v39737_v44, %v17742_v48 }
 0xa02   :  { %40179 = vmatpush3.msra.mxu1 %v21442_v3  ;;  %40171 = vmatprep.subr.mxu0 %v44891_v47  ;;  %v39748_v8 = vpop.f32.mrf.mxu1  ;;  %v44982_v14 = vpop.f32.mrf.mxu0 }
 0xa03   :  { %40180 = vmatprep.subr.mxu1 %v21449_v46  ;;  %40172 = vmatpush3.msra.mxu0 %v44891_v47  ;;  %v17914_v38 = vadd.f32 %v39748_v8, %v17829_v33 }
 0xa04   :  { %40181 = vmatpush3.msra.mxu1 %v21449_v46  ;;  %40173 = vmatprep.subr.mxu0 %v44900_v16  ;;  %v44988_v22 = vpop.f32.mrf.mxu1 }
 0xa05   :  { %40182 = vmatprep.subr.mxu1 %v21456_v15  ;;  %40174 = vmatpush3.msra.mxu0 %v44900_v16 }
 0xa06   :  { %40183 = vmatpush3.msra.mxu1 %v21456_v15  ;;  %40175 = vmatprep.mubr.f32.mxu0 %v44640_v19 }
 0xa07   :  { %40184 = vmatprep.subr.mxu1 %v21463_v6  ;;  %40189 = vmatprep.subr.mxu0 %v44889_v25 }
 0xa08   :  { %40176 = vmatmul.mubr.f32.vlgmr.msra.gmra.mxu0 %v44643_v56  ;;  %40185 = vmatpush3.msra.mxu1 %v21463_v6 }
 0xa09   :  { %40190 = vmatpush3.msra.mxu0 %v44889_v25  ;;  %40186 = vmatprep.mubr.f32.mxu1 %v44569_v53  ;;  %v45035_v25 = vand.u32 4294901760, %v36409_v42 }
 0xa0a   :  { %40191 = vmatprep.subr.mxu0 %v44898_v36  ;;  %40200 = vmatprep.subr.mxu1 %v44870_v54  ;;  %v39759_v26 = vpop.f32.mrf.mxu0 }
 0xa0b   :  { %40187 = vmatmul.mubr.f32.vlgmr.msra.gmra.mxu1 %v44576_v7  ;;  %40192 = vmatpush3.msra.mxu0 %v44898_v36  ;;  %v18003_v45 = vadd.f32 %v39759_v26, %v17914_v38  ;;  %v45060_v60 = vsub.f32 %v36409_v42, %v45035_v25  ;;  %v36416_v38 = vld [vmem:[%s47265_s2 + $0x2b8] sm:$0xff]  ;;  %v47346_v42 = vld [vmem:[#allocation20_spill] sm:$0xff] }
 0xa0c   :  { %40201 = vmatpush3.msra.mxu1 %v44870_v54  ;;  %40193 = vmatprep.subr.mxu0 %v44922_v41  ;;  %v39770_v24 = vpop.f32.mrf.mxu1  ;;  %v45033_v49 = vpop.f32.mrf.mxu0 }
 0xa0d   :  { %40202 = vmatprep.subr.mxu1 %v44879_v2  ;;  %40194 = vmatpush3.msra.mxu0 %v44922_v41  ;;  %v45004_v59 = vadd.f32 %v39770_v24, %v18003_v45  ;;  %v45076_v48 = vand.u32 4294901760, %v45060_v60  ;;  %v45121_v45 = vand.u32 4294901760, %v36416_v38  ;;  %v36415_v24 = vld [vmem:[%s47265_s2 + $0x2b0] sm:$0xff] }
 0xa0e   :  { %40203 = vmatpush3.msra.mxu1 %v44879_v2  ;;  %40195 = vmatprep.subr.mxu0 %v44932_v55  ;;  %v45047_v36 = vpop.f32.mrf.mxu1 }
 0xa0f   :  { %40204 = vmatprep.subr.mxu1 %v44891_v47  ;;  %40196 = vmatpush3.msra.mxu0 %v44932_v55  ;;  %v21999_v4 = vsub.f32 %v45060_v60, %v45076_v48 }
 0xa10   :  { %40205 = vmatpush3.msra.mxu1 %v44891_v47  ;;  %40197 = vmatprep.mubr.f32.mxu0 %v44593_v5 }
 0xa11   :  { %40206 = vmatprep.subr.mxu1 %v44900_v16  ;;  %40211 = vmatprep.subr.mxu0 %v44919_v13  ;;  %v22000_v15 = vand.u32 4294901760, %v21999_v4 }
 0xa12   :  { %40198 = vmatmul.mubr.f32.vlgmr.msra.gmra.mxu0 %v44601_v51  ;;  %40207 = vmatpush3.msra.mxu1 %v44900_v16 }
 0xa13   :  { %40212 = vmatpush3.msra.mxu0 %v44919_v13  ;;  %40208 = vmatprep.mubr.f32.mxu1 %v44615_v28  ;;  %v45053_v13 = vand.u32 4294901760, %v45029_v39 }
 0xa14   :  { %40213 = vmatprep.subr.mxu0 %v44929_v61  ;;  %40222 = vmatprep.subr.mxu1 %v44870_v54  ;;  %v39781_v41 = vpop.f32.mrf.mxu0 }
 0xa15   :  { %40209 = vmatmul.mubr.f32.vlgmr.msra.gmra.mxu1 %v44622_v11  ;;  %40214 = vmatpush3.msra.mxu0 %v44929_v61  ;;  %v18182_v55 = vadd.f32 %v39781_v41, %v45026_v43  ;;  %v45147_v41 = vsub.f32 %v36416_v38, %v45121_v45 }
 0xa16   :  { %40223 = vmatpush3.msra.mxu1 %v44870_v54  ;;  %40215 = vmatprep.subr.mxu0 %v44942_v12  ;;  %v39792_v34 = vpop.f32.mrf.mxu1  ;;  %v21985_v54 = vsub.f32 %v45029_v39, %v45053_v13  ;;  %v45084_v30 = vpop.f32.mrf.mxu0 }
 0xa17   :  { %40224 = vmatprep.subr.mxu1 %v44879_v2  ;;  %40216 = vmatpush3.msra.mxu0 %v44942_v12  ;;  %v18279_v61 = vadd.f32 %v39792_v34, %v18182_v55  ;;  %v21979_v12 = vand.u32 4294901760, %v21978_v35 }
 0xa18   :  { %40225 = vmatpush3.msra.mxu1 %v44879_v2  ;;  %40217 = vmatprep.subr.mxu0 %v44951_v31  ;;  %v21992_v2 = vsub.f32 %v45043_v17, %v45065_v32 }
 0xa19   :  { %40226 = vmatprep.subr.mxu1 %v44891_v47  ;;  %40218 = vmatpush3.msra.mxu0 %v44951_v31  ;;  %v45089_v31 = vpop.f32.mrf.mxu1 }
 0xa1a   :  { %40219 = vmatprep.mubr.f32.mxu0 %v44569_v53  ;;  %40227 = vmatpush3.msra.mxu1 %v44891_v47  ;;  %v21986_v47 = vand.u32 4294901760, %v21985_v54  ;;  %v21993_v46 = vand.u32 4294901760, %v21992_v2  ;;  %v45168_v54 = vand.u32 4294901760, %v45147_v41 }
 0xa1b   :  { %40220 = vmatmul.mubr.f32.vlgmr.msra.gmra.mxu0 %v44576_v7  ;;  %40228 = vmatprep.subr.mxu1 %v44900_v16 }
 0xa1c   :  { %40229 = vmatpush3.msra.mxu1 %v44900_v16  ;;  %40230 = vmatprep.mubr.f32.mxu1 %v44569_v53 }
 0xa1d   :  { %40231 = vmatmul.mubr.f32.vlgmr.msra.gmra.mxu1 %v44576_v7  ;;  %40233 = vmatprep.subr.mxu0 %v44990_v40 }
 0xa1e   :  { %40234 = vmatpush3.msra.mxu0 %v44990_v40  ;;  %v39803_v3 = vpop.f32.mrf.mxu0  ;;  %40244 = vmatprep.subr.mxu1 %v21979_v12 }
 0xa1f   :  { %40235 = vmatprep.subr.mxu0 %v45006_v20  ;;  %v18366_v16 = vadd.f32 %v39803_v3, %v18279_v61  ;;  %40241 = vmatprep.mubr.f32.mxu0 %v44640_v19 }
 0xa20   :  { %40236 = vmatpush3.msra.mxu0 %v45006_v20  ;;  %v39814_v29 = vpop.f32.mrf.mxu1  ;;  %40245 = vmatpush3.msra.mxu1 %v21979_v12  ;;  %v45102_v33 = vpop.f32.mrf.mxu0 }
 0xa21   :  { %40237 = vmatprep.subr.mxu0 %v45015_v37  ;;  %v18451_v44 = vadd.f32 %v39814_v29, %v18366_v16  ;;  %40246 = vmatprep.subr.mxu1 %v21986_v47 }
 0xa22   :  { %40238 = vmatpush3.msra.mxu0 %v45015_v37  ;;  %40247 = vmatpush3.msra.mxu1 %v21986_v47  ;;  %v45106_v8 = vpop.f32.mrf.mxu1 }
 0xa23   :  { %40239 = vmatprep.subr.mxu0 %v45035_v25  ;;  %40248 = vmatprep.subr.mxu1 %v21993_v46 }
 0xa24   :  { %40240 = vmatpush3.msra.mxu0 %v45035_v25  ;;  %40249 = vmatpush3.msra.mxu1 %v21993_v46 }
 0xa25   :  { %40255 = vmatprep.subr.mxu0 %v45011_v9  ;;  %40242 = vmatmul.mubr.f32.vlgmr.msra.gmra.mxu0 %v44643_v56 }
 0xa26   :  { %40256 = vmatpush3.msra.mxu0 %v45011_v9  ;;  %40250 = vmatprep.subr.mxu1 %v22000_v15  ;;  %v45135_v9 = vand.u32 4294901760, %v36415_v24 }
 0xa27   :  { %40257 = vmatprep.subr.mxu0 %v45029_v39  ;;  %40251 = vmatpush3.msra.mxu1 %v22000_v15 }
 0xa28   :  { %40258 = vmatpush3.msra.mxu0 %v45029_v39  ;;  %v39825_v6 = vpop.f32.mrf.mxu0  ;;  %40252 = vmatprep.mubr.f32.mxu1 %v44569_v53  ;;  %v45141_v39 = vrot.slane %v44910_v58, %v47346_v42  ;;  %v22520_v61 = vsub.f32 %v36415_v24, %v45135_v9 }
 0xa29   :  { %40259 = vmatprep.subr.mxu0 %v45043_v17  ;;  %v18540_v1 = vadd.f32 %v39825_v6, %v18451_v44  ;;  %40266 = vmatprep.subr.mxu1 %v44990_v40 }
 0xa2a   :  { %40260 = vmatpush3.msra.mxu0 %v45043_v17  ;;  %v39836_v26 = vpop.f32.mrf.mxu1  ;;  %40253 = vmatmul.mubr.f32.vlgmr.msra.gmra.mxu1 %v44576_v7  ;;  %v36413_v17 = vld [vmem:[%s47265_s2 + $0x2a0] sm:$0xff]  ;;  %v45149_v55 = vpop.f32.mrf.mxu0  ;;  %v45177_v47 = vand.u32 4294901760, %v22520_v61 }
 0xa2b   :  { %40261 = vmatprep.subr.mxu0 %v45060_v60  ;;  %v45118_v27 = vadd.f32 %v39836_v26, %v18540_v1  ;;  %40263 = vmatprep.mubr.f32.mxu0 %v44593_v5 }
 0xa2c   :  { %40262 = vmatpush3.msra.mxu0 %v45060_v60  ;;  %40267 = vmatpush3.msra.mxu1 %v44990_v40  ;;  %v45157_v34 = vpop.f32.mrf.mxu1  ;;  %v45161_v60 = vand.u32 4294901760, %v36413_v17  ;;  %v22522_v16 = vsub.f32 %v22520_v61, %v45177_v47 }
 0xa2d   :  { %40277 = vmatprep.subr.mxu0 %v45038_v18  ;;  %40264 = vmatmul.mubr.f32.vlgmr.msra.gmra.mxu0 %v44601_v51 }
 0xa2e   :  { %40268 = vmatprep.subr.mxu1 %v45006_v20  ;;  %40278 = vmatpush3.msra.mxu0 %v45038_v18  ;;  %v45153_v18 = vand.u32 4294901760, %v36414_v62  ;;  %v22534_v3 = vsub.f32 %v36413_v17, %v45161_v60  ;;  %v22523_v38 = vand.u32 4294901760, %v22522_v16  ;;  %v47347_v16 = vld [vmem:[#allocation21_spill] sm:$0xff] }
 0xa2f   :  { %40269 = vmatpush3.msra.mxu1 %v45006_v20  ;;  %40279 = vmatprep.subr.mxu0 %v45053_v13 }
 0xa30   :  { %40270 = vmatprep.subr.mxu1 %v45015_v37  ;;  %40280 = vmatpush3.msra.mxu0 %v45053_v13  ;;  %v45195_v46 = vand.u32 4294901760, %v22534_v3 }
 0xa31   :  { %40271 = vmatpush3.msra.mxu1 %v45015_v37  ;;  %40281 = vmatprep.subr.mxu0 %v45065_v32 }
 0xa32   :  { %40272 = vmatprep.subr.mxu1 %v45035_v25  ;;  %40282 = vmatpush3.msra.mxu0 %v45065_v32  ;;  %v39847_v35 = vpop.f32.mrf.mxu0  ;;  %v22527_v32 = vsub.f32 %v36414_v62, %v45153_v18  ;;  %v22536_v1 = vsub.f32 %v22534_v3, %v45195_v46 }
 0xa33   :  { %40273 = vmatpush3.msra.mxu1 %v45035_v25  ;;  %40283 = vmatprep.subr.mxu0 %v45076_v48  ;;  %v18719_v13 = vadd.f32 %v39847_v35, %v45141_v39 }
 0xa34   :  { %40274 = vmatprep.mubr.f32.mxu1 %v44615_v28  ;;  %40284 = vmatpush3.msra.mxu0 %v45076_v48  ;;  %v39858_v12 = vpop.f32.mrf.mxu1  ;;  %v22515_v48 = vsub.f32 %v45147_v41, %v45168_v54  ;;  %v45186_v4 = vand.u32 4294901760, %v22527_v32 }
 0xa35   :  { %40288 = vmatprep.subr.mxu1 %v44990_v40  ;;  %v18816_v2 = vadd.f32 %v39858_v12, %v18719_v13  ;;  %40275 = vmatmul.mubr.f32.vlgmr.msra.gmra.mxu1 %v44622_v11  ;;  %v36420_v13 = vld [vmem:[%s47265_s2 + $0x2d8] sm:$0xff] }
 0xa36   :  { %40285 = vmatprep.mubr.f32.mxu0 %v44569_v53  ;;  %40289 = vmatpush3.msra.mxu1 %v44990_v40  ;;  %v45190_v40 = vpop.f32.mrf.mxu0  ;;  %v22516_v29 = vand.u32 4294901760, %v22515_v48  ;;  %v45199_v44 = vpop.f32.mrf.mxu1  ;;  %v22529_v15 = vsub.f32 %v22527_v32, %v45186_v4 }
 0xa37   :  { %40299 = vmatprep.subr.mxu0 %v45121_v45  ;;  %40286 = vmatmul.mubr.f32.vlgmr.msra.gmra.mxu0 %v44576_v7 }
 0xa38   :  { %40290 = vmatprep.subr.mxu1 %v45006_v20  ;;  %40300 = vmatpush3.msra.mxu0 %v45121_v45  ;;  %v22530_v24 = vand.u32 4294901760, %v22529_v15 }
 0xa39   :  { %40291 = vmatpush3.msra.mxu1 %v45006_v20  ;;  %40301 = vmatprep.subr.mxu0 %v45135_v9 }
 0xa3a   :  { %40292 = vmatprep.subr.mxu1 %v45015_v37  ;;  %40302 = vmatpush3.msra.mxu0 %v45135_v9 }
 0xa3b   :  { %40293 = vmatpush3.msra.mxu1 %v45015_v37  ;;  %40303 = vmatprep.subr.mxu0 %v45153_v18 }
 0xa3c   :  { %40294 = vmatprep.subr.mxu1 %v45035_v25  ;;  %40304 = vmatpush3.msra.mxu0 %v45153_v18  ;;  %v39869_v20 = vpop.f32.mrf.mxu0 }
 0xa3d   :  { %40295 = vmatpush3.msra.mxu1 %v45035_v25  ;;  %40296 = vmatprep.mubr.f32.mxu1 %v44569_v53  ;;  %v18903_v6 = vadd.f32 %v39869_v20, %v18816_v2  ;;  %v22537_v25 = vand.u32 4294901760, %v22536_v1  ;;  %v45226_v2 = vand.u32 4294901760, %v36420_v13  ;;  %v36417_v20 = vld [vmem:[%s47265_s2 + $0x2c0] sm:$0xff] }
 0xa3e   :  { %40305 = vmatprep.subr.mxu0 %v45161_v60  ;;  %40297 = vmatmul.mubr.f32.vlgmr.msra.gmra.mxu1 %v44576_v7  ;;  %v39880_v37 = vpop.f32.mrf.mxu1  ;;  %v45214_v62 = vpop.f32.mrf.mxu0 }
 0xa3f   :  { %40306 = vmatpush3.msra.mxu0 %v45161_v60  ;;  %40310 = vmatprep.subr.mxu1 %v22516_v29  ;;  %v18988_v26 = vadd.f32 %v39880_v37, %v18903_v6  ;;  %v45252_v15 = vsub.f32 %v36420_v13, %v45226_v2 }
 0xa40   :  { %40307 = vmatprep.mubr.f32.mxu0 %v44640_v19  ;;  %40311 = vmatpush3.msra.mxu1 %v22516_v29  ;;  %v45216_v17 = vpop.f32.mrf.mxu1  ;;  %v45246_v29 = vrot.slane %v44910_v58, %v47347_v16 }
 0xa41   :  { %40321 = vmatprep.subr.mxu0 %v45147_v41  ;;  %40308 = vmatmul.mubr.f32.vlgmr.msra.gmra.mxu0 %v44643_v56 }
 0xa42   :  { %40312 = vmatprep.subr.mxu1 %v22523_v38  ;;  %40322 = vmatpush3.msra.mxu0 %v45147_v41 }
 0xa43   :  { %40313 = vmatpush3.msra.mxu1 %v22523_v38  ;;  %40323 = vmatprep.subr.mxu0 %v22520_v61  ;;  %v45266_v38 = vand.u32 4294901760, %v36417_v20 }
 0xa44   :  { %40314 = vmatprep.subr.mxu1 %v22530_v24  ;;  %40324 = vmatpush3.msra.mxu0 %v22520_v61 }
 0xa45   :  { %40315 = vmatpush3.msra.mxu1 %v22530_v24  ;;  %40325 = vmatprep.subr.mxu0 %v22527_v32  ;;  %v23071_v13 = vsub.f32 %v36417_v20, %v45266_v38 }
 0xa46   :  { %40316 = vmatprep.subr.mxu1 %v22537_v25  ;;  %40326 = vmatpush3.msra.mxu0 %v22527_v32  ;;  %v39891_v35 = vpop.f32.mrf.mxu0  ;;  %v36419_v32 = vld [vmem:[%s47265_s2 + $0x2d0] sm:$0xff] }
 0xa47   :  { %40317 = vmatpush3.msra.mxu1 %v22537_v25  ;;  %40327 = vmatprep.subr.mxu0 %v22534_v3  ;;  %v19077_v41 = vadd.f32 %v39891_v35, %v18988_v26  ;;  %v45240_v48 = vand.u32 4294901760, %v36419_v32  ;;  %v45273_v26 = vand.u32 4294901760, %v45252_v15 }
 0xa48   :  { %40318 = vmatprep.mubr.f32.mxu1 %v44569_v53  ;;  %40328 = vmatpush3.msra.mxu0 %v22534_v3  ;;  %v39902_v12 = vpop.f32.mrf.mxu1  ;;  %v36418_v3 = vld [vmem:[%s47265_s2 + $0x2c8] sm:$0xff]  ;;  %v45254_v6 = vpop.f32.mrf.mxu0 }
 0xa49   :  { %40332 = vmatprep.subr.mxu1 %v45121_v45  ;;  %v45223_v61 = vadd.f32 %v39902_v12, %v19077_v41  ;;  %40319 = vmatmul.mubr.f32.vlgmr.msra.gmra.mxu1 %v44576_v7  ;;  %v23057_v1 = vsub.f32 %v36419_v32, %v45240_v48  ;;  %v45300_v32 = vand.u32 4294901760, %v23071_v13 }
 0xa4a   :  { %40329 = vmatprep.mubr.f32.mxu0 %v44593_v5  ;;  %40333 = vmatpush3.msra.mxu1 %v45121_v45  ;;  %v45262_v58 = vpop.f32.mrf.mxu1 }
 0xa4b   :  { %40343 = vmatprep.subr.mxu0 %v45168_v54  ;;  %40330 = vmatmul.mubr.f32.vlgmr.msra.gmra.mxu0 %v44601_v51  ;;  %v45282_v35 = vand.u32 4294901760, %v23057_v1 }
 0xa4c   :  { %40334 = vmatprep.subr.mxu1 %v45135_v9  ;;  %40344 = vmatpush3.msra.mxu0 %v45168_v54  ;;  %v45258_v54 = vand.u32 4294901760, %v36418_v3 }
 0xa4d   :  { %40335 = vmatpush3.msra.mxu1 %v45135_v9  ;;  %40345 = vmatprep.subr.mxu0 %v45177_v47  ;;  %v23059_v12 = vsub.f32 %v23057_v1, %v45282_v35 }
 0xa4e   :  { %40336 = vmatprep.subr.mxu1 %v45153_v18  ;;  %40346 = vmatpush3.msra.mxu0 %v45177_v47 }
 0xa4f   :  { %40337 = vmatpush3.msra.mxu1 %v45153_v18  ;;  %40347 = vmatprep.subr.mxu0 %v45186_v4 }
 0xa50   :  { %40338 = vmatprep.subr.mxu1 %v45161_v60  ;;  %40348 = vmatpush3.msra.mxu0 %v45186_v4  ;;  %v39913_v37 = vpop.f32.mrf.mxu0  ;;  %v23064_v4 = vsub.f32 %v36418_v3, %v45258_v54 }
 0xa51   :  { %40339 = vmatpush3.msra.mxu1 %v45161_v60  ;;  %40349 = vmatprep.subr.mxu0 %v45195_v46  ;;  %v19256_v47 = vadd.f32 %v39913_v37, %v45246_v29 }
 0xa52   :  { %40340 = vmatprep.mubr.f32.mxu1 %v44615_v28  ;;  %40350 = vmatpush3.msra.mxu0 %v45195_v46  ;;  %v39924_v24 = vpop.f32.mrf.mxu1  ;;  %v23052_v46 = vsub.f32 %v45252_v15, %v45273_v26  ;;  %v45291_v41 = vand.u32 4294901760, %v23064_v4 }
 0xa53   :  { %40354 = vmatprep.subr.mxu1 %v45121_v45  ;;  %v19353_v25 = vadd.f32 %v39924_v24, %v19256_v47  ;;  %40341 = vmatmul.mubr.f32.vlgmr.msra.gmra.mxu1 %v44622_v11  ;;  %v23060_v24 = vand.u32 4294901760, %v23059_v12 }
 0xa54   :  { %40351 = vmatprep.mubr.f32.mxu0 %v44569_v53  ;;  %40355 = vmatpush3.msra.mxu1 %v45121_v45  ;;  %v45295_v45 = vpop.f32.mrf.mxu0  ;;  %v23053_v3 = vand.u32 4294901760, %v23052_v46  ;;  %v45304_v20 = vpop.f32.mrf.mxu1  ;;  %v23066_v37 = vsub.f32 %v23064_v4, %v45291_v41  ;;  %v23073_v46 = vsub.f32 %v23071_v13, %v45300_v32 }
 0xa55   :  { %40365 = vmatprep.subr.mxu0 %v45226_v2  ;;  %40352 = vmatmul.mubr.f32.vlgmr.msra.gmra.mxu0 %v44576_v7 }
 0xa56   :  { %40356 = vmatprep.subr.mxu1 %v45135_v9  ;;  %40366 = vmatpush3.msra.mxu0 %v45226_v2  ;;  %v23067_v0 = vand.u32 4294901760, %v23066_v37 }
 0xa57   :  { %40357 = vmatpush3.msra.mxu1 %v45135_v9  ;;  %40367 = vmatprep.subr.mxu0 %v45240_v48 }
 0xa58   :  { %40358 = vmatprep.subr.mxu1 %v45153_v18  ;;  %40368 = vmatpush3.msra.mxu0 %v45240_v48 }
 0xa59   :  { %40359 = vmatpush3.msra.mxu1 %v45153_v18  ;;  %40369 = vmatprep.subr.mxu0 %v45258_v54 }
 0xa5a   :  { %40360 = vmatprep.subr.mxu1 %v45161_v60  ;;  %40370 = vmatpush3.msra.mxu0 %v45258_v54  ;;  %v39935_v9 = vpop.f32.mrf.mxu0 }
 0xa5b   :  { %40361 = vmatpush3.msra.mxu1 %v45161_v60  ;;  %40362 = vmatprep.mubr.f32.mxu1 %v44569_v53  ;;  %v19440_v47 = vadd.f32 %v39935_v9, %v19353_v25  ;;  %v23074_v60 = vand.u32 4294901760, %v23073_v46  ;;  %v36424_v9 = vld [vmem:[%s47265_s2 + $0x2f8] sm:$0xff]  ;;  %v36421_v46 = vld [vmem:[%s47265_s2 + $0x2e0] sm:$0xff] }
 0xa5c   :  { %40371 = vmatprep.subr.mxu0 %v45266_v38  ;;  %40363 = vmatmul.mubr.f32.vlgmr.msra.gmra.mxu1 %v44576_v7  ;;  %v39946_v18 = vpop.f32.mrf.mxu1  ;;  %v45319_v25 = vpop.f32.mrf.mxu0 }
 0xa5d   :  { %40372 = vmatpush3.msra.mxu0 %v45266_v38  ;;  %40376 = vmatprep.subr.mxu1 %v23053_v3  ;;  %v19525_v52 = vadd.f32 %v39946_v18, %v19440_v47  ;;  %v47349_v18 = vld [vmem:[#allocation13_spill] sm:$0xff] }
 0xa5e   :  { %40373 = vmatprep.mubr.f32.mxu0 %v44640_v19  ;;  %40377 = vmatpush3.msra.mxu1 %v23053_v3  ;;  %v45321_v12 = vpop.f32.mrf.mxu1 }
 0xa5f   :  { %40387 = vmatprep.subr.mxu0 %v45252_v15  ;;  %40374 = vmatmul.mubr.f32.vlgmr.msra.gmra.mxu0 %v44643_v56 }
 0xa60   :  { %40378 = vmatprep.subr.mxu1 %v23060_v24  ;;  %40388 = vmatpush3.msra.mxu0 %v45252_v15 }
 0xa61   :  { %40379 = vmatpush3.msra.mxu1 %v23060_v24  ;;  %40389 = vmatprep.subr.mxu0 %v23057_v1 }
 0xa62   :  { %40380 = vmatprep.subr.mxu1 %v23067_v0  ;;  %40390 = vmatpush3.msra.mxu0 %v23057_v1  ;;  %v45331_v1 = vand.u32 4294901760, %v36424_v9 }
 0xa63   :  { %40381 = vmatpush3.msra.mxu1 %v23067_v0  ;;  %40391 = vmatprep.subr.mxu0 %v23064_v4 }
 0xa64   :  { %40382 = vmatprep.subr.mxu1 %v23074_v60  ;;  %40392 = vmatpush3.msra.mxu0 %v23064_v4  ;;  %v39957_v3 = vpop.f32.mrf.mxu0  ;;  %v36423_v4 = vld [vmem:[%s47265_s2 + $0x2f0] sm:$0xff] }
 0xa65   :  { %40383 = vmatpush3.msra.mxu1 %v23074_v60  ;;  %40393 = vmatprep.subr.mxu0 %v23071_v13  ;;  %v19614_v15 = vadd.f32 %v39957_v3, %v19525_v52  ;;  %v45341_v52 = vld [vmem:[%s47267_s4 + $0x10] sm:$0xff]  ;;  %v45350_v47 = vand.u32 4294901760, %v36423_v4  ;;  %v45360_v60 = vsub.f32 %v36424_v9, %v45331_v1  ;;  %v17635_v3 = vadd.f32 %v44961_v57, %v44914_v21 }
 0xa66   :  { %40384 = vmatprep.mubr.f32.mxu1 %v44569_v53  ;;  %40394 = vmatpush3.msra.mxu0 %v23071_v13  ;;  %v39968_v37 = vpop.f32.mrf.mxu1  ;;  %v36422_v13 = vld [vmem:[%s47265_s2 + $0x2e8] sm:$0xff]  ;;  %v19706_v24 = vrot.slane %v45341_v52, %v47349_v18  ;;  %v45376_v21 = vand.u32 4294901760, %v36421_v46 }
 0xa67   :  { %40398 = vmatprep.subr.mxu1 %v45226_v2  ;;  %v45328_v0 = vadd.f32 %v39968_v37, %v19614_v15  ;;  %40385 = vmatmul.mubr.f32.vlgmr.msra.gmra.mxu1 %v44576_v7  ;;  %v45368_v15 = vand.u32 4294901760, %v36422_v13  ;;  %v45379_v57 = vsub.f32 %v36423_v4, %v45350_v47  ;;  %v45384_v18 = vand.u32 4294901760, %v45360_v60 }
 0xa68   :  { %40395 = vmatprep.mubr.f32.mxu0 %v44593_v5  ;;  %40399 = vmatpush3.msra.mxu1 %v45226_v2  ;;  %v45372_v37 = vpop.f32.mrf.mxu1  ;;  %v17736_v16 = vadd.f32 %v44969_v10, %v17635_v3 }
 0xa69   :  { %47348 = vst [vmem:[#allocation5_spill] sm:$0xff] %v45328_v0  ;;  %40409 = vmatprep.subr.mxu0 %v45273_v26  ;;  %40396 = vmatmul.mubr.f32.vlgmr.msra.gmra.mxu0 %v44601_v51  ;;  %v45390_v42 = vsub.f32 %v36422_v13, %v45368_v15  ;;  %v45398_v10 = vand.u32 4294901760, %v45379_v57  ;;  %v23589_v13 = vsub.f32 %v45360_v60, %v45384_v18 }
 0xa6a   :  { %40400 = vmatprep.subr.mxu1 %v45240_v48  ;;  %40410 = vmatpush3.msra.mxu0 %v45273_v26  ;;  %v45364_v26 = vpop.f32.mrf.mxu0 }
 0xa6b   :  { %40401 = vmatpush3.msra.mxu1 %v45240_v48  ;;  %40411 = vmatprep.subr.mxu0 %v45282_v35 }
 0xa6c   :  { %40402 = vmatprep.subr.mxu1 %v45258_v54  ;;  %40412 = vmatpush3.msra.mxu0 %v45282_v35 }
 0xa6d   :  { %40403 = vmatpush3.msra.mxu1 %v45258_v54  ;;  %40413 = vmatprep.subr.mxu0 %v45291_v41 }
 0xa6e   :  { %40404 = vmatprep.subr.mxu1 %v45266_v38  ;;  %40414 = vmatpush3.msra.mxu0 %v45291_v41  ;;  %v39979_v9 = vpop.f32.mrf.mxu0 }
 0xa6f   :  { %40405 = vmatpush3.msra.mxu1 %v45266_v38  ;;  %40415 = vmatprep.subr.mxu0 %v45300_v32  ;;  %v19799_v35 = vadd.f32 %v39979_v9, %v19706_v24  ;;  %v17822_v9 = vadd.f32 %v44982_v14, %v17736_v16  ;;  %v45410_v14 = vand.u32 4294901760, %v45390_v42 }
 0xa70   :  { %40406 = vmatprep.mubr.f32.mxu1 %v44615_v28  ;;  %40416 = vmatpush3.msra.mxu0 %v45300_v32  ;;  %v39990_v41 = vpop.f32.mrf.mxu1  ;;  %v45401_v32 = vsub.f32 %v36421_v46, %v45376_v21  ;;  %v19788_v16 = vpop.f32.mrf.mxu0  ;;  %v23596_v46 = vsub.f32 %v45379_v57, %v45398_v10 }
 0xa71   :  { %40420 = vmatprep.subr.mxu1 %v45226_v2  ;;  %v19896_v4 = vadd.f32 %v39990_v41, %v19799_v35  ;;  %40407 = vmatmul.mubr.f32.vlgmr.msra.gmra.mxu1 %v44622_v11  ;;  %v19789_v0 = vadd.f32 %v19788_v16, %v19706_v24 }
 0xa72   :  { %40417 = vmatprep.mubr.f32.mxu0 %v44569_v53  ;;  %40421 = vmatpush3.msra.mxu1 %v45226_v2  ;;  %v17906_v2 = vadd.f32 %v44988_v22, %v17822_v9  ;;  %v45420_v3 = vand.u32 4294901760, %v45401_v32  ;;  %v19889_v41 = vpop.f32.mrf.mxu1  ;;  %v23603_v9 = vsub.f32 %v45390_v42, %v45410_v14 }
 0xa73   :  { %40431 = vmatprep.subr.mxu0 %v45331_v1  ;;  %40418 = vmatmul.mubr.f32.vlgmr.msra.gmra.mxu0 %v44576_v7  ;;  %v19890_v16 = vadd.f32 %v19889_v41, %v19789_v0 }
 0xa74   :  { %40422 = vmatprep.subr.mxu1 %v45240_v48  ;;  %40432 = vmatpush3.msra.mxu0 %v45331_v1  ;;  %v17997_v35 = vadd.f32 %v45033_v49, %v17906_v2  ;;  %v23610_v2 = vsub.f32 %v45401_v32, %v45420_v3 }
 0xa75   :  { %40423 = vmatpush3.msra.mxu1 %v45240_v48  ;;  %40433 = vmatprep.subr.mxu0 %v45350_v47  ;;  %v23590_v48 = vand.u32 4294901760, %v23589_v13  ;;  %v23597_v13 = vand.u32 4294901760, %v23596_v46 }
 0xa76   :  { %40424 = vmatprep.subr.mxu1 %v45258_v54  ;;  %40434 = vmatpush3.msra.mxu0 %v45350_v47  ;;  %v18078_v24 = vadd.f32 %v45047_v36, %v17997_v35  ;;  %v23611_v46 = vand.u32 4294901760, %v23610_v2 }
 0xa77   :  { %40425 = vmatpush3.msra.mxu1 %v45258_v54  ;;  %40435 = vmatprep.subr.mxu0 %v45368_v15 }
 0xa78   :  { %40426 = vmatprep.subr.mxu1 %v45266_v38  ;;  %40436 = vmatpush3.msra.mxu0 %v45368_v15  ;;  %v40001_v22 = vpop.f32.mrf.mxu0  ;;  %v24001_v36 = vsel %vm6496_vm1, %v18078_v24, 0 }
 0xa79   :  { %40427 = vmatpush3.msra.mxu1 %v45266_v38  ;;  %40428 = vmatprep.mubr.f32.mxu1 %v44569_v53  ;;  %v19983_v54 = vadd.f32 %v40001_v22, %v19896_v4  ;;  %v23604_v4 = vand.u32 4294901760, %v23603_v9 }
 0xa7a   :  { %40437 = vmatprep.subr.mxu0 %v45376_v21  ;;  %40429 = vmatmul.mubr.f32.vlgmr.msra.gmra.mxu1 %v44576_v7  ;;  %v40012_v49 = vpop.f32.mrf.mxu1  ;;  %v19975_v38 = vpop.f32.mrf.mxu0 }
 0xa7b   :  { %40438 = vmatpush3.msra.mxu0 %v45376_v21  ;;  %40442 = vmatprep.subr.mxu1 %v23590_v48  ;;  %v20068_v50 = vadd.f32 %v40012_v49, %v19983_v54  ;;  %v19976_v22 = vadd.f32 %v19975_v38, %v19890_v16 }
 0xa7c   :  { %40439 = vmatprep.mubr.f32.mxu0 %v44640_v19  ;;  %40443 = vmatpush3.msra.mxu1 %v23590_v48  ;;  %v20059_v35 = vpop.f32.mrf.mxu1  ;;  %v18172_v48 = vadd.f32 %v45084_v30, %v45026_v43 }
 0xa7d   :  { %40453 = vmatprep.subr.mxu0 %v45360_v60  ;;  %40440 = vmatmul.mubr.f32.vlgmr.msra.gmra.mxu0 %v44643_v56  ;;  %v45446_v56 = vand.u32 4294901760, %v24001_v36  ;;  %v20060_v0 = vadd.f32 %v20059_v35, %v19976_v22 }
 0xa7e   :  { %40444 = vmatprep.subr.mxu1 %v23597_v13  ;;  %40454 = vmatpush3.msra.mxu0 %v45360_v60 }
 0xa7f   :  { %40445 = vmatpush3.msra.mxu1 %v23597_v13  ;;  %40455 = vmatprep.subr.mxu0 %v45379_v57  ;;  %v45460_v43 = vsub.f32 %v24001_v36, %v45446_v56 }
 0xa80   :  { %40446 = vmatprep.subr.mxu1 %v23604_v4  ;;  %40456 = vmatpush3.msra.mxu0 %v45379_v57 }
 0xa81   :  { %40447 = vmatpush3.msra.mxu1 %v23604_v4  ;;  %40457 = vmatprep.subr.mxu0 %v45390_v42 }
 0xa82   :  { %40448 = vmatprep.subr.mxu1 %v23611_v46  ;;  %40458 = vmatpush3.msra.mxu0 %v45390_v42  ;;  %v40023_v19 = vpop.f32.mrf.mxu0 }
 0xa83   :  { %40449 = vmatpush3.msra.mxu1 %v23611_v46  ;;  %40459 = vmatprep.subr.mxu0 %v45401_v32  ;;  %v20157_v60 = vadd.f32 %v40023_v19, %v20068_v50 }
 0xa84   :  { %40450 = vmatprep.mubr.f32.mxu1 %v44569_v53  ;;  %40460 = vmatpush3.msra.mxu0 %v45401_v32  ;;  %v40034_v57 = vpop.f32.mrf.mxu1  ;;  %v20150_v41 = vpop.f32.mrf.mxu0  ;;  %v18273_v32 = vadd.f32 %v45089_v31, %v18172_v48 }
 0xa85   :  { %40464 = vmatprep.subr.mxu1 %v45331_v1  ;;  %v45454_v42 = vadd.f32 %v40034_v57, %v20157_v60  ;;  %40451 = vmatmul.mubr.f32.vlgmr.msra.gmra.mxu1 %v44576_v7  ;;  %v20151_v9 = vadd.f32 %v20150_v41, %v20060_v0 }
 0xa86   :  { %40461 = vmatprep.mubr.f32.mxu0 %v44593_v5  ;;  %40465 = vmatpush3.msra.mxu1 %v45331_v1  ;;  %v20231_v50 = vpop.f32.mrf.mxu1  ;;  %v47350_v5 = vld [vmem:[#allocation14_spill] sm:$0xff]  ;;  %v18359_v13 = vadd.f32 %v45102_v33, %v18273_v32 }
 0xa87   :  { %40475 = vmatprep.subr.mxu0 %v45384_v18  ;;  %40462 = vmatmul.mubr.f32.vlgmr.msra.gmra.mxu0 %v44601_v51  ;;  %v20232_v30 = vadd.f32 %v20231_v50, %v20151_v9  ;;  %v20249_v49 = vrot.slane %v45341_v52, %v47350_v5  ;;  %v24074_v51 = vand.u32 4294901760, %v45460_v43  ;;  %v18709_v9 = vadd.f32 %v45190_v40, %v45141_v39 }
 0xa88   :  { %40466 = vmatprep.subr.mxu1 %v45350_v47  ;;  %40476 = vmatpush3.msra.mxu0 %v45384_v18 }
 0xa89   :  { %v24004_v54 = vsel %vm6496_vm1, %v20232_v30, 0  ;;  %40467 = vmatpush3.msra.mxu1 %v45350_v47  ;;  %40477 = vmatprep.subr.mxu0 %v45398_v10  ;;  %v24075_v4 = vsub.f32 %v45460_v43, %v24074_v51 }
 0xa8a   :  { %v45473_v2 = vand.u32 4294901760, %v24004_v54  ;;  %40468 = vmatprep.subr.mxu1 %v45368_v15  ;;  %40478 = vmatpush3.msra.mxu0 %v45398_v10  ;;  %v18443_v10 = vadd.f32 %v45106_v8, %v18359_v13 }
 0xa8b   :  { %40469 = vmatpush3.msra.mxu1 %v45368_v15  ;;  %40479 = vmatprep.subr.mxu0 %v45410_v14  ;;  %v24076_v8 = vand.u32 4294901760, %v24075_v4 }
 0xa8c   :  { %v24114_v31 = vsub.f32 %v24004_v54, %v45473_v2  ;;  %40470 = vmatprep.subr.mxu1 %v45376_v21  ;;  %40480 = vmatpush3.msra.mxu0 %v45410_v14  ;;  %v40045_v18 = vpop.f32.mrf.mxu0  ;;  %v18534_v16 = vadd.f32 %v45149_v55, %v18443_v10 }
 0xa8d   :  { %40471 = vmatpush3.msra.mxu1 %v45376_v21  ;;  %40481 = vmatprep.subr.mxu0 %v45420_v3  ;;  %v20336_v33 = vadd.f32 %v40045_v18, %v20249_v49 }
 0xa8e   :  { %v24115_v24 = vand.u32 4294901760, %v24114_v31  ;;  %40472 = vmatprep.mubr.f32.mxu1 %v44615_v28  ;;  %40482 = vmatpush3.msra.mxu0 %v45420_v3  ;;  %v40056_v38 = vpop.f32.mrf.mxu1  ;;  %v18615_v55 = vadd.f32 %v45157_v34, %v18534_v16 }
 0xa8f   :  { %40483 = vmatprep.mubr.f32.mxu0 %v44569_v53  ;;  %40486 = vmatprep.subr.mxu1 %v45331_v1  ;;  %v20433_v14 = vadd.f32 %v40056_v38, %v20336_v33 }
 0xa90   :  { %40473 = vmatmul.mubr.f32.vlgmr.msra.gmra.mxu1 %v44622_v11  ;;  %40484 = vmatmul.mubr.f32.vlgmr.msra.gmra.mxu0 %v44576_v7  ;;  %v24116_v28 = vsub.f32 %v24114_v31, %v24115_v24  ;;  %v20325_v11 = vpop.f32.mrf.mxu0  ;;  %v24453_v22 = vsel %vm6496_vm1, %v18615_v55, 0 }
 0xa91   :  { %40487 = vmatpush3.msra.mxu1 %v45331_v1  ;;  %40497 = vmatprep.subr.mxu0 %v47332_v63  ;;  %v20426_v1 = vpop.f32.mrf.mxu1 }
 0xa92   :  { %40488 = vmatprep.subr.mxu1 %v45350_v47  ;;  %40498 = vmatpush3.xpose.msra.mxu0 %v45473_v2  ;;  %v24117_v46 = vand.u32 4294901760, %v24116_v28 }
 0xa93   :  { %40489 = vmatpush3.msra.mxu1 %v45350_v47  ;;  %40499 = vmatprep.mubr.msk.f32.mxu0 %vm41652_vm2, %v47332_v63  ;;  %v20326_v47 = vadd.f32 %v20325_v11, %v20249_v49 }
 0xa94   :  { %40490 = vmatprep.subr.mxu1 %v45368_v15  ;;  %40507 = vmatprep.subr.mxu0 %v47332_v63 }
 0xa95   :  { %40491 = vmatpush3.msra.mxu1 %v45368_v15  ;;  %40500 = vmatmul.mubr.f32.vlgmr.msra.gmra.mxu0 %v24076_v8 }
 0xa96   :  { %40492 = vmatprep.subr.mxu1 %v45376_v21  ;;  %40508 = vmatpush3.xpose.msra.mxu0 %v24114_v31  ;;  %v40067_v3 = vpop.f32.mrf.mxu0  ;;  %v47351_v31 = vld [vmem:[#allocation15_spill] sm:$0xff] }
 0xa97   :  { %40493 = vmatpush3.msra.mxu1 %v45376_v21  ;;  %40494 = vmatprep.mubr.f32.mxu1 %v44569_v53  ;;  %v20520_v34 = vadd.f32 %v40067_v3, %v20433_v14  ;;  %v45517_v21 = vand.u32 4294901760, %v24453_v22  ;;  %v20427_v53 = vadd.f32 %v20426_v1, %v20326_v47  ;;  %v20786_v18 = vrot.slane %v45341_v52, %v47351_v31 }
 0xa98   :  { %40495 = vmatmul.mubr.f32.vlgmr.msra.gmra.mxu1 %v44576_v7  ;;  %40509 = vmatprep.mubr.msk.f32.mxu0 %vm41652_vm2, %v47332_v63  ;;  %v40078_v15 = vpop.f32.mrf.mxu1  ;;  %v20512_v35 = vpop.f32.mrf.mxu0 }
 0xa99   :  { %v20605_v36 = vadd.f32 %v40078_v15, %v20520_v34  ;;  %40502 = vmatprep.subr.mxu1 %v47332_v63  ;;  %40510 = vmatmul.mubr.f32.vlgmr.msra.gmra.mxu0 %v45460_v43  ;;  %v20513_v7 = vadd.f32 %v20512_v35, %v20427_v53  ;;  %v45529_v0 = vsub.f32 %v24453_v22, %v45517_v21 }
 0xa9a   :  { %40517 = vmatprep.subr.mxu0 %v47332_v63  ;;  %40503 = vmatpush3.xpose.msra.mxu1 %v24117_v46  ;;  %v20596_v19 = vpop.f32.mrf.mxu1  ;;  %v18810_v43 = vadd.f32 %v45199_v44, %v18709_v9 }
 0xa9b   :  { %40518 = vmatpush3.xpose.msra.mxu0 %v24115_v24  ;;  %40504 = vmatprep.mubr.msk.f32.mxu1 %vm41652_vm2, %v47332_v63  ;;  %v20597_v48 = vadd.f32 %v20596_v19, %v20513_v7  ;;  %v24526_v30 = vand.u32 4294901760, %v45529_v0 }
 0xa9c   :  { %40519 = vmatprep.mubr.msk.f32.mxu0 %vm41652_vm2, %v47332_v63  ;;  %40512 = vmatprep.subr.mxu1 %v47332_v63 }
 0xa9d   :  { %40505 = vmatmul.mubr.f32.vlgmr.msra.gmra.mxu1 %v45446_v56  ;;  %40527 = vmatprep.subr.mxu0 %v47332_v63  ;;  %v24527_v39 = vsub.f32 %v45529_v0, %v24526_v30 }
 0xa9e   :  { %40520 = vmatmul.mubr.f32.vlgmr.msra.gmra.mxu0 %v45446_v56  ;;  %40513 = vmatpush3.xpose.msra.mxu1 %v45473_v2 }
 0xa9f   :  { %40514 = vmatprep.mubr.msk.f32.mxu1 %vm41652_vm2, %v47332_v63  ;;  %40522 = vmatprep.subr.mxu1 %v47332_v63  ;;  %v24528_v24 = vand.u32 4294901760, %v24527_v39 }
 0xaa0   :  { %v40089_v60 = vpop.f32.mrf.mxu0  ;;  %40529 = vmatprep.mubr.msk.f32.mxu0 %vm41652_vm2, %v47332_v63 }
 0xaa1   :  { %v20694_v57 = vadd.f32 %v40089_v60, %v20605_v36  ;;  %v40100_v41 = vpop.f32.mrf.mxu1  ;;  %40515 = vmatmul.mubr.f32.vlgmr.msra.gmra.mxu1 %v24074_v51 }
 0xaa2   :  { %v20687_v50 = vpop.f32.mrf.mxu0  ;;  %40523 = vmatpush3.xpose.msra.mxu1 %v45473_v2  ;;  %40524 = vmatprep.mubr.msk.f32.mxu1 %vm41652_vm2, %v47332_v63  ;;  %v18896_v2 = vadd.f32 %v45214_v62, %v18810_v43 }
 0xaa3   :  { %v45544_v32 = vadd.f32 %v40100_v41, %v20694_v57  ;;  %v20688_v54 = vadd.f32 %v20687_v50, %v20597_v48  ;;  %40532 = vmatprep.subr.mxu1 %v47332_v63  ;;  %v20768_v49 = vpop.f32.mrf.mxu1 }
 0xaa5   :  { %v20769_v13 = vadd.f32 %v20768_v49, %v20688_v54  ;;  %40525 = vmatmul.mubr.f32.vlgmr.msra.gmra.mxu1 %v45446_v56  ;;  %v18980_v56 = vadd.f32 %v45216_v17, %v18896_v2 }
 0xaa6   :  { %40534 = vmatprep.mubr.msk.f32.mxu1 %vm41652_vm2, %v47332_v63 }
 0xaa7   :  { %v24456_v40 = vsel %vm6496_vm1, %v20769_v13, 0  ;;  %v19071_v16 = vadd.f32 %v45254_v6, %v18980_v56 }
 0xaa8   :  { %v24489_v51 = vand.u32 4294901760, %v24456_v40 }
 0xaa9   :  { %v19152_v17 = vadd.f32 %v45262_v58, %v19071_v16 }
 0xaaa   :  { %v24566_v33 = vsub.f32 %v24456_v40, %v24489_v51  ;;  %40528 = vmatpush3.xpose.msra.mxu0 %v24489_v51  ;;  %v40111_v10 = vpop.f32.mrf.mxu0 }
 0xaab   :  { %40537 = vmatprep.subr.mxu0 %v47332_v63  ;;  %v20873_v44 = vadd.f32 %v40111_v10, %v20786_v18  ;;  %v24905_v46 = vsel %vm6496_vm1, %v19152_v17, 0 }
 0xaac   :  { %v24567_v38 = vand.u32 4294901760, %v24566_v33  ;;  %v20862_v4 = vpop.f32.mrf.mxu0  ;;  %v45576_v15 = vand.u32 4294901760, %v24905_v46 }
 0xaad   :  { %40530 = vmatmul.mubr.f32.vlgmr.msra.gmra.mxu0 %v24528_v24  ;;  %v40122_v14 = vpop.f32.mrf.mxu1  ;;  %v20863_v8 = vadd.f32 %v20862_v4, %v20786_v18 }
 0xaae   :  { %40538 = vmatpush3.xpose.msra.mxu0 %v24566_v33  ;;  %40539 = vmatprep.mubr.msk.f32.mxu0 %vm41652_vm2, %v47332_v63  ;;  %v20970_v62 = vadd.f32 %v40122_v14, %v20873_v44  ;;  %v24568_v28 = vsub.f32 %v24566_v33, %v24567_v38  ;;  %v24977_v53 = vsub.f32 %v24905_v46, %v45576_v15  ;;  %v25809_v46 = vsel %vm6496_vm1, %v45004_v59, 0 }
 0xaaf   :  { %40547 = vmatprep.subr.mxu0 %v47332_v63  ;;  %v20963_v11 = vpop.f32.mrf.mxu1 }
 0xab0   :  { %v24569_v55 = vand.u32 4294901760, %v24568_v28  ;;  %v20964_v6 = vadd.f32 %v20963_v11, %v20863_v8  ;;  %v24978_v41 = vand.u32 4294901760, %v24977_v53 }
 0xab1   :  { %40540 = vmatmul.mubr.f32.vlgmr.msra.gmra.mxu0 %v45529_v0  ;;  %v19246_v0 = vadd.f32 %v45295_v45, %v45246_v29 }
 0xab2   :  { %40533 = vmatpush3.xpose.msra.mxu1 %v24569_v55  ;;  %40548 = vmatpush3.xpose.msra.mxu0 %v24567_v38  ;;  %v24979_v49 = vsub.f32 %v24977_v53, %v24978_v41 }
 0xab3   :  { %40549 = vmatprep.mubr.msk.f32.mxu0 %vm41652_vm2, %v47332_v63  ;;  %40542 = vmatprep.subr.mxu1 %v47332_v63 }
 0xab4   :  { %v40133_v1 = vpop.f32.mrf.mxu0  ;;  %40557 = vmatprep.subr.mxu0 %v47332_v63  ;;  %v24980_v29 = vand.u32 4294901760, %v24979_v49 }
 0xab5   :  { %v21057_v3 = vadd.f32 %v40133_v1, %v20970_v62  ;;  %40535 = vmatmul.mubr.f32.vlgmr.msra.gmra.mxu1 %v45517_v21  ;;  %40550 = vmatmul.mubr.f32.vlgmr.msra.gmra.mxu0 %v45517_v21 }
 0xab6   :  { %v21049_v47 = vpop.f32.mrf.mxu0  ;;  %40543 = vmatpush3.xpose.msra.mxu1 %v24489_v51  ;;  %40544 = vmatprep.mubr.msk.f32.mxu1 %vm41652_vm2, %v47332_v63 }
 0xab7   :  { %v40144_v58 = vpop.f32.mrf.mxu1  ;;  %40552 = vmatprep.subr.mxu1 %v47332_v63  ;;  %40559 = vmatprep.mubr.msk.f32.mxu0 %vm41652_vm2, %v47332_v63  ;;  %v21050_v34 = vadd.f32 %v21049_v47, %v20964_v6 }
 0xab8   :  { %v21142_v22 = vadd.f32 %v40144_v58, %v21057_v3 }
 0xab9   :  { %v21133_v36 = vpop.f32.mrf.mxu1  ;;  %40545 = vmatmul.mubr.f32.vlgmr.msra.gmra.mxu1 %v24526_v30  ;;  %v19347_v30 = vadd.f32 %v45304_v20, %v19246_v0 }
 0xaba   :  { %40553 = vmatpush3.xpose.msra.mxu1 %v24489_v51  ;;  %40554 = vmatprep.mubr.msk.f32.mxu1 %vm41652_vm2, %v47332_v63  ;;  %v21134_v35 = vadd.f32 %v21133_v36, %v21050_v34  ;;  %v47352_v51 = vld [vmem:[#allocation16_spill] sm:$0xff]  ;;  %v45642_v34 = vand.u32 4294901760, %v25809_v46  ;;  %v45648_v36 = vrot.slane %v45341_v52, %v47344_v23 }
 0xabb   :  { %40562 = vmatprep.subr.mxu1 %v47332_v63  ;;  %v45598_v20 = vrot.slane %v45341_v52, %v47352_v51 }
 0xabc   :  { %v45653_v59 = vsub.f32 %v25809_v46, %v45642_v34 }
 0xabd   :  { %v40155_v7 = vpop.f32.mrf.mxu0  ;;  %40555 = vmatmul.mubr.f32.vlgmr.msra.gmra.mxu1 %v45517_v21  ;;  %v19433_v21 = vadd.f32 %v45319_v25, %v19347_v30 }
 0xabe   :  { %v21231_v19 = vadd.f32 %v40155_v7, %v21142_v22  ;;  %40564 = vmatprep.mubr.msk.f32.mxu1 %vm41652_vm2, %v47332_v63 }
 0xabf   :  { %v21224_v60 = vpop.f32.mrf.mxu0  ;;  %v19517_v45 = vadd.f32 %v45321_v12, %v19433_v21 }
 0xac0   :  { %v21225_v48 = vadd.f32 %v21224_v60, %v21134_v35  ;;  %v40166_v57 = vpop.f32.mrf.mxu1 }
 0xac1   :  { %v45587_v9 = vadd.f32 %v40166_v57, %v21231_v19  ;;  %v19608_v18 = vadd.f32 %v45364_v26, %v19517_v45 }
 0xac2   :  { %v21305_v50 = vpop.f32.mrf.mxu1 }
 0xac3   :  { %v21306_v54 = vadd.f32 %v21305_v50, %v21225_v48  ;;  %v19689_v44 = vadd.f32 %v45372_v37, %v19608_v18  ;;  %v25882_v50 = vand.u32 4294901760, %v45653_v59 }
 0xac5   :  { %v24908_v13 = vsel %vm6496_vm1, %v21306_v54, 0  ;;  %v25357_v4 = vsel %vm6496_vm1, %v19689_v44, 0  ;;  %v26261_v54 = vsel %vm6496_vm1, %v45118_v27, 0 }
 0xac6   :  { %v24941_v43 = vand.u32 4294901760, %v24908_v13  ;;  %v45624_v16 = vand.u32 4294901760, %v25357_v4 }
 0xac8   :  { %v25018_v39 = vsub.f32 %v24908_v13, %v24941_v43  ;;  %40558 = vmatpush3.xpose.msra.mxu0 %v24941_v43  ;;  %v45592_v40 = vpop.f32.mrf.mxu0  ;;  %v45630_v8 = vsub.f32 %v25357_v4, %v45624_v16  ;;  %v26713_v4 = vsel %vm6496_vm1, %v45223_v61, 0 }
 0xac9   :  { %40567 = vmatprep.subr.mxu0 %v47332_v63  ;;  %v21410_v18 = vadd.f32 %v45592_v40, %v45598_v20 }
 0xaca   :  { %v25019_v2 = vand.u32 4294901760, %v25018_v39  ;;  %v21399_v25 = vpop.f32.mrf.mxu0  ;;  %v25430_v1 = vand.u32 4294901760, %v45630_v8 }
 0xacb   :  { %40560 = vmatmul.mubr.f32.vlgmr.msra.gmra.mxu0 %v24980_v29  ;;  %v45601_v33 = vpop.f32.mrf.mxu1  ;;  %v21400_v12 = vadd.f32 %v21399_v25, %v45598_v20  ;;  %v45672_v29 = vand.u32 4294901760, %v26261_v54 }
 0xacc   :  { %40568 = vmatpush3.xpose.msra.mxu0 %v25018_v39  ;;  %40569 = vmatprep.mubr.msk.f32.mxu0 %vm41652_vm2, %v47332_v63  ;;  %v25020_v10 = vsub.f32 %v25018_v39, %v25019_v2  ;;  %v25431_v22 = vsub.f32 %v45630_v8, %v25430_v1  ;;  %v25883_v39 = vsub.f32 %v45653_v59, %v25882_v50 }
 0xacd   :  { %40577 = vmatprep.subr.mxu0 %v47332_v63  ;;  %v21500_v56 = vpop.f32.mrf.mxu1 }
 0xace   :  { %v25021_v24 = vand.u32 4294901760, %v25020_v10  ;;  %v21501_v26 = vadd.f32 %v21500_v56, %v21400_v12  ;;  %v25432_v0 = vand.u32 4294901760, %v25431_v22  ;;  %v25884_v10 = vand.u32 4294901760, %v25883_v39 }
 0xacf   :  { %40570 = vmatmul.mubr.f32.vlgmr.msra.gmra.mxu0 %v24977_v53  ;;  %v25812_v53 = vsel %vm6496_vm1, %v45454_v42, 0  ;;  %v45688_v12 = vsub.f32 %v26261_v54, %v45672_v29 }
 0xad0   :  { %40563 = vmatpush3.xpose.msra.mxu1 %v25021_v24  ;;  %40578 = vmatpush3.xpose.msra.mxu0 %v25019_v2  ;;  %v45657_v48 = vand.u32 4294901760, %v25812_v53  ;;  %v26264_v2 = vsel %vm6496_vm1, %v45544_v32, 0  ;;  %v21507_v24 = vadd.f32 %v45601_v33, %v21410_v18 }
 0xad1   :  { %40579 = vmatprep.mubr.msk.f32.mxu0 %vm41652_vm2, %v47332_v63  ;;  %40572 = vmatprep.subr.mxu1 %v47332_v63  ;;  %v45694_v32 = vand.u32 4294901760, %v26264_v2  ;;  %v26334_v56 = vand.u32 4294901760, %v45688_v12 }
 0xad2   :  { %v45611_v38 = vpop.f32.mrf.mxu0  ;;  %40587 = vmatprep.subr.mxu0 %v47332_v63  ;;  %v25922_v49 = vsub.f32 %v25812_v53, %v45657_v48 }
 0xad3   :  { %40565 = vmatmul.mubr.f32.vlgmr.msra.gmra.mxu1 %v45576_v15  ;;  %40580 = vmatmul.mubr.f32.vlgmr.msra.gmra.mxu0 %v45576_v15  ;;  %v26335_v61 = vsub.f32 %v45688_v12, %v26334_v56 }
 0xad4   :  { %v21586_v37 = vpop.f32.mrf.mxu0  ;;  %40573 = vmatpush3.xpose.msra.mxu1 %v24941_v43  ;;  %40574 = vmatprep.mubr.msk.f32.mxu1 %vm41652_vm2, %v47332_v63  ;;  %v25923_v45 = vand.u32 4294901760, %v25922_v49 }
 0xad5   :  { %v45619_v14 = vpop.f32.mrf.mxu1  ;;  %40582 = vmatprep.subr.mxu1 %v47332_v63  ;;  %40589 = vmatprep.mubr.msk.f32.mxu0 %vm41652_vm2, %v47332_v63  ;;  %v21587_v62 = vadd.f32 %v21586_v37, %v21501_v26  ;;  %v26374_v37 = vsub.f32 %v26264_v2, %v45694_v32  ;;  %v26336_v46 = vand.u32 4294901760, %v26335_v61 }
 0xad6   :  { %v25924_v40 = vsub.f32 %v25922_v49, %v25923_v45 }
 0xad7   :  { %v21670_v28 = vpop.f32.mrf.mxu1  ;;  %40575 = vmatmul.mubr.f32.vlgmr.msra.gmra.mxu1 %v24978_v41 }
 0xad8   :  { %40583 = vmatpush3.xpose.msra.mxu1 %v24941_v43  ;;  %40584 = vmatprep.mubr.msk.f32.mxu1 %vm41652_vm2, %v47332_v63  ;;  %v21671_v55 = vadd.f32 %v21670_v28, %v21587_v62  ;;  %v25925_v33 = vand.u32 4294901760, %v25924_v40  ;;  %v21594_v28 = vadd.f32 %v45611_v38, %v21507_v24 }
 0xad9   :  { %40592 = vmatprep.subr.mxu1 %v47332_v63 }
 0xadb   :  { %v45632_v11 = vpop.f32.mrf.mxu0  ;;  %40585 = vmatmul.mubr.f32.vlgmr.msra.gmra.mxu1 %v45576_v15 }
 0xadc   :  { %40594 = vmatprep.mubr.msk.f32.mxu1 %vm41652_vm2, %v47332_v63 }
 0xadd   :  { %v21761_v17 = vpop.f32.mrf.mxu0  ;;  %v45637_v6 = vpop.f32.mrf.mxu1 }
 0xade   :  { %v21762_v3 = vadd.f32 %v21761_v17, %v21671_v55  ;;  %v45717_v55 = vand.u32 4294901760, %v26713_v4  ;;  %v26375_v17 = vand.u32 4294901760, %v26374_v37 }
 0xadf   :  { %v21842_v47 = vpop.f32.mrf.mxu1 }
 0xae0   :  { %v21843_v58 = vadd.f32 %v21842_v47, %v21762_v3  ;;  %v45735_v47 = vsub.f32 %v26713_v4, %v45717_v55 }
 0xae2   :  { %v25360_v15 = vsel %vm6496_vm1, %v21843_v58, 0 }
 0xae3   :  { %v25393_v35 = vand.u32 4294901760, %v25360_v15 }
 0xae5   :  { %v25470_v7 = vsub.f32 %v25360_v15, %v25393_v35  ;;  %40588 = vmatpush3.xpose.msra.mxu0 %v25393_v35  ;;  %v40243_v19 = vpop.f32.mrf.mxu0  ;;  %v26376_v15 = vsub.f32 %v26374_v37, %v26375_v17 }
 0xae6   :  { %40597 = vmatprep.subr.mxu0 %v47332_v63  ;;  %v21947_v60 = vadd.f32 %v40243_v19, %v45648_v36  ;;  %v26786_v19 = vand.u32 4294901760, %v45735_v47 }
 0xae7   :  { %v25471_v57 = vand.u32 4294901760, %v25470_v7  ;;  %v45661_v41 = vpop.f32.mrf.mxu0 }
 0xae8   :  { %40590 = vmatmul.mubr.f32.vlgmr.msra.gmra.mxu0 %v25432_v0  ;;  %v21937_v3 = vadd.f32 %v45661_v41, %v45648_v36  ;;  %v47354_v0 = vld [vmem:[#allocation5_spill] sm:$0xff]  ;;  %v26787_v41 = vsub.f32 %v45735_v47, %v26786_v19 }
 0xae9   :  { %40598 = vmatpush3.xpose.msra.mxu0 %v25470_v7  ;;  %40599 = vmatprep.mubr.msk.f32.mxu0 %vm41652_vm2, %v47332_v63  ;;  %v25472_v42 = vsub.f32 %v25470_v7, %v25471_v57 }
 0xaea   :  { %40607 = vmatprep.subr.mxu0 %v47332_v63  ;;  %v40254_v30 = vpop.f32.mrf.mxu1 }
 0xaeb   :  { %v25473_v21 = vand.u32 4294901760, %v25472_v42  ;;  %v22044_v13 = vadd.f32 %v40254_v30, %v21947_v60 }
 0xaec   :  { %40600 = vmatmul.mubr.f32.vlgmr.msra.gmra.mxu0 %v45630_v8  ;;  %v45685_v25 = vpop.f32.mrf.mxu1 }
 0xaed   :  { %40593 = vmatpush3.xpose.msra.mxu1 %v25473_v21  ;;  %40608 = vmatpush3.xpose.msra.mxu0 %v25471_v57  ;;  %v40265_v43 = vpop.f32.mrf.mxu0 }
 0xaee   :  { %40609 = vmatprep.mubr.msk.f32.mxu0 %vm41652_vm2, %v47332_v63  ;;  %40602 = vmatprep.subr.mxu1 %v47332_v63  ;;  %v22131_v27 = vadd.f32 %v40265_v43, %v22044_v13  ;;  %v26788_v13 = vand.u32 4294901760, %v26787_v41 }
 0xaef   :  { %40617 = vmatprep.subr.mxu0 %v47332_v63  ;;  %v45698_v20 = vpop.f32.mrf.mxu0 }
 0xaf0   :  { %40595 = vmatmul.mubr.f32.vlgmr.msra.gmra.mxu1 %v45624_v16  ;;  %40610 = vmatmul.mubr.f32.vlgmr.msra.gmra.mxu0 %v45624_v16 }
 0xaf1   :  { %40603 = vmatpush3.xpose.msra.mxu1 %v25393_v35  ;;  %40618 = vmatpush3.xpose.msra.mxu0 %v45657_v48 }
 0xaf2   :  { %40604 = vmatprep.mubr.msk.f32.mxu1 %vm41652_vm2, %v47332_v63  ;;  %40619 = vmatprep.mubr.msk.f32.mxu0 %vm41652_vm2, %v47332_v63 }
 0xaf3   :  { %40612 = vmatprep.subr.mxu1 %v47332_v63  ;;  %40627 = vmatprep.subr.mxu0 %v47332_v63 }
 0xaf4   :  { %40605 = vmatmul.mubr.f32.vlgmr.msra.gmra.mxu1 %v25430_v1  ;;  %40620 = vmatmul.mubr.f32.vlgmr.msra.gmra.mxu0 %v25884_v10  ;;  %v21679_v1 = vadd.f32 %v45619_v14, %v21594_v28  ;;  %v47353_v14 = vld [vmem:[#allocation19_spill] sm:$0xff] }
 0xaf5   :  { %40613 = vmatpush3.xpose.msra.mxu1 %v25393_v35  ;;  %40628 = vmatpush3.xpose.msra.mxu0 %v25922_v49  ;;  %v40276_v44 = vpop.f32.mrf.mxu1  ;;  %v45743_v58 = vrot.slane %v45341_v52, %v47353_v14  ;;  %v22038_v52 = vadd.f32 %v45685_v25, %v21937_v3 }
 0xaf6   :  { %40614 = vmatprep.mubr.msk.f32.mxu1 %vm41652_vm2, %v47332_v63  ;;  %40629 = vmatprep.mubr.msk.f32.mxu0 %vm41652_vm2, %v47332_v63  ;;  %v22216_v26 = vadd.f32 %v40276_v44, %v22131_v27  ;;  %v21768_v53 = vadd.f32 %v45632_v11, %v21679_v1  ;;  %v47355_v1 = vld [vmem:[#allocation20_spill] sm:$0xff] }
 0xaf7   :  { %40622 = vmatprep.subr.mxu1 %v47332_v63  ;;  %40637 = vmatprep.subr.mxu0 %v47332_v63  ;;  %v40287_v62 = vpop.f32.mrf.mxu0  ;;  %v22207_v38 = vpop.f32.mrf.mxu1  ;;  %v22124_v42 = vadd.f32 %v45698_v20, %v22038_v52 }
 0xaf8   :  { %40615 = vmatmul.mubr.f32.vlgmr.msra.gmra.mxu1 %v45624_v16  ;;  %40630 = vmatmul.mubr.f32.vlgmr.msra.gmra.mxu0 %v45653_v59  ;;  %v22305_v8 = vadd.f32 %v40287_v62, %v22216_v26  ;;  %v26716_v16 = vsel %vm6496_vm1, %v45587_v9, 0  ;;  %v27165_v59 = vsel %vm6496_vm1, %v47354_v0, 0  ;;  %v21849_v57 = vadd.f32 %v45637_v6, %v21768_v53 }
 0xaf9   :  { %40623 = vmatpush3.xpose.msra.mxu1 %v25925_v33  ;;  %40638 = vmatpush3.xpose.msra.mxu0 %v25923_v45  ;;  %v45745_v22 = vand.u32 4294901760, %v26716_v16  ;;  %v22298_v36 = vpop.f32.mrf.mxu0  ;;  %v22208_v49 = vadd.f32 %v22207_v38, %v22124_v42 }
 0xafa   :  { %40624 = vmatprep.mubr.msk.f32.mxu1 %vm41652_vm2, %v47332_v63  ;;  %40639 = vmatprep.mubr.msk.f32.mxu0 %vm41652_vm2, %v47332_v63  ;;  %v27168_v54 = vsel %vm6496_vm1, %v21849_v57, 0 }
 0xafb   :  { %40632 = vmatprep.subr.mxu1 %v47332_v63  ;;  %40647 = vmatprep.subr.mxu0 %v47332_v63  ;;  %v26826_v60 = vsub.f32 %v26716_v16, %v45745_v22  ;;  %v45796_v27 = vand.u32 4294901760, %v27168_v54  ;;  %v22299_v25 = vadd.f32 %v22298_v36, %v22208_v49  ;;  %v41624_v16 = vld [vmem:[%s47267_s4 + $0x10] sm:$0xff] }
 0xafc   :  { %40625 = vmatmul.mubr.f32.vlgmr.msra.gmra.mxu1 %v45642_v34  ;;  %40640 = vmatmul.mubr.f32.vlgmr.msra.gmra.mxu0 %v45642_v34  ;;  %v45858_v3 = vrot.slane %v41624_v16, %v47355_v1 }
 0xafd   :  { %40633 = vmatpush3.xpose.msra.mxu1 %v45657_v48  ;;  %40648 = vmatpush3.xpose.msra.mxu0 %v45694_v32  ;;  %v26827_v6 = vand.u32 4294901760, %v26826_v60  ;;  %v27278_v40 = vsub.f32 %v27168_v54, %v45796_v27 }
 0xafe   :  { %40634 = vmatprep.mubr.msk.f32.mxu1 %vm41652_vm2, %v47332_v63  ;;  %40649 = vmatprep.mubr.msk.f32.mxu0 %vm41652_vm2, %v47332_v63  ;;  %v40298_v9 = vpop.f32.mrf.mxu1 }
 0xaff   :  { %40642 = vmatprep.subr.mxu1 %v47332_v63  ;;  %40657 = vmatprep.subr.mxu0 %v47332_v63  ;;  %v45749_v35 = vadd.f32 %v40298_v9, %v22305_v8  ;;  %v26828_v45 = vsub.f32 %v26826_v60, %v26827_v6 }
 0xb00   :  { %40635 = vmatmul.mubr.f32.vlgmr.msra.gmra.mxu1 %v25882_v50  ;;  %40650 = vmatmul.mubr.f32.vlgmr.msra.gmra.mxu0 %v26336_v46  ;;  %v45774_v50 = vand.u32 4294901760, %v27165_v59 }
 0xb01   :  { %40643 = vmatpush3.xpose.msra.mxu1 %v45657_v48  ;;  %40658 = vmatpush3.xpose.msra.mxu0 %v26374_v37  ;;  %v40309_v7 = vpop.f32.mrf.mxu0  ;;  %v26377_v48 = vand.u32 4294901760, %v26376_v15 }
 0xb02   :  { %40644 = vmatprep.mubr.msk.f32.mxu1 %vm41652_vm2, %v47332_v63  ;;  %40659 = vmatprep.mubr.msk.f32.mxu0 %vm41652_vm2, %v47332_v63  ;;  %v22484_v11 = vadd.f32 %v40309_v7, %v45743_v58  ;;  %v45790_v43 = vsub.f32 %v27165_v59, %v45774_v50 }
 0xb03   :  { %40652 = vmatprep.subr.mxu1 %v47332_v63  ;;  %40667 = vmatprep.subr.mxu0 %v47332_v63  ;;  %v45782_v30 = vpop.f32.mrf.mxu0 }
 0xb04   :  { %40645 = vmatmul.mubr.f32.vlgmr.msra.gmra.mxu1 %v45642_v34  ;;  %40660 = vmatmul.mubr.f32.vlgmr.msra.gmra.mxu0 %v45688_v12  ;;  %v22379_v34 = vpop.f32.mrf.mxu1  ;;  %v27238_v10 = vand.u32 4294901760, %v45790_v43  ;;  %v26829_v12 = vand.u32 4294901760, %v26828_v45 }
 0xb05   :  { %40653 = vmatpush3.xpose.msra.mxu1 %v26377_v48  ;;  %40668 = vmatpush3.xpose.msra.mxu0 %v26375_v17 }
 0xb06   :  { %40654 = vmatprep.mubr.msk.f32.mxu1 %vm41652_vm2, %v47332_v63  ;;  %40669 = vmatprep.mubr.msk.f32.mxu0 %vm41652_vm2, %v47332_v63  ;;  %v27239_v44 = vsub.f32 %v45790_v43, %v27238_v10 }
 0xb07   :  { %40662 = vmatprep.subr.mxu1 %v47332_v63  ;;  %40677 = vmatprep.subr.mxu0 %v47332_v63 }
 0xb08   :  { %40655 = vmatmul.mubr.f32.vlgmr.msra.gmra.mxu1 %v45672_v29  ;;  %40670 = vmatmul.mubr.f32.vlgmr.msra.gmra.mxu0 %v45672_v29  ;;  %v27240_v33 = vand.u32 4294901760, %v27239_v44 }
 0xb09   :  { %40663 = vmatpush3.xpose.msra.mxu1 %v45694_v32  ;;  %40678 = vmatpush3.xpose.msra.mxu0 %v45745_v22  ;;  %v40320_v21 = vpop.f32.mrf.mxu1 }
 0xb0a   :  { %40664 = vmatprep.mubr.msk.f32.mxu1 %vm41652_vm2, %v47332_v63  ;;  %40679 = vmatprep.mubr.msk.f32.mxu0 %vm41652_vm2, %v47332_v63  ;;  %v22581_v39 = vadd.f32 %v40320_v21, %v22484_v11 }
 0xb0b   :  { %40672 = vmatprep.subr.mxu1 %v47332_v63  ;;  %40687 = vmatprep.subr.mxu0 %v47332_v63  ;;  %v40331_v2 = vpop.f32.mrf.mxu0  ;;  %v45811_v20 = vpop.f32.mrf.mxu1 }
 0xb0c   :  { %40665 = vmatmul.mubr.f32.vlgmr.msra.gmra.mxu1 %v26334_v56  ;;  %40680 = vmatmul.mubr.f32.vlgmr.msra.gmra.mxu0 %v26788_v13  ;;  %v22668_v18 = vadd.f32 %v40331_v2, %v22581_v39  ;;  %v27279_v56 = vand.u32 4294901760, %v27278_v40 }
 0xb0d   :  { %40673 = vmatpush3.xpose.msra.mxu1 %v45694_v32  ;;  %40688 = vmatpush3.xpose.msra.mxu0 %v26826_v60  ;;  %v22380_v32 = vadd.f32 %v22379_v34, %v22299_v25  ;;  %v45815_v24 = vpop.f32.mrf.mxu0  ;;  %v47356_v34 = vld [vmem:[#allocation21_spill] sm:$0xff] }
 0xb0e   :  { %40674 = vmatprep.mubr.msk.f32.mxu1 %vm41652_vm2, %v47332_v63  ;;  %40689 = vmatprep.mubr.msk.f32.mxu0 %vm41652_vm2, %v47332_v63  ;;  %v27280_v28 = vsub.f32 %v27278_v40, %v27279_v56  ;;  %v45906_v54 = vrot.slane %v41624_v16, %v47356_v34 }
 0xb0f   :  { %40682 = vmatprep.subr.mxu1 %v47332_v63  ;;  %40697 = vmatprep.subr.mxu0 %v47332_v63  ;;  %v45830_v4 = vand.u32 4294901760, %v22380_v32 }
 0xb10   :  { %40675 = vmatmul.mubr.f32.vlgmr.msra.gmra.mxu1 %v45672_v29  ;;  %40690 = vmatmul.mubr.f32.vlgmr.msra.gmra.mxu0 %v45735_v47  ;;  %v27281_v38 = vand.u32 4294901760, %v27280_v28 }
 0xb11   :  { %40683 = vmatpush3.xpose.msra.mxu1 %v26829_v12  ;;  %40698 = vmatpush3.xpose.msra.mxu0 %v26827_v6  ;;  %v45844_v61 = vsub.f32 %v22380_v32, %v45830_v4 }
 0xb12   :  { %40684 = vmatprep.mubr.msk.f32.mxu1 %vm41652_vm2, %v47332_v63  ;;  %40699 = vmatprep.mubr.msk.f32.mxu0 %vm41652_vm2, %v47332_v63 }
 0xb13   :  { %40692 = vmatprep.subr.mxu1 %v47332_v63  ;;  %40707 = vmatprep.subr.mxu0 %v47332_v63  ;;  %v40342_v29 = vpop.f32.mrf.mxu1  ;;  %v47304_v46 = vand.u32 4294901760, %v45844_v61 }
 0xb14   :  { %40685 = vmatmul.mubr.f32.vlgmr.msra.gmra.mxu1 %v45717_v55  ;;  %40700 = vmatmul.mubr.f32.vlgmr.msra.gmra.mxu0 %v45717_v55  ;;  %v22753_v26 = vadd.f32 %v40342_v29, %v22668_v18 }
 0xb15   :  { %40693 = vmatpush3.xpose.msra.mxu1 %v45745_v22  ;;  %40708 = vmatpush3.xpose.msra.mxu0 %v45796_v27  ;;  %v40353_v37 = vpop.f32.mrf.mxu0  ;;  %v45840_v8 = vpop.f32.mrf.mxu1  ;;  %v27817_v15 = vsub.f32 %v45844_v61, %v47304_v46 }
 0xb16   :  { %40694 = vmatprep.mubr.msk.f32.mxu1 %vm41652_vm2, %v47332_v63  ;;  %40709 = vmatprep.mubr.msk.f32.mxu0 %vm41652_vm2, %v47332_v63  ;;  %v22842_v62 = vadd.f32 %v40353_v37, %v22753_v26  ;;  %v27_v37 = vld [vmem:[%s47264_s1 + $0x10] sm:$0xff] }
 0xb17   :  { %40702 = vmatprep.subr.mxu1 %v47332_v63  ;;  %40717 = vmatprep.subr.mxu0 %v47332_v63  ;;  %v45861_v47 = vpop.f32.mrf.mxu0  ;;  %v27818_v36 = vand.u32 4294901760, %v27817_v15  ;;  %v45928_v28 = vmul.f32 -1e+09, %v27_v37 }
 0xb18   :  { %40695 = vmatmul.mubr.f32.vlgmr.msra.gmra.mxu1 %v26786_v19  ;;  %40710 = vmatmul.mubr.f32.vlgmr.msra.gmra.mxu0 %v27240_v33 }
 0xb19   :  { %40703 = vmatpush3.xpose.msra.mxu1 %v45745_v22  ;;  %40718 = vmatpush3.xpose.msra.mxu0 %v27278_v40 }
 0xb1a   :  { %40704 = vmatprep.mubr.msk.f32.mxu1 %vm41652_vm2, %v47332_v63  ;;  %40719 = vmatprep.mubr.msk.f32.mxu0 %vm41652_vm2, %v47332_v63 }
 0xb1b   :  { %40712 = vmatprep.subr.mxu1 %v47332_v63  ;;  %40727 = vmatprep.subr.mxu0 %v47332_v63 }
 0xb1c   :  { %40705 = vmatmul.mubr.f32.vlgmr.msra.gmra.mxu1 %v45717_v55  ;;  %40720 = vmatmul.mubr.f32.vlgmr.msra.gmra.mxu0 %v45790_v43  ;;  %v40364_v17 = vpop.f32.mrf.mxu1 }
 0xb1d   :  { %40713 = vmatpush3.xpose.msra.mxu1 %v27281_v38  ;;  %40728 = vmatpush3.xpose.msra.mxu0 %v27279_v56  ;;  %v45863_v9 = vadd.f32 %v40364_v17, %v22842_v62 }
 0xb1e   :  { %40714 = vmatprep.mubr.msk.f32.mxu1 %vm41652_vm2, %v47332_v63  ;;  %40729 = vmatprep.mubr.msk.f32.mxu0 %vm41652_vm2, %v47332_v63  ;;  %v45890_v53 = vpop.f32.mrf.mxu1 }
 0xb1f   :  { %40722 = vmatprep.subr.mxu1 %v47332_v63  ;;  %40737 = vmatprep.subr.mxu0 %v47332_v63  ;;  %v40375_v55 = vpop.f32.mrf.mxu0 }
 0xb20   :  { %40715 = vmatmul.mubr.f32.vlgmr.msra.gmra.mxu1 %v45774_v50  ;;  %40730 = vmatmul.mubr.f32.vlgmr.msra.gmra.mxu0 %v45774_v50  ;;  %v23021_v22 = vadd.f32 %v40375_v55, %v45858_v3 }
 0xb21   :  { %40723 = vmatpush3.xpose.msra.mxu1 %v45796_v27  ;;  %40724 = vmatprep.mubr.msk.f32.mxu1 %vm41652_vm2, %v47332_v63  ;;  %v45892_v52 = vpop.f32.mrf.mxu0 }
 0xb22   :  { %40732 = vmatprep.subr.mxu1 %v47332_v63  ;;  %40738 = vmatpush3.msra.mxu0 %v45830_v4 }
 0xb23   :  { %40739 = vmatprep.mubr.msk.f32.mxu0 %vm41652_vm2, %v47332_v63  ;;  %40747 = vmatprep.subr.mxu0 %v47332_v63 }
 0xb24   :  { %40725 = vmatmul.mubr.f32.vlgmr.msra.gmra.mxu1 %v27238_v10 }
 0xb25   :  { %40733 = vmatpush3.xpose.msra.mxu1 %v45796_v27  ;;  %40734 = vmatprep.mubr.msk.f32.mxu1 %vm41652_vm2, %v47332_v63 }
 0xb26   :  { %40742 = vmatprep.subr.mxu1 %v47332_v63 }
 0xb27   :  { %v40386_v7 = vpop.f32.mrf.mxu1 }
 0xb28   :  { %40735 = vmatmul.mubr.f32.vlgmr.msra.gmra.mxu1 %v45774_v50  ;;  %v23118_v19 = vadd.f32 %v40386_v7, %v23021_v22 }
 0xb29   :  { %40743 = vmatpush3.msra.mxu1 %v27818_v36  ;;  %v40397_v11 = vpop.f32.mrf.mxu0  ;;  %40744 = vmatprep.mubr.msk.f32.mxu1 %vm41652_vm2, %v47332_v63  ;;  %v45899_v59 = vpop.f32.mrf.mxu1 }
 0xb2a   :  { %v23205_v0 = vadd.f32 %v40397_v11, %v23118_v19  ;;  %40752 = vmatprep.subr.mxu1 %v47332_v63 }
 0xb2b   :  { %v45901_v60 = vpop.f32.mrf.mxu0 }
 0xb31   :  { %v40408_v48 = vpop.f32.mrf.mxu1 }
 0xb32   :  { %v23290_v57 = vadd.f32 %v40408_v48, %v23205_v0 }
 0xb33   :  { %v40419_v42 = vpop.f32.mrf.mxu0  ;;  %v45903_v6 = vpop.f32.mrf.mxu1 }
 0xb34   :  { %v23379_v41 = vadd.f32 %v40419_v42, %v23290_v57 }
 0xb35   :  { %v45908_v49 = vpop.f32.mrf.mxu0 }
 0xb3a   :  { %v40430_v50 = vpop.f32.mrf.mxu1 }
 0xb3b   :  { %v45910_v21 = vadd.f32 %v40430_v50, %v23379_v41 }
 0xb3c   :  { %v45913_v39 = vpop.f32.mrf.mxu1 }
 0xb3d   :  { %v40441_v13 = vpop.f32.mrf.mxu0 }
 0xb3e   :  { %v23558_v43 = vadd.f32 %v40441_v13, %v45906_v54 }
 0xb3f   :  { %v45915_v27 = vpop.f32.mrf.mxu0 }
 0xb45   :  { %v40452_v45 = vpop.f32.mrf.mxu1 }
 0xb46   :  { %v23655_v2 = vadd.f32 %v40452_v45, %v23558_v43 }
 0xb47   :  { %v40463_v18 = vpop.f32.mrf.mxu0  ;;  %v45919_v40 = vpop.f32.mrf.mxu1 }
 0xb48   :  { %v23742_v25 = vadd.f32 %v40463_v18, %v23655_v2 }
 0xb49   :  { %v45917_v10 = vpop.f32.mrf.mxu0 }
 0xb50   :  { %v40485_v12 = vpop.f32.mrf.mxu0  ;;  %v40474_v32 = vpop.f32.mrf.mxu1 }
 0xb51   :  { %v23827_v44 = vadd.f32 %v40474_v32, %v23742_v25 }
 0xb52   :  { %v45921_v56 = vpop.f32.mrf.mxu0  ;;  %v45923_v26 = vpop.f32.mrf.mxu1 }
 0xb53   :  { %v23916_v29 = vadd.f32 %v40485_v12, %v23827_v44 }
 0xb55   :  { %v24078_v33 = vpop.f32.mrf.mxu0 }
 0xb56   :  { %v24079_v15 = vadd.f32 %v24078_v33, %v45928_v28 }
 0xb57   :  { %v40501_v62 = vpop.f32.mrf.mxu0 }
 0xb58   :  { %v40496_v38 = vpop.f32.mrf.mxu1 }
 0xb59   :  { %v45930_v17 = vadd.f32 %v40496_v38, %v23916_v29  ;;  %v24228_v16 = vpop.f32.mrf.mxu0 }
 0xb5a   :  { %v45932_v55 = vpop.f32.mrf.mxu1 }
 0xb5b   :  { %47357 = vst [vmem:[#allocation12_spill] sm:$0xff] %v45930_v17  ;;  %v40511_v22 = vpop.f32.mrf.mxu0 }
 0xb5d   :  { %v24154_v36 = vpop.f32.mrf.mxu1 }
 0xb5e   :  { %v24155_v7 = vadd.f32 %v24154_v36, %v24079_v15  ;;  %v24376_v19 = vpop.f32.mrf.mxu0 }
 0xb5f   :  { %v40506_v11 = vpop.f32.mrf.mxu1 }
 0xb60   :  { %v40521_v0 = vpop.f32.mrf.mxu0  ;;  %v24229_v48 = vadd.f32 %v24228_v16, %v24155_v7 }
 0xb61   :  { %v24302_v57 = vpop.f32.mrf.mxu1 }
 0xb62   :  { %v24303_v42 = vadd.f32 %v24302_v57, %v24229_v48 }
 0xb63   :  { %v40516_v41 = vpop.f32.mrf.mxu1 }
 0xb64   :  { %v24377_v50 = vadd.f32 %v24376_v19, %v24303_v42 }
 0xb65   :  { %v24448_v13 = vpop.f32.mrf.mxu1 }
 0xb66   :  { %v45935_v43 = vadd.f32 %v24448_v13, %v24377_v50 }
 0xb67   :  { %v40526_v45 = vpop.f32.mrf.mxu1 }
 0xb68   :  { %v27616_v2 = vsel %vm10113_vm3, %v45935_v43, -inf }
 0xb69   :  { %27617 = vmax.xlane.f32.xlu0 %v27616_v2 }
 0xb6d   :  { %v24530_v18 = vpop.f32.mrf.mxu0 }
 0xb6e   :  { %v24531_v44 = vadd.f32 %v24530_v18, %v45928_v28 }
 0xb6f   :  { %v40531_v25 = vpop.f32.mrf.mxu0 }
 0xb71   :  { %v24680_v12 = vpop.f32.mrf.mxu0 }
 0xb73   :  { %v40541_v32 = vpop.f32.mrf.mxu0 }
 0xb75   :  { %v24606_v29 = vpop.f32.mrf.mxu1  ;;  %v24828_v37 = vpop.f32.mrf.mxu0 }
 0xb76   :  { %v24607_v33 = vadd.f32 %v24606_v29, %v24531_v44 }
 0xb77   :  { %v40536_v62 = vpop.f32.mrf.mxu1  ;;  %v40551_v38 = vpop.f32.mrf.mxu0 }
 0xb78   :  { %v24681_v16 = vadd.f32 %v24680_v12, %v24607_v33 }
 0xb79   :  { %v24754_v22 = vpop.f32.mrf.mxu1 }
 0xb7a   :  { %v24755_v15 = vadd.f32 %v24754_v22, %v24681_v16 }
 0xb7b   :  { %v40546_v36 = vpop.f32.mrf.mxu1 }
 0xb7c   :  { %v24829_v7 = vadd.f32 %v24828_v37, %v24755_v15 }
 0xb7d   :  { %v24900_v19 = vpop.f32.mrf.mxu1 }
 0xb7e   :  { %v45940_v11 = vadd.f32 %v24900_v19, %v24829_v7 }
 0xb7f   :  { %v40556_v0 = vpop.f32.mrf.mxu1 }
 0xb80   :  { %v27619_v48 = vsel %vm10113_vm3, %v45940_v11, -inf }
 0xb81   :  { %27620 = vmax.xlane.f32.xlu1 %v27619_v48 }
 0xb8b   :  { %v24982_v57 = vpop.f32.mrf.mxu0 }
 0xb8c   :  { %v24983_v13 = vadd.f32 %v24982_v57, %v45928_v28 }
 0xb8d   :  { %v40561_v42 = vpop.f32.mrf.mxu0 }
 0xb8f   :  { %v25132_v41 = vpop.f32.mrf.mxu0 }
 0xb91   :  { %v40571_v50 = vpop.f32.mrf.mxu0 }
 0xb93   :  { %v25058_v45 = vpop.f32.mrf.mxu1  ;;  %v25280_v2 = vpop.f32.mrf.mxu0 }
 0xb94   :  { %v25059_v18 = vadd.f32 %v25058_v45, %v24983_v13  ;;  %v28_v45 = vld [vmem:[%s47264_s1 + $0x18] sm:$0xff] }
 0xb95   :  { %v40566_v25 = vpop.f32.mrf.mxu1  ;;  %v40581_v12 = vpop.f32.mrf.mxu0 }
 0xb96   :  { %v25133_v32 = vadd.f32 %v25132_v41, %v25059_v18 }
 0xb97   :  { %v25206_v44 = vpop.f32.mrf.mxu1 }
 0xb98   :  { %v25207_v29 = vadd.f32 %v25206_v44, %v25133_v32  ;;  %v32_v32 = vmul.f32 -1e+09, %v28_v45 }
 0xb99   :  { %v40576_v37 = vpop.f32.mrf.mxu1 }
 0xb9a   :  { %v25281_v33 = vadd.f32 %v25280_v2, %v25207_v29 }
 0xb9b   :  { %v25352_v62 = vpop.f32.mrf.mxu1 }
 0xb9c   :  { %v45945_v38 = vadd.f32 %v25352_v62, %v25281_v33 }
 0xb9d   :  { %v40586_v16 = vpop.f32.mrf.mxu1 }
 0xba8   :  { %v25434_v22 = vpop.f32.mrf.mxu0 }
 0xba9   :  { %v25435_v19 = vadd.f32 %v25434_v22, %v45928_v28 }
 0xbaa   :  { %v40591_v15 = vpop.f32.mrf.mxu0 }
 0xbac   :  { %v25584_v36 = vpop.f32.mrf.mxu0 }
 0xbae   :  { %v40601_v7 = vpop.f32.mrf.mxu0 }
 0xbb0   :  { %v25510_v0 = vpop.f32.mrf.mxu1  ;;  %v25732_v48 = vpop.f32.mrf.mxu0 }
 0xbb1   :  { %v25511_v57 = vadd.f32 %v25510_v0, %v25435_v19 }
 0xbb2   :  { %v40596_v42 = vpop.f32.mrf.mxu1  ;;  %v40611_v50 = vpop.f32.mrf.mxu0 }
 0xbb3   :  { %v25585_v41 = vadd.f32 %v25584_v36, %v25511_v57 }
 0xbb4   :  { %v25658_v13 = vpop.f32.mrf.mxu1  ;;  %v25886_v2 = vpop.f32.mrf.mxu0 }
 0xbb5   :  { %v25659_v18 = vadd.f32 %v25658_v13, %v25585_v41  ;;  %v25887_v16 = vadd.f32 %v25886_v2, %v32_v32 }
 0xbb6   :  { %v40606_v25 = vpop.f32.mrf.mxu1  ;;  %v40621_v12 = vpop.f32.mrf.mxu0 }
 0xbb7   :  { %v25733_v44 = vadd.f32 %v25732_v48, %v25659_v18 }
 0xbb8   :  { %v25804_v29 = vpop.f32.mrf.mxu1  ;;  %v26036_v37 = vpop.f32.mrf.mxu0 }
 0xbb9   :  { %v45951_v28 = vadd.f32 %v25804_v29, %v25733_v44 }
 0xbba   :  { %v40616_v33 = vpop.f32.mrf.mxu1  ;;  %v40631_v62 = vpop.f32.mrf.mxu0 }
 0xbbc   :  { %v25962_v22 = vpop.f32.mrf.mxu1  ;;  %v26184_v15 = vpop.f32.mrf.mxu0 }
 0xbbd   :  { %v25963_v36 = vadd.f32 %v25962_v22, %v25887_v16 }
 0xbbe   :  { %v40626_v7 = vpop.f32.mrf.mxu1  ;;  %v40641_v19 = vpop.f32.mrf.mxu0 }
 0xbbf   :  { %v26037_v0 = vadd.f32 %v26036_v37, %v25963_v36 }
 0xbc0   :  { %v26110_v57 = vpop.f32.mrf.mxu1  ;;  %v26338_v42 = vpop.f32.mrf.mxu0 }
 0xbc1   :  { %v26111_v50 = vadd.f32 %v26110_v57, %v26037_v0  ;;  %v26339_v41 = vadd.f32 %v26338_v42, %v32_v32 }
 0xbc2   :  { %v40636_v13 = vpop.f32.mrf.mxu1  ;;  %v40651_v45 = vpop.f32.mrf.mxu0 }
 0xbc3   :  { %v26185_v48 = vadd.f32 %v26184_v15, %v26111_v50 }
 0xbc4   :  { %v26256_v18 = vpop.f32.mrf.mxu1  ;;  %v26488_v25 = vpop.f32.mrf.mxu0 }
 0xbc5   :  { %v45953_v12 = vadd.f32 %v26256_v18, %v26185_v48 }
 0xbc6   :  { %v40646_v44 = vpop.f32.mrf.mxu1  ;;  %v40661_v29 = vpop.f32.mrf.mxu0 }
 0xbc8   :  { %v26414_v2 = vpop.f32.mrf.mxu1  ;;  %v26636_v33 = vpop.f32.mrf.mxu0 }
 0xbc9   :  { %v26415_v62 = vadd.f32 %v26414_v2, %v26339_v41 }
 0xbca   :  { %v40656_v16 = vpop.f32.mrf.mxu1  ;;  %v40671_v22 = vpop.f32.mrf.mxu0 }
 0xbcb   :  { %v26489_v7 = vadd.f32 %v26488_v25, %v26415_v62 }
 0xbcc   :  { %v26562_v37 = vpop.f32.mrf.mxu1  ;;  %v26790_v36 = vpop.f32.mrf.mxu0 }
 0xbcd   :  { %v26563_v19 = vadd.f32 %v26562_v37, %v26489_v7  ;;  %v26791_v0 = vadd.f32 %v26790_v36, %v32_v32 }
 0xbce   :  { %v40666_v57 = vpop.f32.mrf.mxu1  ;;  %v40681_v42 = vpop.f32.mrf.mxu0 }
 0xbcf   :  { %v26637_v13 = vadd.f32 %v26636_v33, %v26563_v19 }
 0xbd0   :  { %v26708_v15 = vpop.f32.mrf.mxu1  ;;  %v26940_v50 = vpop.f32.mrf.mxu0 }
 0xbd1   :  { %v45955_v45 = vadd.f32 %v26708_v15, %v26637_v13 }
 0xbd2   :  { %v40676_v48 = vpop.f32.mrf.mxu1  ;;  %v40691_v18 = vpop.f32.mrf.mxu0 }
 0xbd4   :  { %v26866_v44 = vpop.f32.mrf.mxu1  ;;  %v27088_v29 = vpop.f32.mrf.mxu0 }
 0xbd5   :  { %v26867_v46 = vadd.f32 %v26866_v44, %v26791_v0 }
 0xbd6   :  { %v40686_v41 = vpop.f32.mrf.mxu1  ;;  %v40701_v2 = vpop.f32.mrf.mxu0 }
 0xbd7   :  { %v26941_v16 = vadd.f32 %v26940_v50, %v26867_v46 }
 0xbd8   :  { %v27014_v25 = vpop.f32.mrf.mxu1  ;;  %v27242_v62 = vpop.f32.mrf.mxu0 }
 0xbd9   :  { %v27015_v22 = vadd.f32 %v27014_v25, %v26941_v16  ;;  %v27243_v7 = vadd.f32 %v27242_v62, %v32_v32 }
 0xbda   :  { %v40696_v37 = vpop.f32.mrf.mxu1  ;;  %v40711_v36 = vpop.f32.mrf.mxu0 }
 0xbdb   :  { %v27089_v57 = vadd.f32 %v27088_v29, %v27015_v22 }
 0xbdc   :  { %v27160_v33 = vpop.f32.mrf.mxu1  ;;  %v27392_v19 = vpop.f32.mrf.mxu0 }
 0xbdd   :  { %v45957_v42 = vadd.f32 %v27160_v33, %v27089_v57 }
 0xbde   :  { %v40706_v13 = vpop.f32.mrf.mxu1  ;;  %v40721_v15 = vpop.f32.mrf.mxu0 }
 0xbdf   :  { %v27625_v13 = vsel %vm10113_vm3, %v45951_v28, -inf }
 0xbe0   :  { %v27318_v48 = vpop.f32.mrf.mxu1  ;;  %v27540_v18 = vpop.f32.mrf.mxu0 }
 0xbe1   :  { %v27319_v51 = vadd.f32 %v27318_v48, %v27243_v7 }
 0xbe2   :  { %v40716_v0 = vpop.f32.mrf.mxu1  ;;  %v40731_v44 = vpop.f32.mrf.mxu0 }
 0xbe3   :  { %v27393_v41 = vadd.f32 %v27392_v19, %v27319_v51  ;;  %v27622_v51 = vsel %vm10113_vm3, %v45945_v38, -inf }
 0xbe4   :  { %v27466_v46 = vpop.f32.mrf.mxu1 }
 0xbe5   :  { %v27467_v50 = vadd.f32 %v27466_v46, %v27393_v41 }
 0xbe6   :  { %v40726_v2 = vpop.f32.mrf.mxu1 }
 0xbe7   :  { %v27541_v16 = vadd.f32 %v27540_v18, %v27467_v50  ;;  %v22474_v18 = vadd.f32 %v45782_v30, %v45743_v58 }
 0xbe8   :  { %v27612_v32 = vpop.f32.mrf.mxu1 }
 0xbe9   :  { %v45959_v25 = vadd.f32 %v27612_v32, %v27541_v16 }
 0xbea   :  { %v40736_v29 = vpop.f32.mrf.mxu1 }
 0xbf2   :  { %v27618_v62 = vpop.xlane.xlu0 %27617 }
 0xbf3   :  { %v27640_v22 = vsub.f32 %v45935_v43, %v27618_v62  ;;  %v27628_v43 = vsel %vm10113_vm3, %v45953_v12, -inf }
 0xbf5   :  { %v27648_v37 = vmul.f32 1.442695, %v27640_v22 }
 0xbf7   :  { %41578 = vpow2.f32 %v27648_v37 }
 0xc04   :  { %v41579_v36 = vpop.eup %41578 }
 0xc05   :  { %v27664_v57 = vsel %vm10113_vm3, %v41579_v36, 0.0 }
 0xc06   :  { %27665 = vadd.xlane.f32.xlu0 %v27664_v57 }
 0xc0a   :  { %v27621_v7 = vpop.xlane.xlu1 %27620  ;;  %27623 = vmax.xlane.f32.xlu0 %v27622_v51 }
 0xc0b   :  { %v27641_v33 = vsub.f32 %v45940_v11, %v27621_v7  ;;  %v22575_v11 = vadd.f32 %v45811_v20, %v22474_v18 }
 0xc0d   :  { %v27650_v19 = vmul.f32 1.442695, %v27641_v33  ;;  %v22661_v0 = vadd.f32 %v45815_v24, %v22575_v11  ;;  %v36_v11 = vld [vmem:[%s47267_s4 + $0x18] sm:$0xff] }
 0xc0e   :  { %27626 = vmax.xlane.f32.xlu0 %v27625_v13 }
 0xc0f   :  { %41580 = vpow2.f32 %v27650_v19  ;;  %v22745_v44 = vadd.f32 %v45840_v8, %v22661_v0 }
 0xc11   :  { %v22836_v46 = vadd.f32 %v45861_v47, %v22745_v44  ;;  %v47358_v44 = vld [vmem:[#allocation13_spill] sm:$0xff] }
 0xc12   :  { %27629 = vmax.xlane.f32.xlu0 %v27628_v43 }
 0xc13   :  { %v22917_v16 = vadd.f32 %v45890_v53, %v22836_v46  ;;  %v47359_v46 = vand.u32 4294901760, %v45844_v61 }
 0xc15   :  { %v45983_v30 = vand.u32 4294901760, %v22917_v16 }
 0xc17   :  { %v45987_v47 = vsub.f32 %v22917_v16, %v45983_v30  ;;  %v47360_v16 = vld [vmem:[#allocation18_spill] sm:$0xff] }
 0xc19   :  { %v28265_v57 = vand.u32 4294901760, %v45987_v47 }
 0xc1b   :  { %v28266_v7 = vsub.f32 %v45987_v47, %v28265_v57 }
 0xc1c   :  { %v45970_v15 = vpop.eup %41580 }
 0xc1d   :  { %v27667_v48 = vsel %vm10113_vm3, %v45970_v15, 0.0 }
 0xc1e   :  { %27668 = vadd.xlane.f32.xlu1 %v27667_v48  ;;  %v28267_v48 = vand.u32 4294901760, %v28266_v7 }
 0xc8f   :  { %v27666_v41 = vpop.xlane.xlu0 %27665 }
 0xc90   :  { %41582 = vrcp.f32 %v27666_v41  ;;  %v46024_v41 = vrot.slane %v36_v11, %v47358_v44 }
 0xc93   :  { %v27624_v50 = vpop.xlane.xlu0 %27623 }
 0xc94   :  { %v27642_v2 = vsub.f32 %v45945_v38, %v27624_v50  ;;  %v27631_v50 = vsel %vm10113_vm3, %v45955_v45, -inf }
 0xc96   :  { %v27652_v32 = vmul.f32 1.442695, %v27642_v2  ;;  %v27634_v2 = vsel %vm10113_vm3, %v45957_v42, -inf }
 0xc97   :  { %v27627_v29 = vpop.xlane.xlu0 %27626 }
 0xc98   :  { %41584 = vpow2.f32 %v27652_v32  ;;  %v27643_v58 = vsub.f32 %v45951_v28, %v27627_v29  ;;  %v17498_v32 = vadd.f32 %v46024_v41, %v47360_v16 }
 0xc9a   :  { %v27654_v20 = vmul.f32 1.442695, %v27643_v58  ;;  %v27637_v58 = vsel %vm10113_vm3, %v45959_v25, -inf }
 0xc9b   :  { %v27630_v24 = vpop.xlane.xlu0 %27629 }
 0xc9c   :  { %41586 = vpow2.f32 %v27654_v20  ;;  %v27644_v8 = vsub.f32 %v45953_v12, %v27630_v24  ;;  %v41625_v20 = vld [vmem:[%s47263_s0] sm:$0xff] }
 0xc9d   :  { %v41583_v62 = vpop.eup %41582  ;;  %v46048_v24 = vadd.f32 %v41625_v20, %v17498_v32 }
 0xc9e   :  { %v27689_v22 = vmul.f32 %v41583_v62, %v41579_v36  ;;  %v27656_v38 = vmul.f32 1.442695, %v27644_v8 }
 0xca0   :  { %41588 = vpow2.f32 %v27656_v38  ;;  %v27705_v53 = vsel %vm10113_vm3, %v27689_v22, 0  ;;  %v17502_v22 = vsel %vm54_vm0, %v46048_v24, 0.0 }
 0xca1   :  { %v27773_v37 = vand.u32 4294901760, %v27705_v53 }
 0xca3   :  { %v27774_v28 = vsub.f32 %v27705_v53, %v27773_v37  ;;  %40745 = vmatmul.mubr.f32.vlgmr.msra.gmra.mxu1 %v27773_v37 }
 0xca4   :  { %40753 = vmatpush3.msra.mxu1 %v45830_v4  ;;  %40754 = vmatprep.mubr.msk.f32.mxu1 %vm41652_vm2, %v47332_v63 }
 0xca5   :  { %v45994_v12 = vpop.eup %41584  ;;  %40762 = vmatprep.subr.mxu1 %v47332_v63  ;;  %v27775_v51 = vand.u32 4294901760, %v27774_v28 }
 0xca6   :  { %v27670_v36 = vsel %vm10113_vm3, %v45994_v12, 0.0 }
 0xca7   :  { %40755 = vmatmul.mubr.f32.vlgmr.msra.gmra.mxu1 %v27775_v51  ;;  %v27669_v33 = vpop.xlane.xlu1 %27668  ;;  %27671 = vadd.xlane.f32.xlu1 %v27670_v36  ;;  %v27776_v19 = vsub.f32 %v27774_v28, %v27775_v51 }
 0xca8   :  { %40763 = vmatpush3.msra.mxu1 %v45830_v4  ;;  %41590 = vrcp.f32 %v27669_v33  ;;  %40764 = vmatprep.mubr.msk.f32.mxu1 %vm41652_vm2, %v47332_v63 }
 0xca9   :  { %v46005_v13 = vpop.eup %41586  ;;  %40772 = vmatprep.subr.mxu1 %v47332_v63  ;;  %v27777_v43 = vand.u32 4294901760, %v27776_v19 }
 0xcaa   :  { %v27673_v18 = vsel %vm10113_vm3, %v46005_v13, 0.0 }
 0xcab   :  { %40740 = vmatmul.mubr.f32.vlgmr.msra.gmra.mxu0 %v27777_v43  ;;  %40765 = vmatmul.mubr.f32.vlgmr.msra.gmra.mxu1 %v27773_v37 }
 0xcac   :  { %40748 = vmatpush3.msra.mxu0 %v45844_v61  ;;  %40773 = vmatpush3.msra.mxu1 %v28267_v48 }
 0xcad   :  { %v46014_v4 = vpop.eup %41588  ;;  %27674 = vadd.xlane.f32.xlu1 %v27673_v18  ;;  %40749 = vmatprep.mubr.msk.f32.mxu0 %vm41652_vm2, %v47332_v63 }
 0xcae   :  { %40757 = vmatprep.subr.mxu0 %v47332_v63  ;;  %v27676_v0 = vsel %vm10113_vm3, %v46014_v4, 0.0  ;;  %40774 = vmatprep.mubr.msk.f32.mxu1 %vm41652_vm2, %v47332_v63 }
 0xcaf   :  { %40750 = vmatmul.mubr.f32.vlgmr.msra.gmra.mxu0 %v27774_v28  ;;  %27677 = vadd.xlane.f32.xlu0 %v27676_v0 }
 0xcb0   :  { %40758 = vmatpush3.msra.mxu0 %v47359_v46  ;;  %40759 = vmatprep.mubr.msk.f32.mxu0 %vm41652_vm2, %v47332_v63 }
 0xcb1   :  { %27632 = vmax.xlane.f32.xlu1 %v27631_v50  ;;  %40767 = vmatprep.subr.mxu0 %v47332_v63 }
 0xcb2   :  { %40782 = vmatprep.subr.mxu1 %v47332_v63 }
 0xcb3   :  { %40760 = vmatmul.mubr.f32.vlgmr.msra.gmra.mxu0 %v27773_v37  ;;  %27635 = vmax.xlane.f32.xlu0 %v27634_v2 }
 0xcb4   :  { %40768 = vmatpush3.msra.mxu0 %v45983_v30  ;;  %40769 = vmatprep.mubr.msk.f32.mxu0 %vm41652_vm2, %v47332_v63 }
 0xcb5   :  { %v41591_v61 = vpop.eup %41590  ;;  %40777 = vmatprep.subr.mxu0 %v47332_v63 }
 0xcb6   :  { %v27691_v29 = vmul.f32 %v41591_v61, %v45970_v15 }
 0xcb7   :  { %27638 = vmax.xlane.f32.xlu0 %v27637_v58 }
 0xcb8   :  { %v28154_v8 = vsel %vm10113_vm3, %v27691_v29, 0 }
 0xcb9   :  { %v28222_v62 = vand.u32 4294901760, %v28154_v8 }
 0xcbb   :  { %v28223_v38 = vsub.f32 %v28154_v8, %v28222_v62  ;;  %40775 = vmatmul.mubr.f32.vlgmr.msra.gmra.mxu1 %v28222_v62  ;;  %17503 = vadd.xlane.f32.xlu0 %v17502_v22 }
 0xcbc   :  { %40783 = vmatpush3.msra.mxu1 %v45983_v30  ;;  %40784 = vmatprep.mubr.msk.f32.mxu1 %vm41652_vm2, %v47332_v63 }
 0xcbd   :  { %40792 = vmatprep.subr.mxu1 %v47332_v63  ;;  %v28224_v15 = vand.u32 4294901760, %v28223_v38 }
 0xcbf   :  { %40785 = vmatmul.mubr.f32.vlgmr.msra.gmra.mxu1 %v28224_v15  ;;  %v28225_v53 = vsub.f32 %v28223_v38, %v28224_v15 }
 0xcc0   :  { %40793 = vmatpush3.msra.mxu1 %v45983_v30  ;;  %40794 = vmatprep.mubr.msk.f32.mxu1 %vm41652_vm2, %v47332_v63  ;;  %v36372_v30 = vld [vmem:[%s47266_s3 + $0x58] sm:$0xff] }
 0xcc1   :  { %v28226_v37 = vand.u32 4294901760, %v28225_v53  ;;  %40804 = vmatprep.subr.mxu1 %v47332_v63  ;;  %v46077_v28 = vand.u32 4294901760, %v36372_v30 }
 0xcc3   :  { %40770 = vmatmul.mubr.f32.vlgmr.msra.gmra.mxu0 %v28226_v37  ;;  %40795 = vmatmul.mubr.f32.vlgmr.msra.gmra.mxu1 %v28222_v62 }
 0xcc4   :  { %40778 = vmatpush3.msra.mxu0 %v45987_v47  ;;  %40779 = vmatprep.mubr.msk.f32.mxu0 %vm41652_vm2, %v47332_v63  ;;  %v36371_v47 = vld [vmem:[%s47266_s3 + $0x50] sm:$0xff] }
 0xcc5   :  { %40787 = vmatprep.subr.mxu0 %v47332_v63  ;;  %40808 = vmatprep.mubr.msk.f32.mxu1 %vm41652_vm2, %v47332_v63  ;;  %v46085_v51 = vand.u32 4294901760, %v36371_v47 }
 0xcc7   :  { %40780 = vmatmul.mubr.f32.vlgmr.msra.gmra.mxu0 %v28223_v38  ;;  %v46093_v7 = vsub.f32 %v36371_v47, %v46085_v51 }
 0xcc8   :  { %40788 = vmatpush3.msra.mxu0 %v28265_v57  ;;  %40789 = vmatprep.mubr.msk.f32.mxu0 %vm41652_vm2, %v47332_v63  ;;  %v46083_v57 = vsub.f32 %v36372_v30, %v46077_v28  ;;  %v47361_v30 = vld [vmem:[#allocation11_spill] sm:$0xff] }
 0xcc9   :  { %40797 = vmatprep.subr.mxu0 %v47332_v63  ;;  %v46100_v19 = vand.u32 4294901760, %v46093_v7 }
 0xcca   :  { %v46090_v36 = vand.u32 4294901760, %v46083_v57 }
 0xccb   :  { %40790 = vmatmul.mubr.f32.vlgmr.msra.gmra.mxu0 %v28222_v62  ;;  %v28721_v48 = vsub.f32 %v46093_v7, %v46100_v19 }
 0xccc   :  { %40801 = vmatprep.mubr.msk.f32.mxu0 %vm41652_vm2, %v47332_v63  ;;  %40798 = vmatpush3.msra.mxu0 %v46077_v28  ;;  %v28714_v33 = vsub.f32 %v46083_v57, %v46090_v36 }
 0xccd   :  { %40799 = vmatprep.subr.mxu0 %v47332_v63  ;;  %v46107_v18 = vand.u32 4294901760, %v28721_v48  ;;  %v41626_v48 = vld [vmem:[%s47263_s0 + $0x8] sm:$0xff] }
 0xcce   :  { %40800 = vmatpush3.msra.mxu0 %v46085_v51  ;;  %v46102_v43 = vand.u32 4294901760, %v28714_v33 }
 0xccf   :  { %40811 = vmatprep.subr.mxu0 %v47332_v63 }
 0xcd0   :  { %40805 = vmatpush3.msra.mxu1 %v46102_v43 }
 0xcd1   :  { %40806 = vmatprep.subr.mxu1 %v47332_v63 }
 0xcd2   :  { %40807 = vmatpush3.msra.mxu1 %v46107_v18 }
 0xcd3   :  { %40818 = vmatprep.subr.mxu1 %v47332_v63 }
 0xd30   :  { %v46112_v11 = vpop.xlane.xlu1 %27671 }
 0xd36   :  { %v46114_v0 = vpop.xlane.xlu1 %27674 }
 0xd38   :  { %v46116_v46 = vpop.xlane.xlu0 %27677 }
 0xd3a   :  { %v27633_v50 = vpop.xlane.xlu1 %27632 }
 0xd3b   :  { %v27645_v2 = vsub.f32 %v45955_v45, %v27633_v50 }
 0xd3c   :  { %v27636_v16 = vpop.xlane.xlu0 %27635 }
 0xd3d   :  { %v27658_v32 = vmul.f32 1.442695, %v27645_v2  ;;  %v27646_v61 = vsub.f32 %v45957_v42, %v27636_v16 }
 0xd3f   :  { %41592 = vpow2.f32 %v27658_v32  ;;  %v27660_v29 = vmul.f32 1.442695, %v27646_v61 }
 0xd40   :  { %v27639_v58 = vpop.xlane.xlu0 %27638 }
 0xd41   :  { %41594 = vpow2.f32 %v27660_v29  ;;  %v27647_v20 = vsub.f32 %v45959_v25, %v27639_v58 }
 0xd43   :  { %v27662_v8 = vmul.f32 1.442695, %v27647_v20 }
 0xd44   :  { %v17504_v62 = vpop.xlane.xlu0 %17503 }
 0xd45   :  { %41596 = vpow2.f32 %v27662_v8  ;;  %v17509_v22 = vmul.f32 0.03125, %v17504_v62 }
 0xd46   :  { %41598 = vrcp.f32 %v46112_v11 }
 0xd47   :  { %v46122_v38 = vsub.f32 %v46048_v24, %v17509_v22  ;;  %v17499_v24 = vadd.f32 %v46024_v41, %v47361_v30  ;;  %41600 = vrcp.f32 %v46114_v0 }
 0xd48   :  { %41602 = vrcp.f32 %v46116_v46 }
 0xd49   :  { %v17513_v45 = vmul.f32 %v46122_v38, %v46122_v38  ;;  %v46144_v50 = vadd.f32 %v41626_v48, %v17499_v24 }
 0xd4b   :  { %v17515_v15 = vsel %vm54_vm0, %v17513_v45, 0.0  ;;  %v17505_v2 = vsel %vm54_vm0, %v46144_v50, 0.0 }
 0xd4c   :  { %v46127_v53 = vpop.eup %41592  ;;  %17516 = vadd.xlane.f32.xlu0 %v17515_v15 }
 0xd4d   :  { %v27679_v42 = vsel %vm10113_vm3, %v46127_v53, 0.0 }
 0xd4e   :  { %v46131_v37 = vpop.eup %41594  ;;  %27680 = vadd.xlane.f32.xlu1 %v27679_v42 }
 0xd4f   :  { %v27682_v25 = vsel %vm10113_vm3, %v46131_v37, 0.0 }
 0xd52   :  { %v46137_v47 = vpop.eup %41596  ;;  %27683 = vadd.xlane.f32.xlu1 %v27682_v25 }
 0xd53   :  { %47362 = vst [vmem:[#allocation6_spill] sm:$0xff] %v46137_v47  ;;  %v27685_v33 = vsel %vm10113_vm3, %v46137_v47, 0.0 }
 0xd56   :  { %27686 = vadd.xlane.f32.xlu1 %v27685_v33 }
 0xd5a   :  { %17506 = vadd.xlane.f32.xlu1 %v17505_v2  ;;  %v23011_v2 = vadd.f32 %v45892_v52, %v45858_v3 }
 0xd63   :  { %v27855_v16 = vpop.f32.mrf.mxu1 }
 0xd65   :  { %v40746_v32 = vpop.f32.mrf.mxu1 }
 0xd67   :  { %v28003_v41 = vpop.f32.mrf.mxu1 }
 0xd69   :  { %v40756_v61 = vpop.f32.mrf.mxu1 }
 0xd6b   :  { %v27779_v29 = vpop.f32.mrf.mxu0  ;;  %v28149_v58 = vpop.f32.mrf.mxu1 }
 0xd6c   :  { %v27856_v61 = vadd.f32 %v27855_v16, %v27779_v29 }
 0xd6d   :  { %v40741_v20 = vpop.f32.mrf.mxu0  ;;  %v40766_v8 = vpop.f32.mrf.mxu1 }
 0xd6e   :  { %v36370_v20 = vld [vmem:[%s47266_s3 + $0x48] sm:$0xff] }
 0xd6f   :  { %v27929_v62 = vpop.f32.mrf.mxu0  ;;  %v46157_v1 = vand.u32 4294901760, %v36370_v20 }
 0xd71   :  { %v40751_v22 = vpop.f32.mrf.mxu0 }
 0xd72   :  { %v27930_v22 = vadd.f32 %v27929_v62, %v27856_v61 }
 0xd73   :  { %v28077_v45 = vpop.f32.mrf.mxu0 }
 0xd74   :  { %v28004_v16 = vadd.f32 %v28003_v41, %v27930_v22 }
 0xd75   :  { %v40761_v15 = vpop.f32.mrf.mxu0 }
 0xd7b   :  { %v28304_v42 = vpop.f32.mrf.mxu1 }
 0xd7d   :  { %v40776_v25 = vpop.f32.mrf.mxu1 }
 0xd7e   :  { %v36369_v25 = vld [vmem:[%s47266_s3 + $0x40] sm:$0xff] }
 0xd7f   :  { %v28452_v30 = vpop.f32.mrf.mxu1 }
 0xd81   :  { %v40786_v24 = vpop.f32.mrf.mxu1 }
 0xd82   :  { %v23112_v24 = vadd.f32 %v45899_v59, %v23011_v2  ;;  %v28078_v59 = vadd.f32 %v28077_v45, %v28004_v16 }
 0xd83   :  { %v28228_v33 = vpop.f32.mrf.mxu0  ;;  %v28598_v48 = vpop.f32.mrf.mxu1 }
 0xd84   :  { %v28305_v31 = vadd.f32 %v28304_v42, %v28228_v33  ;;  %v23198_v42 = vadd.f32 %v45901_v60, %v23112_v24 }
 0xd85   :  { %v40771_v32 = vpop.f32.mrf.mxu0  ;;  %v40796_v44 = vpop.f32.mrf.mxu1 }
 0xd86   :  { %v46159_v44 = vand.u32 4294901760, %v36369_v25 }
 0xd87   :  { %v28378_v8 = vpop.f32.mrf.mxu0 }
 0xd88   :  { %v28379_v15 = vadd.f32 %v28378_v8, %v28305_v31  ;;  %v46163_v31 = vsub.f32 %v36370_v20, %v46157_v1  ;;  %v46166_v32 = vsub.f32 %v36369_v25, %v46159_v44 }
 0xd89   :  { %v40781_v34 = vpop.f32.mrf.mxu0 }
 0xd8a   :  { %v28453_v3 = vadd.f32 %v28452_v30, %v28379_v15  ;;  %v23282_v30 = vadd.f32 %v45903_v6, %v23198_v42  ;;  %v46171_v61 = vand.u32 4294901760, %v46163_v31  ;;  %v46175_v41 = vand.u32 4294901760, %v46166_v32 }
 0xd8b   :  { %v28526_v52 = vpop.f32.mrf.mxu0 }
 0xd8c   :  { %v28527_v29 = vadd.f32 %v28526_v52, %v28453_v3  ;;  %47363 = vst [vmem:[#allocation7_spill] sm:$0xff] %v46171_v61  ;;  %47364 = vst [vmem:[#allocation8_spill] sm:$0xff] %v46175_v41  ;;  %v23373_v45 = vadd.f32 %v45908_v49, %v23282_v30  ;;  %v29176_v20 = vsub.f32 %v46163_v31, %v46171_v61 }
 0xd8d   :  { %v40791_v33 = vpop.f32.mrf.mxu0 }
 0xd8e   :  { %v28599_v62 = vadd.f32 %v28598_v48, %v28527_v29  ;;  %v28150_v48 = vadd.f32 %v28149_v58, %v28078_v59  ;;  %v29183_v58 = vsub.f32 %v46166_v32, %v46175_v41  ;;  %v23454_v49 = vadd.f32 %v45913_v39, %v23373_v45  ;;  %v41599_v39 = vpop.eup %41598 }
 0xd8f   :  { %v46194_v15 = vand.u32 4294901760, %v29176_v20  ;;  %v27693_v29 = vmul.f32 %v41599_v39, %v45994_v12  ;;  %v36374_v39 = vld [vmem:[%s47266_s3 + $0x68] sm:$0xff] }
 0xd90   :  { %v28603_v34 = vsel %vm6496_vm1, %v28599_v62, 0  ;;  %v29065_v8 = vsel %vm6496_vm1, %v28150_v48, 0  ;;  %v46200_v24 = vand.u32 4294901760, %v29183_v58  ;;  %v46203_v3 = vand.u32 4294901760, %v23454_v49 }
 0xd91   :  { %v28672_v2 = vand.u32 4294901760, %v28603_v34  ;;  %v46197_v25 = vand.u32 4294901760, %v29065_v8  ;;  %v29527_v12 = vsel %vm10113_vm3, %v27693_v29, 0 }
 0xd92   :  { %v46217_v16 = vsub.f32 %v23454_v49, %v46203_v3 }
 0xd93   :  { %v28673_v60 = vsub.f32 %v28603_v34, %v28672_v2  ;;  %40809 = vmatmul.mubr.f32.vlgmr.msra.gmra.mxu1 %v28672_v2  ;;  %v29135_v52 = vsub.f32 %v29065_v8, %v46197_v25  ;;  %v29595_v34 = vand.u32 4294901760, %v29527_v12 }
 0xd94   :  { %40819 = vmatpush3.msra.mxu1 %v46077_v28  ;;  %40822 = vmatprep.mubr.msk.f32.mxu1 %vm41652_vm2, %v47332_v63  ;;  %v29638_v33 = vand.u32 4294901760, %v46217_v16 }
 0xd95   :  { %v28674_v6 = vand.u32 4294901760, %v28673_v60  ;;  %40820 = vmatprep.subr.mxu1 %v47332_v63  ;;  %v29136_v42 = vand.u32 4294901760, %v29135_v52 }
 0xd96   :  { %40821 = vmatpush3.msra.mxu1 %v46085_v51  ;;  %v29639_v59 = vsub.f32 %v46217_v16, %v29638_v33 }
 0xd97   :  { %v28675_v11 = vsub.f32 %v28673_v60, %v28674_v6  ;;  %40832 = vmatprep.subr.mxu1 %v47332_v63  ;;  %40823 = vmatmul.mubr.f32.vlgmr.msra.gmra.mxu1 %v28674_v6  ;;  %v29137_v62 = vsub.f32 %v29135_v52, %v29136_v42 }
 0xd98   :  { %40833 = vmatpush3.msra.mxu1 %v46077_v28  ;;  %40836 = vmatprep.mubr.msk.f32.mxu1 %vm41652_vm2, %v47332_v63 }
 0xd99   :  { %v28676_v22 = vand.u32 4294901760, %v28675_v11  ;;  %40834 = vmatprep.subr.mxu1 %v47332_v63  ;;  %v29138_v30 = vand.u32 4294901760, %v29137_v62 }
 0xd9a   :  { %40835 = vmatpush3.msra.mxu1 %v46085_v51 }
 0xd9b   :  { %40846 = vmatprep.subr.mxu1 %v47332_v63  ;;  %40802 = vmatmul.mubr.f32.vlgmr.msra.gmra.mxu0 %v28676_v22 }
 0xd9c   :  { %40812 = vmatpush3.msra.mxu0 %v46083_v57  ;;  %40837 = vmatmul.mubr.f32.vlgmr.msra.gmra.mxu1 %v28672_v2 }
 0xd9d   :  { %40847 = vmatpush3.msra.mxu1 %v46194_v15  ;;  %40813 = vmatprep.subr.mxu0 %v47332_v63 }
 0xd9e   :  { %40848 = vmatprep.subr.mxu1 %v47332_v63  ;;  %40814 = vmatpush3.msra.mxu0 %v46093_v7 }
 0xd9f   :  { %40849 = vmatpush3.msra.mxu1 %v46200_v24  ;;  %40815 = vmatprep.mubr.msk.f32.mxu0 %vm41652_vm2, %v47332_v63 }
 0xda0   :  { %40825 = vmatprep.subr.mxu0 %v47332_v63  ;;  %40850 = vmatprep.mubr.msk.f32.mxu1 %vm41652_vm2, %v47332_v63 }
 0xda1   :  { %40860 = vmatprep.subr.mxu1 %v47332_v63  ;;  %40816 = vmatmul.mubr.f32.vlgmr.msra.gmra.mxu0 %v28673_v60  ;;  %v29596_v60 = vsub.f32 %v29527_v12, %v29595_v34 }
 0xda2   :  { %40826 = vmatpush3.msra.mxu0 %v46090_v36  ;;  %40851 = vmatmul.mubr.f32.vlgmr.msra.gmra.mxu1 %v46197_v25 }
 0xda3   :  { %40861 = vmatpush3.msra.mxu1 %v46157_v1  ;;  %40827 = vmatprep.subr.mxu0 %v47332_v63  ;;  %v29597_v48 = vand.u32 4294901760, %v29596_v60 }
 0xda4   :  { %40862 = vmatprep.subr.mxu1 %v47332_v63  ;;  %40828 = vmatpush3.msra.mxu0 %v46100_v19 }
 0xda5   :  { %40863 = vmatpush3.msra.mxu1 %v46159_v44  ;;  %40829 = vmatprep.mubr.msk.f32.mxu0 %vm41652_vm2, %v47332_v63  ;;  %v29598_v45 = vsub.f32 %v29596_v60, %v29597_v48 }
 0xda6   :  { %40839 = vmatprep.subr.mxu0 %v47332_v63  ;;  %40864 = vmatprep.mubr.msk.f32.mxu1 %vm41652_vm2, %v47332_v63 }
 0xda7   :  { %40874 = vmatprep.subr.mxu1 %v47332_v63  ;;  %40830 = vmatmul.mubr.f32.vlgmr.msra.gmra.mxu0 %v28672_v2  ;;  %v29640_v2 = vand.u32 4294901760, %v29639_v59  ;;  %v29599_v6 = vand.u32 4294901760, %v29598_v45 }
 0xda8   :  { %40840 = vmatpush3.msra.mxu0 %v46157_v1  ;;  %40865 = vmatmul.mubr.f32.vlgmr.msra.gmra.mxu1 %v29136_v42 }
 0xda9   :  { %40875 = vmatpush3.msra.mxu1 %v46157_v1  ;;  %40841 = vmatprep.subr.mxu0 %v47332_v63 }
 0xdaa   :  { %40876 = vmatprep.subr.mxu1 %v47332_v63  ;;  %40842 = vmatpush3.msra.mxu0 %v46159_v44 }
 0xdab   :  { %40877 = vmatpush3.msra.mxu1 %v46159_v44  ;;  %40843 = vmatprep.mubr.msk.f32.mxu0 %vm41652_vm2, %v47332_v63 }
 0xdac   :  { %40853 = vmatprep.subr.mxu0 %v47332_v63  ;;  %40878 = vmatprep.mubr.msk.f32.mxu1 %vm41652_vm2, %v47332_v63 }
 0xdad   :  { %40886 = vmatprep.subr.mxu1 %v47332_v63  ;;  %40844 = vmatmul.mubr.f32.vlgmr.msra.gmra.mxu0 %v29138_v30 }
 0xdae   :  { %40854 = vmatpush3.msra.mxu0 %v46163_v31  ;;  %40879 = vmatmul.mubr.f32.vlgmr.msra.gmra.mxu1 %v46197_v25 }
 0xdaf   :  { %40887 = vmatpush3.msra.mxu1 %v29640_v2  ;;  %40855 = vmatprep.subr.mxu0 %v47332_v63 }
 0xdb0   :  { %40856 = vmatpush3.msra.mxu0 %v46166_v32  ;;  %40857 = vmatprep.mubr.msk.f32.mxu0 %vm41652_vm2, %v47332_v63 }
 0xdb1   :  { %40867 = vmatprep.subr.mxu0 %v47332_v63  ;;  %40888 = vmatprep.mubr.msk.f32.mxu1 %vm41652_vm2, %v47332_v63 }
 0xdb2   :  { %40896 = vmatprep.subr.mxu1 %v47332_v63  ;;  %40858 = vmatmul.mubr.f32.vlgmr.msra.gmra.mxu0 %v29135_v52  ;;  %v46304_v52 = vand.u32 4294901760, %v36374_v39 }
 0xdb3   :  { %40868 = vmatpush3.msra.mxu0 %v46171_v61  ;;  %40889 = vmatmul.mubr.f32.vlgmr.msra.gmra.mxu1 %v29595_v34 }
 0xdb4   :  { %40897 = vmatpush3.msra.mxu1 %v46203_v3  ;;  %40869 = vmatprep.subr.mxu0 %v47332_v63  ;;  %v46310_v29 = vsub.f32 %v36374_v39, %v46304_v52 }
 0xdb5   :  { %40870 = vmatpush3.msra.mxu0 %v46175_v41  ;;  %40871 = vmatprep.mubr.msk.f32.mxu0 %vm41652_vm2, %v47332_v63 }
 0xdb6   :  { %40881 = vmatprep.subr.mxu0 %v47332_v63  ;;  %40898 = vmatprep.mubr.msk.f32.mxu1 %vm41652_vm2, %v47332_v63  ;;  %v46317_v42 = vand.u32 4294901760, %v46310_v29 }
 0xdb7   :  { %40906 = vmatprep.subr.mxu1 %v47332_v63  ;;  %40872 = vmatmul.mubr.f32.vlgmr.msra.gmra.mxu0 %v46197_v25 }
 0xdb8   :  { %40882 = vmatpush3.msra.mxu0 %v46203_v3  ;;  %40899 = vmatmul.mubr.f32.vlgmr.msra.gmra.mxu1 %v29597_v48  ;;  %v30087_v12 = vsub.f32 %v46310_v29, %v46317_v42 }
 0xdb9   :  { %40907 = vmatpush3.msra.mxu1 %v46203_v3  ;;  %40883 = vmatprep.mubr.msk.f32.mxu0 %vm41652_vm2, %v47332_v63 }
 0xdba   :  { %40891 = vmatprep.subr.mxu0 %v47332_v63  ;;  %40908 = vmatprep.mubr.msk.f32.mxu1 %vm41652_vm2, %v47332_v63  ;;  %v46329_v59 = vand.u32 4294901760, %v30087_v12 }
 0xdbb   :  { %40884 = vmatmul.mubr.f32.vlgmr.msra.gmra.mxu0 %v29599_v6  ;;  %40918 = vmatprep.subr.mxu1 %v47332_v63 }
 0xdbc   :  { %40892 = vmatpush3.msra.mxu0 %v46217_v16  ;;  %40909 = vmatmul.mubr.f32.vlgmr.msra.gmra.mxu1 %v29595_v34  ;;  %v36373_v16 = vld [vmem:[%s47266_s3 + $0x60] sm:$0xff]  ;;  %47367 = vst [vmem:[#allocation17_spill] sm:$0xff] %v46329_v59 }
 0xdbd   :  { %40893 = vmatprep.mubr.msk.f32.mxu0 %vm41652_vm2, %v47332_v63  ;;  %40901 = vmatprep.subr.mxu0 %v47332_v63 }
 0xdbe   :  { %40922 = vmatprep.mubr.msk.f32.mxu1 %vm41652_vm2, %v47332_v63  ;;  %40919 = vmatpush3.msra.mxu1 %v46329_v59 }
 0xdbf   :  { %40894 = vmatmul.mubr.f32.vlgmr.msra.gmra.mxu0 %v29596_v60  ;;  %40920 = vmatprep.subr.mxu1 %v47332_v63 }
 0xdc0   :  { %40902 = vmatpush3.msra.mxu0 %v29638_v33  ;;  %40903 = vmatprep.mubr.msk.f32.mxu0 %vm41652_vm2, %v47332_v63 }
 0xdc1   :  { %40911 = vmatprep.subr.mxu0 %v47332_v63 }
 0xdc3   :  { %40904 = vmatmul.mubr.f32.vlgmr.msra.gmra.mxu0 %v29595_v34 }
 0xdc4   :  { %40915 = vmatprep.mubr.msk.f32.mxu0 %vm41652_vm2, %v47332_v63  ;;  %40912 = vmatpush3.msra.mxu0 %v46304_v52 }
 0xdc5   :  { %40913 = vmatprep.subr.mxu0 %v47332_v63 }
 0xdd7   :  { %v46289_v20 = vpop.xlane.xlu1 %27680 }
 0xdd8   :  { %41604 = vrcp.f32 %v46289_v20 }
 0xddb   :  { %v46291_v11 = vpop.xlane.xlu1 %27683 }
 0xddf   :  { %v46293_v58 = vpop.xlane.xlu1 %27686 }
 0xde0   :  { %47365 = vst [vmem:[#allocation9_spill] sm:$0xff] %v46293_v58 }
 0xde3   :  { %v17507_v8 = vpop.xlane.xlu1 %17506 }
 0xde4   :  { %v17510_v49 = vmul.f32 0.03125, %v17507_v8 }
 0xde6   :  { %v46296_v22 = vsub.f32 %v46144_v50, %v17510_v49  ;;  %v46312_v50 = vand.u32 4294901760, %v36373_v16 }
 0xde8   :  { %47366 = vst [vmem:[#allocation10_spill] sm:$0xff] %v46296_v22  ;;  %v17514_v25 = vmul.f32 %v46296_v22, %v46296_v22  ;;  %v46320_v33 = vsub.f32 %v36373_v16, %v46312_v50  ;;  %40914 = vmatpush3.msra.mxu0 %v46312_v50 }
 0xde9   :  { %40925 = vmatprep.subr.mxu0 %v47332_v63 }
 0xdea   :  { %v17518_v3 = vsel %vm54_vm0, %v17514_v25, 0.0  ;;  %v46327_v62 = vand.u32 4294901760, %v46320_v33 }
 0xdeb   :  { %17519 = vadd.xlane.f32.xlu1 %v17518_v3 }
 0xdec   :  { %v30094_v34 = vsub.f32 %v46320_v33, %v46327_v62 }
 0xdee   :  { %v46334_v30 = vand.u32 4294901760, %v30094_v34 }
 0xdf0   :  { %47368 = vst [vmem:[#allocation14_spill] sm:$0xff] %v46334_v30  ;;  %40921 = vmatpush3.msra.mxu1 %v46334_v30 }
 0xdf1   :  { %40932 = vmatprep.subr.mxu1 %v47332_v63 }
 0xe53   :  { %v28759_v2 = vpop.f32.mrf.mxu1 }
 0xe55   :  { %v40810_v60 = vpop.f32.mrf.mxu1 }
 0xe56   :  { %v23548_v60 = vadd.f32 %v45915_v27, %v45906_v54 }
 0xe57   :  { %v28910_v48 = vpop.f32.mrf.mxu1 }
 0xe59   :  { %v40824_v45 = vpop.f32.mrf.mxu1 }
 0xe5b   :  { %v28678_v6 = vpop.f32.mrf.mxu0 }
 0xe5c   :  { %v28760_v8 = vadd.f32 %v28759_v2, %v28678_v6  ;;  %v29060_v49 = vpop.f32.mrf.mxu1 }
 0xe5d   :  { %v40803_v25 = vpop.f32.mrf.mxu0 }
 0xe5e   :  { %v40838_v3 = vpop.f32.mrf.mxu1  ;;  %v23649_v25 = vadd.f32 %v45919_v40, %v23548_v60 }
 0xe61   :  { %v28835_v39 = vpop.f32.mrf.mxu0 }
 0xe62   :  { %v28836_v16 = vadd.f32 %v28835_v39, %v28760_v8  ;;  %v29221_v12 = vpop.f32.mrf.mxu1 }
 0xe63   :  { %v40817_v34 = vpop.f32.mrf.mxu0 }
 0xe64   :  { %v40852_v22 = vpop.f32.mrf.mxu1  ;;  %v28911_v47 = vadd.f32 %v28910_v48, %v28836_v16 }
 0xe65   :  { %v23735_v22 = vadd.f32 %v45917_v10, %v23649_v25 }
 0xe67   :  { %v28987_v17 = vpop.f32.mrf.mxu0 }
 0xe68   :  { %v28988_v58 = vadd.f32 %v28987_v17, %v28911_v47  ;;  %v29372_v30 = vpop.f32.mrf.mxu1 }
 0xe69   :  { %v40831_v59 = vpop.f32.mrf.mxu0 }
 0xe6a   :  { %v40866_v41 = vpop.f32.mrf.mxu1  ;;  %v29061_v61 = vadd.f32 %v29060_v49, %v28988_v58  ;;  %v23819_v58 = vadd.f32 %v45923_v26, %v23735_v22 }
 0xe6d   :  { %v29140_v45 = vpop.f32.mrf.mxu0 }
 0xe6e   :  { %v29141_v2 = vadd.f32 %v29140_v45, %v29061_v61  ;;  %v29522_v6 = vpop.f32.mrf.mxu1 }
 0xe6f   :  { %v40845_v3 = vpop.f32.mrf.mxu0 }
 0xe70   :  { %v40880_v8 = vpop.f32.mrf.mxu1  ;;  %v29222_v39 = vadd.f32 %v29221_v12, %v29141_v2  ;;  %v23910_v12 = vadd.f32 %v45921_v56, %v23819_v58 }
 0xe72   :  { %v29297_v34 = vpop.f32.mrf.mxu0 }
 0xe73   :  { %v29298_v48 = vadd.f32 %v29297_v34, %v29222_v39  ;;  %v29677_v17 = vpop.f32.mrf.mxu1 }
 0xe74   :  { %v40859_v47 = vpop.f32.mrf.mxu0 }
 0xe75   :  { %v40890_v59 = vpop.f32.mrf.mxu1  ;;  %v29373_v41 = vadd.f32 %v29372_v30, %v29298_v48  ;;  %v23991_v30 = vadd.f32 %v45932_v55, %v23910_v12  ;;  %v41601_v48 = vpop.eup %41600 }
 0xe76   :  { %v27695_v56 = vmul.f32 %v41601_v48, %v46005_v13 }
 0xe77   :  { %v29449_v49 = vpop.f32.mrf.mxu0  ;;  %v30472_v0 = vand.u32 4294901760, %v23991_v30 }
 0xe78   :  { %v29450_v54 = vadd.f32 %v29449_v49, %v29373_v41  ;;  %v29825_v27 = vpop.f32.mrf.mxu1  ;;  %v30439_v49 = vsel %vm10113_vm3, %v27695_v56, 0 }
 0xe79   :  { %v40873_v61 = vpop.f32.mrf.mxu0  ;;  %v46349_v59 = vsub.f32 %v23991_v30, %v30472_v0 }
 0xe7a   :  { %v46345_v40 = vadd.f32 %v29522_v6, %v29450_v54  ;;  %v40900_v16 = vpop.f32.mrf.mxu1  ;;  %v30507_v61 = vand.u32 4294901760, %v30439_v49 }
 0xe7b   :  { %v29601_v60 = vpop.f32.mrf.mxu0  ;;  %v30550_v58 = vand.u32 4294901760, %v46349_v59 }
 0xe7c   :  { %v29971_v10 = vpop.f32.mrf.mxu1  ;;  %v29678_v2 = vadd.f32 %v29677_v17, %v29601_v60  ;;  %v30508_v60 = vsub.f32 %v30439_v49, %v30507_v61 }
 0xe7d   :  { %v40885_v45 = vpop.f32.mrf.mxu0 }
 0xe7e   :  { %v40910_v25 = vpop.f32.mrf.mxu1 }
 0xe7f   :  { %v29751_v3 = vpop.f32.mrf.mxu0  ;;  %v36376_v25 = vld [vmem:[%s47266_s3 + $0x78] sm:$0xff] }
 0xe80   :  { %v29752_v26 = vadd.f32 %v29751_v3, %v29678_v2  ;;  %v46406_v30 = vand.u32 4294901760, %v36376_v25  ;;  %v36375_v3 = vld [vmem:[%s47266_s3 + $0x70] sm:$0xff] }
 0xe81   :  { %v40895_v8 = vpop.f32.mrf.mxu0 }
 0xe82   :  { %v29826_v39 = vadd.f32 %v29825_v27, %v29752_v26  ;;  %v30551_v27 = vsub.f32 %v46349_v59, %v30550_v58  ;;  %v46412_v26 = vsub.f32 %v36376_v25, %v46406_v30  ;;  %v46414_v8 = vand.u32 4294901760, %v36375_v3 }
 0xe83   :  { %v29899_v34 = vpop.f32.mrf.mxu0 }
 0xe84   :  { %v29900_v22 = vadd.f32 %v29899_v34, %v29826_v39  ;;  %v30552_v12 = vand.u32 4294901760, %v30551_v27  ;;  %v46419_v39 = vand.u32 4294901760, %v46412_v26 }
 0xe85   :  { %v40905_v6 = vpop.f32.mrf.mxu0 }
 0xe86   :  { %v29972_v47 = vadd.f32 %v29971_v10, %v29900_v22  ;;  %v30509_v10 = vand.u32 4294901760, %v30508_v60  ;;  %v30999_v34 = vsub.f32 %v46412_v26, %v46419_v39 }
 0xe88   :  { %v29976_v41 = vsel %vm6496_vm1, %v29972_v47, 0  ;;  %v30510_v45 = vsub.f32 %v30508_v60, %v30509_v10  ;;  %v46431_v48 = vand.u32 4294901760, %v30999_v34 }
 0xe89   :  { %v30045_v17 = vand.u32 4294901760, %v29976_v41 }
 0xe8a   :  { %v30511_v2 = vand.u32 4294901760, %v30510_v45 }
 0xe8b   :  { %v30046_v55 = vsub.f32 %v29976_v41, %v30045_v17  ;;  %40923 = vmatmul.mubr.f32.vlgmr.msra.gmra.mxu1 %v30045_v17 }
 0xe8c   :  { %40933 = vmatpush3.msra.mxu1 %v46304_v52  ;;  %40936 = vmatprep.mubr.msk.f32.mxu1 %vm41652_vm2, %v47332_v63 }
 0xe8d   :  { %v30047_v54 = vand.u32 4294901760, %v30046_v55  ;;  %40934 = vmatprep.subr.mxu1 %v47332_v63 }
 0xe8e   :  { %40935 = vmatpush3.msra.mxu1 %v46312_v50 }
 0xe8f   :  { %v30048_v13 = vsub.f32 %v30046_v55, %v30047_v54  ;;  %40946 = vmatprep.subr.mxu1 %v47332_v63  ;;  %40937 = vmatmul.mubr.f32.vlgmr.msra.gmra.mxu1 %v30047_v54 }
 0xe90   :  { %40947 = vmatpush3.msra.mxu1 %v46304_v52  ;;  %40950 = vmatprep.mubr.msk.f32.mxu1 %vm41652_vm2, %v47332_v63 }
 0xe91   :  { %v30049_v16 = vand.u32 4294901760, %v30048_v13  ;;  %40948 = vmatprep.subr.mxu1 %v47332_v63 }
 0xe92   :  { %40949 = vmatpush3.msra.mxu1 %v46312_v50 }
 0xe93   :  { %40958 = vmatprep.subr.mxu1 %v47332_v63  ;;  %40916 = vmatmul.mubr.f32.vlgmr.msra.gmra.mxu0 %v30049_v16 }
 0xe94   :  { %40926 = vmatpush3.msra.mxu0 %v46310_v29  ;;  %40951 = vmatmul.mubr.f32.vlgmr.msra.gmra.mxu1 %v30045_v17 }
 0xe95   :  { %40959 = vmatpush3.msra.mxu1 %v30552_v12  ;;  %40927 = vmatprep.subr.mxu0 %v47332_v63 }
 0xe96   :  { %40928 = vmatpush3.msra.mxu0 %v46320_v33  ;;  %40929 = vmatprep.mubr.msk.f32.mxu0 %vm41652_vm2, %v47332_v63 }
 0xe97   :  { %40939 = vmatprep.subr.mxu0 %v47332_v63  ;;  %40960 = vmatprep.mubr.msk.f32.mxu1 %vm41652_vm2, %v47332_v63 }
 0xe98   :  { %40968 = vmatprep.subr.mxu1 %v47332_v63  ;;  %40930 = vmatmul.mubr.f32.vlgmr.msra.gmra.mxu0 %v30046_v55 }
 0xe99   :  { %40940 = vmatpush3.msra.mxu0 %v46317_v42  ;;  %40961 = vmatmul.mubr.f32.vlgmr.msra.gmra.mxu1 %v30507_v61 }
 0xe9a   :  { %40969 = vmatpush3.msra.mxu1 %v30472_v0  ;;  %40941 = vmatprep.subr.mxu0 %v47332_v63 }
 0xe9b   :  { %40942 = vmatpush3.msra.mxu0 %v46327_v62  ;;  %40943 = vmatprep.mubr.msk.f32.mxu0 %vm41652_vm2, %v47332_v63 }
 0xe9c   :  { %40953 = vmatprep.subr.mxu0 %v47332_v63  ;;  %40970 = vmatprep.mubr.msk.f32.mxu1 %vm41652_vm2, %v47332_v63 }
 0xe9d   :  { %40978 = vmatprep.subr.mxu1 %v47332_v63  ;;  %40944 = vmatmul.mubr.f32.vlgmr.msra.gmra.mxu0 %v30045_v17 }
 0xe9e   :  { %40954 = vmatpush3.msra.mxu0 %v30472_v0  ;;  %40971 = vmatmul.mubr.f32.vlgmr.msra.gmra.mxu1 %v30509_v10 }
 0xe9f   :  { %40979 = vmatpush3.msra.mxu1 %v30472_v0  ;;  %40955 = vmatprep.mubr.msk.f32.mxu0 %vm41652_vm2, %v47332_v63  ;;  %v46422_v0 = vsub.f32 %v36375_v3, %v46414_v8 }
 0xea0   :  { %40963 = vmatprep.subr.mxu0 %v47332_v63  ;;  %40980 = vmatprep.mubr.msk.f32.mxu1 %vm41652_vm2, %v47332_v63 }
 0xea1   :  { %40956 = vmatmul.mubr.f32.vlgmr.msra.gmra.mxu0 %v30511_v2  ;;  %40990 = vmatprep.subr.mxu1 %v47332_v63  ;;  %v46429_v22 = vand.u32 4294901760, %v46422_v0 }
 0xea2   :  { %40964 = vmatpush3.msra.mxu0 %v46349_v59  ;;  %40981 = vmatmul.mubr.f32.vlgmr.msra.gmra.mxu1 %v30507_v61 }
 0xea3   :  { %40965 = vmatprep.mubr.msk.f32.mxu0 %vm41652_vm2, %v47332_v63  ;;  %40973 = vmatprep.subr.mxu0 %v47332_v63  ;;  %v31006_v6 = vsub.f32 %v46422_v0, %v46429_v22 }
 0xea4   :  { %40994 = vmatprep.mubr.msk.f32.mxu1 %vm41652_vm2, %v47332_v63  ;;  %40991 = vmatpush3.msra.mxu1 %v46431_v48 }
 0xea5   :  { %40966 = vmatmul.mubr.f32.vlgmr.msra.gmra.mxu0 %v30508_v60  ;;  %v46436_v47 = vand.u32 4294901760, %v31006_v6  ;;  %40992 = vmatprep.subr.mxu1 %v47332_v63 }
 0xea6   :  { %40974 = vmatpush3.msra.mxu0 %v30550_v58  ;;  %40975 = vmatprep.mubr.msk.f32.mxu0 %vm41652_vm2, %v47332_v63 }
 0xea7   :  { %40983 = vmatprep.subr.mxu0 %v47332_v63  ;;  %40993 = vmatpush3.msra.mxu1 %v46436_v47 }
 0xea8   :  { %41004 = vmatprep.subr.mxu1 %v47332_v63 }
 0xea9   :  { %40976 = vmatmul.mubr.f32.vlgmr.msra.gmra.mxu0 %v30507_v61 }
 0xeaa   :  { %40987 = vmatprep.mubr.msk.f32.mxu0 %vm41652_vm2, %v47332_v63  ;;  %40984 = vmatpush3.msra.mxu0 %v46406_v30 }
 0xeab   :  { %40985 = vmatprep.subr.mxu0 %v47332_v63 }
 0xeac   :  { %40986 = vmatpush3.msra.mxu0 %v46414_v8 }
 0xead   :  { %40997 = vmatprep.subr.mxu0 %v47332_v63 }
 0xf4b   :  { %v30132_v59 = vpop.f32.mrf.mxu1 }
 0xf4d   :  { %v40924_v56 = vpop.f32.mrf.mxu1 }
 0xf4f   :  { %v30283_v41 = vpop.f32.mrf.mxu1 }
 0xf51   :  { %v40938_v17 = vpop.f32.mrf.mxu1 }
 0xf53   :  { %v30051_v58 = vpop.f32.mrf.mxu0 }
 0xf54   :  { %v30133_v55 = vadd.f32 %v30132_v59, %v30051_v58  ;;  %v30433_v49 = vpop.f32.mrf.mxu1 }
 0xf55   :  { %v40917_v54 = vpop.f32.mrf.mxu0 }
 0xf56   :  { %v40952_v13 = vpop.f32.mrf.mxu1 }
 0xf58   :  { %v30208_v27 = vpop.f32.mrf.mxu0 }
 0xf59   :  { %v30209_v61 = vadd.f32 %v30208_v27, %v30133_v55  ;;  %v30589_v16 = vpop.f32.mrf.mxu1 }
 0xf5a   :  { %v40931_v12 = vpop.f32.mrf.mxu0 }
 0xf5b   :  { %v40962_v60 = vpop.f32.mrf.mxu1  ;;  %v30284_v10 = vadd.f32 %v30283_v41, %v30209_v61  ;;  %v46446_v61 = vand.u32 4294901760, %v45749_v35 }
 0xf5c   :  { %v41603_v60 = vpop.eup %41602 }
 0xf5d   :  { %v30360_v45 = vpop.f32.mrf.mxu0 }
 0xf5e   :  { %v30361_v2 = vadd.f32 %v30360_v45, %v30284_v10  ;;  %v30737_v25 = vpop.f32.mrf.mxu1 }
 0xf5f   :  { %v40945_v3 = vpop.f32.mrf.mxu0 }
 0xf60   :  { %v30434_v34 = vadd.f32 %v30433_v49, %v30361_v2  ;;  %v40972_v6 = vpop.f32.mrf.mxu1 }
 0xf61   :  { %v30513_v56 = vpop.f32.mrf.mxu0 }
 0xf62   :  { %v46443_v59 = vadd.f32 %v30434_v34, %v46345_v40  ;;  %v30883_v17 = vpop.f32.mrf.mxu1  ;;  %v30590_v54 = vadd.f32 %v30589_v16, %v30513_v56  ;;  %v46451_v40 = vsub.f32 %v45749_v35, %v46446_v61  ;;  %v27697_v16 = vmul.f32 %v41603_v60, %v46014_v4 }
 0xf63   :  { %v40957_v58 = vpop.f32.mrf.mxu0 }
 0xf64   :  { %v40982_v55 = vpop.f32.mrf.mxu1  ;;  %v31351_v20 = vsel %vm10113_vm3, %v27697_v16, 0  ;;  %v46472_v58 = vand.u32 4294901760, %v45863_v9 }
 0xf65   :  { %v30663_v13 = vpop.f32.mrf.mxu0  ;;  %v46466_v56 = vand.u32 4294901760, %v31351_v20 }
 0xf66   :  { %v30664_v27 = vadd.f32 %v30663_v13, %v30590_v54 }
 0xf67   :  { %v40967_v12 = vpop.f32.mrf.mxu0  ;;  %v31420_v13 = vsub.f32 %v31351_v20, %v46466_v56 }
 0xf68   :  { %v30738_v41 = vadd.f32 %v30737_v25, %v30664_v27  ;;  %v31462_v25 = vand.u32 4294901760, %v46451_v40  ;;  %v46482_v12 = vsub.f32 %v45863_v9, %v46472_v58 }
 0xf69   :  { %v30811_v46 = vpop.f32.mrf.mxu0 }
 0xf6a   :  { %v30812_v49 = vadd.f32 %v30811_v46, %v30738_v41  ;;  %v31463_v35 = vsub.f32 %v46451_v40, %v31462_v25  ;;  %v31911_v41 = vand.u32 4294901760, %v46482_v12 }
 0xf6b   :  { %v40977_v10 = vpop.f32.mrf.mxu0 }
 0xf6c   :  { %v30884_v45 = vadd.f32 %v30883_v17, %v30812_v49  ;;  %v41605_v17 = vpop.eup %41604  ;;  %v31464_v55 = vand.u32 4294901760, %v31463_v35  ;;  %v31912_v60 = vsub.f32 %v46482_v12, %v31911_v41 }
 0xf6d   :  { %v27699_v27 = vmul.f32 %v41605_v17, %v46127_v53  ;;  %v31421_v53 = vand.u32 4294901760, %v31420_v13 }
 0xf6e   :  { %v30888_v2 = vsel %vm6496_vm1, %v30884_v45, 0  ;;  %v31913_v16 = vand.u32 4294901760, %v31912_v60 }
 0xf6f   :  { %v30957_v3 = vand.u32 4294901760, %v30888_v2  ;;  %v31800_v9 = vsel %vm10113_vm3, %v27699_v27, 0  ;;  %v31422_v46 = vsub.f32 %v31420_v13, %v31421_v53 }
 0xf70   :  { %v31868_v49 = vand.u32 4294901760, %v31800_v9 }
 0xf71   :  { %v30958_v34 = vsub.f32 %v30888_v2, %v30957_v3  ;;  %40995 = vmatmul.mubr.f32.vlgmr.msra.gmra.mxu1 %v30957_v3  ;;  %v31423_v10 = vand.u32 4294901760, %v31422_v46  ;;  %v46563_v46 = vld [vmem:[%s47267_s4 + $0x18] sm:$0xff] }
 0xf72   :  { %41005 = vmatpush3.msra.mxu1 %v46406_v30  ;;  %41008 = vmatprep.mubr.msk.f32.mxu1 %vm41652_vm2, %v47332_v63  ;;  %v31869_v45 = vsub.f32 %v31800_v9, %v31868_v49 }
 0xf73   :  { %v30959_v6 = vand.u32 4294901760, %v30958_v34  ;;  %41006 = vmatprep.subr.mxu1 %v47332_v63 }
 0xf74   :  { %41007 = vmatpush3.msra.mxu1 %v46414_v8 }
 0xf75   :  { %v30960_v4 = vsub.f32 %v30958_v34, %v30959_v6  ;;  %41018 = vmatprep.subr.mxu1 %v47332_v63  ;;  %41009 = vmatmul.mubr.f32.vlgmr.msra.gmra.mxu1 %v30959_v6 }
 0xf76   :  { %41019 = vmatpush3.msra.mxu1 %v46406_v30  ;;  %41022 = vmatprep.mubr.msk.f32.mxu1 %vm41652_vm2, %v47332_v63 }
 0xf77   :  { %v30961_v54 = vand.u32 4294901760, %v30960_v4  ;;  %41020 = vmatprep.subr.mxu1 %v47332_v63 }
 0xf78   :  { %41021 = vmatpush3.msra.mxu1 %v46414_v8 }
 0xf79   :  { %41030 = vmatprep.subr.mxu1 %v47332_v63  ;;  %40988 = vmatmul.mubr.f32.vlgmr.msra.gmra.mxu0 %v30961_v54 }
 0xf7a   :  { %40998 = vmatpush3.msra.mxu0 %v46412_v26  ;;  %41023 = vmatmul.mubr.f32.vlgmr.msra.gmra.mxu1 %v30957_v3 }
 0xf7b   :  { %41031 = vmatpush3.msra.mxu1 %v31464_v55  ;;  %40999 = vmatprep.subr.mxu0 %v47332_v63 }
 0xf7c   :  { %41000 = vmatpush3.msra.mxu0 %v46422_v0  ;;  %41001 = vmatprep.mubr.msk.f32.mxu0 %vm41652_vm2, %v47332_v63 }
 0xf7d   :  { %41011 = vmatprep.subr.mxu0 %v47332_v63  ;;  %41032 = vmatprep.mubr.msk.f32.mxu1 %vm41652_vm2, %v47332_v63 }
 0xf7e   :  { %41040 = vmatprep.subr.mxu1 %v47332_v63  ;;  %41002 = vmatmul.mubr.f32.vlgmr.msra.gmra.mxu0 %v30958_v34 }
 0xf7f   :  { %41012 = vmatpush3.msra.mxu0 %v46419_v39  ;;  %41033 = vmatmul.mubr.f32.vlgmr.msra.gmra.mxu1 %v46466_v56 }
 0xf80   :  { %41041 = vmatpush3.msra.mxu1 %v46446_v61  ;;  %41013 = vmatprep.subr.mxu0 %v47332_v63 }
 0xf81   :  { %41014 = vmatpush3.msra.mxu0 %v46429_v22  ;;  %41015 = vmatprep.mubr.msk.f32.mxu0 %vm41652_vm2, %v47332_v63 }
 0xf82   :  { %41025 = vmatprep.subr.mxu0 %v47332_v63  ;;  %41042 = vmatprep.mubr.msk.f32.mxu1 %vm41652_vm2, %v47332_v63 }
 0xf83   :  { %41050 = vmatprep.subr.mxu1 %v47332_v63  ;;  %41016 = vmatmul.mubr.f32.vlgmr.msra.gmra.mxu0 %v30957_v3 }
 0xf84   :  { %41026 = vmatpush3.msra.mxu0 %v46446_v61  ;;  %41043 = vmatmul.mubr.f32.vlgmr.msra.gmra.mxu1 %v31421_v53 }
 0xf85   :  { %41051 = vmatpush3.msra.mxu1 %v46446_v61  ;;  %41027 = vmatprep.mubr.msk.f32.mxu0 %vm41652_vm2, %v47332_v63  ;;  %v31870_v61 = vand.u32 4294901760, %v31869_v45 }
 0xf86   :  { %41035 = vmatprep.subr.mxu0 %v47332_v63  ;;  %41052 = vmatprep.mubr.msk.f32.mxu1 %vm41652_vm2, %v47332_v63 }
 0xf87   :  { %41060 = vmatprep.subr.mxu1 %v47332_v63  ;;  %41028 = vmatmul.mubr.f32.vlgmr.msra.gmra.mxu0 %v31423_v10  ;;  %v31871_v2 = vsub.f32 %v31869_v45, %v31870_v61 }
 0xf88   :  { %41036 = vmatpush3.msra.mxu0 %v46451_v40  ;;  %41053 = vmatmul.mubr.f32.vlgmr.msra.gmra.mxu1 %v46466_v56 }
 0xf89   :  { %41061 = vmatpush3.msra.mxu1 %v31913_v16  ;;  %41037 = vmatprep.mubr.msk.f32.mxu0 %vm41652_vm2, %v47332_v63  ;;  %v31872_v40 = vand.u32 4294901760, %v31871_v2 }
 0xf8a   :  { %41045 = vmatprep.subr.mxu0 %v47332_v63  ;;  %41062 = vmatprep.mubr.msk.f32.mxu1 %vm41652_vm2, %v47332_v63 }
 0xf8b   :  { %41070 = vmatprep.subr.mxu1 %v47332_v63  ;;  %41038 = vmatmul.mubr.f32.vlgmr.msra.gmra.mxu0 %v31420_v13 }
 0xf8c   :  { %41046 = vmatpush3.msra.mxu0 %v31462_v25  ;;  %41063 = vmatmul.mubr.f32.vlgmr.msra.gmra.mxu1 %v31868_v49 }
 0xf8d   :  { %41071 = vmatpush3.msra.mxu1 %v46472_v58  ;;  %41047 = vmatprep.mubr.msk.f32.mxu0 %vm41652_vm2, %v47332_v63 }
 0xf8e   :  { %41055 = vmatprep.subr.mxu0 %v47332_v63  ;;  %41072 = vmatprep.mubr.msk.f32.mxu1 %vm41652_vm2, %v47332_v63 }
 0xf8f   :  { %41080 = vmatprep.subr.mxu1 %v47332_v63  ;;  %41048 = vmatmul.mubr.f32.vlgmr.msra.gmra.mxu0 %v46466_v56 }
 0xf90   :  { %41056 = vmatpush3.msra.mxu0 %v46472_v58  ;;  %41073 = vmatmul.mubr.f32.vlgmr.msra.gmra.mxu1 %v31870_v61 }
 0xf91   :  { %41081 = vmatpush3.msra.mxu1 %v46472_v58  ;;  %41057 = vmatprep.mubr.msk.f32.mxu0 %vm41652_vm2, %v47332_v63 }
 0xf92   :  { %41065 = vmatprep.subr.mxu0 %v47332_v63  ;;  %41082 = vmatprep.mubr.msk.f32.mxu1 %vm41652_vm2, %v47332_v63 }
 0xf93   :  { %41058 = vmatmul.mubr.f32.vlgmr.msra.gmra.mxu0 %v31872_v40  ;;  %41092 = vmatprep.subr.mxu1 %v47332_v63 }
 0xf94   :  { %41066 = vmatpush3.msra.mxu0 %v46482_v12  ;;  %41083 = vmatmul.mubr.f32.vlgmr.msra.gmra.mxu1 %v31868_v49 }
 0xf95   :  { %41067 = vmatprep.mubr.msk.f32.mxu0 %vm41652_vm2, %v47332_v63  ;;  %41075 = vmatprep.subr.mxu0 %v47332_v63 }
 0xf96   :  { %41093 = vmatpush3.msra.mxu1 %v46102_v43  ;;  %41096 = vmatprep.mubr.msk.f32.mxu1 %vm41652_vm2, %v47332_v63  ;;  %v17517_v43 = vpop.xlane.xlu0 %17516 }
 0xf97   :  { %41068 = vmatmul.mubr.f32.vlgmr.msra.gmra.mxu0 %v31869_v45  ;;  %41094 = vmatprep.subr.mxu1 %v47332_v63  ;;  %v17521_v3 = vmul.f32 0.03125, %v17517_v43  ;;  %v46576_v43 = vrot.slane %v46563_v46, %v47350_v5 }
 0xf98   :  { %41076 = vmatpush3.msra.mxu0 %v31911_v41  ;;  %41077 = vmatprep.mubr.msk.f32.mxu0 %vm41652_vm2, %v47332_v63 }
 0xf99   :  { %41095 = vmatpush3.msra.mxu1 %v46107_v18  ;;  %41085 = vmatprep.subr.mxu0 %v47332_v63  ;;  %v17523_v25 = vadd.f32 1e-05, %v17521_v3 }
 0xf9a   :  { %41106 = vmatprep.subr.mxu1 %v47332_v63 }
 0xf9b   :  { %41078 = vmatmul.mubr.f32.vlgmr.msra.gmra.mxu0 %v31868_v49  ;;  %41606 = vrsqrt.f32 %v17523_v25  ;;  %v46567_v49 = vrot.slane %v46563_v46, %v47344_v23 }
 0xf9c   :  { %41086 = vmatpush3.msra.mxu0 %v46077_v28  ;;  %41089 = vmatprep.mubr.msk.f32.mxu0 %vm41652_vm2, %v47332_v63  ;;  %41608 = vrcp.f32 %v46291_v11 }
 0xf9d   :  { %41087 = vmatprep.subr.mxu0 %v47332_v63 }
 0xf9e   :  { %41088 = vmatpush3.msra.mxu0 %v46085_v51 }
 0xf9f   :  { %41099 = vmatprep.subr.mxu0 %v47332_v63 }
 0xfa8   :  { %v41607_v55 = vpop.eup %41606 }
 0xfa9   :  { %v17527_v41 = vmul.f32 %v41607_v55, %v46122_v38  ;;  %v46572_v38 = vrot.slane %v46563_v46, %v47353_v14 }
 0xfab   :  { %v17533_v40 = vmul.f32 %v46567_v49, %v17527_v41 }
0x1031   :  { %v31044_v18 = vpop.f32.mrf.mxu1 }
0x1033   :  { %v40996_v34 = vpop.f32.mrf.mxu1 }
0x1035   :  { %v31195_v20 = vpop.f32.mrf.mxu1 }
0x1037   :  { %v41010_v6 = vpop.f32.mrf.mxu1 }
0x1039   :  { %v30963_v35 = vpop.f32.mrf.mxu0 }
0x103a   :  { %v31345_v4 = vpop.f32.mrf.mxu1  ;;  %v31045_v58 = vadd.f32 %v31044_v18, %v30963_v35 }
0x103b   :  { %v40989_v56 = vpop.f32.mrf.mxu0 }
0x103c   :  { %v41024_v17 = vpop.f32.mrf.mxu1 }
0x103e   :  { %v31120_v54 = vpop.f32.mrf.mxu0 }
0x103f   :  { %v31121_v13 = vadd.f32 %v31120_v54, %v31045_v58  ;;  %v31501_v27 = vpop.f32.mrf.mxu1 }
0x1040   :  { %v41003_v12 = vpop.f32.mrf.mxu0 }
0x1041   :  { %v41034_v53 = vpop.f32.mrf.mxu1  ;;  %v31196_v9 = vadd.f32 %v31195_v20, %v31121_v13  ;;  %v17539_v20 = vadd.f32 %v46572_v38, %v17533_v40 }
0x1043   :  { %v31272_v60 = vpop.f32.mrf.mxu0 }
0x1044   :  { %v31273_v10 = vadd.f32 %v31272_v60, %v31196_v9  ;;  %v31649_v45 = vpop.f32.mrf.mxu1 }
0x1045   :  { %v41017_v16 = vpop.f32.mrf.mxu0 }
0x1046   :  { %v31346_v61 = vadd.f32 %v31345_v4, %v31273_v10  ;;  %v41044_v2 = vpop.f32.mrf.mxu1 }
0x1047   :  { %v31425_v3 = vpop.f32.mrf.mxu0 }
0x1048   :  { %v31349_v23 = vadd.f32 %v31346_v61, %v46443_v59  ;;  %v31795_v25 = vpop.f32.mrf.mxu1  ;;  %v31502_v41 = vadd.f32 %v31501_v27, %v31425_v3 }
0x1049   :  { %v41029_v18 = vpop.f32.mrf.mxu0 }
0x104a   :  { %v41054_v34 = vpop.f32.mrf.mxu1  ;;  %v35000_v6 = vadd.f32 %v46576_v43, %v31349_v23 }
0x104b   :  { %v31575_v35 = vpop.f32.mrf.mxu0 }
0x104c   :  { %v31950_v4 = vpop.f32.mrf.mxu1  ;;  %v46581_v56 = vadd.f32 %v35000_v6, %v17539_v20  ;;  %v31576_v61 = vadd.f32 %v31575_v35, %v31502_v41  ;;  %v47372_v41 = vld [vmem:[#allocation14_spill] sm:$0xff] }
0x104d   :  { %v41039_v14 = vpop.f32.mrf.mxu0 }
0x104e   :  { %v41064_v17 = vpop.f32.mrf.mxu1  ;;  %v35004_v58 = vsel %vm54_vm0, %v46581_v56, 0.0  ;;  %v31650_v34 = vadd.f32 %v31649_v45, %v31576_v61 }
0x104f   :  { %35005 = vadd.xlane.f32.xlu0 %v35004_v58  ;;  %v31723_v54 = vpop.f32.mrf.mxu0 }
0x1050   :  { %v32098_v55 = vpop.f32.mrf.mxu1  ;;  %v31724_v17 = vadd.f32 %v31723_v54, %v31650_v34 }
0x1051   :  { %v41049_v59 = vpop.f32.mrf.mxu0 }
0x1052   :  { %v41074_v13 = vpop.f32.mrf.mxu1  ;;  %v31796_v27 = vadd.f32 %v31795_v25, %v31724_v17 }
0x1053   :  { %v31874_v12 = vpop.f32.mrf.mxu0 }
0x1054   :  { %v32244_v53 = vpop.f32.mrf.mxu1  ;;  %v31951_v60 = vadd.f32 %v31950_v4, %v31874_v12  ;;  %v32711_v35 = vsel %vm6496_vm1, %v31796_v27, 0  ;;  %v46604_v4 = vand.u32 4294901760, %v45910_v21 }
0x1055   :  { %v41059_v9 = vpop.f32.mrf.mxu0  ;;  %v46599_v25 = vand.u32 4294901760, %v32711_v35 }
0x1056   :  { %v41084_v10 = vpop.f32.mrf.mxu1  ;;  %v47371_v9 = vld [vmem:[#allocation17_spill] sm:$0xff] }
0x1057   :  { %v32024_v16 = vpop.f32.mrf.mxu0 }
0x1058   :  { %v32025_v2 = vadd.f32 %v32024_v16, %v31951_v60 }
0x1059   :  { %v41069_v40 = vpop.f32.mrf.mxu0 }
0x105a   :  { %v32099_v23 = vadd.f32 %v32098_v55, %v32025_v2 }
0x105b   :  { %v32172_v18 = vpop.f32.mrf.mxu0 }
0x105c   :  { %v32173_v20 = vadd.f32 %v32172_v18, %v32099_v23 }
0x105d   :  { %v41079_v6 = vpop.f32.mrf.mxu0 }
0x105e   :  { %v32245_v14 = vadd.f32 %v32244_v53, %v32173_v20 }
0x1060   :  { %v32249_v58 = vsel %vm6496_vm1, %v32245_v14, 0 }
0x1061   :  { %v32318_v59 = vand.u32 4294901760, %v32249_v58 }
0x1063   :  { %v32319_v13 = vsub.f32 %v32249_v58, %v32318_v59  ;;  %41097 = vmatmul.mubr.f32.vlgmr.msra.gmra.mxu1 %v32318_v59 }
0x1064   :  { %41107 = vmatpush3.msra.mxu1 %v46077_v28  ;;  %41110 = vmatprep.mubr.msk.f32.mxu1 %vm41652_vm2, %v47332_v63 }
0x1065   :  { %v32320_v3 = vand.u32 4294901760, %v32319_v13  ;;  %41108 = vmatprep.subr.mxu1 %v47332_v63 }
0x1066   :  { %41109 = vmatpush3.msra.mxu1 %v46085_v51 }
0x1067   :  { %v32321_v45 = vsub.f32 %v32319_v13, %v32320_v3  ;;  %41120 = vmatprep.subr.mxu1 %v47332_v63  ;;  %41111 = vmatmul.mubr.f32.vlgmr.msra.gmra.mxu1 %v32320_v3 }
0x1068   :  { %41121 = vmatpush3.msra.mxu1 %v46077_v28  ;;  %41124 = vmatprep.mubr.msk.f32.mxu1 %vm41652_vm2, %v47332_v63  ;;  %v41609_v28 = vpop.eup %41608 }
0x1069   :  { %v32322_v11 = vand.u32 4294901760, %v32321_v45  ;;  %41122 = vmatprep.subr.mxu1 %v47332_v63 }
0x106a   :  { %41123 = vmatpush3.msra.mxu1 %v46085_v51  ;;  %v32781_v51 = vsub.f32 %v32711_v35, %v46599_v25 }
0x106b   :  { %41134 = vmatprep.subr.mxu1 %v47332_v63  ;;  %41090 = vmatmul.mubr.f32.vlgmr.msra.gmra.mxu0 %v32322_v11 }
0x106c   :  { %41100 = vmatpush3.msra.mxu0 %v46083_v57  ;;  %41125 = vmatmul.mubr.f32.vlgmr.msra.gmra.mxu1 %v32318_v59  ;;  %v46619_v57 = vsub.f32 %v45910_v21, %v46604_v4 }
0x106d   :  { %41135 = vmatpush3.msra.mxu1 %v46194_v15  ;;  %41101 = vmatprep.subr.mxu0 %v47332_v63  ;;  %v32782_v15 = vand.u32 4294901760, %v32781_v51 }
0x106e   :  { %41136 = vmatprep.subr.mxu1 %v47332_v63  ;;  %41102 = vmatpush3.msra.mxu0 %v46093_v7  ;;  %v27701_v7 = vmul.f32 %v41609_v28, %v46131_v37  ;;  %v33284_v21 = vand.u32 4294901760, %v46619_v57 }
0x106f   :  { %41137 = vmatpush3.msra.mxu1 %v46200_v24  ;;  %41103 = vmatprep.mubr.msk.f32.mxu0 %vm41652_vm2, %v47332_v63  ;;  %v32783_v37 = vsub.f32 %v32781_v51, %v32782_v15 }
0x1070   :  { %41113 = vmatprep.subr.mxu0 %v47332_v63  ;;  %41138 = vmatprep.mubr.msk.f32.mxu1 %vm41652_vm2, %v47332_v63 }
0x1071   :  { %41148 = vmatprep.subr.mxu1 %v47332_v63  ;;  %41104 = vmatmul.mubr.f32.vlgmr.msra.gmra.mxu0 %v32319_v13  ;;  %v32784_v54 = vand.u32 4294901760, %v32783_v37 }
0x1072   :  { %41114 = vmatpush3.msra.mxu0 %v46090_v36  ;;  %41139 = vmatmul.mubr.f32.vlgmr.msra.gmra.mxu1 %v46599_v25  ;;  %v33173_v36 = vsel %vm10113_vm3, %v27701_v7, 0 }
0x1073   :  { %41149 = vmatpush3.msra.mxu1 %v46157_v1  ;;  %41115 = vmatprep.subr.mxu0 %v47332_v63  ;;  %v33241_v24 = vand.u32 4294901760, %v33173_v36 }
0x1074   :  { %41150 = vmatprep.subr.mxu1 %v47332_v63  ;;  %41116 = vmatpush3.msra.mxu0 %v46100_v19  ;;  %v33285_v19 = vsub.f32 %v46619_v57, %v33284_v21 }
0x1075   :  { %41151 = vmatpush3.msra.mxu1 %v46159_v44  ;;  %41117 = vmatprep.mubr.msk.f32.mxu0 %vm41652_vm2, %v47332_v63  ;;  %v33242_v55 = vsub.f32 %v33173_v36, %v33241_v24 }
0x1076   :  { %41127 = vmatprep.subr.mxu0 %v47332_v63  ;;  %41152 = vmatprep.mubr.msk.f32.mxu1 %vm41652_vm2, %v47332_v63 }
0x1077   :  { %41162 = vmatprep.subr.mxu1 %v47332_v63  ;;  %41118 = vmatmul.mubr.f32.vlgmr.msra.gmra.mxu0 %v32318_v59 }
0x1078   :  { %41128 = vmatpush3.msra.mxu0 %v46157_v1  ;;  %41153 = vmatmul.mubr.f32.vlgmr.msra.gmra.mxu1 %v32782_v15 }
0x1079   :  { %41163 = vmatpush3.msra.mxu1 %v46157_v1  ;;  %41129 = vmatprep.subr.mxu0 %v47332_v63  ;;  %v33286_v1 = vand.u32 4294901760, %v33285_v19 }
0x107a   :  { %41164 = vmatprep.subr.mxu1 %v47332_v63  ;;  %41130 = vmatpush3.msra.mxu0 %v46159_v44 }
0x107b   :  { %41165 = vmatpush3.msra.mxu1 %v46159_v44  ;;  %41131 = vmatprep.mubr.msk.f32.mxu0 %vm41652_vm2, %v47332_v63  ;;  %v33243_v44 = vand.u32 4294901760, %v33242_v55 }
0x107c   :  { %41141 = vmatprep.subr.mxu0 %v47332_v63  ;;  %41166 = vmatprep.mubr.msk.f32.mxu1 %vm41652_vm2, %v47332_v63 }
0x107d   :  { %41174 = vmatprep.subr.mxu1 %v47332_v63  ;;  %41132 = vmatmul.mubr.f32.vlgmr.msra.gmra.mxu0 %v32784_v54  ;;  %v33244_v12 = vsub.f32 %v33242_v55, %v33243_v44 }
0x107e   :  { %41142 = vmatpush3.msra.mxu0 %v46163_v31  ;;  %41167 = vmatmul.mubr.f32.vlgmr.msra.gmra.mxu1 %v46599_v25  ;;  %v47369_v31 = vld [vmem:[#allocation7_spill] sm:$0xff] }
0x107f   :  { %41175 = vmatpush3.msra.mxu1 %v33286_v1  ;;  %41143 = vmatprep.subr.mxu0 %v47332_v63  ;;  %v33245_v53 = vand.u32 4294901760, %v33244_v12 }
0x1080   :  { %41144 = vmatpush3.msra.mxu0 %v46166_v32  ;;  %41145 = vmatprep.mubr.msk.f32.mxu0 %vm41652_vm2, %v47332_v63  ;;  %v47370_v32 = vld [vmem:[#allocation8_spill] sm:$0xff] }
0x1081   :  { %41155 = vmatprep.subr.mxu0 %v47332_v63  ;;  %41176 = vmatprep.mubr.msk.f32.mxu1 %vm41652_vm2, %v47332_v63 }
0x1082   :  { %41184 = vmatprep.subr.mxu1 %v47332_v63  ;;  %41146 = vmatmul.mubr.f32.vlgmr.msra.gmra.mxu0 %v32781_v51 }
0x1083   :  { %41156 = vmatpush3.msra.mxu0 %v47369_v31  ;;  %41177 = vmatmul.mubr.f32.vlgmr.msra.gmra.mxu1 %v33241_v24 }
0x1084   :  { %41185 = vmatpush3.msra.mxu1 %v46604_v4  ;;  %41157 = vmatprep.subr.mxu0 %v47332_v63 }
0x1085   :  { %41158 = vmatpush3.msra.mxu0 %v47370_v32  ;;  %41159 = vmatprep.mubr.msk.f32.mxu0 %vm41652_vm2, %v47332_v63  ;;  %v47373_v32 = vld [vmem:[#allocation9_spill] sm:$0xff] }
0x1086   :  { %41169 = vmatprep.subr.mxu0 %v47332_v63  ;;  %41186 = vmatprep.mubr.msk.f32.mxu1 %vm41652_vm2, %v47332_v63  ;;  %41610 = vrcp.f32 %v47373_v32 }
0x1087   :  { %41194 = vmatprep.subr.mxu1 %v47332_v63  ;;  %41160 = vmatmul.mubr.f32.vlgmr.msra.gmra.mxu0 %v46599_v25 }
0x1088   :  { %41170 = vmatpush3.msra.mxu0 %v46604_v4  ;;  %41187 = vmatmul.mubr.f32.vlgmr.msra.gmra.mxu1 %v33243_v44 }
0x1089   :  { %41195 = vmatpush3.msra.mxu1 %v46604_v4  ;;  %41171 = vmatprep.mubr.msk.f32.mxu0 %vm41652_vm2, %v47332_v63 }
0x108a   :  { %41179 = vmatprep.subr.mxu0 %v47332_v63  ;;  %41196 = vmatprep.mubr.msk.f32.mxu1 %vm41652_vm2, %v47332_v63 }
0x108b   :  { %41172 = vmatmul.mubr.f32.vlgmr.msra.gmra.mxu0 %v33245_v53  ;;  %41206 = vmatprep.subr.mxu1 %v47332_v63 }
0x108c   :  { %41180 = vmatpush3.msra.mxu0 %v46619_v57  ;;  %41197 = vmatmul.mubr.f32.vlgmr.msra.gmra.mxu1 %v33241_v24 }
0x108d   :  { %41181 = vmatprep.mubr.msk.f32.mxu0 %vm41652_vm2, %v47332_v63  ;;  %41189 = vmatprep.subr.mxu0 %v47332_v63 }
0x108e   :  { %41207 = vmatpush3.msra.mxu1 %v47371_v9  ;;  %41210 = vmatprep.mubr.msk.f32.mxu1 %vm41652_vm2, %v47332_v63 }
0x108f   :  { %41182 = vmatmul.mubr.f32.vlgmr.msra.gmra.mxu0 %v33242_v55  ;;  %41208 = vmatprep.subr.mxu1 %v47332_v63 }
0x1090   :  { %41190 = vmatpush3.msra.mxu0 %v33284_v21  ;;  %41191 = vmatprep.mubr.msk.f32.mxu0 %vm41652_vm2, %v47332_v63 }
0x1091   :  { %41209 = vmatpush3.msra.mxu1 %v47372_v41  ;;  %41199 = vmatprep.subr.mxu0 %v47332_v63 }
0x1092   :  { %41220 = vmatprep.subr.mxu1 %v47332_v63 }
0x1093   :  { %41192 = vmatmul.mubr.f32.vlgmr.msra.gmra.mxu0 %v33241_v24 }
0x1094   :  { %41200 = vmatpush3.msra.mxu0 %v46304_v52  ;;  %41203 = vmatprep.mubr.msk.f32.mxu0 %vm41652_vm2, %v47332_v63 }
0x1095   :  { %41201 = vmatprep.subr.mxu0 %v47332_v63 }
0x1096   :  { %41202 = vmatpush3.msra.mxu0 %v46312_v50 }
0x1097   :  { %41213 = vmatprep.subr.mxu0 %v47332_v63 }
0x10d8   :  { %v35006_v60 = vpop.xlane.xlu0 %35005 }
0x10d9   :  { %v35010_v10 = vmul.f32 0.03125, %v35006_v60 }
0x10db   :  { %v46704_v16 = vsub.f32 %v46581_v56, %v35010_v10 }
0x10dd   :  { %v35014_v61 = vmul.f32 %v46704_v16, %v46704_v16 }
0x10df   :  { %v35016_v2 = vsel %vm54_vm0, %v35014_v61, 0.0 }
0x10e0   :  { %35017 = vadd.xlane.f32.xlu0 %v35016_v2 }
0x1123   :  { %v32405_v40 = vpop.f32.mrf.mxu1 }
0x1125   :  { %v41098_v23 = vpop.f32.mrf.mxu1 }
0x1127   :  { %v32556_v18 = vpop.f32.mrf.mxu1 }
0x1129   :  { %v41112_v34 = vpop.f32.mrf.mxu1 }
0x112b   :  { %v32324_v20 = vpop.f32.mrf.mxu0 }
0x112c   :  { %v32406_v6 = vadd.f32 %v32405_v40, %v32324_v20  ;;  %v32706_v14 = vpop.f32.mrf.mxu1 }
0x112d   :  { %v41091_v17 = vpop.f32.mrf.mxu0 }
0x112e   :  { %v41126_v58 = vpop.f32.mrf.mxu1 }
0x1131   :  { %v32481_v59 = vpop.f32.mrf.mxu0 }
0x1132   :  { %v32482_v13 = vadd.f32 %v32481_v59, %v32406_v6  ;;  %v32867_v27 = vpop.f32.mrf.mxu1 }
0x1133   :  { %v41105_v56 = vpop.f32.mrf.mxu0 }
0x1134   :  { %v41140_v3 = vpop.f32.mrf.mxu1  ;;  %v32557_v45 = vadd.f32 %v32556_v18, %v32482_v13  ;;  %v41611_v13 = vpop.eup %41610 }
0x1137   :  { %v32633_v35 = vpop.f32.mrf.mxu0 }
0x1138   :  { %v32634_v11 = vadd.f32 %v32633_v35, %v32557_v45  ;;  %v33018_v25 = vpop.f32.mrf.mxu1  ;;  %v47375_v45 = vld [vmem:[#allocation6_spill] sm:$0xff] }
0x1139   :  { %v41119_v4 = vpop.f32.mrf.mxu0  ;;  %v27703_v35 = vmul.f32 %v41611_v13, %v47375_v45 }
0x113a   :  { %v41154_v28 = vpop.f32.mrf.mxu1  ;;  %v32707_v51 = vadd.f32 %v32706_v14, %v32634_v11  ;;  %v47374_v14 = vld [vmem:[#allocation12_spill] sm:$0xff] }
0x113b   :  { %v34118_v17 = vand.u32 4294901760, %v47374_v14 }
0x113d   :  { %v32786_v57 = vpop.f32.mrf.mxu0  ;;  %v46714_v3 = vsub.f32 %v47374_v14, %v34118_v17 }
0x113e   :  { %v32787_v7 = vadd.f32 %v32786_v57, %v32707_v51  ;;  %v33168_v15 = vpop.f32.mrf.mxu1  ;;  %v34085_v51 = vsel %vm10113_vm3, %v27703_v35, 0 }
0x113f   :  { %v41133_v21 = vpop.f32.mrf.mxu0  ;;  %v34196_v4 = vand.u32 4294901760, %v46714_v3 }
0x1140   :  { %v41168_v36 = vpop.f32.mrf.mxu1  ;;  %v32868_v37 = vadd.f32 %v32867_v27, %v32787_v7  ;;  %v34153_v21 = vand.u32 4294901760, %v34085_v51 }
0x1141   :  { %v34197_v7 = vsub.f32 %v46714_v3, %v34196_v4 }
0x1142   :  { %v32943_v19 = vpop.f32.mrf.mxu0 }
0x1143   :  { %v32944_v24 = vadd.f32 %v32943_v19, %v32868_v37  ;;  %v33323_v54 = vpop.f32.mrf.mxu1  ;;  %v34198_v37 = vand.u32 4294901760, %v34197_v7  ;;  %v34154_v19 = vsub.f32 %v34085_v51, %v34153_v21 }
0x1144   :  { %v41147_v1 = vpop.f32.mrf.mxu0 }
0x1145   :  { %v41178_v55 = vpop.f32.mrf.mxu1  ;;  %v33019_v44 = vadd.f32 %v33018_v25, %v32944_v24 }
0x1147   :  { %v33095_v31 = vpop.f32.mrf.mxu0 }
0x1148   :  { %v33096_v12 = vadd.f32 %v33095_v31, %v33019_v44  ;;  %v33471_v53 = vpop.f32.mrf.mxu1 }
0x1149   :  { %v41161_v9 = vpop.f32.mrf.mxu0 }
0x114a   :  { %v46710_v41 = vadd.f32 %v33168_v15, %v33096_v12  ;;  %v41188_v60 = vpop.f32.mrf.mxu1 }
0x114b   :  { %v33247_v10 = vpop.f32.mrf.mxu0 }
0x114c   :  { %v33617_v61 = vpop.f32.mrf.mxu1  ;;  %v33324_v40 = vadd.f32 %v33323_v54, %v33247_v10 }
0x114d   :  { %v41173_v2 = vpop.f32.mrf.mxu0 }
0x114e   :  { %v41198_v23 = vpop.f32.mrf.mxu1 }
0x114f   :  { %v33397_v18 = vpop.f32.mrf.mxu0 }
0x1150   :  { %v33398_v34 = vadd.f32 %v33397_v18, %v33324_v40 }
0x1151   :  { %v41183_v20 = vpop.f32.mrf.mxu0 }
0x1152   :  { %v33472_v6 = vadd.f32 %v33471_v53, %v33398_v34 }
0x1153   :  { %v33545_v58 = vpop.f32.mrf.mxu0 }
0x1154   :  { %v33546_v59 = vadd.f32 %v33545_v58, %v33472_v6  ;;  %v47376_v58 = vld [vmem:[#allocation20_spill] sm:$0xff] }
0x1155   :  { %v41193_v27 = vpop.f32.mrf.mxu0 }
0x1156   :  { %v33618_v56 = vadd.f32 %v33617_v61, %v33546_v59  ;;  %v46779_v59 = vrot.slane %v46563_v46, %v47376_v58  ;;  %v36432_v58 = vld [vmem:[%s47266_s3 + $0xf8] sm:$0xff] }
0x1158   :  { %v33622_v11 = vsel %vm6496_vm1, %v33618_v56, 0 }
0x1159   :  { %v33691_v25 = vand.u32 4294901760, %v33622_v11 }
0x115b   :  { %v33692_v28 = vsub.f32 %v33622_v11, %v33691_v25  ;;  %41211 = vmatmul.mubr.f32.vlgmr.msra.gmra.mxu1 %v33691_v25 }
0x115c   :  { %41221 = vmatpush3.msra.mxu1 %v46304_v52  ;;  %41224 = vmatprep.mubr.msk.f32.mxu1 %vm41652_vm2, %v47332_v63 }
0x115d   :  { %v33693_v57 = vand.u32 4294901760, %v33692_v28  ;;  %41222 = vmatprep.subr.mxu1 %v47332_v63 }
0x115e   :  { %41223 = vmatpush3.msra.mxu1 %v46312_v50 }
0x115f   :  { %v33694_v15 = vsub.f32 %v33692_v28, %v33693_v57  ;;  %41234 = vmatprep.subr.mxu1 %v47332_v63  ;;  %41225 = vmatmul.mubr.f32.vlgmr.msra.gmra.mxu1 %v33693_v57 }
0x1160   :  { %41235 = vmatpush3.msra.mxu1 %v46304_v52  ;;  %41238 = vmatprep.mubr.msk.f32.mxu1 %vm41652_vm2, %v47332_v63  ;;  %v34155_v52 = vand.u32 4294901760, %v34154_v19 }
0x1161   :  { %v33695_v36 = vand.u32 4294901760, %v33694_v15  ;;  %41236 = vmatprep.subr.mxu1 %v47332_v63 }
0x1162   :  { %41237 = vmatpush3.msra.mxu1 %v46312_v50 }
0x1163   :  { %41246 = vmatprep.subr.mxu1 %v47332_v63  ;;  %41204 = vmatmul.mubr.f32.vlgmr.msra.gmra.mxu0 %v33695_v36 }
0x1164   :  { %41214 = vmatpush3.msra.mxu0 %v46310_v29  ;;  %41239 = vmatmul.mubr.f32.vlgmr.msra.gmra.mxu1 %v33691_v25  ;;  %v34156_v29 = vsub.f32 %v34154_v19, %v34155_v52 }
0x1165   :  { %41247 = vmatpush3.msra.mxu1 %v34198_v37  ;;  %41215 = vmatprep.subr.mxu0 %v47332_v63 }
0x1166   :  { %41216 = vmatpush3.msra.mxu0 %v46320_v33  ;;  %41217 = vmatprep.mubr.msk.f32.mxu0 %vm41652_vm2, %v47332_v63  ;;  %v34157_v50 = vand.u32 4294901760, %v34156_v29 }
0x1167   :  { %41227 = vmatprep.subr.mxu0 %v47332_v63  ;;  %41248 = vmatprep.mubr.msk.f32.mxu1 %vm41652_vm2, %v47332_v63 }
0x1168   :  { %41256 = vmatprep.subr.mxu1 %v47332_v63  ;;  %41218 = vmatmul.mubr.f32.vlgmr.msra.gmra.mxu0 %v33692_v28 }
0x1169   :  { %41228 = vmatpush3.msra.mxu0 %v46317_v42  ;;  %41249 = vmatmul.mubr.f32.vlgmr.msra.gmra.mxu1 %v34153_v21  ;;  %v35018_v42 = vpop.xlane.xlu0 %35017 }
0x116a   :  { %41257 = vmatpush3.msra.mxu1 %v34118_v17  ;;  %41229 = vmatprep.subr.mxu0 %v47332_v63  ;;  %v35022_v33 = vmul.f32 0.03125, %v35018_v42 }
0x116b   :  { %41230 = vmatpush3.msra.mxu0 %v46327_v62  ;;  %41231 = vmatprep.mubr.msk.f32.mxu0 %vm41652_vm2, %v47332_v63 }
0x116c   :  { %41241 = vmatprep.subr.mxu0 %v47332_v63  ;;  %41258 = vmatprep.mubr.msk.f32.mxu1 %vm41652_vm2, %v47332_v63 }
0x116d   :  { %41266 = vmatprep.subr.mxu1 %v47332_v63  ;;  %41232 = vmatmul.mubr.f32.vlgmr.msra.gmra.mxu0 %v33691_v25  ;;  %v47377_v25 = vld [vmem:[#allocation21_spill] sm:$0xff] }
0x116e   :  { %41242 = vmatpush3.msra.mxu0 %v34118_v17  ;;  %41259 = vmatmul.mubr.f32.vlgmr.msra.gmra.mxu1 %v34155_v52 }
0x116f   :  { %41267 = vmatpush3.msra.mxu1 %v34118_v17  ;;  %41243 = vmatprep.mubr.msk.f32.mxu0 %vm41652_vm2, %v47332_v63 }
0x1170   :  { %41251 = vmatprep.subr.mxu0 %v47332_v63  ;;  %41268 = vmatprep.mubr.msk.f32.mxu1 %vm41652_vm2, %v47332_v63 }
0x1171   :  { %41244 = vmatmul.mubr.f32.vlgmr.msra.gmra.mxu0 %v34157_v50  ;;  %41278 = vmatprep.subr.mxu1 %v47332_v63 }
0x1172   :  { %41252 = vmatpush3.msra.mxu0 %v46714_v3  ;;  %41269 = vmatmul.mubr.f32.vlgmr.msra.gmra.mxu1 %v34153_v21 }
0x1173   :  { %41253 = vmatprep.mubr.msk.f32.mxu0 %vm41652_vm2, %v47332_v63  ;;  %41261 = vmatprep.subr.mxu0 %v47332_v63 }
0x1174   :  { %41279 = vmatpush3.msra.mxu1 %v46431_v48  ;;  %41282 = vmatprep.mubr.msk.f32.mxu1 %vm41652_vm2, %v47332_v63  ;;  %v35024_v48 = vadd.f32 1e-05, %v35022_v33 }
0x1175   :  { %41254 = vmatmul.mubr.f32.vlgmr.msra.gmra.mxu0 %v34154_v19  ;;  %41280 = vmatprep.subr.mxu1 %v47332_v63 }
0x1176   :  { %41262 = vmatpush3.msra.mxu0 %v34196_v4  ;;  %41263 = vmatprep.mubr.msk.f32.mxu0 %vm41652_vm2, %v47332_v63  ;;  %41612 = vrsqrt.f32 %v35024_v48  ;;  %v46787_v4 = vrot.slane %v46563_v46, %v47377_v25 }
0x1177   :  { %41281 = vmatpush3.msra.mxu1 %v46436_v47  ;;  %41271 = vmatprep.subr.mxu0 %v47332_v63 }
0x1178   :  { %41292 = vmatprep.subr.mxu1 %v47332_v63 }
0x1179   :  { %41264 = vmatmul.mubr.f32.vlgmr.msra.gmra.mxu0 %v34153_v21 }
0x117a   :  { %41272 = vmatpush3.msra.mxu0 %v46406_v30  ;;  %41275 = vmatprep.mubr.msk.f32.mxu0 %vm41652_vm2, %v47332_v63 }
0x117b   :  { %41273 = vmatprep.subr.mxu0 %v47332_v63 }
0x117c   :  { %41274 = vmatpush3.msra.mxu0 %v46414_v8 }
0x117d   :  { %41285 = vmatprep.subr.mxu0 %v47332_v63 }
0x1183   :  { %v41613_v40 = vpop.eup %41612 }
0x1184   :  { %v35028_v17 = vmul.f32 %v41613_v40, %v46704_v16 }
0x1186   :  { %v35034_v11 = vmul.f32 %v46779_v59, %v35028_v17 }
0x1188   :  { %v46790_v7 = vadd.f32 %v46787_v4, %v35034_v11 }
0x118a   :  { %v35056_v36 = vsel %vm54_vm0, %v46790_v7, 0 }
0x118b   :  { %v46795_v52 = vand.u32 4294901760, %v35056_v36 }
0x118d   :  { %v46803_v50 = vsub.f32 %v35056_v36, %v46795_v52  ;;  %v36430_v36 = vld [vmem:[%s47266_s3 + $0xe8] sm:$0xff] }
0x121b   :  { %v33778_v62 = vpop.f32.mrf.mxu1 }
0x121d   :  { %v41212_v47 = vpop.f32.mrf.mxu1 }
0x121f   :  { %v33929_v24 = vpop.f32.mrf.mxu1 }
0x1221   :  { %v41226_v54 = vpop.f32.mrf.mxu1 }
0x1223   :  { %v33697_v1 = vpop.f32.mrf.mxu0 }
0x1224   :  { %v33779_v55 = vadd.f32 %v33778_v62, %v33697_v1  ;;  %v34079_v44 = vpop.f32.mrf.mxu1  ;;  %v35160_v62 = vand.u32 4294901760, %v46803_v50 }
0x1225   :  { %v41205_v31 = vpop.f32.mrf.mxu0 }
0x1226   :  { %v41240_v32 = vpop.f32.mrf.mxu1 }
0x1228   :  { %v33854_v12 = vpop.f32.mrf.mxu0 }
0x1229   :  { %v33855_v53 = vadd.f32 %v33854_v12, %v33779_v55  ;;  %v34235_v9 = vpop.f32.mrf.mxu1 }
0x122a   :  { %v41219_v60 = vpop.f32.mrf.mxu0 }
0x122b   :  { %v41250_v10 = vpop.f32.mrf.mxu1  ;;  %v33930_v61 = vadd.f32 %v33929_v24, %v33855_v53  ;;  %v47378_v60 = vld [vmem:[#allocation10_spill] sm:$0xff] }
0x122d   :  { %v34006_v2 = vpop.f32.mrf.mxu0 }
0x122e   :  { %v34007_v23 = vadd.f32 %v34006_v2, %v33930_v61  ;;  %v34383_v18 = vpop.f32.mrf.mxu1 }
0x122f   :  { %v41233_v34 = vpop.f32.mrf.mxu0 }
0x1230   :  { %v34080_v20 = vadd.f32 %v34079_v44, %v34007_v23  ;;  %v41260_v6 = vpop.f32.mrf.mxu1 }
0x1231   :  { %v34159_v14 = vpop.f32.mrf.mxu0 }
0x1232   :  { %v46782_v13 = vadd.f32 %v34080_v20, %v46710_v41  ;;  %v34529_v27 = vpop.f32.mrf.mxu1  ;;  %v34236_v3 = vadd.f32 %v34235_v9, %v34159_v14 }
0x1233   :  { %v41245_v56 = vpop.f32.mrf.mxu0 }
0x1234   :  { %v41270_v45 = vpop.f32.mrf.mxu1 }
0x1235   :  { %v34309_v35 = vpop.f32.mrf.mxu0 }
0x1236   :  { %v34310_v28 = vadd.f32 %v34309_v35, %v34236_v3 }
0x1237   :  { %v41255_v16 = vpop.f32.mrf.mxu0 }
0x1238   :  { %v34384_v51 = vadd.f32 %v34383_v18, %v34310_v28 }
0x1239   :  { %v34457_v57 = vpop.f32.mrf.mxu0 }
0x123a   :  { %v34458_v41 = vadd.f32 %v34457_v57, %v34384_v51 }
0x123b   :  { %v41265_v15 = vpop.f32.mrf.mxu0 }
0x123c   :  { %v34530_v21 = vadd.f32 %v34529_v27, %v34458_v41  ;;  %v36431_v27 = vld [vmem:[%s47266_s3 + $0xf0] sm:$0xff] }
0x123e   :  { %v34534_v37 = vsel %vm6496_vm1, %v34530_v21, 0 }
0x123f   :  { %v34603_v19 = vand.u32 4294901760, %v34534_v37 }
0x1241   :  { %v34604_v46 = vsub.f32 %v34534_v37, %v34603_v19  ;;  %41283 = vmatmul.mubr.f32.vlgmr.msra.gmra.mxu1 %v34603_v19  ;;  %v35077_v37 = vsel %vm54_vm0, %v36430_v36, 0 }
0x1242   :  { %41293 = vmatpush3.msra.mxu1 %v46406_v30  ;;  %41296 = vmatprep.mubr.msk.f32.mxu1 %vm41652_vm2, %v47332_v63 }
0x1243   :  { %v34605_v29 = vand.u32 4294901760, %v34604_v46  ;;  %41294 = vmatprep.subr.mxu1 %v47332_v63 }
0x1244   :  { %41295 = vmatpush3.msra.mxu1 %v46414_v8 }
0x1245   :  { %v34606_v42 = vsub.f32 %v34604_v46, %v34605_v29  ;;  %41297 = vmatmul.mubr.f32.vlgmr.msra.gmra.mxu1 %v34605_v29  ;;  %41306 = vmatprep.subr.mxu1 %v47332_v63  ;;  %v36429_v29 = vld [vmem:[%s47266_s3 + $0xe0] sm:$0xff] }
0x1246   :  { %41307 = vmatpush3.msra.mxu1 %v46406_v30  ;;  %41310 = vmatprep.mubr.msk.f32.mxu1 %vm41652_vm2, %v47332_v63  ;;  %v35161_v30 = vsub.f32 %v46803_v50, %v35160_v62 }
0x1247   :  { %v34607_v33 = vand.u32 4294901760, %v34606_v42  ;;  %41308 = vmatprep.subr.mxu1 %v47332_v63  ;;  %v35074_v42 = vsel %vm54_vm0, %v36429_v29, 0 }
0x1248   :  { %41309 = vmatpush3.msra.mxu1 %v46414_v8  ;;  %v17520_v8 = vpop.xlane.xlu1 %17519 }
0x1249   :  { %41276 = vmatmul.mubr.f32.vlgmr.msra.gmra.mxu0 %v34607_v33  ;;  %41311 = vmatmul.mubr.f32.vlgmr.msra.gmra.mxu1 %v34603_v19 }
0x124a   :  { %41286 = vmatpush3.msra.mxu0 %v46412_v26  ;;  %41348 = vmatprep.mubr.f32.mxu1 %v46795_v52  ;;  %v35162_v26 = vand.u32 4294901760, %v35161_v30  ;;  %v46888_v30 = vand.u32 4294901760, %v35074_v42 }
0x124b   :  { %41287 = vmatprep.subr.mxu0 %v47332_v63  ;;  %41289 = vmatprep.mubr.msk.f32.mxu0 %vm41652_vm2, %v47332_v63 }
0x124c   :  { %41288 = vmatpush3.msra.mxu0 %v46422_v0  ;;  %v17522_v0 = vmul.f32 0.03125, %v17520_v8  ;;  %v46893_v8 = vsub.f32 %v35074_v42, %v46888_v30 }
0x124d   :  { %41290 = vmatmul.mubr.f32.vlgmr.msra.gmra.mxu0 %v34604_v46  ;;  %41299 = vmatprep.subr.mxu0 %v47332_v63 }
0x124e   :  { %41300 = vmatpush3.msra.mxu0 %v46419_v39  ;;  %41303 = vmatprep.mubr.msk.f32.mxu0 %vm41652_vm2, %v47332_v63  ;;  %v17524_v48 = vadd.f32 1e-05, %v17522_v0  ;;  %v36428_v0 = vld [vmem:[%s47266_s3 + $0xd8] sm:$0xff] }
0x124f   :  { %41301 = vmatprep.subr.mxu0 %v47332_v63 }
0x1250   :  { %41302 = vmatpush3.msra.mxu0 %v46429_v22  ;;  %41614 = vrsqrt.f32 %v17524_v48  ;;  %v35071_v48 = vsel %vm54_vm0, %v36428_v0, 0 }
0x1251   :  { %41304 = vmatmul.mubr.f32.vlgmr.msra.gmra.mxu0 %v34603_v19  ;;  %v46874_v19 = vand.u32 4294901760, %v35077_v37 }
0x1252   :  { %41329 = vmatprep.mubr.f32.mxu0 %v35162_v26 }
0x1253   :  { %v46877_v46 = vsub.f32 %v35077_v37, %v46874_v19 }
0x1255   :  { %v46886_v33 = vand.u32 4294901760, %v46877_v46 }
0x1257   :  { %v35212_v26 = vsub.f32 %v46877_v46, %v46886_v33 }
0x125d   :  { %v41615_v12 = vpop.eup %41614 }
0x125e   :  { %v17528_v10 = vmul.f32 %v41615_v12, %v47378_v60 }
0x1260   :  { %v17534_v18 = vmul.f32 %v46567_v49, %v17528_v10  ;;  %v35083_v49 = vsel %vm54_vm0, %v36432_v58, 0 }
0x1261   :  { %v46841_v56 = vand.u32 4294901760, %v35083_v49 }
0x1262   :  { %v17540_v20 = vadd.f32 %v46572_v38, %v17534_v18 }
0x1263   :  { %41313 = vmatprep.subr.mxu0 %v46841_v56 }
0x1264   :  { %41314 = vmatpush3.xpose.msra.mxu0 %v46841_v56 }
0x1301   :  { %v34690_v47 = vpop.f32.mrf.mxu1 }
0x1303   :  { %v41284_v24 = vpop.f32.mrf.mxu1 }
0x1304   :  { %v46902_v24 = vand.u32 4294901760, %v46893_v8 }
0x1305   :  { %v34841_v54 = vpop.f32.mrf.mxu1 }
0x1307   :  { %v41298_v1 = vpop.f32.mrf.mxu1 }
0x1308   :  { %v35219_v1 = vsub.f32 %v46893_v8, %v46902_v24 }
0x1309   :  { %v34609_v55 = vpop.f32.mrf.mxu0  ;;  %v34991_v39 = vpop.f32.mrf.mxu1 }
0x130a   :  { %v34691_v32 = vadd.f32 %v34690_v47, %v34609_v55  ;;  %v35213_v47 = vand.u32 4294901760, %v35212_v26 }
0x130b   :  { %v41277_v44 = vpop.f32.mrf.mxu0  ;;  %v41312_v31 = vpop.f32.mrf.mxu1 }
0x130c   :  { %v35220_v31 = vand.u32 4294901760, %v35219_v1 }
0x130d   :  { %v34766_v63 = vpop.f32.mrf.mxu0 }
0x130e   :  { %v34767_v53 = vadd.f32 %v34766_v63, %v34691_v32 }
0x130f   :  { %v41291_v22 = vpop.f32.mrf.mxu0 }
0x1310   :  { %v34842_v9 = vadd.f32 %v34841_v54, %v34767_v53  ;;  %v46904_v54 = vand.u32 4294901760, %v35071_v48  ;;  %v36426_v22 = vld [vmem:[%s47266_s3 + $0xc8] sm:$0xff] }
0x1311   :  { %v34918_v61 = vpop.f32.mrf.mxu0 }
0x1312   :  { %v34919_v2 = vadd.f32 %v34918_v61, %v34842_v9  ;;  %v46909_v55 = vsub.f32 %v35071_v48, %v46904_v54  ;;  %v35065_v9 = vsel %vm54_vm0, %v36426_v22, 0 }
0x1313   :  { %v41305_v40 = vpop.f32.mrf.mxu0  ;;  %v46936_v61 = vand.u32 4294901760, %v35065_v9 }
0x1314   :  { %v34992_v23 = vadd.f32 %v34991_v39, %v34919_v2  ;;  %v36427_v39 = vld [vmem:[%s47266_s3 + $0xd0] sm:$0xff]  ;;  %v46918_v32 = vand.u32 4294901760, %v46909_v55 }
0x1315   :  { %v35068_v44 = vsel %vm54_vm0, %v36427_v39, 0  ;;  %v46941_v40 = vsub.f32 %v35065_v9, %v46936_v61  ;;  %v36433_v9 = vld [vmem:[%s47266_s3 + $0x80] sm:$0xff] }
0x1316   :  { %v34995_v34 = vadd.f32 %v34992_v23, %v46782_v13  ;;  %v35080_v13 = vsel %vm54_vm0, %v36431_v27, 0  ;;  %v46920_v12 = vand.u32 4294901760, %v35068_v44  ;;  %v35226_v63 = vsub.f32 %v46909_v55, %v46918_v32  ;;  %v36425_v23 = vld [vmem:[%s47266_s3 + $0xc0] sm:$0xff] }
0x1317   :  { %v46843_v38 = vand.u32 4294901760, %v35080_v13  ;;  %v35062_v18 = vsel %vm54_vm0, %v36425_v23, 0 }
0x1318   :  { %v35001_v6 = vadd.f32 %v46576_v43, %v34995_v34  ;;  %v46846_v43 = vsub.f32 %v35083_v49, %v46841_v56  ;;  %v46925_v53 = vsub.f32 %v35068_v44, %v46920_v12  ;;  %v35227_v60 = vand.u32 4294901760, %v35226_v63 }
0x1319   :  { %v46849_v3 = vsub.f32 %v35080_v13, %v46843_v38  ;;  %41315 = vmatprep.subr.mxu0 %v46843_v38 }
0x131a   :  { %v35003_v14 = vadd.f32 %v35001_v6, %v17540_v20  ;;  %v46854_v45 = vand.u32 4294901760, %v46846_v43  ;;  %41316 = vmatpush3.xpose.msra.mxu0 %v46843_v38  ;;  %v46934_v10 = vand.u32 4294901760, %v46925_v53  ;;  %v46950_v20 = vand.u32 4294901760, %v46941_v40 }
0x131b   :  { %v46857_v35 = vand.u32 4294901760, %v46849_v3  ;;  %41317 = vmatprep.subr.mxu0 %v46874_v19  ;;  %v46952_v6 = vand.u32 4294901760, %v35062_v18 }
0x131c   :  { %v35007_v17 = vsel %vm54_vm0, %v35003_v14, 0.0  ;;  %v35198_v11 = vsub.f32 %v46846_v43, %v46854_v45  ;;  %v35233_v2 = vsub.f32 %v46925_v53, %v46934_v10 }
0x131d   :  { %35008 = vadd.xlane.f32.xlu1 %v35007_v17  ;;  %v35205_v25 = vsub.f32 %v46849_v3, %v46857_v35  ;;  %v46957_v17 = vsub.f32 %v35062_v18, %v46952_v6 }
0x131e   :  { %v35199_v28 = vand.u32 4294901760, %v35198_v11  ;;  %41318 = vmatpush3.xpose.msra.mxu0 %v46874_v19  ;;  %v35234_v34 = vand.u32 4294901760, %v35233_v2  ;;  %v47144_v2 = vand.u32 4294901760, %v36433_v9 }
0x131f   :  { %v35206_v16 = vand.u32 4294901760, %v35205_v25  ;;  %41319 = vmatprep.subr.mxu0 %v46888_v30  ;;  %v46962_v27 = vand.u32 4294901760, %v46957_v17 }
0x1320   :  { %41332 = vmatprep.subr.mxu1 %v35199_v28 }
0x1321   :  { %41333 = vmatpush3.xpose.msra.mxu1 %v35199_v28  ;;  %v35247_v49 = vsub.f32 %v46957_v17, %v46962_v27 }
0x1322   :  { %41334 = vmatprep.subr.mxu1 %v35206_v16  ;;  %41320 = vmatpush3.xpose.msra.mxu0 %v46888_v30 }
0x1323   :  { %41321 = vmatprep.subr.mxu0 %v46904_v54  ;;  %v35248_v13 = vand.u32 4294901760, %v35247_v49 }
0x1325   :  { %41335 = vmatpush3.xpose.msra.mxu1 %v35206_v16 }
0x1326   :  { %41336 = vmatprep.subr.mxu1 %v35213_v47  ;;  %41322 = vmatpush3.xpose.msra.mxu0 %v46904_v54 }
0x1327   :  { %41323 = vmatprep.subr.mxu0 %v46920_v12 }
0x1329   :  { %41337 = vmatpush3.xpose.msra.mxu1 %v35213_v47 }
0x132a   :  { %41338 = vmatprep.subr.mxu1 %v35220_v31  ;;  %41324 = vmatpush3.xpose.msra.mxu0 %v46920_v12 }
0x132b   :  { %41325 = vmatprep.subr.mxu0 %v46936_v61 }
0x132d   :  { %41339 = vmatpush3.xpose.msra.mxu1 %v35220_v31  ;;  %v36434_v31 = vld [vmem:[%s47266_s3 + $0x88] sm:$0xff] }
0x132e   :  { %41340 = vmatprep.subr.mxu1 %v35227_v60  ;;  %41326 = vmatpush3.xpose.msra.mxu0 %v46936_v61 }
0x132f   :  { %41327 = vmatprep.subr.mxu0 %v46952_v6 }
0x1331   :  { %41341 = vmatpush3.xpose.msra.mxu1 %v35227_v60 }
0x1332   :  { %41342 = vmatprep.subr.mxu1 %v35234_v34  ;;  %41328 = vmatpush3.xpose.msra.mxu0 %v46952_v6 }
0x1333   :  { %41351 = vmatprep.subr.mxu0 %v46846_v43 }
0x1335   :  { %41343 = vmatpush3.xpose.msra.mxu1 %v35234_v34  ;;  %v47156_v34 = vsub.f32 %v36433_v9, %v47144_v2 }
0x13a6   :  { %v35009_v51 = vpop.xlane.xlu1 %35008 }
0x13a7   :  { %v35011_v57 = vmul.f32 0.03125, %v35009_v51 }
0x13a9   :  { %v46865_v41 = vsub.f32 %v35003_v14, %v35011_v57  ;;  %v35240_v14 = vsub.f32 %v46941_v40, %v46950_v20 }
0x13ab   :  { %v35015_v15 = vmul.f32 %v46865_v41, %v46865_v41  ;;  %v35241_v58 = vand.u32 4294901760, %v35240_v14 }
0x13ad   :  { %v35019_v21 = vsel %vm54_vm0, %v35015_v15, 0.0  ;;  %41344 = vmatprep.subr.mxu1 %v35241_v58 }
0x13ae   :  { %35020 = vadd.xlane.f32.xlu1 %v35019_v21  ;;  %41345 = vmatpush3.xpose.msra.mxu1 %v35241_v58 }
0x13af   :  { %41346 = vmatprep.subr.mxu1 %v35248_v13 }
0x13b2   :  { %41347 = vmatpush3.xpose.msra.mxu1 %v35248_v13 }
0x13b3   :  { %41370 = vmatprep.subr.mxu1 %v46841_v56 }
0x1437   :  { %v35021_v11 = vpop.xlane.xlu1 %35020 }
0x1438   :  { %v35023_v25 = vmul.f32 0.03125, %v35021_v11  ;;  %v47173_v11 = vld [vmem:[%s47267_s4 + $0x18] sm:$0xff] }
0x143a   :  { %v35025_v28 = vadd.f32 1e-05, %v35023_v25  ;;  %v47379_v25 = vld [vmem:[#allocation15_spill] sm:$0xff] }
0x143c   :  { %41616 = vrsqrt.f32 %v35025_v28  ;;  %v35054_v28 = vrot.slane %v47173_v11, %v47379_v25 }
0x1449   :  { %v41617_v16 = vpop.eup %41616 }
0x144a   :  { %v35029_v51 = vmul.f32 %v41617_v16, %v46865_v41 }
0x144c   :  { %v35035_v57 = vmul.f32 %v46779_v59, %v35029_v51 }
0x144e   :  { %v46971_v15 = vadd.f32 %v46787_v4, %v35035_v57 }
0x1450   :  { %v35059_v21 = vsel %vm54_vm0, %v46971_v15, 0 }
0x1451   :  { %v46975_v36 = vand.u32 4294901760, %v35059_v21 }
0x1453   :  { %v35169_v37 = vsub.f32 %v35059_v21, %v46975_v36  ;;  %41349 = vmatmul.mubr.f32.vlgmr.msra.gmra.mxu1 %v46975_v36 }
0x1454   :  { %41371 = vmatpush3.xpose.msra.mxu1 %v46841_v56  ;;  %41386 = vmatprep.mubr.f32.mxu1 %v35160_v62  ;;  %v36439_v62 = vld [vmem:[%s47266_s3 + $0xb0] sm:$0xff] }
0x1455   :  { %41372 = vmatprep.subr.mxu1 %v46843_v38  ;;  %v35170_v59 = vand.u32 4294901760, %v35169_v37 }
0x1457   :  { %v35171_v41 = vsub.f32 %v35169_v37, %v35170_v59 }
0x1458   :  { %41373 = vmatpush3.xpose.msra.mxu1 %v46843_v38 }
0x1459   :  { %41374 = vmatprep.subr.mxu1 %v46874_v19  ;;  %v35172_v4 = vand.u32 4294901760, %v35171_v41 }
0x145b   :  { %41330 = vmatmul.mubr.f32.vlgmr.msra.gmra.mxu0 %v35172_v4 }
0x145c   :  { %41352 = vmatpush3.xpose.msra.mxu0 %v46846_v43  ;;  %41375 = vmatpush3.xpose.msra.mxu1 %v46874_v19  ;;  %v36438_v43 = vld [vmem:[%s47266_s3 + $0xa8] sm:$0xff] }
0x145d   :  { %41367 = vmatprep.mubr.f32.mxu0 %v46803_v50  ;;  %41353 = vmatprep.subr.mxu0 %v46849_v3 }
0x145e   :  { %41376 = vmatprep.subr.mxu1 %v46888_v30 }
0x1460   :  { %41354 = vmatpush3.xpose.msra.mxu0 %v46849_v3  ;;  %41377 = vmatpush3.xpose.msra.mxu1 %v46888_v30 }
0x1461   :  { %41355 = vmatprep.subr.mxu0 %v46877_v46  ;;  %41378 = vmatprep.subr.mxu1 %v46904_v54 }
0x1464   :  { %41356 = vmatpush3.xpose.msra.mxu0 %v46877_v46  ;;  %41379 = vmatpush3.xpose.msra.mxu1 %v46904_v54 }
0x1465   :  { %41357 = vmatprep.subr.mxu0 %v46893_v8  ;;  %41380 = vmatprep.subr.mxu1 %v46920_v12 }
0x1468   :  { %41358 = vmatpush3.xpose.msra.mxu0 %v46893_v8  ;;  %41381 = vmatpush3.xpose.msra.mxu1 %v46920_v12 }
0x1469   :  { %41359 = vmatprep.subr.mxu0 %v46909_v55  ;;  %41382 = vmatprep.subr.mxu1 %v46936_v61 }
0x146c   :  { %41360 = vmatpush3.xpose.msra.mxu0 %v46909_v55  ;;  %41383 = vmatpush3.xpose.msra.mxu1 %v46936_v61 }
0x146d   :  { %41361 = vmatprep.subr.mxu0 %v46925_v53  ;;  %41384 = vmatprep.subr.mxu1 %v46952_v6 }
0x1470   :  { %41362 = vmatpush3.xpose.msra.mxu0 %v46925_v53  ;;  %41385 = vmatpush3.xpose.msra.mxu1 %v46952_v6  ;;  %v47128_v53 = vand.u32 4294901760, %v36434_v31 }
0x1471   :  { %41363 = vmatprep.subr.mxu0 %v46941_v40  ;;  %41408 = vmatprep.subr.mxu1 %v46841_v56 }
0x1473   :  { %41387 = vmatmul.mubr.f32.vlgmr.msra.gmra.mxu1 %v35170_v59 }
0x1474   :  { %41364 = vmatpush3.xpose.msra.mxu0 %v46941_v40  ;;  %41409 = vmatpush3.xpose.msra.mxu1 %v46841_v56 }
0x1475   :  { %41424 = vmatprep.mubr.f32.mxu1 %v46795_v52  ;;  %41365 = vmatprep.subr.mxu0 %v46957_v17 }
0x1476   :  { %41410 = vmatprep.subr.mxu1 %v46843_v38 }
0x1478   :  { %41366 = vmatpush3.xpose.msra.mxu0 %v46957_v17  ;;  %41411 = vmatpush3.xpose.msra.mxu1 %v46843_v38  ;;  %v47059_v38 = vand.u32 4294901760, %v36439_v62  ;;  %v47163_v17 = vand.u32 4294901760, %v47156_v34 }
0x1479   :  { %41389 = vmatprep.subr.mxu0 %v46854_v45  ;;  %41412 = vmatprep.subr.mxu1 %v46874_v19 }
0x147b   :  { %41368 = vmatmul.mubr.f32.vlgmr.msra.gmra.mxu0 %v35169_v37 }
0x147c   :  { %41390 = vmatpush3.xpose.msra.mxu0 %v46854_v45  ;;  %41405 = vmatprep.mubr.f32.mxu0 %v46795_v52  ;;  %v36440_v52 = vld [vmem:[%s47266_s3 + $0xb8] sm:$0xff]  ;;  %v47070_v45 = vsub.f32 %v36439_v62, %v47059_v38 }
0x147d   :  { %41413 = vmatpush3.xpose.msra.mxu1 %v46874_v19  ;;  %41391 = vmatprep.subr.mxu0 %v46857_v35  ;;  %v47051_v50 = vand.u32 4294901760, %v36440_v52  ;;  %v36437_v19 = vld [vmem:[%s47266_s3 + $0xa0] sm:$0xff] }
0x147e   :  { %41414 = vmatprep.subr.mxu1 %v46888_v30  ;;  %v47082_v29 = vand.u32 4294901760, %v47070_v45 }
0x147f   :  { %v47057_v56 = vsub.f32 %v36440_v52, %v47051_v50 }
0x1480   :  { %41392 = vmatpush3.xpose.msra.mxu0 %v46857_v35  ;;  %v47072_v35 = vand.u32 4294901760, %v36438_v43  ;;  %v35807_v8 = vsub.f32 %v47070_v45, %v47082_v29 }
0x1481   :  { %41415 = vmatpush3.xpose.msra.mxu1 %v46888_v30  ;;  %41393 = vmatprep.subr.mxu0 %v46886_v33  ;;  %v47067_v3 = vand.u32 4294901760, %v47057_v56  ;;  %v36436_v30 = vld [vmem:[%s47266_s3 + $0x98] sm:$0xff] }
0x1482   :  { %41416 = vmatprep.subr.mxu1 %v46904_v54  ;;  %v47085_v42 = vsub.f32 %v36438_v43, %v47072_v35  ;;  %v47103_v47 = vand.u32 4294901760, %v36436_v30 }
0x1483   :  { %v35800_v46 = vsub.f32 %v47057_v56, %v47067_v3 }
0x1484   :  { %41394 = vmatpush3.xpose.msra.mxu0 %v46886_v33  ;;  %v47087_v33 = vand.u32 4294901760, %v36437_v19  ;;  %v47097_v0 = vand.u32 4294901760, %v47085_v42  ;;  %v47117_v44 = vsub.f32 %v36436_v30, %v47103_v47 }
0x1485   :  { %41417 = vmatpush3.xpose.msra.mxu1 %v46904_v54  ;;  %41395 = vmatprep.subr.mxu0 %v46902_v24  ;;  %v35801_v26 = vand.u32 4294901760, %v35800_v46  ;;  %v35808_v54 = vand.u32 4294901760, %v35807_v8 }
0x1486   :  { %41418 = vmatprep.subr.mxu1 %v46920_v12  ;;  %v47100_v48 = vsub.f32 %v36437_v19, %v47087_v33  ;;  %v35814_v1 = vsub.f32 %v47085_v42, %v47097_v0  ;;  %v47132_v22 = vand.u32 4294901760, %v47117_v44 }
0x1488   :  { %41396 = vmatpush3.xpose.msra.mxu0 %v46902_v24  ;;  %v36435_v24 = vld [vmem:[%s47266_s3 + $0x90] sm:$0xff]  ;;  %v47112_v55 = vand.u32 4294901760, %v47100_v48  ;;  %v35828_v40 = vsub.f32 %v47117_v44, %v47132_v22 }
0x1489   :  { %41419 = vmatpush3.xpose.msra.mxu1 %v46920_v12  ;;  %41397 = vmatprep.subr.mxu0 %v46918_v32  ;;  %v47114_v39 = vand.u32 4294901760, %v36435_v24 }
0x148a   :  { %41420 = vmatprep.subr.mxu1 %v46936_v61  ;;  %v35821_v12 = vsub.f32 %v47100_v48, %v47112_v55 }
0x148b   :  { %v47126_v63 = vsub.f32 %v36435_v24, %v47114_v39 }
0x148c   :  { %41398 = vmatpush3.xpose.msra.mxu0 %v46918_v32  ;;  %v35815_v32 = vand.u32 4294901760, %v35814_v1  ;;  %v35822_v60 = vand.u32 4294901760, %v35821_v12 }
0x148d   :  { %41421 = vmatpush3.xpose.msra.mxu1 %v46936_v61  ;;  %41399 = vmatprep.subr.mxu0 %v46934_v10  ;;  %v47142_v61 = vsub.f32 %v36434_v31, %v47128_v53 }
0x148e   :  { %41422 = vmatprep.subr.mxu1 %v46952_v6 }
0x148f   :  { %v47153_v18 = vand.u32 4294901760, %v47142_v61 }
0x1490   :  { %41400 = vmatpush3.xpose.msra.mxu0 %v46934_v10  ;;  %v47139_v10 = vand.u32 4294901760, %v47126_v63 }
0x1491   :  { %41423 = vmatpush3.xpose.msra.mxu1 %v46952_v6  ;;  %41401 = vmatprep.subr.mxu0 %v46950_v20  ;;  %v35842_v14 = vsub.f32 %v47142_v61, %v47153_v18 }
0x1492   :  { %41446 = vmatprep.subr.mxu1 %v35801_v26  ;;  %v35835_v23 = vsub.f32 %v47126_v63, %v47139_v10 }
0x1493   :  { %v35843_v58 = vand.u32 4294901760, %v35842_v14 }
0x1494   :  { %41425 = vmatmul.mubr.f32.vlgmr.msra.gmra.mxu1 %v46975_v36  ;;  %41402 = vmatpush3.xpose.msra.mxu0 %v46950_v20  ;;  %v35829_v20 = vand.u32 4294901760, %v35828_v40  ;;  %v35836_v6 = vand.u32 4294901760, %v35835_v23 }
0x1495   :  { %41403 = vmatprep.subr.mxu0 %v46962_v27  ;;  %41447 = vmatpush3.msra.mxu1 %v35801_v26 }
0x1496   :  { %41448 = vmatprep.subr.mxu1 %v35808_v54 }
0x1497   :  { %41449 = vmatpush3.msra.mxu1 %v35808_v54 }
0x1498   :  { %41404 = vmatpush3.xpose.msra.mxu0 %v46962_v27  ;;  %41450 = vmatprep.subr.mxu1 %v35815_v32  ;;  %v35849_v27 = vsub.f32 %v47156_v34, %v47163_v17 }
0x1499   :  { %41427 = vmatprep.subr.mxu0 %v47051_v50  ;;  %41451 = vmatpush3.msra.mxu1 %v35815_v32 }
0x149a   :  { %41452 = vmatprep.subr.mxu1 %v35822_v60  ;;  %v35850_v49 = vand.u32 4294901760, %v35849_v27 }
0x149b   :  { %41406 = vmatmul.mubr.f32.vlgmr.msra.gmra.mxu0 %v46975_v36  ;;  %41453 = vmatpush3.msra.mxu1 %v35822_v60 }
0x149c   :  { %41428 = vmatpush3.msra.mxu0 %v47051_v50  ;;  %41454 = vmatprep.subr.mxu1 %v35829_v20 }
0x149d   :  { %41429 = vmatprep.subr.mxu0 %v47059_v38  ;;  %41455 = vmatpush3.msra.mxu1 %v35829_v20 }
0x149e   :  { %41430 = vmatpush3.msra.mxu0 %v47059_v38  ;;  %41456 = vmatprep.subr.mxu1 %v35836_v6 }
0x149f   :  { %41431 = vmatprep.subr.mxu0 %v47072_v35  ;;  %41457 = vmatpush3.msra.mxu1 %v35836_v6 }
0x14a0   :  { %41432 = vmatpush3.msra.mxu0 %v47072_v35  ;;  %41458 = vmatprep.subr.mxu1 %v35843_v58 }
0x14a1   :  { %41433 = vmatprep.subr.mxu0 %v47087_v33  ;;  %41459 = vmatpush3.msra.mxu1 %v35843_v58 }
0x14a2   :  { %41434 = vmatpush3.msra.mxu0 %v47087_v33  ;;  %41460 = vmatprep.subr.mxu1 %v35850_v49 }
0x14a3   :  { %41435 = vmatprep.subr.mxu0 %v47103_v47  ;;  %41461 = vmatpush3.msra.mxu1 %v35850_v49 }
0x14a4   :  { %41436 = vmatpush3.msra.mxu0 %v47103_v47  ;;  %41484 = vmatprep.subr.mxu1 %v47051_v50 }
0x14a5   :  { %41437 = vmatprep.subr.mxu0 %v47114_v39 }
0x14a6   :  { %41438 = vmatpush3.msra.mxu0 %v47114_v39 }
0x14a7   :  { %41439 = vmatprep.subr.mxu0 %v47128_v53 }
0x14a8   :  { %41440 = vmatpush3.msra.mxu0 %v47128_v53 }
0x14a9   :  { %41441 = vmatprep.subr.mxu0 %v47144_v2 }
0x14aa   :  { %41442 = vmatpush3.msra.mxu0 %v47144_v2 }
0x14ab   :  { %41465 = vmatprep.subr.mxu0 %v47057_v56 }
0x1513   :  { %v41350_v16 = vpop.f32.mrf.mxu1 }
0x1515   :  { %v35285_v37 = vpop.f32.mrf.mxu1 }
0x151b   :  { %v41331_v13 = vpop.f32.mrf.mxu0 }
0x151c   :  { %v35175_v57 = vadd.f32 %v41331_v13, %v35054_v28 }
0x151d   :  { %v35164_v51 = vpop.f32.mrf.mxu0 }
0x151e   :  { %v35165_v36 = vadd.f32 %v35164_v51, %v35054_v28  ;;  %v35292_v59 = vadd.f32 %v41350_v16, %v35175_v57 }
0x1520   :  { %v35286_v62 = vadd.f32 %v35285_v37, %v35165_v36 }
0x1533   :  { %v41388_v41 = vpop.f32.mrf.mxu1 }
0x1535   :  { %v35467_v19 = vpop.f32.mrf.mxu1 }
0x153b   :  { %v41369_v21 = vpop.f32.mrf.mxu0 }
0x153c   :  { %v35387_v52 = vadd.f32 %v41369_v21, %v35292_v59 }
0x153d   :  { %v35379_v4 = vpop.f32.mrf.mxu0 }
0x153e   :  { %v35380_v43 = vadd.f32 %v35379_v4, %v35286_v62  ;;  %v35476_v46 = vadd.f32 %v41388_v41, %v35387_v52 }
0x1540   :  { %v35468_v24 = vadd.f32 %v35467_v19, %v35380_v43 }
0x1554   :  { %v41426_v30 = vpop.f32.mrf.mxu1 }
0x1556   :  { %v35655_v32 = vpop.f32.mrf.mxu1 }
0x155b   :  { %v41407_v26 = vpop.f32.mrf.mxu0 }
0x155c   :  { %v35577_v8 = vadd.f32 %v41407_v26, %v35476_v46 }
0x155d   :  { %v35570_v54 = vpop.f32.mrf.mxu0 }
0x155e   :  { %v35662_v1 = vadd.f32 %v41426_v30, %v35577_v8  ;;  %v35571_v31 = vadd.f32 %v35570_v54, %v35468_v24 }
0x1560   :  { %v35666_v12 = vmax.f32 %v35662_v1, 0.0  ;;  %v35656_v9 = vadd.f32 %v35655_v32, %v35571_v31  ;;  %v37_v31 = vld [vmem:[%s47267_s4 + $0x20] sm:$0x3]  ;;  %v47381_v32 = vld [vmem:[#allocation13_spill] sm:$0xff]  ;;  %s41629_s4 = scalar_lea.vmem %s36315_s6, 256 }
0x1561   :  { %p41630_p0 = scmp.ne.s32.totalorder %s36315_s6, %s41629_s4  ;;  %p41635_p2 = scmp.lt.s32.totalorder %s41629_s4, %s41629_s4 }
0x1562   :  { %v35685_v60 = vsel %vm35680_vm4, %v35666_v12, 0  ;;  %v35665_v40 = vmax.f32 %v35656_v9, 0.0  ;;  %v36298_v12 = vrot.slane %v37_v31, %v47381_v32 }
0x1563   :  { %v47177_v23 = vand.u32 4294901760, %v35685_v60  ;;  %p41636_p3 = por %p41635_p2, %p41634_p1 }
0x1564   :  { %v35682_v20 = vsel %vm35680_vm4, %v35665_v40, 0  ;;  %v36304_v40 = vrot.slane %v37_v31, %v47350_v5 }
0x1565   :  { %v35771_v6 = vsub.f32 %v35685_v60, %v47177_v23  ;;  %v35760_v14 = vand.u32 4294901760, %v35682_v20  ;;  %p41637_p4 = pnand %p41636_p3, %p41630_p0 }
0x1567   :  { %v35772_v58 = vand.u32 4294901760, %v35771_v6  ;;  %v35761_v27 = vsub.f32 %v35682_v20, %v35760_v14  ;;  %41462 = vmatprep.mubr.f32.mxu1 %v35760_v14 }
0x1568   :  { %41463 = vmatmul.mubr.f32.vlgmr.msra.gmra.mxu1 %v47177_v23 }
0x1569   :  { %41485 = vmatpush3.msra.mxu1 %v47051_v50  ;;  %v35762_v49 = vand.u32 4294901760, %v35761_v27  ;;  %v35773_v13 = vsub.f32 %v35771_v6, %v35772_v58 }
0x156a   :  { %41486 = vmatprep.subr.mxu1 %v47059_v38 }
0x156b   :  { %41487 = vmatpush3.msra.mxu1 %v47059_v38  ;;  %41500 = vmatprep.mubr.f32.mxu1 %v35762_v49  ;;  %v35763_v25 = vsub.f32 %v35761_v27, %v35762_v49  ;;  %v35774_v16 = vand.u32 4294901760, %v35773_v13 }
0x156c   :  { %41488 = vmatprep.subr.mxu1 %v47072_v35 }
0x156d   :  { %41489 = vmatpush3.msra.mxu1 %v47072_v35  ;;  %v35764_v28 = vand.u32 4294901760, %v35763_v25 }
0x156e   :  { %41490 = vmatprep.subr.mxu1 %v47087_v33 }
0x156f   :  { %41491 = vmatpush3.msra.mxu1 %v47087_v33  ;;  %41443 = vmatprep.mubr.f32.mxu0 %v35764_v28 }
0x1570   :  { %41492 = vmatprep.subr.mxu1 %v47103_v47  ;;  %41444 = vmatmul.mubr.f32.vlgmr.msra.gmra.mxu0 %v35774_v16 }
0x1571   :  { %41466 = vmatpush3.msra.mxu0 %v47057_v56  ;;  %41493 = vmatpush3.msra.mxu1 %v47103_v47  ;;  %v47380_v56 = vld [vmem:[#allocation16_spill] sm:$0xff] }
0x1572   :  { %41467 = vmatprep.subr.mxu0 %v47070_v45  ;;  %41481 = vmatprep.mubr.f32.mxu0 %v35761_v27 }
0x1573   :  { %41494 = vmatprep.subr.mxu1 %v47114_v39  ;;  %41468 = vmatpush3.msra.mxu0 %v47070_v45 }
0x1574   :  { %41495 = vmatpush3.msra.mxu1 %v47114_v39  ;;  %41469 = vmatprep.subr.mxu0 %v47085_v42 }
0x1575   :  { %41496 = vmatprep.subr.mxu1 %v47128_v53  ;;  %41470 = vmatpush3.msra.mxu0 %v47085_v42 }
0x1576   :  { %41497 = vmatpush3.msra.mxu1 %v47128_v53  ;;  %41471 = vmatprep.subr.mxu0 %v47100_v48 }
0x1577   :  { %41498 = vmatprep.subr.mxu1 %v47144_v2  ;;  %41472 = vmatpush3.msra.mxu0 %v47100_v48 }
0x1578   :  { %41499 = vmatpush3.msra.mxu1 %v47144_v2  ;;  %41473 = vmatprep.subr.mxu0 %v47117_v44 }
0x1579   :  { %41501 = vmatmul.mubr.f32.vlgmr.msra.gmra.mxu1 %v35772_v58  ;;  %41522 = vmatprep.subr.mxu1 %v47051_v50 }
0x157a   :  { %41474 = vmatpush3.msra.mxu0 %v47117_v44  ;;  %41523 = vmatpush3.msra.mxu1 %v47051_v50 }
0x157b   :  { %41538 = vmatprep.mubr.f32.mxu1 %v35760_v14  ;;  %41475 = vmatprep.subr.mxu0 %v47126_v63 }
0x157c   :  { %41524 = vmatprep.subr.mxu1 %v47059_v38  ;;  %41476 = vmatpush3.msra.mxu0 %v47126_v63 }
0x157d   :  { %41525 = vmatpush3.msra.mxu1 %v47059_v38  ;;  %41477 = vmatprep.subr.mxu0 %v47142_v61  ;;  %v35679_v38 = vrot.slane %v47173_v11, %v47380_v56 }
0x157e   :  { %41526 = vmatprep.subr.mxu1 %v47072_v35  ;;  %41478 = vmatpush3.msra.mxu0 %v47142_v61 }
0x157f   :  { %41527 = vmatpush3.msra.mxu1 %v47072_v35  ;;  %41479 = vmatprep.subr.mxu0 %v47156_v34 }
0x1580   :  { %41528 = vmatprep.subr.mxu1 %v47087_v33  ;;  %41480 = vmatpush3.msra.mxu0 %v47156_v34 }
0x1581   :  { %41529 = vmatpush3.msra.mxu1 %v47087_v33  ;;  %41482 = vmatmul.mubr.f32.vlgmr.msra.gmra.mxu0 %v35771_v6 }
0x1582   :  { %41503 = vmatprep.subr.mxu0 %v47067_v3  ;;  %41530 = vmatprep.subr.mxu1 %v47103_v47 }
0x1583   :  { %41504 = vmatpush3.msra.mxu0 %v47067_v3  ;;  %41519 = vmatprep.mubr.f32.mxu0 %v35760_v14 }
0x1584   :  { %41531 = vmatpush3.msra.mxu1 %v47103_v47  ;;  %41505 = vmatprep.subr.mxu0 %v47082_v29 }
0x1585   :  { %41532 = vmatprep.subr.mxu1 %v47114_v39  ;;  %41506 = vmatpush3.msra.mxu0 %v47082_v29 }
0x1586   :  { %41533 = vmatpush3.msra.mxu1 %v47114_v39  ;;  %41507 = vmatprep.subr.mxu0 %v47097_v0 }
0x1587   :  { %41534 = vmatprep.subr.mxu1 %v47128_v53  ;;  %41508 = vmatpush3.msra.mxu0 %v47097_v0 }
0x1588   :  { %41535 = vmatpush3.msra.mxu1 %v47128_v53  ;;  %41509 = vmatprep.subr.mxu0 %v47112_v55 }
0x1589   :  { %41536 = vmatprep.subr.mxu1 %v47144_v2  ;;  %41510 = vmatpush3.msra.mxu0 %v47112_v55 }
0x158a   :  { %41537 = vmatpush3.msra.mxu1 %v47144_v2  ;;  %41511 = vmatprep.subr.mxu0 %v47132_v22 }
0x158b   :  { %41539 = vmatmul.mubr.f32.vlgmr.msra.gmra.mxu1 %v47177_v23  ;;  %41512 = vmatpush3.msra.mxu0 %v47132_v22 }
0x158c   :  { %41513 = vmatprep.subr.mxu0 %v47139_v10 }
0x158d   :  { %41514 = vmatpush3.msra.mxu0 %v47139_v10 }
0x158e   :  { %41515 = vmatprep.subr.mxu0 %v47153_v18 }
0x158f   :  { %41516 = vmatpush3.msra.mxu0 %v47153_v18 }
0x1590   :  { %41517 = vmatprep.subr.mxu0 %v47163_v17 }
0x1591   :  { %41518 = vmatpush3.msra.mxu0 %v47163_v17 }
0x1592   :  { %41520 = vmatmul.mubr.f32.vlgmr.msra.gmra.mxu0 %v47177_v23 }
0x1628   :  { %v41464_v3 = vpop.f32.mrf.mxu1 }
0x162a   :  { %v35887_v33 = vpop.f32.mrf.mxu1 }
0x1630   :  { %v41445_v50 = vpop.f32.mrf.mxu0 }
0x1631   :  { %v35777_v35 = vadd.f32 %v41445_v50, %v35679_v38 }
0x1632   :  { %v35766_v45 = vpop.f32.mrf.mxu0 }
0x1633   :  { %v35767_v42 = vadd.f32 %v35766_v45, %v35679_v38  ;;  %v35894_v0 = vadd.f32 %v41464_v3, %v35777_v35 }
0x1635   :  { %v35888_v39 = vadd.f32 %v35887_v33, %v35767_v42 }
0x1639   :  { %v41502_v48 = vpop.f32.mrf.mxu1 }
0x163b   :  { %v36069_v63 = vpop.f32.mrf.mxu1 }
0x1641   :  { %v41483_v29 = vpop.f32.mrf.mxu0 }
0x1642   :  { %v35989_v55 = vadd.f32 %v41483_v29, %v35894_v0 }
0x1643   :  { %v35981_v47 = vpop.f32.mrf.mxu0 }
0x1644   :  { %v35982_v44 = vadd.f32 %v35981_v47, %v35888_v39  ;;  %v36078_v53 = vadd.f32 %v41502_v48, %v35989_v55 }
0x1646   :  { %v36070_v2 = vadd.f32 %v36069_v63, %v35982_v44 }
0x164b   :  { %v41540_v22 = vpop.f32.mrf.mxu1 }
0x164d   :  { %v36257_v11 = vpop.f32.mrf.mxu1 }
0x1652   :  { %v41521_v10 = vpop.f32.mrf.mxu0 }
0x1653   :  { %v36179_v61 = vadd.f32 %v41521_v10, %v36078_v53 }
0x1654   :  { %v36172_v18 = vpop.f32.mrf.mxu0 }
0x1655   :  { %v36264_v34 = vadd.f32 %v41540_v22, %v36179_v61  ;;  %v36173_v17 = vadd.f32 %v36172_v18, %v36070_v2 }
0x1657   :  { %v36258_v51 = vadd.f32 %v36257_v11, %v36173_v17  ;;  %v36268_v57 = vadd.f32 %v36264_v34, %v46971_v15 }
0x1659   :  { %v36272_v21 = vsel %vm54_vm0, %v36268_v57, 0.0  ;;  %v36267_v36 = vadd.f32 %v36258_v51, %v46790_v7 }
0x165a   :  { %36273 = vadd.xlane.f32.xlu1 %v36272_v21 }
0x165b   :  { %v36269_v37 = vsel %vm54_vm0, %v36267_v36, 0.0 }
0x165c   :  { %36270 = vadd.xlane.f32.xlu0 %v36269_v37 }
0x16e3   :  { %v36274_v59 = vpop.xlane.xlu1 %36273 }
0x16e4   :  { %v36276_v41 = vmul.f32 0.03125, %v36274_v59 }
0x16e5   :  { %v36271_v4 = vpop.xlane.xlu0 %36270 }
0x16e6   :  { %v36278_v52 = vsub.f32 %v36268_v57, %v36276_v41  ;;  %v36275_v62 = vmul.f32 0.03125, %v36271_v4 }
0x16e8   :  { %v36277_v43 = vsub.f32 %v36267_v36, %v36275_v62  ;;  %v36280_v19 = vmul.f32 %v36278_v52, %v36278_v52 }
0x16ea   :  { %v36284_v46 = vsel %vm54_vm0, %v36280_v19, 0.0  ;;  %v36279_v30 = vmul.f32 %v36277_v43, %v36277_v43 }
0x16eb   :  { %36285 = vadd.xlane.f32.xlu1 %v36284_v46 }
0x16ec   :  { %v36281_v15 = vsel %vm54_vm0, %v36279_v30, 0.0 }
0x16ed   :  { %36282 = vadd.xlane.f32.xlu0 %v36281_v15 }
0x1774   :  { %v36286_v26 = vpop.xlane.xlu1 %36285 }
0x1775   :  { %v36288_v7 = vmul.f32 0.03125, %v36286_v26 }
0x1776   :  { %v36283_v8 = vpop.xlane.xlu0 %36282 }
0x1777   :  { %v36290_v24 = vadd.f32 1e-05, %v36288_v7  ;;  %v36287_v54 = vmul.f32 0.03125, %v36283_v8 }
0x1779   :  { %41618 = vrsqrt.f32 %v36290_v24  ;;  %v36289_v1 = vadd.f32 1e-05, %v36287_v54 }
0x177b   :  { %41620 = vrsqrt.f32 %v36289_v1 }
0x1786   :  { %v41619_v9 = vpop.eup %41618 }
0x1787   :  { %v36294_v60 = vmul.f32 %v41619_v9, %v36278_v52 }
0x1788   :  { %v41621_v23 = vpop.eup %41620 }
0x1789   :  { %v36293_v20 = vmul.f32 %v41621_v23, %v36277_v43  ;;  %v36300_v6 = vmul.f32 %v36298_v12, %v36294_v60 }
0x178b   :  { %v36299_v14 = vmul.f32 %v36298_v12, %v36293_v20  ;;  %v36306_v58 = vadd.f32 %v36304_v40, %v36300_v6 }
0x178d   :  { %v36305_v27 = vadd.f32 %v36304_v40, %v36299_v14  ;;  %36308 = vst.msk [vmem:[#allocation2 + $0x8] sm:$0xff] %vm54_vm0, %v36306_v58 }
0x178f   :  { %36307 = vst.msk [vmem:[#allocation2] sm:$0xff] %vm54_vm0, %v36305_v27 }
0x1790   :  { %41640 = shalt.err (!%p41637_p4)
}
0x1791   :  { %s41654_s7 = smov 128   ;;  %s41655_s8 = smov 8  }
0x1792   :  { %36320 = dma.vmem_to_hbm [thread:$0]  %s36315_s6, 256, %s47268_s5, [#allocation3], %s41654_s7, %s41654_s7, %s41655_s8  }
0x1793   :  { %41649 = dma.done.wait [#allocation3], 256  }
0x1794   :  { %41650 = vsyncadd [#allocation3], 4294967040 }
0x1795   :  { %36324 = vsyncpa [#allocation3], 1 }

</bundles_post_ra>
